<compile_context>
chip_gen: v6e
topology: v6e:2x2x1
jax: 0.10.0
libtpu: 0.0.40
codegen_flags: <defaults>
</compile_context>

<pallas_src>
import functools
import numpy as np
import jax
import jax.numpy as jnp
from jax import lax
from jax.experimental import pallas as pl
from jax.experimental.pallas import tpu as pltpu


GROWTH = 32
BN_SIZE = 4
BLOCK_CONFIG = (6, 12, 32, 32)          # DenseNet-169
NUM_INIT_FEATURES = 64
BN_EPS = 1e-5


def _round_up(x, m):
    return (x + m - 1) // m * m


# ---------------------------------------------------------------------------
# Pallas kernels
# ---------------------------------------------------------------------------
def _mm_kernel(*refs, fuse_in, relu_out):
    """out = epi( (relu(a*si+ti) if fuse_in else a) @ w ) where
    epi(y) = [relu](y*so + to).  a/w are bf16, accumulation is f32."""
    if fuse_in:
        a_ref, si_ref, ti_ref, w_ref, so_ref, to_ref, o_ref = refs
        a = jnp.maximum(a_ref[...].astype(jnp.float32) * si_ref[...] + ti_ref[...],
                        0.0)
        a = a.astype(jnp.bfloat16)
    else:
        a_ref, w_ref, so_ref, to_ref, o_ref = refs
        a = a_ref[...]
    acc = jnp.dot(a, w_ref[...], preferred_element_type=jnp.float32)
    acc = acc * so_ref[...] + to_ref[...]
    if relu_out:
        acc = jnp.maximum(acc, 0.0)
    o_ref[...] = acc.astype(o_ref.dtype)


def _head_kernel(x_ref, s_ref, t_ref, w_ref, b_ref, o_ref):
    # fused: norm5 (scale/shift) -> relu -> global avg pool -> fc -> sigmoid
    x = x_ref[...].astype(jnp.float32)                  # (B, HW, C)
    x = jnp.maximum(x * s_ref[...] + t_ref[...], 0.0)
    pooled = jnp.mean(x, axis=1)                        # (B, C)
    logits = jnp.dot(pooled, w_ref[...],
                     preferred_element_type=jnp.float32) + b_ref[...]
    o_ref[...] = jax.nn.sigmoid(logits)


# ---------------------------------------------------------------------------
# Pallas wrappers
# ---------------------------------------------------------------------------
def _pick_tm(m):
    # multiples of 16 (bf16 sublane tile); aim for >=2..4 grid steps.
    if m >= 1024:
        return 256
    if m >= 256:
        return 128
    if m >= 64:
        return 32
    return 16


def _conv_mm(a, w, so, to, *, si=None, ti=None, relu_out=False,
             out_dtype=jnp.bfloat16):
    """a:(M,K) bf16, w:(Kp,Np) bf16 (pre-padded), si/ti:(1,Kp) f32 (optional
    fused BN+ReLU on the input), so/to:(1,Np) f32 (fused output affine)."""
    M, K = a.shape
    Kp, Np = w.shape
    if K < Kp:
        a = jnp.pad(a, ((0, 0), (0, Kp - K)))
    tm = _pick_tm(M)
    Mp = _round_up(M, tm)
    if Mp > M:
        a = jnp.pad(a, ((0, Mp - M), (0, 0)))
    fuse_in = si is not None

    operands = [a]
    in_specs = [pl.BlockSpec((tm, Kp), lambda i: (i, 0))]
    if fuse_in:
        operands += [si, ti]
        in_specs += [pl.BlockSpec((1, Kp), lambda i: (0, 0)),
                     pl.BlockSpec((1, Kp), lambda i: (0, 0))]
    operands += [w, so, to]
    in_specs += [pl.BlockSpec((Kp, Np), lambda i: (0, 0)),
                 pl.BlockSpec((1, Np), lambda i: (0, 0)),
                 pl.BlockSpec((1, Np), lambda i: (0, 0))]

    out = pl.pallas_call(
        functools.partial(_mm_kernel, fuse_in=fuse_in, relu_out=relu_out),
        out_shape=jax.ShapeDtypeStruct((Mp, Np), out_dtype),
        grid=(Mp // tm,),
        in_specs=in_specs,
        out_specs=pl.BlockSpec((tm, Np), lambda i: (i, 0)),
        compiler_params=pltpu.CompilerParams(dimension_semantics=("parallel",)),
    )(*operands)
    return out[:M]


def _head(feats, s5, t5, fc_w, fc_b, num_class):
    """feats: (B, H, W, C) bf16 (pre-norm5)."""
    B, H, W, C = feats.shape
    x = feats.reshape(B, H * W, C)                       # free reshape in NHWC
    out = pl.pallas_call(
        _head_kernel,
        out_shape=jax.ShapeDtypeStruct((B, fc_w.shape[1]), jnp.float32),
    )(x, s5, t5, fc_w, fc_b)
    return out[:, :num_class]


# ---------------------------------------------------------------------------
# Plain-XLA glue (all inside the one jit)
# ---------------------------------------------------------------------------
def _im2col(x, k, stride, pad):
    """NHWC im2col; K ordered (kh, kw, cin) to match the packed weights."""
    B, H, W, C = x.shape
    if pad:
        x = jnp.pad(x, ((0, 0), (pad, pad), (pad, pad), (0, 0)))
    Hp, Wp = H + 2 * pad, W + 2 * pad
    Ho = (Hp - k) // stride + 1
    Wo = (Wp - k) // stride + 1
    cols = []
    for i in range(k):
        for j in range(k):
            cols.append(x[:, i:i + (Ho - 1) * stride + 1:stride,
                             j:j + (Wo - 1) * stride + 1:stride, :])
    a = jnp.concatenate(cols, axis=-1)                   # (B, Ho, Wo, k*k*C)
    return a.reshape(B * Ho * Wo, k * k * C), Ho, Wo


def _max_pool_3x3_s2_p1(x):
    return lax.reduce_window(x, jnp.array(-jnp.inf, x.dtype), lax.max,
                             window_dimensions=(1, 3, 3, 1),
                             window_strides=(1, 2, 2, 1),
                             padding=((0, 0), (1, 1), (1, 1), (0, 0)))


def _avg_pool_2x2(x):
    B, H, W, C = x.shape
    y = x.astype(jnp.float32).reshape(B, H // 2, 2, W // 2, 2, C).mean(axis=(2, 4))
    return y.astype(x.dtype)


# ---------------------------------------------------------------------------
# Parameters (deterministic synthetic DenseNet-169 weights, pre-packed)
# ---------------------------------------------------------------------------
def make_params(seed=0, num_class=1):
    rng = np.random.default_rng(seed)

    def conv_w(cout, cin, k):
        fan_in = cin * k * k
        return (rng.standard_normal((cout, cin, k, k)) /
                np.sqrt(fan_in)).astype(np.float32)

    def bn(c):
        gamma = 1.0 + 0.05 * rng.standard_normal(c)
        beta = 0.05 * rng.standard_normal(c)
        mean = 0.05 * rng.standard_normal(c)
        var = np.abs(1.0 + 0.05 * rng.standard_normal(c))
        scale = (gamma / np.sqrt(var + BN_EPS)).astype(np.float32)
        shift = (beta - mean * scale).astype(np.float32)
        return scale, shift

    def pack_w(w, kp=None, np_=None):
        # PyTorch (Cout, Cin, kh, kw) -> padded (Kp, Np) with K order (kh,kw,cin)
        cout, cin, kh, kw = w.shape
        k = kh * kw * cin
        kp = _round_up(k, 128) if kp is None else kp
        np_ = _round_up(cout, 128) if np_ is None else np_
        wm = np.zeros((kp, np_), np.float32)
        wm[:k, :cout] = w.transpose(2, 3, 1, 0).reshape(k, cout)
        return jnp.asarray(wm, jnp.bfloat16)

    def vec(v, n, fill):
        out = np.full((1, n), fill, np.float32)
        out[0, :v.shape[0]] = v
        return jnp.asarray(out, jnp.float32)

    P = {}
    # stem nn.Conv2d(1, 3, 3) with bias (bias folded into the output shift)
    w = conv_w(3, 1, 3)
    b = (0.05 * rng.standard_normal(3)).astype(np.float32)
    P["conv1"] = {"w": pack_w(w),
                  "so": vec(np.ones(3, np.float32), 128, 1.0),
                  "to": vec(b, 128, 0.0)}
    # densenet conv0 (7x7 s2 p3, no bias); norm0+relu0 fused as output epilogue
    w = conv_w(NUM_INIT_FEATURES, 3, 7)
    s0, t0 = bn(NUM_INIT_FEATURES)
    P["conv0"] = {"w": pack_w(w),
                  "so": vec(s0, 128, 1.0),
                  "to": vec(t0, 128, 0.0)}

    c = NUM_INIT_FEATURES
    blocks, transitions = [], []
    for bi, n_layers in enumerate(BLOCK_CONFIG):
        c_final = c + n_layers * GROWTH          # 256/512/1280/1664 (all %128==0)
        w1s, s1s, t1s, s2s, t2s, w2s, offs = [], [], [], [], [], [], []
        cl = c
        for _ in range(n_layers):
            s1, t1 = bn(cl)
            w1 = conv_w(BN_SIZE * GROWTH, cl, 1)
            s2, t2 = bn(BN_SIZE * GROWTH)
            w2 = conv_w(GROWTH, BN_SIZE * GROWTH, 3)
            # K of the 1x1 conv padded to the block-final channel count so all
            # layers of a block share shapes (zero rows kill unwritten channels)
            w1s.append(pack_w(w1, kp=c_final, np_=128))
            s1s.append(vec(s1, c_final, 0.0))
            t1s.append(vec(t1, c_final, 0.0))
            s2s.append(vec(s2, 128, 1.0))
            t2s.append(vec(t2, 128, 0.0))
            w2s.append(pack_w(w2))               # (1152, 128)
            offs.append(cl)
            cl += GROWTH
        blocks.append({
            "w1": jnp.stack(w1s), "s1": jnp.stack(s1s), "t1": jnp.stack(t1s),
            "s2": jnp.stack(s2s), "t2": jnp.stack(t2s), "w2": jnp.stack(w2s),
            "c_off": jnp.asarray(offs, jnp.int32),
        })
        c = c_final
        if bi != len(BLOCK_CONFIG) - 1:
            st, tt = bn(c)
            wt = conv_w(c // 2, c, 1)
            transitions.append({
                "w": pack_w(wt),                 # (c, c//2), both %128==0
                "si": vec(st, c, 0.0), "ti": vec(tt, c, 0.0),
                "so": jnp.ones((1, c // 2), jnp.float32),
                "to": jnp.zeros((1, c // 2), jnp.float32),
            })
            c //= 2
    P["blocks"] = blocks
    P["transitions"] = transitions

    s5, t5 = bn(c)                               # c == 1664
    P["norm5_s"] = jnp.asarray(s5, jnp.float32).reshape(1, 1, c)
    P["norm5_t"] = jnp.asarray(t5, jnp.float32).reshape(1, 1, c)
    fcw = (rng.standard_normal((num_class, c)) / np.sqrt(c)).astype(np.float32)
    fcb = (0.05 * rng.standard_normal(num_class)).astype(np.float32)
    wpad = np.zeros((c, 128), np.float32)
    wpad[:, :num_class] = fcw.T
    bpad = np.zeros((1, 128), np.float32)
    bpad[0, :num_class] = fcb
    P["fc_w"] = jnp.asarray(wpad)
    P["fc_b"] = jnp.asarray(bpad)
    return P


# ---------------------------------------------------------------------------
# Forward pass (everything under one jit)
# ---------------------------------------------------------------------------
def _dense_block(x, blk):
    B, H, W, c0 = x.shape
    c_final = blk["w1"].shape[1]
    M = B * H * W
    # preallocated channel buffer (no O(L^2) concatenation)
    buf = jnp.pad(x, ((0, 0), (0, 0), (0, 0), (0, c_final - c0)))
    one_n = jnp.ones((1, blk["w2"].shape[-1]), jnp.float32)
    zero_n = jnp.zeros((1, blk["w2"].shape[-1]), jnp.float32)

    def body(buf, lp):
        # 1x1 bottleneck conv with norm1+relu1 fused on the input and
        # norm2+relu2 fused on the output
        bott = _conv_mm(buf.reshape(M, c_final), lp["w1"], lp["s2"], lp["t2"],
                        si=lp["s1"], ti=lp["t1"], relu_out=True)   # (M, 128)
        bott = bott.reshape(B, H, W, BN_SIZE * GROWTH)
        # 3x3 conv (pad=1) on the activated bottleneck
        a2, _, _ = _im2col(bott, 3, 1, 1)                          # (M, 1152)
        new = _conv_mm(a2, lp["w2"], one_n, zero_n)[:, :GROWTH]
        new = new.reshape(B, H, W, GROWTH)
        buf = lax.dynamic_update_slice_in_dim(buf, new, lp["c_off"], axis=3)
        return buf, None

    buf, _ = lax.scan(body, buf, blk)
    return buf


def _transition(x, tp):
    B, H, W, C = x.shape
    y = _conv_mm(x.reshape(B * H * W, C), tp["w"], tp["so"], tp["to"],
                 si=tp["si"], ti=tp["ti"], relu_out=False)
    y = y.reshape(B, H, W, tp["w"].shape[1])
    return _avg_pool_2x2(y)


@functools.partial(jax.jit, static_argnames=("num_class",))
def model_forward(x, P, num_class=1):
    """x: (B, 1, H, W) float32 -> (B, num_class) sigmoid probabilities."""
    B = x.shape[0]
    x = x.transpose(0, 2, 3, 1).astype(jnp.bfloat16)       # NCHW -> NHWC (once)

    # self.conv1 : Conv2d(1, 3, 3) + bias
    a, Ho, Wo = _im2col(x, 3, 1, 0)
    y = _conv_mm(a, P["conv1"]["w"], P["conv1"]["so"], P["conv1"]["to"])
    x = y[:, :3].reshape(B, Ho, Wo, 3)

    # features.conv0 (7x7 s2 p3) with norm0 + relu0 fused as output epilogue
    a, Ho, Wo = _im2col(x, 7, 2, 3)
    y = _conv_mm(a, P["conv0"]["w"], P["conv0"]["so"], P["conv0"]["to"],
                 relu_out=True)
    x = y[:, :NUM_INIT_FEATURES].reshape(B, Ho, Wo, NUM_INIT_FEATURES)

    x = _max_pool_3x3_s2_p1(x)                              # pool0

    for bi, blk in enumerate(P["blocks"]):
        x = _dense_block(x, blk)
        if bi != len(P["blocks"]) - 1:
            x = _transition(x, P["transitions"][bi])

    # norm5 -> relu -> adaptive_avg_pool2d((1,1)) -> fc1 -> sigmoid (fused)
    return _head(x, P["norm5_s"], P["norm5_t"], P["fc_w"], P["fc_b"], num_class)


if __name__ == "__main__":
    params = make_params(seed=0, num_class=1)
    key = jax.random.PRNGKey(0)
    x = jax.random.normal(key, (2, 1, 64, 64), jnp.float32)
    out = model_forward(x, params)
    out = jax.block_until_ready(out)
    assert out.shape == (2, 1), out.shape
    assert bool(jnp.all(jnp.isfinite(out)))
    assert bool(jnp.all((out >= 0.0) & (out <= 1.0)))
    print("KERNEL_OK")
</pallas_src>

<mosaic_0001>
module attributes {stable_mosaic.version = 11 : i64} {
  func.func @_mm_kernel(%arg0: i32, %arg1: memref<256x128xbf16, #tpu.memory_space<vmem>>, %arg2: memref<128x128xbf16, #tpu.memory_space<vmem>>, %arg3: memref<1x128xf32, #tpu.memory_space<vmem>>, %arg4: memref<1x128xf32, #tpu.memory_space<vmem>>, %arg5: memref<256x128xbf16, #tpu.memory_space<vmem>>) attributes {dimension_semantics = [#tpu.dimension_semantics<parallel>], iteration_bounds = array<i64: 31>, scalar_prefetch = 0 : i64, scratch_operands = 0 : i64, tpu.core_type = #tpu.core_type<tc>, window_params = [{transform_indices = @transform_0, window_bounds = array<i64: 256, 128>}, {pipeline_mode = #tpu.pipeline_mode<synchronous>, transform_indices = @transform_1, window_bounds = array<i64: 128, 128>}, {pipeline_mode = #tpu.pipeline_mode<synchronous>, transform_indices = @transform_2, window_bounds = array<i64: 1, 128>}, {pipeline_mode = #tpu.pipeline_mode<synchronous>, transform_indices = @transform_3, window_bounds = array<i64: 1, 128>}, {transform_indices = @transform_4, window_bounds = array<i64: 256, 128>}]} {
    %c0 = arith.constant 0 : index
    %c0_0 = arith.constant 0 : index
    %0 = vector.load %arg1[%c0, %c0_0] : memref<256x128xbf16, #tpu.memory_space<vmem>>, vector<256x128xbf16>
    %c0_1 = arith.constant 0 : index
    %c0_2 = arith.constant 0 : index
    %1 = vector.load %arg2[%c0_1, %c0_2] : memref<128x128xbf16, #tpu.memory_space<vmem>>, vector<128x128xbf16>
    %cst = arith.constant dense<0.000000e+00> : vector<256x128xf32>
    %2 = tpu.matmul %0, %1, %cst {dimension_numbers = #tpu.dot_dimension_numbers<[1], [0], [0], [1], [0, 0, 1, 1], [], []>} : vector<256x128xbf16>, vector<128x128xbf16>, vector<256x128xf32> -> vector<256x128xf32>
    %c0_3 = arith.constant 0 : index
    %c0_4 = arith.constant 0 : index
    %3 = vector.load %arg3[%c0_3, %c0_4] : memref<1x128xf32, #tpu.memory_space<vmem>>, vector<1x128xf32>
    %4 = vector.broadcast %3 : vector<1x128xf32> to vector<256x128xf32>
    %5 = arith.mulf %2, %4 : vector<256x128xf32>
    %c0_5 = arith.constant 0 : index
    %c0_6 = arith.constant 0 : index
    %6 = vector.load %arg4[%c0_5, %c0_6] : memref<1x128xf32, #tpu.memory_space<vmem>>, vector<1x128xf32>
    %7 = vector.broadcast %6 : vector<1x128xf32> to vector<256x128xf32>
    %8 = arith.addf %5, %7 : vector<256x128xf32>
    %9 = arith.truncf %8 : vector<256x128xf32> to vector<256x128xbf16>
    %c0_7 = arith.constant 0 : index
    %c0_8 = arith.constant 0 : index
    %10 = vector.load %arg5[%c0_7, %c0_8] : memref<256x128xbf16, #tpu.memory_space<vmem>>, vector<256x128xbf16>
    tpu.vector_store %arg5[%c0_7, %c0_8], %9 {strides = array<i32>} : memref<256x128xbf16, #tpu.memory_space<vmem>>, vector<256x128xbf16>,
    return
  }
  func.func @transform_0(%arg0: i32) -> (i32, i32) {
    %c0_i32 = arith.constant 0 : i32
    %c0_i32_0 = arith.constant 0 : i32
    return %arg0, %c0_i32 : i32, i32
  }
  func.func @transform_1(%arg0: i32) -> (i32, i32) {
    %c0_i32 = arith.constant 0 : i32
    %c0_i32_0 = arith.constant 0 : i32
    %c0_i32_1 = arith.constant 0 : i32
    return %c0_i32, %c0_i32_0 : i32, i32
  }
  func.func @transform_2(%arg0: i32) -> (i32, i32) {
    %c0_i32 = arith.constant 0 : i32
    %c0_i32_0 = arith.constant 0 : i32
    %c0_i32_1 = arith.constant 0 : i32
    return %c0_i32, %c0_i32_0 : i32, i32
  }
  func.func @transform_3(%arg0: i32) -> (i32, i32) {
    %c0_i32 = arith.constant 0 : i32
    %c0_i32_0 = arith.constant 0 : i32
    %c0_i32_1 = arith.constant 0 : i32
    return %c0_i32, %c0_i32_0 : i32, i32
  }
  func.func @transform_4(%arg0: i32) -> (i32, i32) {
    %c0_i32 = arith.constant 0 : i32
    %c0_i32_0 = arith.constant 0 : i32
    return %arg0, %c0_i32 : i32, i32
  }
}

module attributes {stable_mosaic.version = 11 : i64} {
  func.func @_mm_kernel(%arg0: i32, %arg1: memref<256x256xbf16, #tpu.memory_space<vmem>>, %arg2: memref<256x128xbf16, #tpu.memory_space<vmem>>, %arg3: memref<1x128xf32, #tpu.memory_space<vmem>>, %arg4: memref<1x128xf32, #tpu.memory_space<vmem>>, %arg5: memref<256x128xbf16, #tpu.memory_space<vmem>>) attributes {dimension_semantics = [#tpu.dimension_semantics<parallel>], iteration_bounds = array<i64: 8>, scalar_prefetch = 0 : i64, scratch_operands = 0 : i64, tpu.core_type = #tpu.core_type<tc>, window_params = [{transform_indices = @transform_0, window_bounds = array<i64: 256, 256>}, {pipeline_mode = #tpu.pipeline_mode<synchronous>, transform_indices = @transform_1, window_bounds = array<i64: 256, 128>}, {pipeline_mode = #tpu.pipeline_mode<synchronous>, transform_indices = @transform_2, window_bounds = array<i64: 1, 128>}, {pipeline_mode = #tpu.pipeline_mode<synchronous>, transform_indices = @transform_3, window_bounds = array<i64: 1, 128>}, {transform_indices = @transform_4, window_bounds = array<i64: 256, 128>}]} {
    %c0 = arith.constant 0 : index
    %c0_0 = arith.constant 0 : index
    %0 = vector.load %arg1[%c0, %c0_0] : memref<256x256xbf16, #tpu.memory_space<vmem>>, vector<256x256xbf16>
    %c0_1 = arith.constant 0 : index
    %c0_2 = arith.constant 0 : index
    %1 = vector.load %arg2[%c0_1, %c0_2] : memref<256x128xbf16, #tpu.memory_space<vmem>>, vector<256x128xbf16>
    %cst = arith.constant dense<0.000000e+00> : vector<256x128xf32>
    %2 = tpu.matmul %0, %1, %cst {dimension_numbers = #tpu.dot_dimension_numbers<[1], [0], [0], [1], [0, 0, 1, 1], [], []>} : vector<256x256xbf16>, vector<256x128xbf16>, vector<256x128xf32> -> vector<256x128xf32>
    %c0_3 = arith.constant 0 : index
    %c0_4 = arith.constant 0 : index
    %3 = vector.load %arg3[%c0_3, %c0_4] : memref<1x128xf32, #tpu.memory_space<vmem>>, vector<1x128xf32>
    %4 = vector.broadcast %3 : vector<1x128xf32> to vector<256x128xf32>
    %5 = arith.mulf %2, %4 : vector<256x128xf32>
    %c0_5 = arith.constant 0 : index
    %c0_6 = arith.constant 0 : index
    %6 = vector.load %arg4[%c0_5, %c0_6] : memref<1x128xf32, #tpu.memory_space<vmem>>, vector<1x128xf32>
    %7 = vector.broadcast %6 : vector<1x128xf32> to vector<256x128xf32>
    %8 = arith.addf %5, %7 : vector<256x128xf32>
    %cst_7 = arith.constant 0.000000e+00 : f32
    %9 = vector.broadcast %cst_7 : f32 to vector<256x128xf32>
    %10 = arith.maximumf %8, %9 : vector<256x128xf32>
    %11 = arith.truncf %10 : vector<256x128xf32> to vector<256x128xbf16>
    %c0_8 = arith.constant 0 : index
    %c0_9 = arith.constant 0 : index
    %12 = vector.load %arg5[%c0_8, %c0_9] : memref<256x128xbf16, #tpu.memory_space<vmem>>, vector<256x128xbf16>
    tpu.vector_store %arg5[%c0_8, %c0_9], %11 {strides = array<i32>} : memref<256x128xbf16, #tpu.memory_space<vmem>>, vector<256x128xbf16>,
    return
  }
  func.func @transform_0(%arg0: i32) -> (i32, i32) {
    %c0_i32 = arith.constant 0 : i32
    %c0_i32_0 = arith.constant 0 : i32
    return %arg0, %c0_i32 : i32, i32
  }
  func.func @transform_1(%arg0: i32) -> (i32, i32) {
    %c0_i32 = arith.constant 0 : i32
    %c0_i32_0 = arith.constant 0 : i32
    %c0_i32_1 = arith.constant 0 : i32
    return %c0_i32, %c0_i32_0 : i32, i32
  }
  func.func @transform_2(%arg0: i32) -> (i32, i32) {
    %c0_i32 = arith.constant 0 : i32
    %c0_i32_0 = arith.constant 0 : i32
    %c0_i32_1 = arith.constant 0 : i32
    return %c0_i32, %c0_i32_0 : i32, i32
  }
  func.func @transform_3(%arg0: i32) -> (i32, i32) {
    %c0_i32 = arith.constant 0 : i32
    %c0_i32_0 = arith.constant 0 : i32
    %c0_i32_1 = arith.constant 0 : i32
    return %c0_i32, %c0_i32_0 : i32, i32
  }
  func.func @transform_4(%arg0: i32) -> (i32, i32) {
    %c0_i32 = arith.constant 0 : i32
    %c0_i32_0 = arith.constant 0 : i32
    return %arg0, %c0_i32 : i32, i32
  }
}

module attributes {stable_mosaic.version = 11 : i64} {
  func.func @_mm_kernel(%arg0: i32, %arg1: memref<128x256xbf16, #tpu.memory_space<vmem>>, %arg2: memref<1x256xf32, #tpu.memory_space<vmem>>, %arg3: memref<1x256xf32, #tpu.memory_space<vmem>>, %arg4: memref<256x128xbf16, #tpu.memory_space<vmem>>, %arg5: memref<1x128xf32, #tpu.memory_space<vmem>>, %arg6: memref<1x128xf32, #tpu.memory_space<vmem>>, %arg7: memref<128x128xbf16, #tpu.memory_space<vmem>>) attributes {dimension_semantics = [#tpu.dimension_semantics<parallel>], iteration_bounds = array<i64: 4>, scalar_prefetch = 0 : i64, scratch_operands = 0 : i64, tpu.core_type = #tpu.core_type<tc>, window_params = [{transform_indices = @transform_0, window_bounds = array<i64: 128, 256>}, {pipeline_mode = #tpu.pipeline_mode<synchronous>, transform_indices = @transform_1, window_bounds = array<i64: 1, 256>}, {pipeline_mode = #tpu.pipeline_mode<synchronous>, transform_indices = @transform_2, window_bounds = array<i64: 1, 256>}, {pipeline_mode = #tpu.pipeline_mode<synchronous>, transform_indices = @transform_3, window_bounds = array<i64: 256, 128>}, {pipeline_mode = #tpu.pipeline_mode<synchronous>, transform_indices = @transform_4, window_bounds = array<i64: 1, 128>}, {pipeline_mode = #tpu.pipeline_mode<synchronous>, transform_indices = @transform_5, window_bounds = array<i64: 1, 128>}, {transform_indices = @transform_6, window_bounds = array<i64: 128, 128>}]} {
    %c0 = arith.constant 0 : index
    %c0_0 = arith.constant 0 : index
    %0 = vector.load %arg1[%c0, %c0_0] : memref<128x256xbf16, #tpu.memory_space<vmem>>, vector<128x256xbf16>
    %1 = arith.extf %0 : vector<128x256xbf16> to vector<128x256xf32>
    %c0_1 = arith.constant 0 : index
    %c0_2 = arith.constant 0 : index
    %2 = vector.load %arg2[%c0_1, %c0_2] : memref<1x256xf32, #tpu.memory_space<vmem>>, vector<1x256xf32>
    %3 = vector.broadcast %2 : vector<1x256xf32> to vector<128x256xf32>
    %4 = arith.mulf %1, %3 : vector<128x256xf32>
    %c0_3 = arith.constant 0 : index
    %c0_4 = arith.constant 0 : index
    %5 = vector.load %arg3[%c0_3, %c0_4] : memref<1x256xf32, #tpu.memory_space<vmem>>, vector<1x256xf32>
    %6 = vector.broadcast %5 : vector<1x256xf32> to vector<128x256xf32>
    %7 = arith.addf %4, %6 : vector<128x256xf32>
    %cst = arith.constant 0.000000e+00 : f32
    %8 = vector.broadcast %cst : f32 to vector<128x256xf32>
    %9 = arith.maximumf %7, %8 : vector<128x256xf32>
    %10 = arith.truncf %9 : vector<128x256xf32> to vector<128x256xbf16>
    %c0_5 = arith.constant 0 : index
    %c0_6 = arith.constant 0 : index
    %11 = vector.load %arg4[%c0_5, %c0_6] : memref<256x128xbf16, #tpu.memory_space<vmem>>, vector<256x128xbf16>
    %cst_7 = arith.constant dense<0.000000e+00> : vector<128x128xf32>
    %12 = tpu.matmul %10, %11, %cst_7 {dimension_numbers = #tpu.dot_dimension_numbers<[1], [0], [0], [1], [0, 0, 1, 1], [], []>} : vector<128x256xbf16>, vector<256x128xbf16>, vector<128x128xf32> -> vector<128x128xf32>
    %c0_8 = arith.constant 0 : index
    %c0_9 = arith.constant 0 : index
    %13 = vector.load %arg5[%c0_8, %c0_9] : memref<1x128xf32, #tpu.memory_space<vmem>>, vector<1x128xf32>
    %14 = vector.broadcast %13 : vector<1x128xf32> to vector<128x128xf32>
    %15 = arith.mulf %12, %14 : vector<128x128xf32>
    %c0_10 = arith.constant 0 : index
    %c0_11 = arith.constant 0 : index
    %16 = vector.load %arg6[%c0_10, %c0_11] : memref<1x128xf32, #tpu.memory_space<vmem>>, vector<1x128xf32>
    %17 = vector.broadcast %16 : vector<1x128xf32> to vector<128x128xf32>
    %18 = arith.addf %15, %17 : vector<128x128xf32>
    %cst_12 = arith.constant 0.000000e+00 : f32
    %19 = vector.broadcast %cst_12 : f32 to vector<128x128xf32>
    %20 = arith.maximumf %18, %19 : vector<128x128xf32>
    %21 = arith.truncf %20 : vector<128x128xf32> to vector<128x128xbf16>
    %c0_13 = arith.constant 0 : index
    %c0_14 = arith.constant 0 : index
    %22 = vector.load %arg7[%c0_13, %c0_14] : memref<128x128xbf16, #tpu.memory_space<vmem>>, vector<128x128xbf16>
    tpu.vector_store %arg7[%c0_13, %c0_14], %21 {strides = array<i32>} : memref<128x128xbf16, #tpu.memory_space<vmem>>, vector<128x128xbf16>,
    return
  }
  func.func @transform_0(%arg0: i32) -> (i32, i32) {
    %c0_i32 = arith.constant 0 : i32
    %c0_i32_0 = arith.constant 0 : i32
    return %arg0, %c0_i32 : i32, i32
  }
  func.func @transform_1(%arg0: i32) -> (i32, i32) {
    %c0_i32 = arith.constant 0 : i32
    %c0_i32_0 = arith.constant 0 : i32
    %c0_i32_1 = arith.constant 0 : i32
    return %c0_i32, %c0_i32_0 : i32, i32
  }
  func.func @transform_2(%arg0: i32) -> (i32, i32) {
    %c0_i32 = arith.constant 0 : i32
    %c0_i32_0 = arith.constant 0 : i32
    %c0_i32_1 = arith.constant 0 : i32
    return %c0_i32, %c0_i32_0 : i32, i32
  }
  func.func @transform_3(%arg0: i32) -> (i32, i32) {
    %c0_i32 = arith.constant 0 : i32
    %c0_i32_0 = arith.constant 0 : i32
    %c0_i32_1 = arith.constant 0 : i32
    return %c0_i32, %c0_i32_0 : i32, i32
  }
  func.func @transform_4(%arg0: i32) -> (i32, i32) {
    %c0_i32 = arith.constant 0 : i32
    %c0_i32_0 = arith.constant 0 : i32
    %c0_i32_1 = arith.constant 0 : i32
    return %c0_i32, %c0_i32_0 : i32, i32
  }
  func.func @transform_5(%arg0: i32) -> (i32, i32) {
    %c0_i32 = arith.constant 0 : i32
    %c0_i32_0 = arith.constant 0 : i32
    %c0_i32_1 = arith.constant 0 : i32
    return %c0_i32, %c0_i32_0 : i32, i32
  }
  func.func @transform_6(%arg0: i32) -> (i32, i32) {
    %c0_i32 = arith.constant 0 : i32
    %c0_i32_0 = arith.constant 0 : i32
    return %arg0, %c0_i32 : i32, i32
  }
}

module attributes {stable_mosaic.version = 11 : i64} {
  func.func @_mm_kernel(%arg0: i32, %arg1: memref<128x1152xbf16, #tpu.memory_space<vmem>>, %arg2: memref<1152x128xbf16, #tpu.memory_space<vmem>>, %arg3: memref<1x128xf32, #tpu.memory_space<vmem>>, %arg4: memref<1x128xf32, #tpu.memory_space<vmem>>, %arg5: memref<128x128xbf16, #tpu.memory_space<vmem>>) attributes {dimension_semantics = [#tpu.dimension_semantics<parallel>], iteration_bounds = array<i64: 4>, scalar_prefetch = 0 : i64, scratch_operands = 0 : i64, tpu.core_type = #tpu.core_type<tc>, window_params = [{transform_indices = @transform_0, window_bounds = array<i64: 128, 1152>}, {pipeline_mode = #tpu.pipeline_mode<synchronous>, transform_indices = @transform_1, window_bounds = array<i64: 1152, 128>}, {pipeline_mode = #tpu.pipeline_mode<synchronous>, transform_indices = @transform_2, window_bounds = array<i64: 1, 128>}, {pipeline_mode = #tpu.pipeline_mode<synchronous>, transform_indices = @transform_3, window_bounds = array<i64: 1, 128>}, {transform_indices = @transform_4, window_bounds = array<i64: 128, 128>}]} {
    %c0 = arith.constant 0 : index
    %c0_0 = arith.constant 0 : index
    %0 = vector.load %arg1[%c0, %c0_0] : memref<128x1152xbf16, #tpu.memory_space<vmem>>, vector<128x1152xbf16>
    %c0_1 = arith.constant 0 : index
    %c0_2 = arith.constant 0 : index
    %1 = vector.load %arg2[%c0_1, %c0_2] : memref<1152x128xbf16, #tpu.memory_space<vmem>>, vector<1152x128xbf16>
    %cst = arith.constant dense<0.000000e+00> : vector<128x128xf32>
    %2 = tpu.matmul %0, %1, %cst {dimension_numbers = #tpu.dot_dimension_numbers<[1], [0], [0], [1], [0, 0, 1, 1], [], []>} : vector<128x1152xbf16>, vector<1152x128xbf16>, vector<128x128xf32> -> vector<128x128xf32>
    %c0_3 = arith.constant 0 : index
    %c0_4 = arith.constant 0 : index
    %3 = vector.load %arg3[%c0_3, %c0_4] : memref<1x128xf32, #tpu.memory_space<vmem>>, vector<1x128xf32>
    %4 = vector.broadcast %3 : vector<1x128xf32> to vector<128x128xf32>
    %5 = arith.mulf %2, %4 : vector<128x128xf32>
    %c0_5 = arith.constant 0 : index
    %c0_6 = arith.constant 0 : index
    %6 = vector.load %arg4[%c0_5, %c0_6] : memref<1x128xf32, #tpu.memory_space<vmem>>, vector<1x128xf32>
    %7 = vector.broadcast %6 : vector<1x128xf32> to vector<128x128xf32>
    %8 = arith.addf %5, %7 : vector<128x128xf32>
    %9 = arith.truncf %8 : vector<128x128xf32> to vector<128x128xbf16>
    %c0_7 = arith.constant 0 : index
    %c0_8 = arith.constant 0 : index
    %10 = vector.load %arg5[%c0_7, %c0_8] : memref<128x128xbf16, #tpu.memory_space<vmem>>, vector<128x128xbf16>
    tpu.vector_store %arg5[%c0_7, %c0_8], %9 {strides = array<i32>} : memref<128x128xbf16, #tpu.memory_space<vmem>>, vector<128x128xbf16>,
    return
  }
  func.func @transform_0(%arg0: i32) -> (i32, i32) {
    %c0_i32 = arith.constant 0 : i32
    %c0_i32_0 = arith.constant 0 : i32
    return %arg0, %c0_i32 : i32, i32
  }
  func.func @transform_1(%arg0: i32) -> (i32, i32) {
    %c0_i32 = arith.constant 0 : i32
    %c0_i32_0 = arith.constant 0 : i32
    %c0_i32_1 = arith.constant 0 : i32
    return %c0_i32, %c0_i32_0 : i32, i32
  }
  func.func @transform_2(%arg0: i32) -> (i32, i32) {
    %c0_i32 = arith.constant 0 : i32
    %c0_i32_0 = arith.constant 0 : i32
    %c0_i32_1 = arith.constant 0 : i32
    return %c0_i32, %c0_i32_0 : i32, i32
  }
  func.func @transform_3(%arg0: i32) -> (i32, i32) {
    %c0_i32 = arith.constant 0 : i32
    %c0_i32_0 = arith.constant 0 : i32
    %c0_i32_1 = arith.constant 0 : i32
    return %c0_i32, %c0_i32_0 : i32, i32
  }
  func.func @transform_4(%arg0: i32) -> (i32, i32) {
    %c0_i32 = arith.constant 0 : i32
    %c0_i32_0 = arith.constant 0 : i32
    return %arg0, %c0_i32 : i32, i32
  }
}

module attributes {stable_mosaic.version = 11 : i64} {
  func.func @_mm_kernel(%arg0: i32, %arg1: memref<128x256xbf16, #tpu.memory_space<vmem>>, %arg2: memref<1x256xf32, #tpu.memory_space<vmem>>, %arg3: memref<1x256xf32, #tpu.memory_space<vmem>>, %arg4: memref<256x128xbf16, #tpu.memory_space<vmem>>, %arg5: memref<1x128xf32, #tpu.memory_space<vmem>>, %arg6: memref<1x128xf32, #tpu.memory_space<vmem>>, %arg7: memref<128x128xbf16, #tpu.memory_space<vmem>>) attributes {dimension_semantics = [#tpu.dimension_semantics<parallel>], iteration_bounds = array<i64: 4>, scalar_prefetch = 0 : i64, scratch_operands = 0 : i64, tpu.core_type = #tpu.core_type<tc>, window_params = [{transform_indices = @transform_0, window_bounds = array<i64: 128, 256>}, {pipeline_mode = #tpu.pipeline_mode<synchronous>, transform_indices = @transform_1, window_bounds = array<i64: 1, 256>}, {pipeline_mode = #tpu.pipeline_mode<synchronous>, transform_indices = @transform_2, window_bounds = array<i64: 1, 256>}, {pipeline_mode = #tpu.pipeline_mode<synchronous>, transform_indices = @transform_3, window_bounds = array<i64: 256, 128>}, {pipeline_mode = #tpu.pipeline_mode<synchronous>, transform_indices = @transform_4, window_bounds = array<i64: 1, 128>}, {pipeline_mode = #tpu.pipeline_mode<synchronous>, transform_indices = @transform_5, window_bounds = array<i64: 1, 128>}, {transform_indices = @transform_6, window_bounds = array<i64: 128, 128>}]} {
    %c0 = arith.constant 0 : index
    %c0_0 = arith.constant 0 : index
    %0 = vector.load %arg1[%c0, %c0_0] : memref<128x256xbf16, #tpu.memory_space<vmem>>, vector<128x256xbf16>
    %1 = arith.extf %0 : vector<128x256xbf16> to vector<128x256xf32>
    %c0_1 = arith.constant 0 : index
    %c0_2 = arith.constant 0 : index
    %2 = vector.load %arg2[%c0_1, %c0_2] : memref<1x256xf32, #tpu.memory_space<vmem>>, vector<1x256xf32>
    %3 = vector.broadcast %2 : vector<1x256xf32> to vector<128x256xf32>
    %4 = arith.mulf %1, %3 : vector<128x256xf32>
    %c0_3 = arith.constant 0 : index
    %c0_4 = arith.constant 0 : index
    %5 = vector.load %arg3[%c0_3, %c0_4] : memref<1x256xf32, #tpu.memory_space<vmem>>, vector<1x256xf32>
    %6 = vector.broadcast %5 : vector<1x256xf32> to vector<128x256xf32>
    %7 = arith.addf %4, %6 : vector<128x256xf32>
    %cst = arith.constant 0.000000e+00 : f32
    %8 = vector.broadcast %cst : f32 to vector<128x256xf32>
    %9 = arith.maximumf %7, %8 : vector<128x256xf32>
    %10 = arith.truncf %9 : vector<128x256xf32> to vector<128x256xbf16>
    %c0_5 = arith.constant 0 : index
    %c0_6 = arith.constant 0 : index
    %11 = vector.load %arg4[%c0_5, %c0_6] : memref<256x128xbf16, #tpu.memory_space<vmem>>, vector<256x128xbf16>
    %cst_7 = arith.constant dense<0.000000e+00> : vector<128x128xf32>
    %12 = tpu.matmul %10, %11, %cst_7 {dimension_numbers = #tpu.dot_dimension_numbers<[1], [0], [0], [1], [0, 0, 1, 1], [], []>} : vector<128x256xbf16>, vector<256x128xbf16>, vector<128x128xf32> -> vector<128x128xf32>
    %c0_8 = arith.constant 0 : index
    %c0_9 = arith.constant 0 : index
    %13 = vector.load %arg5[%c0_8, %c0_9] : memref<1x128xf32, #tpu.memory_space<vmem>>, vector<1x128xf32>
    %14 = vector.broadcast %13 : vector<1x128xf32> to vector<128x128xf32>
    %15 = arith.mulf %12, %14 : vector<128x128xf32>
    %c0_10 = arith.constant 0 : index
    %c0_11 = arith.constant 0 : index
    %16 = vector.load %arg6[%c0_10, %c0_11] : memref<1x128xf32, #tpu.memory_space<vmem>>, vector<1x128xf32>
    %17 = vector.broadcast %16 : vector<1x128xf32> to vector<128x128xf32>
    %18 = arith.addf %15, %17 : vector<128x128xf32>
    %19 = arith.truncf %18 : vector<128x128xf32> to vector<128x128xbf16>
    %c0_12 = arith.constant 0 : index
    %c0_13 = arith.constant 0 : index
    %20 = vector.load %arg7[%c0_12, %c0_13] : memref<128x128xbf16, #tpu.memory_space<vmem>>, vector<128x128xbf16>
    tpu.vector_store %arg7[%c0_12, %c0_13], %19 {strides = array<i32>} : memref<128x128xbf16, #tpu.memory_space<vmem>>, vector<128x128xbf16>,
    return
  }
  func.func @transform_0(%arg0: i32) -> (i32, i32) {
    %c0_i32 = arith.constant 0 : i32
    %c0_i32_0 = arith.constant 0 : i32
    return %arg0, %c0_i32 : i32, i32
  }
  func.func @transform_1(%arg0: i32) -> (i32, i32) {
    %c0_i32 = arith.constant 0 : i32
    %c0_i32_0 = arith.constant 0 : i32
    %c0_i32_1 = arith.constant 0 : i32
    return %c0_i32, %c0_i32_0 : i32, i32
  }
  func.func @transform_2(%arg0: i32) -> (i32, i32) {
    %c0_i32 = arith.constant 0 : i32
    %c0_i32_0 = arith.constant 0 : i32
    %c0_i32_1 = arith.constant 0 : i32
    return %c0_i32, %c0_i32_0 : i32, i32
  }
  func.func @transform_3(%arg0: i32) -> (i32, i32) {
    %c0_i32 = arith.constant 0 : i32
    %c0_i32_0 = arith.constant 0 : i32
    %c0_i32_1 = arith.constant 0 : i32
    return %c0_i32, %c0_i32_0 : i32, i32
  }
  func.func @transform_4(%arg0: i32) -> (i32, i32) {
    %c0_i32 = arith.constant 0 : i32
    %c0_i32_0 = arith.constant 0 : i32
    %c0_i32_1 = arith.constant 0 : i32
    return %c0_i32, %c0_i32_0 : i32, i32
  }
  func.func @transform_5(%arg0: i32) -> (i32, i32) {
    %c0_i32 = arith.constant 0 : i32
    %c0_i32_0 = arith.constant 0 : i32
    %c0_i32_1 = arith.constant 0 : i32
    return %c0_i32, %c0_i32_0 : i32, i32
  }
  func.func @transform_6(%arg0: i32) -> (i32, i32) {
    %c0_i32 = arith.constant 0 : i32
    %c0_i32_0 = arith.constant 0 : i32
    return %arg0, %c0_i32 : i32, i32
  }
}

module attributes {stable_mosaic.version = 11 : i64} {
  func.func @_mm_kernel(%arg0: i32, %arg1: memref<32x512xbf16, #tpu.memory_space<vmem>>, %arg2: memref<1x512xf32, #tpu.memory_space<vmem>>, %arg3: memref<1x512xf32, #tpu.memory_space<vmem>>, %arg4: memref<512x128xbf16, #tpu.memory_space<vmem>>, %arg5: memref<1x128xf32, #tpu.memory_space<vmem>>, %arg6: memref<1x128xf32, #tpu.memory_space<vmem>>, %arg7: memref<32x128xbf16, #tpu.memory_space<vmem>>) attributes {dimension_semantics = [#tpu.dimension_semantics<parallel>], iteration_bounds = array<i64: 4>, scalar_prefetch = 0 : i64, scratch_operands = 0 : i64, tpu.core_type = #tpu.core_type<tc>, window_params = [{transform_indices = @transform_0, window_bounds = array<i64: 32, 512>}, {pipeline_mode = #tpu.pipeline_mode<synchronous>, transform_indices = @transform_1, window_bounds = array<i64: 1, 512>}, {pipeline_mode = #tpu.pipeline_mode<synchronous>, transform_indices = @transform_2, window_bounds = array<i64: 1, 512>}, {pipeline_mode = #tpu.pipeline_mode<synchronous>, transform_indices = @transform_3, window_bounds = array<i64: 512, 128>}, {pipeline_mode = #tpu.pipeline_mode<synchronous>, transform_indices = @transform_4, window_bounds = array<i64: 1, 128>}, {pipeline_mode = #tpu.pipeline_mode<synchronous>, transform_indices = @transform_5, window_bounds = array<i64: 1, 128>}, {transform_indices = @transform_6, window_bounds = array<i64: 32, 128>}]} {
    %c0 = arith.constant 0 : index
    %c0_0 = arith.constant 0 : index
    %0 = vector.load %arg1[%c0, %c0_0] : memref<32x512xbf16, #tpu.memory_space<vmem>>, vector<32x512xbf16>
    %1 = arith.extf %0 : vector<32x512xbf16> to vector<32x512xf32>
    %c0_1 = arith.constant 0 : index
    %c0_2 = arith.constant 0 : index
    %2 = vector.load %arg2[%c0_1, %c0_2] : memref<1x512xf32, #tpu.memory_space<vmem>>, vector<1x512xf32>
    %3 = vector.broadcast %2 : vector<1x512xf32> to vector<32x512xf32>
    %4 = arith.mulf %1, %3 : vector<32x512xf32>
    %c0_3 = arith.constant 0 : index
    %c0_4 = arith.constant 0 : index
    %5 = vector.load %arg3[%c0_3, %c0_4] : memref<1x512xf32, #tpu.memory_space<vmem>>, vector<1x512xf32>
    %6 = vector.broadcast %5 : vector<1x512xf32> to vector<32x512xf32>
    %7 = arith.addf %4, %6 : vector<32x512xf32>
    %cst = arith.constant 0.000000e+00 : f32
    %8 = vector.broadcast %cst : f32 to vector<32x512xf32>
    %9 = arith.maximumf %7, %8 : vector<32x512xf32>
    %10 = arith.truncf %9 : vector<32x512xf32> to vector<32x512xbf16>
    %c0_5 = arith.constant 0 : index
    %c0_6 = arith.constant 0 : index
    %11 = vector.load %arg4[%c0_5, %c0_6] : memref<512x128xbf16, #tpu.memory_space<vmem>>, vector<512x128xbf16>
    %cst_7 = arith.constant dense<0.000000e+00> : vector<32x128xf32>
    %12 = tpu.matmul %10, %11, %cst_7 {dimension_numbers = #tpu.dot_dimension_numbers<[1], [0], [0], [1], [0, 0, 1, 1], [], []>} : vector<32x512xbf16>, vector<512x128xbf16>, vector<32x128xf32> -> vector<32x128xf32>
    %c0_8 = arith.constant 0 : index
    %c0_9 = arith.constant 0 : index
    %13 = vector.load %arg5[%c0_8, %c0_9] : memref<1x128xf32, #tpu.memory_space<vmem>>, vector<1x128xf32>
    %14 = vector.broadcast %13 : vector<1x128xf32> to vector<32x128xf32>
    %15 = arith.mulf %12, %14 : vector<32x128xf32>
    %c0_10 = arith.constant 0 : index
    %c0_11 = arith.constant 0 : index
    %16 = vector.load %arg6[%c0_10, %c0_11] : memref<1x128xf32, #tpu.memory_space<vmem>>, vector<1x128xf32>
    %17 = vector.broadcast %16 : vector<1x128xf32> to vector<32x128xf32>
    %18 = arith.addf %15, %17 : vector<32x128xf32>
    %cst_12 = arith.constant 0.000000e+00 : f32
    %19 = vector.broadcast %cst_12 : f32 to vector<32x128xf32>
    %20 = arith.maximumf %18, %19 : vector<32x128xf32>
    %21 = arith.truncf %20 : vector<32x128xf32> to vector<32x128xbf16>
    %c0_13 = arith.constant 0 : index
    %c0_14 = arith.constant 0 : index
    %22 = vector.load %arg7[%c0_13, %c0_14] : memref<32x128xbf16, #tpu.memory_space<vmem>>, vector<32x128xbf16>
    tpu.vector_store %arg7[%c0_13, %c0_14], %21 {strides = array<i32>} : memref<32x128xbf16, #tpu.memory_space<vmem>>, vector<32x128xbf16>,
    return
  }
  func.func @transform_0(%arg0: i32) -> (i32, i32) {
    %c0_i32 = arith.constant 0 : i32
    %c0_i32_0 = arith.constant 0 : i32
    return %arg0, %c0_i32 : i32, i32
  }
  func.func @transform_1(%arg0: i32) -> (i32, i32) {
    %c0_i32 = arith.constant 0 : i32
    %c0_i32_0 = arith.constant 0 : i32
    %c0_i32_1 = arith.constant 0 : i32
    return %c0_i32, %c0_i32_0 : i32, i32
  }
  func.func @transform_2(%arg0: i32) -> (i32, i32) {
    %c0_i32 = arith.constant 0 : i32
    %c0_i32_0 = arith.constant 0 : i32
    %c0_i32_1 = arith.constant 0 : i32
    return %c0_i32, %c0_i32_0 : i32, i32
  }
  func.func @transform_3(%arg0: i32) -> (i32, i32) {
    %c0_i32 = arith.constant 0 : i32
    %c0_i32_0 = arith.constant 0 : i32
    %c0_i32_1 = arith.constant 0 : i32
    return %c0_i32, %c0_i32_0 : i32, i32
  }
  func.func @transform_4(%arg0: i32) -> (i32, i32) {
    %c0_i32 = arith.constant 0 : i32
    %c0_i32_0 = arith.constant 0 : i32
    %c0_i32_1 = arith.constant 0 : i32
    return %c0_i32, %c0_i32_0 : i32, i32
  }
  func.func @transform_5(%arg0: i32) -> (i32, i32) {
    %c0_i32 = arith.constant 0 : i32
    %c0_i32_0 = arith.constant 0 : i32
    %c0_i32_1 = arith.constant 0 : i32
    return %c0_i32, %c0_i32_0 : i32, i32
  }
  func.func @transform_6(%arg0: i32) -> (i32, i32) {
    %c0_i32 = arith.constant 0 : i32
    %c0_i32_0 = arith.constant 0 : i32
    return %arg0, %c0_i32 : i32, i32
  }
}

module attributes {stable_mosaic.version = 11 : i64} {
  func.func @_mm_kernel(%arg0: i32, %arg1: memref<32x1152xbf16, #tpu.memory_space<vmem>>, %arg2: memref<1152x128xbf16, #tpu.memory_space<vmem>>, %arg3: memref<1x128xf32, #tpu.memory_space<vmem>>, %arg4: memref<1x128xf32, #tpu.memory_space<vmem>>, %arg5: memref<32x128xbf16, #tpu.memory_space<vmem>>) attributes {dimension_semantics = [#tpu.dimension_semantics<parallel>], iteration_bounds = array<i64: 4>, scalar_prefetch = 0 : i64, scratch_operands = 0 : i64, tpu.core_type = #tpu.core_type<tc>, window_params = [{transform_indices = @transform_0, window_bounds = array<i64: 32, 1152>}, {pipeline_mode = #tpu.pipeline_mode<synchronous>, transform_indices = @transform_1, window_bounds = array<i64: 1152, 128>}, {pipeline_mode = #tpu.pipeline_mode<synchronous>, transform_indices = @transform_2, window_bounds = array<i64: 1, 128>}, {pipeline_mode = #tpu.pipeline_mode<synchronous>, transform_indices = @transform_3, window_bounds = array<i64: 1, 128>}, {transform_indices = @transform_4, window_bounds = array<i64: 32, 128>}]} {
    %c0 = arith.constant 0 : index
    %c0_0 = arith.constant 0 : index
    %0 = vector.load %arg1[%c0, %c0_0] : memref<32x1152xbf16, #tpu.memory_space<vmem>>, vector<32x1152xbf16>
    %c0_1 = arith.constant 0 : index
    %c0_2 = arith.constant 0 : index
    %1 = vector.load %arg2[%c0_1, %c0_2] : memref<1152x128xbf16, #tpu.memory_space<vmem>>, vector<1152x128xbf16>
    %cst = arith.constant dense<0.000000e+00> : vector<32x128xf32>
    %2 = tpu.matmul %0, %1, %cst {dimension_numbers = #tpu.dot_dimension_numbers<[1], [0], [0], [1], [0, 0, 1, 1], [], []>} : vector<32x1152xbf16>, vector<1152x128xbf16>, vector<32x128xf32> -> vector<32x128xf32>
    %c0_3 = arith.constant 0 : index
    %c0_4 = arith.constant 0 : index
    %3 = vector.load %arg3[%c0_3, %c0_4] : memref<1x128xf32, #tpu.memory_space<vmem>>, vector<1x128xf32>
    %4 = vector.broadcast %3 : vector<1x128xf32> to vector<32x128xf32>
    %5 = arith.mulf %2, %4 : vector<32x128xf32>
    %c0_5 = arith.constant 0 : index
    %c0_6 = arith.constant 0 : index
    %6 = vector.load %arg4[%c0_5, %c0_6] : memref<1x128xf32, #tpu.memory_space<vmem>>, vector<1x128xf32>
    %7 = vector.broadcast %6 : vector<1x128xf32> to vector<32x128xf32>
    %8 = arith.addf %5, %7 : vector<32x128xf32>
    %9 = arith.truncf %8 : vector<32x128xf32> to vector<32x128xbf16>
    %c0_7 = arith.constant 0 : index
    %c0_8 = arith.constant 0 : index
    %10 = vector.load %arg5[%c0_7, %c0_8] : memref<32x128xbf16, #tpu.memory_space<vmem>>, vector<32x128xbf16>
    tpu.vector_store %arg5[%c0_7, %c0_8], %9 {strides = array<i32>} : memref<32x128xbf16, #tpu.memory_space<vmem>>, vector<32x128xbf16>,
    return
  }
  func.func @transform_0(%arg0: i32) -> (i32, i32) {
    %c0_i32 = arith.constant 0 : i32
    %c0_i32_0 = arith.constant 0 : i32
    return %arg0, %c0_i32 : i32, i32
  }
  func.func @transform_1(%arg0: i32) -> (i32, i32) {
    %c0_i32 = arith.constant 0 : i32
    %c0_i32_0 = arith.constant 0 : i32
    %c0_i32_1 = arith.constant 0 : i32
    return %c0_i32, %c0_i32_0 : i32, i32
  }
  func.func @transform_2(%arg0: i32) -> (i32, i32) {
    %c0_i32 = arith.constant 0 : i32
    %c0_i32_0 = arith.constant 0 : i32
    %c0_i32_1 = arith.constant 0 : i32
    return %c0_i32, %c0_i32_0 : i32, i32
  }
  func.func @transform_3(%arg0: i32) -> (i32, i32) {
    %c0_i32 = arith.constant 0 : i32
    %c0_i32_0 = arith.constant 0 : i32
    %c0_i32_1 = arith.constant 0 : i32
    return %c0_i32, %c0_i32_0 : i32, i32
  }
  func.func @transform_4(%arg0: i32) -> (i32, i32) {
    %c0_i32 = arith.constant 0 : i32
    %c0_i32_0 = arith.constant 0 : i32
    return %arg0, %c0_i32 : i32, i32
  }
}

module attributes {stable_mosaic.version = 11 : i64} {
  func.func @_mm_kernel(%arg0: i32, %arg1: memref<32x512xbf16, #tpu.memory_space<vmem>>, %arg2: memref<1x512xf32, #tpu.memory_space<vmem>>, %arg3: memref<1x512xf32, #tpu.memory_space<vmem>>, %arg4: memref<512x256xbf16, #tpu.memory_space<vmem>>, %arg5: memref<1x256xf32, #tpu.memory_space<vmem>>, %arg6: memref<1x256xf32, #tpu.memory_space<vmem>>, %arg7: memref<32x256xbf16, #tpu.memory_space<vmem>>) attributes {dimension_semantics = [#tpu.dimension_semantics<parallel>], iteration_bounds = array<i64: 4>, scalar_prefetch = 0 : i64, scratch_operands = 0 : i64, tpu.core_type = #tpu.core_type<tc>, window_params = [{transform_indices = @transform_0, window_bounds = array<i64: 32, 512>}, {pipeline_mode = #tpu.pipeline_mode<synchronous>, transform_indices = @transform_1, window_bounds = array<i64: 1, 512>}, {pipeline_mode = #tpu.pipeline_mode<synchronous>, transform_indices = @transform_2, window_bounds = array<i64: 1, 512>}, {pipeline_mode = #tpu.pipeline_mode<synchronous>, transform_indices = @transform_3, window_bounds = array<i64: 512, 256>}, {pipeline_mode = #tpu.pipeline_mode<synchronous>, transform_indices = @transform_4, window_bounds = array<i64: 1, 256>}, {pipeline_mode = #tpu.pipeline_mode<synchronous>, transform_indices = @transform_5, window_bounds = array<i64: 1, 256>}, {transform_indices = @transform_6, window_bounds = array<i64: 32, 256>}]} {
    %c0 = arith.constant 0 : index
    %c0_0 = arith.constant 0 : index
    %0 = vector.load %arg1[%c0, %c0_0] : memref<32x512xbf16, #tpu.memory_space<vmem>>, vector<32x512xbf16>
    %1 = arith.extf %0 : vector<32x512xbf16> to vector<32x512xf32>
    %c0_1 = arith.constant 0 : index
    %c0_2 = arith.constant 0 : index
    %2 = vector.load %arg2[%c0_1, %c0_2] : memref<1x512xf32, #tpu.memory_space<vmem>>, vector<1x512xf32>
    %3 = vector.broadcast %2 : vector<1x512xf32> to vector<32x512xf32>
    %4 = arith.mulf %1, %3 : vector<32x512xf32>
    %c0_3 = arith.constant 0 : index
    %c0_4 = arith.constant 0 : index
    %5 = vector.load %arg3[%c0_3, %c0_4] : memref<1x512xf32, #tpu.memory_space<vmem>>, vector<1x512xf32>
    %6 = vector.broadcast %5 : vector<1x512xf32> to vector<32x512xf32>
    %7 = arith.addf %4, %6 : vector<32x512xf32>
    %cst = arith.constant 0.000000e+00 : f32
    %8 = vector.broadcast %cst : f32 to vector<32x512xf32>
    %9 = arith.maximumf %7, %8 : vector<32x512xf32>
    %10 = arith.truncf %9 : vector<32x512xf32> to vector<32x512xbf16>
    %c0_5 = arith.constant 0 : index
    %c0_6 = arith.constant 0 : index
    %11 = vector.load %arg4[%c0_5, %c0_6] : memref<512x256xbf16, #tpu.memory_space<vmem>>, vector<512x256xbf16>
    %cst_7 = arith.constant dense<0.000000e+00> : vector<32x256xf32>
    %12 = tpu.matmul %10, %11, %cst_7 {dimension_numbers = #tpu.dot_dimension_numbers<[1], [0], [0], [1], [0, 0, 1, 1], [], []>} : vector<32x512xbf16>, vector<512x256xbf16>, vector<32x256xf32> -> vector<32x256xf32>
    %c0_8 = arith.constant 0 : index
    %c0_9 = arith.constant 0 : index
    %13 = vector.load %arg5[%c0_8, %c0_9] : memref<1x256xf32, #tpu.memory_space<vmem>>, vector<1x256xf32>
    %14 = vector.broadcast %13 : vector<1x256xf32> to vector<32x256xf32>
    %15 = arith.mulf %12, %14 : vector<32x256xf32>
    %c0_10 = arith.constant 0 : index
    %c0_11 = arith.constant 0 : index
    %16 = vector.load %arg6[%c0_10, %c0_11] : memref<1x256xf32, #tpu.memory_space<vmem>>, vector<1x256xf32>
    %17 = vector.broadcast %16 : vector<1x256xf32> to vector<32x256xf32>
    %18 = arith.addf %15, %17 : vector<32x256xf32>
    %19 = arith.truncf %18 : vector<32x256xf32> to vector<32x256xbf16>
    %c0_12 = arith.constant 0 : index
    %c0_13 = arith.constant 0 : index
    %20 = vector.load %arg7[%c0_12, %c0_13] : memref<32x256xbf16, #tpu.memory_space<vmem>>, vector<32x256xbf16>
    tpu.vector_store %arg7[%c0_12, %c0_13], %19 {strides = array<i32>} : memref<32x256xbf16, #tpu.memory_space<vmem>>, vector<32x256xbf16>,
    return
  }
  func.func @transform_0(%arg0: i32) -> (i32, i32) {
    %c0_i32 = arith.constant 0 : i32
    %c0_i32_0 = arith.constant 0 : i32
    return %arg0, %c0_i32 : i32, i32
  }
  func.func @transform_1(%arg0: i32) -> (i32, i32) {
    %c0_i32 = arith.constant 0 : i32
    %c0_i32_0 = arith.constant 0 : i32
    %c0_i32_1 = arith.constant 0 : i32
    return %c0_i32, %c0_i32_0 : i32, i32
  }
  func.func @transform_2(%arg0: i32) -> (i32, i32) {
    %c0_i32 = arith.constant 0 : i32
    %c0_i32_0 = arith.constant 0 : i32
    %c0_i32_1 = arith.constant 0 : i32
    return %c0_i32, %c0_i32_0 : i32, i32
  }
  func.func @transform_3(%arg0: i32) -> (i32, i32) {
    %c0_i32 = arith.constant 0 : i32
    %c0_i32_0 = arith.constant 0 : i32
    %c0_i32_1 = arith.constant 0 : i32
    return %c0_i32, %c0_i32_0 : i32, i32
  }
  func.func @transform_4(%arg0: i32) -> (i32, i32) {
    %c0_i32 = arith.constant 0 : i32
    %c0_i32_0 = arith.constant 0 : i32
    %c0_i32_1 = arith.constant 0 : i32
    return %c0_i32, %c0_i32_0 : i32, i32
  }
  func.func @transform_5(%arg0: i32) -> (i32, i32) {
    %c0_i32 = arith.constant 0 : i32
    %c0_i32_0 = arith.constant 0 : i32
    %c0_i32_1 = arith.constant 0 : i32
    return %c0_i32, %c0_i32_0 : i32, i32
  }
  func.func @transform_6(%arg0: i32) -> (i32, i32) {
    %c0_i32 = arith.constant 0 : i32
    %c0_i32_0 = arith.constant 0 : i32
    return %arg0, %c0_i32 : i32, i32
  }
}

module attributes {stable_mosaic.version = 11 : i64} {
  func.func @_mm_kernel(%arg0: i32, %arg1: memref<16x1280xbf16, #tpu.memory_space<vmem>>, %arg2: memref<1x1280xf32, #tpu.memory_space<vmem>>, %arg3: memref<1x1280xf32, #tpu.memory_space<vmem>>, %arg4: memref<1280x128xbf16, #tpu.memory_space<vmem>>, %arg5: memref<1x128xf32, #tpu.memory_space<vmem>>, %arg6: memref<1x128xf32, #tpu.memory_space<vmem>>, %arg7: memref<16x128xbf16, #tpu.memory_space<vmem>>) attributes {dimension_semantics = [#tpu.dimension_semantics<parallel>], iteration_bounds = array<i64: 2>, scalar_prefetch = 0 : i64, scratch_operands = 0 : i64, tpu.core_type = #tpu.core_type<tc>, window_params = [{transform_indices = @transform_0, window_bounds = array<i64: 16, 1280>}, {pipeline_mode = #tpu.pipeline_mode<synchronous>, transform_indices = @transform_1, window_bounds = array<i64: 1, 1280>}, {pipeline_mode = #tpu.pipeline_mode<synchronous>, transform_indices = @transform_2, window_bounds = array<i64: 1, 1280>}, {pipeline_mode = #tpu.pipeline_mode<synchronous>, transform_indices = @transform_3, window_bounds = array<i64: 1280, 128>}, {pipeline_mode = #tpu.pipeline_mode<synchronous>, transform_indices = @transform_4, window_bounds = array<i64: 1, 128>}, {pipeline_mode = #tpu.pipeline_mode<synchronous>, transform_indices = @transform_5, window_bounds = array<i64: 1, 128>}, {transform_indices = @transform_6, window_bounds = array<i64: 16, 128>}]} {
    %c0 = arith.constant 0 : index
    %c0_0 = arith.constant 0 : index
    %0 = vector.load %arg1[%c0, %c0_0] : memref<16x1280xbf16, #tpu.memory_space<vmem>>, vector<16x1280xbf16>
    %1 = arith.extf %0 : vector<16x1280xbf16> to vector<16x1280xf32>
    %c0_1 = arith.constant 0 : index
    %c0_2 = arith.constant 0 : index
    %2 = vector.load %arg2[%c0_1, %c0_2] : memref<1x1280xf32, #tpu.memory_space<vmem>>, vector<1x1280xf32>
    %3 = vector.broadcast %2 : vector<1x1280xf32> to vector<16x1280xf32>
    %4 = arith.mulf %1, %3 : vector<16x1280xf32>
    %c0_3 = arith.constant 0 : index
    %c0_4 = arith.constant 0 : index
    %5 = vector.load %arg3[%c0_3, %c0_4] : memref<1x1280xf32, #tpu.memory_space<vmem>>, vector<1x1280xf32>
    %6 = vector.broadcast %5 : vector<1x1280xf32> to vector<16x1280xf32>
    %7 = arith.addf %4, %6 : vector<16x1280xf32>
    %cst = arith.constant 0.000000e+00 : f32
    %8 = vector.broadcast %cst : f32 to vector<16x1280xf32>
    %9 = arith.maximumf %7, %8 : vector<16x1280xf32>
    %10 = arith.truncf %9 : vector<16x1280xf32> to vector<16x1280xbf16>
    %c0_5 = arith.constant 0 : index
    %c0_6 = arith.constant 0 : index
    %11 = vector.load %arg4[%c0_5, %c0_6] : memref<1280x128xbf16, #tpu.memory_space<vmem>>, vector<1280x128xbf16>
    %cst_7 = arith.constant dense<0.000000e+00> : vector<16x128xf32>
    %12 = tpu.matmul %10, %11, %cst_7 {dimension_numbers = #tpu.dot_dimension_numbers<[1], [0], [0], [1], [0, 0, 1, 1], [], []>} : vector<16x1280xbf16>, vector<1280x128xbf16>, vector<16x128xf32> -> vector<16x128xf32>
    %c0_8 = arith.constant 0 : index
    %c0_9 = arith.constant 0 : index
    %13 = vector.load %arg5[%c0_8, %c0_9] : memref<1x128xf32, #tpu.memory_space<vmem>>, vector<1x128xf32>
    %14 = vector.broadcast %13 : vector<1x128xf32> to vector<16x128xf32>
    %15 = arith.mulf %12, %14 : vector<16x128xf32>
    %c0_10 = arith.constant 0 : index
    %c0_11 = arith.constant 0 : index
    %16 = vector.load %arg6[%c0_10, %c0_11] : memref<1x128xf32, #tpu.memory_space<vmem>>, vector<1x128xf32>
    %17 = vector.broadcast %16 : vector<1x128xf32> to vector<16x128xf32>
    %18 = arith.addf %15, %17 : vector<16x128xf32>
    %cst_12 = arith.constant 0.000000e+00 : f32
    %19 = vector.broadcast %cst_12 : f32 to vector<16x128xf32>
    %20 = arith.maximumf %18, %19 : vector<16x128xf32>
    %21 = arith.truncf %20 : vector<16x128xf32> to vector<16x128xbf16>
    %c0_13 = arith.constant 0 : index
    %c0_14 = arith.constant 0 : index
    %22 = vector.load %arg7[%c0_13, %c0_14] : memref<16x128xbf16, #tpu.memory_space<vmem>>, vector<16x128xbf16>
    tpu.vector_store %arg7[%c0_13, %c0_14], %21 {strides = array<i32>} : memref<16x128xbf16, #tpu.memory_space<vmem>>, vector<16x128xbf16>,
    return
  }
  func.func @transform_0(%arg0: i32) -> (i32, i32) {
    %c0_i32 = arith.constant 0 : i32
    %c0_i32_0 = arith.constant 0 : i32
    return %arg0, %c0_i32 : i32, i32
  }
  func.func @transform_1(%arg0: i32) -> (i32, i32) {
    %c0_i32 = arith.constant 0 : i32
    %c0_i32_0 = arith.constant 0 : i32
    %c0_i32_1 = arith.constant 0 : i32
    return %c0_i32, %c0_i32_0 : i32, i32
  }
  func.func @transform_2(%arg0: i32) -> (i32, i32) {
    %c0_i32 = arith.constant 0 : i32
    %c0_i32_0 = arith.constant 0 : i32
    %c0_i32_1 = arith.constant 0 : i32
    return %c0_i32, %c0_i32_0 : i32, i32
  }
  func.func @transform_3(%arg0: i32) -> (i32, i32) {
    %c0_i32 = arith.constant 0 : i32
    %c0_i32_0 = arith.constant 0 : i32
    %c0_i32_1 = arith.constant 0 : i32
    return %c0_i32, %c0_i32_0 : i32, i32
  }
  func.func @transform_4(%arg0: i32) -> (i32, i32) {
    %c0_i32 = arith.constant 0 : i32
    %c0_i32_0 = arith.constant 0 : i32
    %c0_i32_1 = arith.constant 0 : i32
    return %c0_i32, %c0_i32_0 : i32, i32
  }
  func.func @transform_5(%arg0: i32) -> (i32, i32) {
    %c0_i32 = arith.constant 0 : i32
    %c0_i32_0 = arith.constant 0 : i32
    %c0_i32_1 = arith.constant 0 : i32
    return %c0_i32, %c0_i32_0 : i32, i32
  }
  func.func @transform_6(%arg0: i32) -> (i32, i32) {
    %c0_i32 = arith.constant 0 : i32
    %c0_i32_0 = arith.constant 0 : i32
    return %arg0, %c0_i32 : i32, i32
  }
}

module attributes {stable_mosaic.version = 11 : i64} {
  func.func @_mm_kernel(%arg0: i32, %arg1: memref<16x1152xbf16, #tpu.memory_space<vmem>>, %arg2: memref<1152x128xbf16, #tpu.memory_space<vmem>>, %arg3: memref<1x128xf32, #tpu.memory_space<vmem>>, %arg4: memref<1x128xf32, #tpu.memory_space<vmem>>, %arg5: memref<16x128xbf16, #tpu.memory_space<vmem>>) attributes {dimension_semantics = [#tpu.dimension_semantics<parallel>], iteration_bounds = array<i64: 2>, scalar_prefetch = 0 : i64, scratch_operands = 0 : i64, tpu.core_type = #tpu.core_type<tc>, window_params = [{transform_indices = @transform_0, window_bounds = array<i64: 16, 1152>}, {pipeline_mode = #tpu.pipeline_mode<synchronous>, transform_indices = @transform_1, window_bounds = array<i64: 1152, 128>}, {pipeline_mode = #tpu.pipeline_mode<synchronous>, transform_indices = @transform_2, window_bounds = array<i64: 1, 128>}, {pipeline_mode = #tpu.pipeline_mode<synchronous>, transform_indices = @transform_3, window_bounds = array<i64: 1, 128>}, {transform_indices = @transform_4, window_bounds = array<i64: 16, 128>}]} {
    %c0 = arith.constant 0 : index
    %c0_0 = arith.constant 0 : index
    %0 = vector.load %arg1[%c0, %c0_0] : memref<16x1152xbf16, #tpu.memory_space<vmem>>, vector<16x1152xbf16>
    %c0_1 = arith.constant 0 : index
    %c0_2 = arith.constant 0 : index
    %1 = vector.load %arg2[%c0_1, %c0_2] : memref<1152x128xbf16, #tpu.memory_space<vmem>>, vector<1152x128xbf16>
    %cst = arith.constant dense<0.000000e+00> : vector<16x128xf32>
    %2 = tpu.matmul %0, %1, %cst {dimension_numbers = #tpu.dot_dimension_numbers<[1], [0], [0], [1], [0, 0, 1, 1], [], []>} : vector<16x1152xbf16>, vector<1152x128xbf16>, vector<16x128xf32> -> vector<16x128xf32>
    %c0_3 = arith.constant 0 : index
    %c0_4 = arith.constant 0 : index
    %3 = vector.load %arg3[%c0_3, %c0_4] : memref<1x128xf32, #tpu.memory_space<vmem>>, vector<1x128xf32>
    %4 = vector.broadcast %3 : vector<1x128xf32> to vector<16x128xf32>
    %5 = arith.mulf %2, %4 : vector<16x128xf32>
    %c0_5 = arith.constant 0 : index
    %c0_6 = arith.constant 0 : index
    %6 = vector.load %arg4[%c0_5, %c0_6] : memref<1x128xf32, #tpu.memory_space<vmem>>, vector<1x128xf32>
    %7 = vector.broadcast %6 : vector<1x128xf32> to vector<16x128xf32>
    %8 = arith.addf %5, %7 : vector<16x128xf32>
    %9 = arith.truncf %8 : vector<16x128xf32> to vector<16x128xbf16>
    %c0_7 = arith.constant 0 : index
    %c0_8 = arith.constant 0 : index
    %10 = vector.load %arg5[%c0_7, %c0_8] : memref<16x128xbf16, #tpu.memory_space<vmem>>, vector<16x128xbf16>
    tpu.vector_store %arg5[%c0_7, %c0_8], %9 {strides = array<i32>} : memref<16x128xbf16, #tpu.memory_space<vmem>>, vector<16x128xbf16>,
    return
  }
  func.func @transform_0(%arg0: i32) -> (i32, i32) {
    %c0_i32 = arith.constant 0 : i32
    %c0_i32_0 = arith.constant 0 : i32
    return %arg0, %c0_i32 : i32, i32
  }
  func.func @transform_1(%arg0: i32) -> (i32, i32) {
    %c0_i32 = arith.constant 0 : i32
    %c0_i32_0 = arith.constant 0 : i32
    %c0_i32_1 = arith.constant 0 : i32
    return %c0_i32, %c0_i32_0 : i32, i32
  }
  func.func @transform_2(%arg0: i32) -> (i32, i32) {
    %c0_i32 = arith.constant 0 : i32
    %c0_i32_0 = arith.constant 0 : i32
    %c0_i32_1 = arith.constant 0 : i32
    return %c0_i32, %c0_i32_0 : i32, i32
  }
  func.func @transform_3(%arg0: i32) -> (i32, i32) {
    %c0_i32 = arith.constant 0 : i32
    %c0_i32_0 = arith.constant 0 : i32
    %c0_i32_1 = arith.constant 0 : i32
    return %c0_i32, %c0_i32_0 : i32, i32
  }
  func.func @transform_4(%arg0: i32) -> (i32, i32) {
    %c0_i32 = arith.constant 0 : i32
    %c0_i32_0 = arith.constant 0 : i32
    return %arg0, %c0_i32 : i32, i32
  }
}

module attributes {stable_mosaic.version = 11 : i64} {
  func.func @_mm_kernel(%arg0: i32, %arg1: memref<16x1280xbf16, #tpu.memory_space<vmem>>, %arg2: memref<1x1280xf32, #tpu.memory_space<vmem>>, %arg3: memref<1x1280xf32, #tpu.memory_space<vmem>>, %arg4: memref<1280x640xbf16, #tpu.memory_space<vmem>>, %arg5: memref<1x640xf32, #tpu.memory_space<vmem>>, %arg6: memref<1x640xf32, #tpu.memory_space<vmem>>, %arg7: memref<16x640xbf16, #tpu.memory_space<vmem>>) attributes {dimension_semantics = [#tpu.dimension_semantics<parallel>], iteration_bounds = array<i64: 2>, scalar_prefetch = 0 : i64, scratch_operands = 0 : i64, tpu.core_type = #tpu.core_type<tc>, window_params = [{transform_indices = @transform_0, window_bounds = array<i64: 16, 1280>}, {pipeline_mode = #tpu.pipeline_mode<synchronous>, transform_indices = @transform_1, window_bounds = array<i64: 1, 1280>}, {pipeline_mode = #tpu.pipeline_mode<synchronous>, transform_indices = @transform_2, window_bounds = array<i64: 1, 1280>}, {pipeline_mode = #tpu.pipeline_mode<synchronous>, transform_indices = @transform_3, window_bounds = array<i64: 1280, 640>}, {pipeline_mode = #tpu.pipeline_mode<synchronous>, transform_indices = @transform_4, window_bounds = array<i64: 1, 640>}, {pipeline_mode = #tpu.pipeline_mode<synchronous>, transform_indices = @transform_5, window_bounds = array<i64: 1, 640>}, {transform_indices = @transform_6, window_bounds = array<i64: 16, 640>}]} {
    %c0 = arith.constant 0 : index
    %c0_0 = arith.constant 0 : index
    %0 = vector.load %arg1[%c0, %c0_0] : memref<16x1280xbf16, #tpu.memory_space<vmem>>, vector<16x1280xbf16>
    %1 = arith.extf %0 : vector<16x1280xbf16> to vector<16x1280xf32>
    %c0_1 = arith.constant 0 : index
    %c0_2 = arith.constant 0 : index
    %2 = vector.load %arg2[%c0_1, %c0_2] : memref<1x1280xf32, #tpu.memory_space<vmem>>, vector<1x1280xf32>
    %3 = vector.broadcast %2 : vector<1x1280xf32> to vector<16x1280xf32>
    %4 = arith.mulf %1, %3 : vector<16x1280xf32>
    %c0_3 = arith.constant 0 : index
    %c0_4 = arith.constant 0 : index
    %5 = vector.load %arg3[%c0_3, %c0_4] : memref<1x1280xf32, #tpu.memory_space<vmem>>, vector<1x1280xf32>
    %6 = vector.broadcast %5 : vector<1x1280xf32> to vector<16x1280xf32>
    %7 = arith.addf %4, %6 : vector<16x1280xf32>
    %cst = arith.constant 0.000000e+00 : f32
    %8 = vector.broadcast %cst : f32 to vector<16x1280xf32>
    %9 = arith.maximumf %7, %8 : vector<16x1280xf32>
    %10 = arith.truncf %9 : vector<16x1280xf32> to vector<16x1280xbf16>
    %c0_5 = arith.constant 0 : index
    %c0_6 = arith.constant 0 : index
    %11 = vector.load %arg4[%c0_5, %c0_6] : memref<1280x640xbf16, #tpu.memory_space<vmem>>, vector<1280x640xbf16>
    %cst_7 = arith.constant dense<0.000000e+00> : vector<16x640xf32>
    %12 = tpu.matmul %10, %11, %cst_7 {dimension_numbers = #tpu.dot_dimension_numbers<[1], [0], [0], [1], [0, 0, 1, 1], [], []>} : vector<16x1280xbf16>, vector<1280x640xbf16>, vector<16x640xf32> -> vector<16x640xf32>
    %c0_8 = arith.constant 0 : index
    %c0_9 = arith.constant 0 : index
    %13 = vector.load %arg5[%c0_8, %c0_9] : memref<1x640xf32, #tpu.memory_space<vmem>>, vector<1x640xf32>
    %14 = vector.broadcast %13 : vector<1x640xf32> to vector<16x640xf32>
    %15 = arith.mulf %12, %14 : vector<16x640xf32>
    %c0_10 = arith.constant 0 : index
    %c0_11 = arith.constant 0 : index
    %16 = vector.load %arg6[%c0_10, %c0_11] : memref<1x640xf32, #tpu.memory_space<vmem>>, vector<1x640xf32>
    %17 = vector.broadcast %16 : vector<1x640xf32> to vector<16x640xf32>
    %18 = arith.addf %15, %17 : vector<16x640xf32>
    %19 = arith.truncf %18 : vector<16x640xf32> to vector<16x640xbf16>
    %c0_12 = arith.constant 0 : index
    %c0_13 = arith.constant 0 : index
    %20 = vector.load %arg7[%c0_12, %c0_13] : memref<16x640xbf16, #tpu.memory_space<vmem>>, vector<16x640xbf16>
    tpu.vector_store %arg7[%c0_12, %c0_13], %19 {strides = array<i32>} : memref<16x640xbf16, #tpu.memory_space<vmem>>, vector<16x640xbf16>,
    return
  }
  func.func @transform_0(%arg0: i32) -> (i32, i32) {
    %c0_i32 = arith.constant 0 : i32
    %c0_i32_0 = arith.constant 0 : i32
    return %arg0, %c0_i32 : i32, i32
  }
  func.func @transform_1(%arg0: i32) -> (i32, i32) {
    %c0_i32 = arith.constant 0 : i32
    %c0_i32_0 = arith.constant 0 : i32
    %c0_i32_1 = arith.constant 0 : i32
    return %c0_i32, %c0_i32_0 : i32, i32
  }
  func.func @transform_2(%arg0: i32) -> (i32, i32) {
    %c0_i32 = arith.constant 0 : i32
    %c0_i32_0 = arith.constant 0 : i32
    %c0_i32_1 = arith.constant 0 : i32
    return %c0_i32, %c0_i32_0 : i32, i32
  }
  func.func @transform_3(%arg0: i32) -> (i32, i32) {
    %c0_i32 = arith.constant 0 : i32
    %c0_i32_0 = arith.constant 0 : i32
    %c0_i32_1 = arith.constant 0 : i32
    return %c0_i32, %c0_i32_0 : i32, i32
  }
  func.func @transform_4(%arg0: i32) -> (i32, i32) {
    %c0_i32 = arith.constant 0 : i32
    %c0_i32_0 = arith.constant 0 : i32
    %c0_i32_1 = arith.constant 0 : i32
    return %c0_i32, %c0_i32_0 : i32, i32
  }
  func.func @transform_5(%arg0: i32) -> (i32, i32) {
    %c0_i32 = arith.constant 0 : i32
    %c0_i32_0 = arith.constant 0 : i32
    %c0_i32_1 = arith.constant 0 : i32
    return %c0_i32, %c0_i32_0 : i32, i32
  }
  func.func @transform_6(%arg0: i32) -> (i32, i32) {
    %c0_i32 = arith.constant 0 : i32
    %c0_i32_0 = arith.constant 0 : i32
    return %arg0, %c0_i32 : i32, i32
  }
}

module attributes {stable_mosaic.version = 11 : i64} {
  func.func @_mm_kernel(%arg0: i32, %arg1: memref<16x1664xbf16, #tpu.memory_space<vmem>>, %arg2: memref<1x1664xf32, #tpu.memory_space<vmem>>, %arg3: memref<1x1664xf32, #tpu.memory_space<vmem>>, %arg4: memref<1664x128xbf16, #tpu.memory_space<vmem>>, %arg5: memref<1x128xf32, #tpu.memory_space<vmem>>, %arg6: memref<1x128xf32, #tpu.memory_space<vmem>>, %arg7: memref<16x128xbf16, #tpu.memory_space<vmem>>) attributes {dimension_semantics = [#tpu.dimension_semantics<parallel>], iteration_bounds = array<i64: 1>, scalar_prefetch = 0 : i64, scratch_operands = 0 : i64, tpu.core_type = #tpu.core_type<tc>, window_params = [{transform_indices = @transform_0, window_bounds = array<i64: 16, 1664>}, {pipeline_mode = #tpu.pipeline_mode<synchronous>, transform_indices = @transform_1, window_bounds = array<i64: 1, 1664>}, {pipeline_mode = #tpu.pipeline_mode<synchronous>, transform_indices = @transform_2, window_bounds = array<i64: 1, 1664>}, {pipeline_mode = #tpu.pipeline_mode<synchronous>, transform_indices = @transform_3, window_bounds = array<i64: 1664, 128>}, {pipeline_mode = #tpu.pipeline_mode<synchronous>, transform_indices = @transform_4, window_bounds = array<i64: 1, 128>}, {pipeline_mode = #tpu.pipeline_mode<synchronous>, transform_indices = @transform_5, window_bounds = array<i64: 1, 128>}, {transform_indices = @transform_6, window_bounds = array<i64: 16, 128>}]} {
    %c0 = arith.constant 0 : index
    %c0_0 = arith.constant 0 : index
    %0 = vector.load %arg1[%c0, %c0_0] : memref<16x1664xbf16, #tpu.memory_space<vmem>>, vector<16x1664xbf16>
    %1 = arith.extf %0 : vector<16x1664xbf16> to vector<16x1664xf32>
    %c0_1 = arith.constant 0 : index
    %c0_2 = arith.constant 0 : index
    %2 = vector.load %arg2[%c0_1, %c0_2] : memref<1x1664xf32, #tpu.memory_space<vmem>>, vector<1x1664xf32>
    %3 = vector.broadcast %2 : vector<1x1664xf32> to vector<16x1664xf32>
    %4 = arith.mulf %1, %3 : vector<16x1664xf32>
    %c0_3 = arith.constant 0 : index
    %c0_4 = arith.constant 0 : index
    %5 = vector.load %arg3[%c0_3, %c0_4] : memref<1x1664xf32, #tpu.memory_space<vmem>>, vector<1x1664xf32>
    %6 = vector.broadcast %5 : vector<1x1664xf32> to vector<16x1664xf32>
    %7 = arith.addf %4, %6 : vector<16x1664xf32>
    %cst = arith.constant 0.000000e+00 : f32
    %8 = vector.broadcast %cst : f32 to vector<16x1664xf32>
    %9 = arith.maximumf %7, %8 : vector<16x1664xf32>
    %10 = arith.truncf %9 : vector<16x1664xf32> to vector<16x1664xbf16>
    %c0_5 = arith.constant 0 : index
    %c0_6 = arith.constant 0 : index
    %11 = vector.load %arg4[%c0_5, %c0_6] : memref<1664x128xbf16, #tpu.memory_space<vmem>>, vector<1664x128xbf16>
    %cst_7 = arith.constant dense<0.000000e+00> : vector<16x128xf32>
    %12 = tpu.matmul %10, %11, %cst_7 {dimension_numbers = #tpu.dot_dimension_numbers<[1], [0], [0], [1], [0, 0, 1, 1], [], []>} : vector<16x1664xbf16>, vector<1664x128xbf16>, vector<16x128xf32> -> vector<16x128xf32>
    %c0_8 = arith.constant 0 : index
    %c0_9 = arith.constant 0 : index
    %13 = vector.load %arg5[%c0_8, %c0_9] : memref<1x128xf32, #tpu.memory_space<vmem>>, vector<1x128xf32>
    %14 = vector.broadcast %13 : vector<1x128xf32> to vector<16x128xf32>
    %15 = arith.mulf %12, %14 : vector<16x128xf32>
    %c0_10 = arith.constant 0 : index
    %c0_11 = arith.constant 0 : index
    %16 = vector.load %arg6[%c0_10, %c0_11] : memref<1x128xf32, #tpu.memory_space<vmem>>, vector<1x128xf32>
    %17 = vector.broadcast %16 : vector<1x128xf32> to vector<16x128xf32>
    %18 = arith.addf %15, %17 : vector<16x128xf32>
    %cst_12 = arith.constant 0.000000e+00 : f32
    %19 = vector.broadcast %cst_12 : f32 to vector<16x128xf32>
    %20 = arith.maximumf %18, %19 : vector<16x128xf32>
    %21 = arith.truncf %20 : vector<16x128xf32> to vector<16x128xbf16>
    %c0_13 = arith.constant 0 : index
    %c0_14 = arith.constant 0 : index
    %22 = vector.load %arg7[%c0_13, %c0_14] : memref<16x128xbf16, #tpu.memory_space<vmem>>, vector<16x128xbf16>
    tpu.vector_store %arg7[%c0_13, %c0_14], %21 {strides = array<i32>} : memref<16x128xbf16, #tpu.memory_space<vmem>>, vector<16x128xbf16>,
    return
  }
  func.func @transform_0(%arg0: i32) -> (i32, i32) {
    %c0_i32 = arith.constant 0 : i32
    %c0_i32_0 = arith.constant 0 : i32
    return %arg0, %c0_i32 : i32, i32
  }
  func.func @transform_1(%arg0: i32) -> (i32, i32) {
    %c0_i32 = arith.constant 0 : i32
    %c0_i32_0 = arith.constant 0 : i32
    %c0_i32_1 = arith.constant 0 : i32
    return %c0_i32, %c0_i32_0 : i32, i32
  }
  func.func @transform_2(%arg0: i32) -> (i32, i32) {
    %c0_i32 = arith.constant 0 : i32
    %c0_i32_0 = arith.constant 0 : i32
    %c0_i32_1 = arith.constant 0 : i32
    return %c0_i32, %c0_i32_0 : i32, i32
  }
  func.func @transform_3(%arg0: i32) -> (i32, i32) {
    %c0_i32 = arith.constant 0 : i32
    %c0_i32_0 = arith.constant 0 : i32
    %c0_i32_1 = arith.constant 0 : i32
    return %c0_i32, %c0_i32_0 : i32, i32
  }
  func.func @transform_4(%arg0: i32) -> (i32, i32) {
    %c0_i32 = arith.constant 0 : i32
    %c0_i32_0 = arith.constant 0 : i32
    %c0_i32_1 = arith.constant 0 : i32
    return %c0_i32, %c0_i32_0 : i32, i32
  }
  func.func @transform_5(%arg0: i32) -> (i32, i32) {
    %c0_i32 = arith.constant 0 : i32
    %c0_i32_0 = arith.constant 0 : i32
    %c0_i32_1 = arith.constant 0 : i32
    return %c0_i32, %c0_i32_0 : i32, i32
  }
  func.func @transform_6(%arg0: i32) -> (i32, i32) {
    %c0_i32 = arith.constant 0 : i32
    %c0_i32_0 = arith.constant 0 : i32
    return %arg0, %c0_i32 : i32, i32
  }
}

module attributes {stable_mosaic.version = 11 : i64} {
  func.func @_mm_kernel(%arg0: i32, %arg1: memref<16x1152xbf16, #tpu.memory_space<vmem>>, %arg2: memref<1152x128xbf16, #tpu.memory_space<vmem>>, %arg3: memref<1x128xf32, #tpu.memory_space<vmem>>, %arg4: memref<1x128xf32, #tpu.memory_space<vmem>>, %arg5: memref<16x128xbf16, #tpu.memory_space<vmem>>) attributes {dimension_semantics = [#tpu.dimension_semantics<parallel>], iteration_bounds = array<i64: 1>, scalar_prefetch = 0 : i64, scratch_operands = 0 : i64, tpu.core_type = #tpu.core_type<tc>, window_params = [{transform_indices = @transform_0, window_bounds = array<i64: 16, 1152>}, {pipeline_mode = #tpu.pipeline_mode<synchronous>, transform_indices = @transform_1, window_bounds = array<i64: 1152, 128>}, {pipeline_mode = #tpu.pipeline_mode<synchronous>, transform_indices = @transform_2, window_bounds = array<i64: 1, 128>}, {pipeline_mode = #tpu.pipeline_mode<synchronous>, transform_indices = @transform_3, window_bounds = array<i64: 1, 128>}, {transform_indices = @transform_4, window_bounds = array<i64: 16, 128>}]} {
    %c0 = arith.constant 0 : index
    %c0_0 = arith.constant 0 : index
    %0 = vector.load %arg1[%c0, %c0_0] : memref<16x1152xbf16, #tpu.memory_space<vmem>>, vector<16x1152xbf16>
    %c0_1 = arith.constant 0 : index
    %c0_2 = arith.constant 0 : index
    %1 = vector.load %arg2[%c0_1, %c0_2] : memref<1152x128xbf16, #tpu.memory_space<vmem>>, vector<1152x128xbf16>
    %cst = arith.constant dense<0.000000e+00> : vector<16x128xf32>
    %2 = tpu.matmul %0, %1, %cst {dimension_numbers = #tpu.dot_dimension_numbers<[1], [0], [0], [1], [0, 0, 1, 1], [], []>} : vector<16x1152xbf16>, vector<1152x128xbf16>, vector<16x128xf32> -> vector<16x128xf32>
    %c0_3 = arith.constant 0 : index
    %c0_4 = arith.constant 0 : index
    %3 = vector.load %arg3[%c0_3, %c0_4] : memref<1x128xf32, #tpu.memory_space<vmem>>, vector<1x128xf32>
    %4 = vector.broadcast %3 : vector<1x128xf32> to vector<16x128xf32>
    %5 = arith.mulf %2, %4 : vector<16x128xf32>
    %c0_5 = arith.constant 0 : index
    %c0_6 = arith.constant 0 : index
    %6 = vector.load %arg4[%c0_5, %c0_6] : memref<1x128xf32, #tpu.memory_space<vmem>>, vector<1x128xf32>
    %7 = vector.broadcast %6 : vector<1x128xf32> to vector<16x128xf32>
    %8 = arith.addf %5, %7 : vector<16x128xf32>
    %9 = arith.truncf %8 : vector<16x128xf32> to vector<16x128xbf16>
    %c0_7 = arith.constant 0 : index
    %c0_8 = arith.constant 0 : index
    %10 = vector.load %arg5[%c0_7, %c0_8] : memref<16x128xbf16, #tpu.memory_space<vmem>>, vector<16x128xbf16>
    tpu.vector_store %arg5[%c0_7, %c0_8], %9 {strides = array<i32>} : memref<16x128xbf16, #tpu.memory_space<vmem>>, vector<16x128xbf16>,
    return
  }
  func.func @transform_0(%arg0: i32) -> (i32, i32) {
    %c0_i32 = arith.constant 0 : i32
    %c0_i32_0 = arith.constant 0 : i32
    return %arg0, %c0_i32 : i32, i32
  }
  func.func @transform_1(%arg0: i32) -> (i32, i32) {
    %c0_i32 = arith.constant 0 : i32
    %c0_i32_0 = arith.constant 0 : i32
    %c0_i32_1 = arith.constant 0 : i32
    return %c0_i32, %c0_i32_0 : i32, i32
  }
  func.func @transform_2(%arg0: i32) -> (i32, i32) {
    %c0_i32 = arith.constant 0 : i32
    %c0_i32_0 = arith.constant 0 : i32
    %c0_i32_1 = arith.constant 0 : i32
    return %c0_i32, %c0_i32_0 : i32, i32
  }
  func.func @transform_3(%arg0: i32) -> (i32, i32) {
    %c0_i32 = arith.constant 0 : i32
    %c0_i32_0 = arith.constant 0 : i32
    %c0_i32_1 = arith.constant 0 : i32
    return %c0_i32, %c0_i32_0 : i32, i32
  }
  func.func @transform_4(%arg0: i32) -> (i32, i32) {
    %c0_i32 = arith.constant 0 : i32
    %c0_i32_0 = arith.constant 0 : i32
    return %arg0, %c0_i32 : i32, i32
  }
}

module attributes {stable_mosaic.version = 11 : i64} {
  func.func @_head_kernel(%arg0: memref<2x4x1664xbf16, #tpu.memory_space<vmem>>, %arg1: memref<1x1x1664xf32, #tpu.memory_space<vmem>>, %arg2: memref<1x1x1664xf32, #tpu.memory_space<vmem>>, %arg3: memref<1664x128xf32, #tpu.memory_space<vmem>>, %arg4: memref<1x128xf32, #tpu.memory_space<vmem>>, %arg5: memref<2x128xf32, #tpu.memory_space<vmem>>) attributes {dimension_semantics = [], scalar_prefetch = 0 : i64, scratch_operands = 0 : i64, tpu.core_type = #tpu.core_type<tc>} {
    %c0 = arith.constant 0 : index
    %c0_0 = arith.constant 0 : index
    %c0_1 = arith.constant 0 : index
    %0 = vector.load %arg0[%c0, %c0_0, %c0_1] : memref<2x4x1664xbf16, #tpu.memory_space<vmem>>, vector<2x4x1664xbf16>
    %1 = arith.extf %0 : vector<2x4x1664xbf16> to vector<2x4x1664xf32>
    %c0_2 = arith.constant 0 : index
    %c0_3 = arith.constant 0 : index
    %c0_4 = arith.constant 0 : index
    %2 = vector.load %arg1[%c0_2, %c0_3, %c0_4] : memref<1x1x1664xf32, #tpu.memory_space<vmem>>, vector<1x1x1664xf32>
    %3 = vector.broadcast %2 : vector<1x1x1664xf32> to vector<2x4x1664xf32>
    %4 = arith.mulf %1, %3 : vector<2x4x1664xf32>
    %c0_5 = arith.constant 0 : index
    %c0_6 = arith.constant 0 : index
    %c0_7 = arith.constant 0 : index
    %5 = vector.load %arg2[%c0_5, %c0_6, %c0_7] : memref<1x1x1664xf32, #tpu.memory_space<vmem>>, vector<1x1x1664xf32>
    %6 = vector.broadcast %5 : vector<1x1x1664xf32> to vector<2x4x1664xf32>
    %7 = arith.addf %4, %6 : vector<2x4x1664xf32>
    %cst = arith.constant 0.000000e+00 : f32
    %8 = vector.broadcast %cst : f32 to vector<2x4x1664xf32>
    %9 = arith.maximumf %7, %8 : vector<2x4x1664xf32>
    %cst_8 = arith.constant dense<0.000000e+00> : vector<2x1664xf32>
    %10 = vector.multi_reduction <add>, %9, %cst_8 [1] : vector<2x4x1664xf32> to vector<2x1664xf32>
    %cst_9 = arith.constant 4.000000e+00 : f32
    %11 = vector.broadcast %cst_9 : f32 to vector<2x1664xf32>
    %12 = arith.divf %10, %11 : vector<2x1664xf32>
    %c0_10 = arith.constant 0 : index
    %c0_11 = arith.constant 0 : index
    %13 = vector.load %arg3[%c0_10, %c0_11] : memref<1664x128xf32, #tpu.memory_space<vmem>>, vector<1664x128xf32>
    %cst_12 = arith.constant dense<0.000000e+00> : vector<2x128xf32>
    %14 = tpu.matmul %12, %13, %cst_12 {dimension_numbers = #tpu.dot_dimension_numbers<[1], [0], [0], [1], [0, 0, 1, 1], [], []>} : vector<2x1664xf32>, vector<1664x128xf32>, vector<2x128xf32> -> vector<2x128xf32>
    %c0_13 = arith.constant 0 : index
    %c0_14 = arith.constant 0 : index
    %15 = vector.load %arg4[%c0_13, %c0_14] : memref<1x128xf32, #tpu.memory_space<vmem>>, vector<1x128xf32>
    %16 = vector.broadcast %15 : vector<1x128xf32> to vector<2x128xf32>
    %17 = arith.addf %14, %16 : vector<2x128xf32>
    %18 = arith.negf %17 : vector<2x128xf32>
    %19 = math.exp %18 : vector<2x128xf32>
    %cst_15 = arith.constant 1.000000e+00 : f32
    %20 = vector.broadcast %cst_15 : f32 to vector<2x128xf32>
    %21 = arith.addf %20, %19 : vector<2x128xf32>
    %22 = arith.divf %20, %21 : vector<2x128xf32>
    %c0_16 = arith.constant 0 : index
    %c0_17 = arith.constant 0 : index
    %23 = vector.load %arg5[%c0_16, %c0_17] : memref<2x128xf32, #tpu.memory_space<vmem>>, vector<2x128xf32>
    tpu.vector_store %arg5[%c0_16, %c0_17], %22 {strides = array<i32>} : memref<2x128xf32, #tpu.memory_space<vmem>>, vector<2x128xf32>,
    return
  }
}

</mosaic_0001>

<bundles_post_ra>
// kernel: model_forward.6
= control target key start
LH: loop header
LB: loop body
LE: loop exit
PB: predicated region body
PF: predicated region fallthrough
CT: control target
= control target key end

     0   :  { %s1198_s15 = smov 0   ;;  %s1356_s0 = inlined_call_operand.vmem [shape: bf16[7936,128], index: 0, kind: input, shape index: {}]   ;;  %s1357_s1 = inlined_call_operand.vmem [shape: bf16[128,128], index: 1, kind: input, shape index: {}]   ;;  %s1358_s2 = inlined_call_operand.vmem [shape: f32[1,128], index: 2, kind: input, shape index: {}]   ;;  %s1359_s3 = inlined_call_operand.vmem [shape: f32[1,128], index: 3, kind: input, shape index: {}]   ;;  %s1360_s4 = inlined_call_operand.vmem [shape: bf16[7936,128], index: 4, kind: output, shape index: {}]  }
   0x1 LB: > { %s849_s16 = sadd.s32 4294967295, %s1171_s15   ;;  %p853_p0 = scmp.ge.s32.totalorder %s1171_s15, 1  ;;  %s1171_s15 = sphi %s1198_s15, %s14_s15  }
   0x2   : > { %p163_p1 = scmp.lt.s32.totalorder %s1171_s15, 32 }
   0x4   : > { %p164_p2 = pnand %p853_p0, %p163_p1 }
   0x5   : > { %s854_s19 = sshll.u32 (!%p164_p2), %s849_s16, 5 }
   0x6   : > { %167 = sbr.rel (%p164_p2) target bundleno = 274 (0x112), region = 36  ;;  %p190_p3 = scmp.lt.s32.totalorder (!%p164_p2), %s854_s19, 991 }
   0xb   : > { %v1141_v0 = vld [vmem:[%s1357_s1 + $0x38] sm:$0xff]   ;;  %v1142_v1 = vld [vmem:[%s1357_s1 + $0x30] sm:$0xff]   ;;  %s1362_s19 = smov (!%p190_p3, %s854_s19), 991  ;;  %v1143_v2 = vld [vmem:[%s1357_s1 + $0x28] sm:$0xff]  }
   0xc   : > { %1069 = vmatprep.subr.bf16.mxu0 %v1141_v0  ;;  %1117 = vmatprep.subr.bf16.mxu1 %v1141_v0  ;;  %s855_s24 = sshll.u32 %s1362_s19, 2  ;;  %v1144_v3 = vld [vmem:[%s1357_s1 + $0x20] sm:$0xff]   ;;  %v1145_v6 = vld [vmem:[%s1357_s1 + $0x18] sm:$0xff]   ;;  %v1146_v7 = vld [vmem:[%s1357_s1 + $0x10] sm:$0xff]  }
   0xd   : > { %1070 = vmatpush3.bf16.msra.mxu0 %v1141_v0  ;;  %1125 = vmatpush3.bf16.msra.mxu1 %v1141_v0  ;;  %s1223_s27 = scalar_lea.vmem %s1356_s0, %s855_s24  ;;  %v1147_v8 = vld [vmem:[%s1357_s1 + $0x8] sm:$0xff]   ;;  %v1148_v9 = vld [vmem:[%s1357_s1] sm:$0xff]   ;;  %s1285_s20 = scalar_lea.vmem %s1360_s4, %s855_s24 }
   0xe   : > { %1071 = vmatprep.subr.bf16.mxu0 %v1142_v1  ;;  %1118 = vmatprep.subr.bf16.mxu1 %v1142_v1  ;;  %v1149_v4 = vld [vmem:[%s1223_s27] sm:$0xff]   ;;  %v1151_v10 = vld [vmem:[%s1223_s27 + $0x8] sm:$0xff]   ;;  %v1153_v12 = vld [vmem:[%s1223_s27 + $0x10] sm:$0xff]  }
   0xf   : > { %v1150_v5 = vld [vmem:[%s1223_s27 + $0x40] sm:$0xff]   ;;  %1085 = vmatprep.mubr.bf16.mxu0 %v1149_v4  ;;  %v1152_v11 = vld [vmem:[%s1223_s27 + $0x48] sm:$0xff]   ;;  %v1154_v13 = vld [vmem:[%s1223_s27 + $0x50] sm:$0xff]  }
  0x10   : > { %1101 = vmatprep.mubr.bf16.mxu1 %v1150_v5  ;;  %v1155_v14 = vld [vmem:[%s1223_s27 + $0x18] sm:$0xff]   ;;  %v1157_v16 = vld [vmem:[%s1223_s27 + $0x20] sm:$0xff]   ;;  %v1159_v18 = vld [vmem:[%s1223_s27 + $0x28] sm:$0xff]  }
  0x11   : > { %1072 = vmatpush3.bf16.msra.mxu0 %v1142_v1  ;;  %1126 = vmatpush3.bf16.msra.mxu1 %v1142_v1  ;;  %v1156_v15 = vld [vmem:[%s1223_s27 + $0x58] sm:$0xff]   ;;  %v1158_v17 = vld [vmem:[%s1223_s27 + $0x60] sm:$0xff]   ;;  %v1160_v19 = vld [vmem:[%s1223_s27 + $0x68] sm:$0xff]  }
  0x12   : > { %1073 = vmatprep.subr.bf16.mxu0 %v1143_v2  ;;  %1119 = vmatprep.subr.bf16.mxu1 %v1143_v2  ;;  %v1161_v20 = vld [vmem:[%s1223_s27 + $0x30] sm:$0xff]   ;;  %v1163_v22 = vld [vmem:[%s1223_s27 + $0x38] sm:$0xff]   ;;  %v1259_v24 = vld [vmem:[%s1358_s2] ss:$0 sm:$0xff] }
  0x13   : > { %v1162_v21 = vld [vmem:[%s1223_s27 + $0x70] sm:$0xff]   ;;  %v1164_v23 = vld [vmem:[%s1223_s27 + $0x78] sm:$0xff]   ;;  %v1266_v31 = vld [vmem:[%s1359_s3] ss:$0 sm:$0xff] }
  0x15   : > { %1074 = vmatpush3.bf16.msra.mxu0 %v1143_v2  ;;  %1127 = vmatpush3.bf16.msra.mxu1 %v1143_v2 }
  0x16   : > { %1075 = vmatprep.subr.bf16.mxu0 %v1144_v3  ;;  %1120 = vmatprep.subr.bf16.mxu1 %v1144_v3 }
  0x19   : > { %1076 = vmatpush3.bf16.msra.mxu0 %v1144_v3  ;;  %1128 = vmatpush3.bf16.msra.mxu1 %v1144_v3 }
  0x1a   : > { %1077 = vmatprep.subr.bf16.mxu0 %v1145_v6  ;;  %1121 = vmatprep.subr.bf16.mxu1 %v1145_v6 }
  0x1d   : > { %1078 = vmatpush3.bf16.msra.mxu0 %v1145_v6  ;;  %1129 = vmatpush3.bf16.msra.mxu1 %v1145_v6 }
  0x1e   : > { %1079 = vmatprep.subr.bf16.mxu0 %v1146_v7  ;;  %1122 = vmatprep.subr.bf16.mxu1 %v1146_v7 }
  0x21   : > { %1080 = vmatpush3.bf16.msra.mxu0 %v1146_v7  ;;  %1130 = vmatpush3.bf16.msra.mxu1 %v1146_v7 }
  0x22   : > { %1081 = vmatprep.subr.bf16.mxu0 %v1147_v8  ;;  %1123 = vmatprep.subr.bf16.mxu1 %v1147_v8 }
  0x25   : > { %1082 = vmatpush3.bf16.msra.mxu0 %v1147_v8  ;;  %1131 = vmatpush3.bf16.msra.mxu1 %v1147_v8 }
  0x26   : > { %1083 = vmatprep.subr.bf16.mxu0 %v1148_v9  ;;  %1124 = vmatprep.subr.bf16.mxu1 %v1148_v9 }
  0x29   : > { %1084 = vmatpush3.bf16.msra.mxu0 %v1148_v9  ;;  %1132 = vmatpush3.bf16.msra.mxu1 %v1148_v9 }
  0x2c   : > { %1086 = vmatmul.mubr.bf16.vlgmr.msra.gmra.mxu0 %v1151_v10  ;;  %1102 = vmatmul.mubr.bf16.vlgmr.msra.gmra.mxu1 %v1152_v11 }
  0x2d   : > { %1089 = vmatprep.mubr.bf16.mxu0 %v1153_v12  ;;  %1105 = vmatprep.mubr.bf16.mxu1 %v1154_v13 }
  0x34   : > { %1090 = vmatmul.mubr.bf16.gmra.mxu0 %v1155_v14  ;;  %1106 = vmatmul.mubr.bf16.gmra.mxu1 %v1156_v15 }
  0x35   : > { %1093 = vmatprep.mubr.bf16.mxu0 %v1157_v16  ;;  %1109 = vmatprep.mubr.bf16.mxu1 %v1158_v17 }
  0x3c   : > { %1094 = vmatmul.mubr.bf16.gmra.mxu0 %v1159_v18  ;;  %1110 = vmatmul.mubr.bf16.gmra.mxu1 %v1160_v19 }
  0x3d   : > { %1097 = vmatprep.mubr.bf16.mxu0 %v1161_v20  ;;  %1113 = vmatprep.mubr.bf16.mxu1 %v1162_v21 }
  0x44   : > { %1098 = vmatmul.mubr.bf16.gmra.mxu0 %v1163_v22  ;;  %1114 = vmatmul.mubr.bf16.gmra.mxu1 %v1164_v23 }
  0xec   : > { %v1087_v25 = vpop.f32.mrf.mxu0  ;;  %v1103_v26 = vpop.f32.mrf.mxu1 }
  0xed   : > { %v564_v27 = vmul.f32 %v1087_v25, %v1259_v24  ;;  %v580_v28 = vmul.f32 %v1103_v26, %v1259_v24 }
  0xee   : > { %v428_v29 = vpop.f32.mrf.mxu0  ;;  %v492_v30 = vpop.f32.mrf.mxu1 }
  0xef   : > { %v562_v32 = vmul.f32 %v1259_v24, %v428_v29  ;;  %v578_v33 = vmul.f32 %v1259_v24, %v492_v30  ;;  %v603_v38 = vadd.f32 %v1266_v31, %v564_v27  ;;  %v619_v39 = vadd.f32 %v1266_v31, %v580_v28 }
  0xf0   : > { %v1088_v34 = vpop.f32.mrf.mxu0  ;;  %v1104_v35 = vpop.f32.mrf.mxu1 }
  0xf1   : > { %v565_v36 = vmul.f32 %v1088_v34, %v1259_v24  ;;  %v581_v37 = vmul.f32 %v1104_v35, %v1259_v24  ;;  %v601_v46 = vadd.f32 %v1266_v31, %v562_v32  ;;  %v617_v47 = vadd.f32 %v1266_v31, %v578_v33 }
  0xf2   : > { %v431_v40 = vpop.f32.mrf.mxu0  ;;  %v495_v41 = vpop.f32.mrf.mxu1 }
  0xf3   : > { %v604_v42 = vadd.f32 %v1266_v31, %v565_v36  ;;  %v620_v43 = vadd.f32 %v1266_v31, %v581_v37  ;;  %v563_v44 = vmul.f32 %v1259_v24, %v431_v40  ;;  %v579_v45 = vmul.f32 %v1259_v24, %v495_v41 }
  0xf4   : > { %v1091_v48 = vpop.f32.mrf.mxu0  ;;  %v1107_v49 = vpop.f32.mrf.mxu1 }
  0xf5   : > { %v958_v50 = vpack.c.bf16 %v604_v42, %v603_v38  ;;  %v998_v51 = vpack.c.bf16 %v620_v43, %v619_v39  ;;  %v602_v52 = vadd.f32 %v1266_v31, %v563_v44  ;;  %v618_v53 = vadd.f32 %v1266_v31, %v579_v45 }
  0xf6   : > { %v568_v54 = vmul.f32 %v1091_v48, %v1259_v24  ;;  %v584_v55 = vmul.f32 %v1107_v49, %v1259_v24  ;;  %v444_v56 = vpop.f32.mrf.mxu0  ;;  %v508_v57 = vpop.f32.mrf.mxu1 }
  0xf7   : > { %1030 = vst [vmem:[%s1285_s20 + $0x8] sm:$0xff] %v958_v50   ;;  %1038 = vst [vmem:[%s1285_s20 + $0x48] sm:$0xff] %v998_v51   ;;  %v953_v58 = vpack.c.bf16 %v602_v52, %v601_v46  ;;  %v993_v59 = vpack.c.bf16 %v618_v53, %v617_v47  ;;  %v566_v60 = vmul.f32 %v1259_v24, %v444_v56 }
  0xf8   : > { %v582_v61 = vmul.f32 %v1259_v24, %v508_v57  ;;  %v1092_v62 = vpop.f32.mrf.mxu0  ;;  %v1108_v63 = vpop.f32.mrf.mxu1  ;;  %v607_v2 = vadd.f32 %v1266_v31, %v568_v54  ;;  %v623_v3 = vadd.f32 %v1266_v31, %v584_v55 }
  0xf9   : > { %954 = vst [vmem:[%s1285_s20] sm:$0xff] %v953_v58   ;;  %1037 = vst [vmem:[%s1285_s20 + $0x40] sm:$0xff] %v993_v59   ;;  %v569_v0 = vmul.f32 %v1092_v62, %v1259_v24  ;;  %v585_v1 = vmul.f32 %v1108_v63, %v1259_v24  ;;  %v605_v10 = vadd.f32 %v1266_v31, %v566_v60 }
  0xfa   : > { %v447_v4 = vpop.f32.mrf.mxu0  ;;  %v511_v5 = vpop.f32.mrf.mxu1  ;;  %v621_v11 = vadd.f32 %v1266_v31, %v582_v61 }
  0xfb   : > { %v608_v6 = vadd.f32 %v1266_v31, %v569_v0  ;;  %v624_v7 = vadd.f32 %v1266_v31, %v585_v1  ;;  %v567_v8 = vmul.f32 %v1259_v24, %v447_v4  ;;  %v583_v9 = vmul.f32 %v1259_v24, %v511_v5 }
  0xfc   : > { %v1095_v12 = vpop.f32.mrf.mxu0  ;;  %v1111_v13 = vpop.f32.mrf.mxu1 }
  0xfd   : > { %v968_v14 = vpack.c.bf16 %v608_v6, %v607_v2  ;;  %v1008_v15 = vpack.c.bf16 %v624_v7, %v623_v3  ;;  %v606_v16 = vadd.f32 %v1266_v31, %v567_v8  ;;  %v622_v17 = vadd.f32 %v1266_v31, %v583_v9 }
  0xfe   : > { %v572_v18 = vmul.f32 %v1095_v12, %v1259_v24  ;;  %v588_v19 = vmul.f32 %v1111_v13, %v1259_v24  ;;  %v460_v20 = vpop.f32.mrf.mxu0  ;;  %v524_v21 = vpop.f32.mrf.mxu1 }
  0xff   : > { %1032 = vst [vmem:[%s1285_s20 + $0x18] sm:$0xff] %v968_v14   ;;  %1040 = vst [vmem:[%s1285_s20 + $0x58] sm:$0xff] %v1008_v15   ;;  %v963_v22 = vpack.c.bf16 %v606_v16, %v605_v10  ;;  %v1003_v23 = vpack.c.bf16 %v622_v17, %v621_v11  ;;  %v570_v25 = vmul.f32 %v1259_v24, %v460_v20 }
 0x100   : > { %v586_v26 = vmul.f32 %v1259_v24, %v524_v21  ;;  %v1096_v27 = vpop.f32.mrf.mxu0  ;;  %v1112_v28 = vpop.f32.mrf.mxu1  ;;  %v611_v32 = vadd.f32 %v1266_v31, %v572_v18  ;;  %v627_v33 = vadd.f32 %v1266_v31, %v588_v19 }
 0x101   : > { %1031 = vst [vmem:[%s1285_s20 + $0x10] sm:$0xff] %v963_v22   ;;  %1039 = vst [vmem:[%s1285_s20 + $0x50] sm:$0xff] %v1003_v23   ;;  %v573_v29 = vmul.f32 %v1096_v27, %v1259_v24  ;;  %v589_v30 = vmul.f32 %v1112_v28, %v1259_v24  ;;  %v609_v40 = vadd.f32 %v1266_v31, %v570_v25 }
 0x102   : > { %v463_v34 = vpop.f32.mrf.mxu0  ;;  %v527_v35 = vpop.f32.mrf.mxu1  ;;  %v625_v41 = vadd.f32 %v1266_v31, %v586_v26 }
 0x103   : > { %v612_v36 = vadd.f32 %v1266_v31, %v573_v29  ;;  %v628_v37 = vadd.f32 %v1266_v31, %v589_v30  ;;  %v571_v38 = vmul.f32 %v1259_v24, %v463_v34  ;;  %v587_v39 = vmul.f32 %v1259_v24, %v527_v35 }
 0x104   : > { %v1099_v42 = vpop.f32.mrf.mxu0  ;;  %v1115_v43 = vpop.f32.mrf.mxu1 }
 0x105   : > { %v978_v44 = vpack.c.bf16 %v612_v36, %v611_v32  ;;  %v1018_v45 = vpack.c.bf16 %v628_v37, %v627_v33  ;;  %v610_v46 = vadd.f32 %v1266_v31, %v571_v38  ;;  %v626_v47 = vadd.f32 %v1266_v31, %v587_v39 }
 0x106   : > { %v576_v48 = vmul.f32 %v1099_v42, %v1259_v24  ;;  %v592_v49 = vmul.f32 %v1115_v43, %v1259_v24  ;;  %v476_v50 = vpop.f32.mrf.mxu0  ;;  %v540_v51 = vpop.f32.mrf.mxu1 }
 0x107   : > { %1034 = vst [vmem:[%s1285_s20 + $0x28] sm:$0xff] %v978_v44   ;;  %1042 = vst [vmem:[%s1285_s20 + $0x68] sm:$0xff] %v1018_v45   ;;  %v973_v52 = vpack.c.bf16 %v610_v46, %v609_v40  ;;  %v1013_v53 = vpack.c.bf16 %v626_v47, %v625_v41  ;;  %v574_v54 = vmul.f32 %v1259_v24, %v476_v50 }
 0x108   : > { %v590_v55 = vmul.f32 %v1259_v24, %v540_v51  ;;  %v1100_v56 = vpop.f32.mrf.mxu0  ;;  %v1116_v57 = vpop.f32.mrf.mxu1  ;;  %v615_v60 = vadd.f32 %v1266_v31, %v576_v48  ;;  %v631_v61 = vadd.f32 %v1266_v31, %v592_v49 }
 0x109   : > { %1033 = vst [vmem:[%s1285_s20 + $0x20] sm:$0xff] %v973_v52   ;;  %1041 = vst [vmem:[%s1285_s20 + $0x60] sm:$0xff] %v1013_v53   ;;  %v577_v58 = vmul.f32 %v1100_v56, %v1259_v24  ;;  %v593_v59 = vmul.f32 %v1116_v57, %v1259_v24  ;;  %v613_v4 = vadd.f32 %v1266_v31, %v574_v54 }
 0x10a   : > { %v479_v62 = vpop.f32.mrf.mxu0  ;;  %v543_v63 = vpop.f32.mrf.mxu1  ;;  %v629_v5 = vadd.f32 %v1266_v31, %v590_v55 }
 0x10b   : > { %v616_v0 = vadd.f32 %v1266_v31, %v577_v58  ;;  %v632_v1 = vadd.f32 %v1266_v31, %v593_v59  ;;  %v575_v2 = vmul.f32 %v1259_v24, %v479_v62  ;;  %v591_v3 = vmul.f32 %v1259_v24, %v543_v63 }
 0x10d   : > { %v988_v6 = vpack.c.bf16 %v616_v0, %v615_v60  ;;  %v1028_v7 = vpack.c.bf16 %v632_v1, %v631_v61  ;;  %v614_v8 = vadd.f32 %v1266_v31, %v575_v2  ;;  %v630_v9 = vadd.f32 %v1266_v31, %v591_v3 }
 0x10f   : > { %1036 = vst [vmem:[%s1285_s20 + $0x38] sm:$0xff] %v988_v6   ;;  %1044 = vst [vmem:[%s1285_s20 + $0x78] sm:$0xff] %v1028_v7   ;;  %v983_v10 = vpack.c.bf16 %v614_v8, %v613_v4  ;;  %v1023_v11 = vpack.c.bf16 %v630_v9, %v629_v5 }
 0x111   : > { %1035 = vst [vmem:[%s1285_s20 + $0x30] sm:$0xff] %v983_v10   ;;  %1043 = vst [vmem:[%s1285_s20 + $0x70] sm:$0xff] %v1023_v11  }
 0x112 PF: > { %s14_s15 = sadd.s32 1, %s1171_s15  }
 0x113   : > { %p11_p4 = scmp.ge.s32.totalorder %s14_s15, 33  }
 0x115   :  { %13 = sbr.rel (!%p11_p4) target bundleno = 1 (0x1), region = 66 }

// kernel: model_forward.7
= control target key start
LH: loop header
LB: loop body
LE: loop exit
PB: predicated region body
PF: predicated region fallthrough
CT: control target
= control target key end

     0   :  { %s1467_s15 = smov 0   ;;  %s1662_s0 = inlined_call_operand.vmem [shape: bf16[2048,256], index: 0, kind: input, shape index: {}]   ;;  %s1663_s1 = inlined_call_operand.vmem [shape: bf16[256,128], index: 1, kind: input, shape index: {}]   ;;  %s1664_s2 = inlined_call_operand.vmem [shape: f32[1,128], index: 2, kind: input, shape index: {}]   ;;  %s1665_s3 = inlined_call_operand.vmem [shape: f32[1,128], index: 3, kind: input, shape index: {}]   ;;  %s1666_s4 = inlined_call_operand.vmem [shape: bf16[2048,128], index: 4, kind: output, shape index: {}]  }
   0x1 LB: > { %s1012_s16 = sadd.s32 4294967295, %s1440_s15   ;;  %p1016_p0 = scmp.ge.s32.totalorder %s1440_s15, 1  ;;  %s1440_s15 = sphi %s1467_s15, %s14_s15  }
   0x2   : > { %p164_p1 = scmp.lt.s32.totalorder %s1440_s15, 9 }
   0x4   : > { %p165_p2 = pnand %p1016_p0, %p164_p1 }
   0x5   : > { %s1017_s19 = sshll.u32 (!%p165_p2), %s1012_s16, 5 }
   0x6   : > { %168 = sbr.rel (%p165_p2) target bundleno = 310 (0x136), region = 36  ;;  %p192_p3 = scmp.lt.s32.totalorder (!%p165_p2), %s1017_s19, 255 }
   0xb   : > { %v1370_v0 = vld [vmem:[%s1663_s1 + $0x78] sm:$0xff]   ;;  %v1372_v2 = vld [vmem:[%s1663_s1 + $0x70] sm:$0xff]   ;;  %v1374_v4 = vld [vmem:[%s1663_s1 + $0x68] sm:$0xff]   ;;  %s1668_s19 = smov (!%p192_p3, %s1017_s19), 255 }
   0xc   : > { %v1371_v1 = vld [vmem:[%s1663_s1 + $0x38] sm:$0xff]   ;;  %1234 = vmatprep.subr.bf16.mxu0 %v1370_v0  ;;  %1346 = vmatprep.subr.bf16.mxu1 %v1370_v0  ;;  %v1373_v3 = vld [vmem:[%s1663_s1 + $0x30] sm:$0xff]   ;;  %v1375_v5 = vld [vmem:[%s1663_s1 + $0x28] sm:$0xff]   ;;  %s1106_s8 = sshll.u32 %s1668_s19, 3 }
   0xd   : > { %1235 = vmatpush3.bf16.msra.mxu0 %v1371_v1  ;;  %1354 = vmatpush3.bf16.msra.mxu1 %v1371_v1  ;;  %v1376_v6 = vld [vmem:[%s1663_s1 + $0x60] sm:$0xff]   ;;  %v1378_v8 = vld [vmem:[%s1663_s1 + $0x58] sm:$0xff]   ;;  %s1508_s13 = scalar_lea.vmem %s1662_s0, %s1106_s8  ;;  %v1380_v10 = vld [vmem:[%s1663_s1 + $0x50] sm:$0xff]   ;;  %s1021_s8 = sshll.u32 %s1668_s19, 2 }
   0xe   : > { %1236 = vmatprep.subr.bf16.mxu0 %v1372_v2  ;;  %1347 = vmatprep.subr.bf16.mxu1 %v1372_v2  ;;  %v1377_v7 = vld [vmem:[%s1663_s1 + $0x20] sm:$0xff]   ;;  %v1379_v9 = vld [vmem:[%s1663_s1 + $0x18] sm:$0xff]   ;;  %v1381_v13 = vld [vmem:[%s1663_s1 + $0x10] sm:$0xff]   ;;  %s1585_s11 = scalar_lea.vmem %s1666_s4, %s1021_s8 }
   0xf   : > { %v1388_v11 = vld [vmem:[%s1508_s13 + $0x4] ss:$8 sps:$4 sm:$0xff]   ;;  %v1386_v18 = vld [vmem:[%s1508_s13] ss:$8 sps:$4 sm:$0xff]   ;;  %v1392_v20 = vld [vmem:[%s1508_s13 + $0x14] ss:$8 sps:$4 sm:$0xff]  }
  0x10   : > { %v1391_v12 = vld [vmem:[%s1508_s13 + $0x84] ss:$8 sps:$4 sm:$0xff]   ;;  %557 = vmatprep.mubr.bf16.mxu0 %v1388_v11  ;;  %v1389_v19 = vld [vmem:[%s1508_s13 + $0x80] ss:$8 sps:$4 sm:$0xff]   ;;  %v1394_v21 = vld [vmem:[%s1508_s13 + $0x94] ss:$8 sps:$4 sm:$0xff]  }
  0x11   : > { %1237 = vmatpush3.bf16.msra.mxu0 %v1373_v3  ;;  %1355 = vmatpush3.bf16.msra.mxu1 %v1373_v3  ;;  %v1382_v14 = vld [vmem:[%s1663_s1 + $0x48] sm:$0xff]   ;;  %v1384_v16 = vld [vmem:[%s1663_s1 + $0x40] sm:$0xff]   ;;  %v1396_v22 = vld [vmem:[%s1508_s13 + $0x10] ss:$8 sps:$4 sm:$0xff]  }
  0x12   : > { %1238 = vmatprep.subr.bf16.mxu0 %v1374_v4  ;;  %1348 = vmatprep.subr.bf16.mxu1 %v1374_v4  ;;  %v1383_v15 = vld [vmem:[%s1663_s1 + $0x8] sm:$0xff]   ;;  %v1385_v17 = vld [vmem:[%s1663_s1] sm:$0xff]   ;;  %v1397_v23 = vld [vmem:[%s1508_s13 + $0x90] ss:$8 sps:$4 sm:$0xff]  }
  0x13   : > { %621 = vmatprep.mubr.bf16.mxu1 %v1391_v12  ;;  %v1398_v24 = vld [vmem:[%s1508_s13 + $0x24] ss:$8 sps:$4 sm:$0xff]   ;;  %v1402_v26 = vld [vmem:[%s1508_s13 + $0x20] ss:$8 sps:$4 sm:$0xff]   ;;  %v1404_v28 = vld [vmem:[%s1508_s13 + $0x34] ss:$8 sps:$4 sm:$0xff]  }
  0x14   : > { %v1400_v25 = vld [vmem:[%s1508_s13 + $0xa4] ss:$8 sps:$4 sm:$0xff]   ;;  %v1403_v27 = vld [vmem:[%s1508_s13 + $0xa0] ss:$8 sps:$4 sm:$0xff]   ;;  %v1406_v29 = vld [vmem:[%s1508_s13 + $0xb4] ss:$8 sps:$4 sm:$0xff]  }
  0x15   : > { %1239 = vmatpush3.bf16.msra.mxu0 %v1375_v5  ;;  %1356 = vmatpush3.bf16.msra.mxu1 %v1375_v5  ;;  %v1408_v30 = vld [vmem:[%s1508_s13 + $0x30] ss:$8 sps:$4 sm:$0xff]   ;;  %v1410_v32 = vld [vmem:[%s1508_s13 + $0x44] ss:$8 sps:$4 sm:$0xff]   ;;  %v1414_v34 = vld [vmem:[%s1508_s13 + $0x40] ss:$8 sps:$4 sm:$0xff]  }
  0x16   : > { %1240 = vmatprep.subr.bf16.mxu0 %v1376_v6  ;;  %1349 = vmatprep.subr.bf16.mxu1 %v1376_v6  ;;  %v1409_v31 = vld [vmem:[%s1508_s13 + $0xb0] ss:$8 sps:$4 sm:$0xff]   ;;  %v1412_v33 = vld [vmem:[%s1508_s13 + $0xc4] ss:$8 sps:$4 sm:$0xff]   ;;  %v1415_v35 = vld [vmem:[%s1508_s13 + $0xc0] ss:$8 sps:$4 sm:$0xff]  }
  0x17   : > { %v1416_v36 = vld [vmem:[%s1508_s13 + $0x54] ss:$8 sps:$4 sm:$0xff]   ;;  %v1420_v38 = vld [vmem:[%s1508_s13 + $0x50] ss:$8 sps:$4 sm:$0xff]   ;;  %v1422_v40 = vld [vmem:[%s1508_s13 + $0x64] ss:$8 sps:$4 sm:$0xff]  }
  0x18   : > { %v1418_v37 = vld [vmem:[%s1508_s13 + $0xd4] ss:$8 sps:$4 sm:$0xff]   ;;  %v1421_v39 = vld [vmem:[%s1508_s13 + $0xd0] ss:$8 sps:$4 sm:$0xff]   ;;  %v1424_v41 = vld [vmem:[%s1508_s13 + $0xe4] ss:$8 sps:$4 sm:$0xff]  }
  0x19   : > { %1241 = vmatpush3.bf16.msra.mxu0 %v1377_v7  ;;  %1357 = vmatpush3.bf16.msra.mxu1 %v1377_v7  ;;  %v1426_v42 = vld [vmem:[%s1508_s13 + $0x60] ss:$8 sps:$4 sm:$0xff]   ;;  %v1428_v44 = vld [vmem:[%s1508_s13 + $0x74] ss:$8 sps:$4 sm:$0xff]   ;;  %v1432_v46 = vld [vmem:[%s1508_s13 + $0x70] ss:$8 sps:$4 sm:$0xff]  }
  0x1a   : > { %1242 = vmatprep.subr.bf16.mxu0 %v1378_v8  ;;  %1350 = vmatprep.subr.bf16.mxu1 %v1378_v8  ;;  %v1427_v43 = vld [vmem:[%s1508_s13 + $0xe0] ss:$8 sps:$4 sm:$0xff]   ;;  %v1430_v45 = vld [vmem:[%s1508_s13 + $0xf4] ss:$8 sps:$4 sm:$0xff]   ;;  %v1433_v47 = vld [vmem:[%s1508_s13 + $0xf0] ss:$8 sps:$4 sm:$0xff]  }
  0x1b   : > { %v1566_v51 = vld [vmem:[%s1664_s2] ss:$0 sm:$0xff] }
  0x1c   : > { %v1573_v59 = vld [vmem:[%s1665_s3] ss:$0 sm:$0xff] }
  0x1d   : > { %1243 = vmatpush3.bf16.msra.mxu0 %v1379_v9  ;;  %1358 = vmatpush3.bf16.msra.mxu1 %v1379_v9 }
  0x1e   : > { %1244 = vmatprep.subr.bf16.mxu0 %v1380_v10  ;;  %1351 = vmatprep.subr.bf16.mxu1 %v1380_v10 }
  0x21   : > { %1245 = vmatpush3.bf16.msra.mxu0 %v1381_v13  ;;  %1359 = vmatpush3.bf16.msra.mxu1 %v1381_v13 }
  0x22   : > { %1246 = vmatprep.subr.bf16.mxu0 %v1382_v14  ;;  %1352 = vmatprep.subr.bf16.mxu1 %v1382_v14 }
  0x25   : > { %1247 = vmatpush3.bf16.msra.mxu0 %v1383_v15  ;;  %1360 = vmatpush3.bf16.msra.mxu1 %v1383_v15 }
  0x26   : > { %1248 = vmatprep.subr.bf16.mxu0 %v1384_v16  ;;  %1353 = vmatprep.subr.bf16.mxu1 %v1384_v16 }
  0x29   : > { %1249 = vmatpush3.bf16.msra.mxu0 %v1385_v17  ;;  %1361 = vmatpush3.bf16.msra.mxu1 %v1385_v17 }
  0x2c   : > { %558 = vmatmul.mubr.bf16.vlgmr.msra.gmra.mxu0 %v1386_v18  ;;  %622 = vmatmul.mubr.bf16.vlgmr.msra.gmra.mxu1 %v1389_v19 }
  0x2d   : > { %565 = vmatprep.mubr.bf16.mxu0 %v1392_v20  ;;  %629 = vmatprep.mubr.bf16.mxu1 %v1394_v21 }
  0x34   : > { %566 = vmatmul.mubr.bf16.gmra.mxu0 %v1396_v22  ;;  %630 = vmatmul.mubr.bf16.gmra.mxu1 %v1397_v23 }
  0x35   : > { %573 = vmatprep.mubr.bf16.mxu0 %v1398_v24  ;;  %637 = vmatprep.mubr.bf16.mxu1 %v1400_v25 }
  0x3c   : > { %574 = vmatmul.mubr.bf16.gmra.mxu0 %v1402_v26  ;;  %638 = vmatmul.mubr.bf16.gmra.mxu1 %v1403_v27 }
  0x3d   : > { %581 = vmatprep.mubr.bf16.mxu0 %v1404_v28  ;;  %645 = vmatprep.mubr.bf16.mxu1 %v1406_v29 }
  0x44   : > { %582 = vmatmul.mubr.bf16.gmra.mxu0 %v1408_v30  ;;  %646 = vmatmul.mubr.bf16.gmra.mxu1 %v1409_v31 }
  0x45   : > { %589 = vmatprep.mubr.bf16.mxu0 %v1410_v32  ;;  %653 = vmatprep.mubr.bf16.mxu1 %v1412_v33 }
  0x4c   : > { %590 = vmatmul.mubr.bf16.gmra.mxu0 %v1414_v34  ;;  %654 = vmatmul.mubr.bf16.gmra.mxu1 %v1415_v35 }
  0x4d   : > { %597 = vmatprep.mubr.bf16.mxu0 %v1416_v36  ;;  %661 = vmatprep.mubr.bf16.mxu1 %v1418_v37 }
  0x54   : > { %598 = vmatmul.mubr.bf16.gmra.mxu0 %v1420_v38  ;;  %662 = vmatmul.mubr.bf16.gmra.mxu1 %v1421_v39 }
  0x55   : > { %605 = vmatprep.mubr.bf16.mxu0 %v1422_v40  ;;  %669 = vmatprep.mubr.bf16.mxu1 %v1424_v41 }
  0x5c   : > { %606 = vmatmul.mubr.bf16.gmra.mxu0 %v1426_v42  ;;  %670 = vmatmul.mubr.bf16.gmra.mxu1 %v1427_v43 }
  0x5d   : > { %613 = vmatprep.mubr.bf16.mxu0 %v1428_v44  ;;  %677 = vmatprep.mubr.bf16.mxu1 %v1430_v45 }
  0x64   : > { %614 = vmatmul.mubr.bf16.gmra.mxu0 %v1432_v46  ;;  %678 = vmatmul.mubr.bf16.gmra.mxu1 %v1433_v47 }
  0xec   : > { %v1250_v48 = vpop.f32.mrf.mxu0  ;;  %v1298_v49 = vpop.f32.mrf.mxu1 }
  0xee   : > { %v1251_v50 = vpop.f32.mrf.mxu0  ;;  %v1299_v52 = vpop.f32.mrf.mxu1 }
  0xef   : > { %v1252_v53 = vadd.f32 %v1251_v50, %v1250_v48  ;;  %v1300_v54 = vadd.f32 %v1299_v52, %v1298_v49 }
  0xf0   : > { %v1253_v55 = vpop.f32.mrf.mxu0  ;;  %v1301_v56 = vpop.f32.mrf.mxu1 }
  0xf1   : > { %v693_v57 = vmul.f32 %v1252_v53, %v1566_v51  ;;  %v709_v58 = vmul.f32 %v1300_v54, %v1566_v51 }
  0xf2   : > { %v1254_v60 = vpop.f32.mrf.mxu0  ;;  %v1302_v61 = vpop.f32.mrf.mxu1 }
  0xf3   : > { %v1255_v62 = vadd.f32 %v1254_v60, %v1253_v55  ;;  %v1303_v63 = vadd.f32 %v1302_v61, %v1301_v56  ;;  %v732_v2 = vadd.f32 %v1573_v59, %v693_v57  ;;  %v748_v3 = vadd.f32 %v1573_v59, %v709_v58 }
  0xf4   : > { %v1256_v0 = vpop.f32.mrf.mxu0  ;;  %v1304_v1 = vpop.f32.mrf.mxu1 }
  0xf5   : > { %v694_v4 = vmul.f32 %v1255_v62, %v1566_v51  ;;  %v710_v5 = vmul.f32 %v1303_v63, %v1566_v51  ;;  %v764_v14 = vmax.f32 %v732_v2, 0.0  ;;  %v780_v15 = vmax.f32 %v748_v3, 0.0 }
  0xf6   : > { %v1257_v6 = vpop.f32.mrf.mxu0  ;;  %v1305_v7 = vpop.f32.mrf.mxu1 }
  0xf7   : > { %v733_v8 = vadd.f32 %v1573_v59, %v694_v4  ;;  %v749_v9 = vadd.f32 %v1573_v59, %v710_v5  ;;  %v1258_v10 = vadd.f32 %v1257_v6, %v1256_v0  ;;  %v1306_v11 = vadd.f32 %v1305_v7, %v1304_v1 }
  0xf8   : > { %v1259_v12 = vpop.f32.mrf.mxu0  ;;  %v1307_v13 = vpop.f32.mrf.mxu1 }
  0xf9   : > { %v765_v16 = vmax.f32 %v733_v8, 0.0  ;;  %v781_v17 = vmax.f32 %v749_v9, 0.0  ;;  %v695_v18 = vmul.f32 %v1258_v10, %v1566_v51  ;;  %v711_v19 = vmul.f32 %v1306_v11, %v1566_v51 }
  0xfa   : > { %v1260_v20 = vpop.f32.mrf.mxu0  ;;  %v1308_v21 = vpop.f32.mrf.mxu1 }
  0xfb   : > { %v1142_v22 = vpack.c.bf16 %v765_v16, %v764_v14  ;;  %v1182_v23 = vpack.c.bf16 %v781_v17, %v780_v15  ;;  %v1261_v24 = vadd.f32 %v1260_v20, %v1259_v12  ;;  %v1309_v25 = vadd.f32 %v1308_v21, %v1307_v13 }
  0xfc   : > { %v1262_v26 = vpop.f32.mrf.mxu0  ;;  %v1310_v27 = vpop.f32.mrf.mxu1  ;;  %v734_v28 = vadd.f32 %v1573_v59, %v695_v18  ;;  %v750_v29 = vadd.f32 %v1573_v59, %v711_v19 }
  0xfd   : > { %1143 = vst [vmem:[%s1585_s11] sm:$0xff] %v1142_v22   ;;  %1226 = vst [vmem:[%s1585_s11 + $0x40] sm:$0xff] %v1182_v23   ;;  %v696_v30 = vmul.f32 %v1261_v24, %v1566_v51  ;;  %v712_v31 = vmul.f32 %v1309_v25, %v1566_v51 }
  0xfe   : > { %v1263_v32 = vpop.f32.mrf.mxu0  ;;  %v1311_v33 = vpop.f32.mrf.mxu1  ;;  %v766_v42 = vmax.f32 %v734_v28, 0.0  ;;  %v782_v43 = vmax.f32 %v750_v29, 0.0 }
  0xff   : > { %v1264_v34 = vadd.f32 %v1263_v32, %v1262_v26  ;;  %v1312_v35 = vadd.f32 %v1311_v33, %v1310_v27  ;;  %v735_v36 = vadd.f32 %v1573_v59, %v696_v30  ;;  %v751_v37 = vadd.f32 %v1573_v59, %v712_v31 }
 0x100   : > { %v1265_v38 = vpop.f32.mrf.mxu0  ;;  %v1313_v39 = vpop.f32.mrf.mxu1 }
 0x101   : > { %v697_v40 = vmul.f32 %v1264_v34, %v1566_v51  ;;  %v713_v41 = vmul.f32 %v1312_v35, %v1566_v51  ;;  %v767_v44 = vmax.f32 %v735_v36, 0.0  ;;  %v783_v45 = vmax.f32 %v751_v37, 0.0 }
 0x102   : > { %v1266_v46 = vpop.f32.mrf.mxu0  ;;  %v1314_v47 = vpop.f32.mrf.mxu1 }
 0x103   : > { %v1267_v48 = vadd.f32 %v1266_v46, %v1265_v38  ;;  %v1315_v49 = vadd.f32 %v1314_v47, %v1313_v39  ;;  %v1147_v50 = vpack.c.bf16 %v767_v44, %v766_v42  ;;  %v1187_v52 = vpack.c.bf16 %v783_v45, %v782_v43 }
 0x104   : > { %v1268_v53 = vpop.f32.mrf.mxu0  ;;  %v1316_v54 = vpop.f32.mrf.mxu1  ;;  %v736_v55 = vadd.f32 %v1573_v59, %v697_v40  ;;  %v752_v56 = vadd.f32 %v1573_v59, %v713_v41 }
 0x105   : > { %v698_v57 = vmul.f32 %v1267_v48, %v1566_v51  ;;  %v714_v58 = vmul.f32 %v1315_v49, %v1566_v51  ;;  %1219 = vst [vmem:[%s1585_s11 + $0x8] sm:$0xff] %v1147_v50   ;;  %1227 = vst [vmem:[%s1585_s11 + $0x48] sm:$0xff] %v1187_v52  }
 0x106   : > { %v1269_v60 = vpop.f32.mrf.mxu0  ;;  %v1317_v61 = vpop.f32.mrf.mxu1  ;;  %v768_v4 = vmax.f32 %v736_v55, 0.0  ;;  %v784_v5 = vmax.f32 %v752_v56, 0.0 }
 0x107   : > { %v737_v62 = vadd.f32 %v1573_v59, %v698_v57  ;;  %v753_v63 = vadd.f32 %v1573_v59, %v714_v58  ;;  %v1270_v0 = vadd.f32 %v1269_v60, %v1268_v53  ;;  %v1318_v1 = vadd.f32 %v1317_v61, %v1316_v54 }
 0x108   : > { %v1271_v2 = vpop.f32.mrf.mxu0  ;;  %v1319_v3 = vpop.f32.mrf.mxu1 }
 0x109   : > { %v769_v6 = vmax.f32 %v737_v62, 0.0  ;;  %v785_v7 = vmax.f32 %v753_v63, 0.0  ;;  %v699_v8 = vmul.f32 %v1270_v0, %v1566_v51  ;;  %v715_v9 = vmul.f32 %v1318_v1, %v1566_v51 }
 0x10a   : > { %v1272_v10 = vpop.f32.mrf.mxu0  ;;  %v1320_v11 = vpop.f32.mrf.mxu1 }
 0x10b   : > { %v1152_v12 = vpack.c.bf16 %v769_v6, %v768_v4  ;;  %v1192_v13 = vpack.c.bf16 %v785_v7, %v784_v5  ;;  %v1273_v14 = vadd.f32 %v1272_v10, %v1271_v2  ;;  %v1321_v15 = vadd.f32 %v1320_v11, %v1319_v3 }
 0x10c   : > { %v1274_v16 = vpop.f32.mrf.mxu0  ;;  %v1322_v17 = vpop.f32.mrf.mxu1  ;;  %v738_v18 = vadd.f32 %v1573_v59, %v699_v8  ;;  %v754_v19 = vadd.f32 %v1573_v59, %v715_v9 }
 0x10d   : > { %1220 = vst [vmem:[%s1585_s11 + $0x10] sm:$0xff] %v1152_v12   ;;  %1228 = vst [vmem:[%s1585_s11 + $0x50] sm:$0xff] %v1192_v13   ;;  %v700_v20 = vmul.f32 %v1273_v14, %v1566_v51  ;;  %v716_v21 = vmul.f32 %v1321_v15, %v1566_v51 }
 0x10e   : > { %v1275_v22 = vpop.f32.mrf.mxu0  ;;  %v1323_v23 = vpop.f32.mrf.mxu1  ;;  %v770_v32 = vmax.f32 %v738_v18, 0.0  ;;  %v786_v33 = vmax.f32 %v754_v19, 0.0 }
 0x10f   : > { %v1276_v24 = vadd.f32 %v1275_v22, %v1274_v16  ;;  %v1324_v25 = vadd.f32 %v1323_v23, %v1322_v17  ;;  %v739_v26 = vadd.f32 %v1573_v59, %v700_v20  ;;  %v755_v27 = vadd.f32 %v1573_v59, %v716_v21 }
 0x110   : > { %v1277_v28 = vpop.f32.mrf.mxu0  ;;  %v1325_v29 = vpop.f32.mrf.mxu1 }
 0x111   : > { %v701_v30 = vmul.f32 %v1276_v24, %v1566_v51  ;;  %v717_v31 = vmul.f32 %v1324_v25, %v1566_v51  ;;  %v771_v34 = vmax.f32 %v739_v26, 0.0  ;;  %v787_v35 = vmax.f32 %v755_v27, 0.0 }
 0x112   : > { %v1278_v36 = vpop.f32.mrf.mxu0  ;;  %v1326_v37 = vpop.f32.mrf.mxu1 }
 0x113   : > { %v1279_v38 = vadd.f32 %v1278_v36, %v1277_v28  ;;  %v1327_v39 = vadd.f32 %v1326_v37, %v1325_v29  ;;  %v1157_v40 = vpack.c.bf16 %v771_v34, %v770_v32  ;;  %v1197_v41 = vpack.c.bf16 %v787_v35, %v786_v33 }
 0x114   : > { %v1280_v42 = vpop.f32.mrf.mxu0  ;;  %v1328_v43 = vpop.f32.mrf.mxu1  ;;  %v740_v44 = vadd.f32 %v1573_v59, %v701_v30  ;;  %v756_v45 = vadd.f32 %v1573_v59, %v717_v31 }
 0x115   : > { %v702_v46 = vmul.f32 %v1279_v38, %v1566_v51  ;;  %v718_v47 = vmul.f32 %v1327_v39, %v1566_v51  ;;  %1221 = vst [vmem:[%s1585_s11 + $0x18] sm:$0xff] %v1157_v40   ;;  %1229 = vst [vmem:[%s1585_s11 + $0x58] sm:$0xff] %v1197_v41  }
 0x116   : > { %v1281_v48 = vpop.f32.mrf.mxu0  ;;  %v1329_v49 = vpop.f32.mrf.mxu1  ;;  %v772_v57 = vmax.f32 %v740_v44, 0.0  ;;  %v788_v58 = vmax.f32 %v756_v45, 0.0 }
 0x117   : > { %v741_v50 = vadd.f32 %v1573_v59, %v702_v46  ;;  %v757_v52 = vadd.f32 %v1573_v59, %v718_v47  ;;  %v1282_v53 = vadd.f32 %v1281_v48, %v1280_v42  ;;  %v1330_v54 = vadd.f32 %v1329_v49, %v1328_v43 }
 0x118   : > { %v1283_v55 = vpop.f32.mrf.mxu0  ;;  %v1331_v56 = vpop.f32.mrf.mxu1 }
 0x119   : > { %v773_v60 = vmax.f32 %v741_v50, 0.0  ;;  %v789_v61 = vmax.f32 %v757_v52, 0.0  ;;  %v703_v62 = vmul.f32 %v1282_v53, %v1566_v51  ;;  %v719_v63 = vmul.f32 %v1330_v54, %v1566_v51 }
 0x11a   : > { %v1284_v0 = vpop.f32.mrf.mxu0  ;;  %v1332_v1 = vpop.f32.mrf.mxu1 }
 0x11b   : > { %v1162_v2 = vpack.c.bf16 %v773_v60, %v772_v57  ;;  %v1202_v3 = vpack.c.bf16 %v789_v61, %v788_v58  ;;  %v1285_v4 = vadd.f32 %v1284_v0, %v1283_v55  ;;  %v1333_v5 = vadd.f32 %v1332_v1, %v1331_v56 }
 0x11c   : > { %v1286_v6 = vpop.f32.mrf.mxu0  ;;  %v1334_v7 = vpop.f32.mrf.mxu1  ;;  %v742_v8 = vadd.f32 %v1573_v59, %v703_v62  ;;  %v758_v9 = vadd.f32 %v1573_v59, %v719_v63 }
 0x11d   : > { %1222 = vst [vmem:[%s1585_s11 + $0x20] sm:$0xff] %v1162_v2   ;;  %1230 = vst [vmem:[%s1585_s11 + $0x60] sm:$0xff] %v1202_v3   ;;  %v704_v10 = vmul.f32 %v1285_v4, %v1566_v51  ;;  %v720_v11 = vmul.f32 %v1333_v5, %v1566_v51 }
 0x11e   : > { %v1287_v12 = vpop.f32.mrf.mxu0  ;;  %v1335_v13 = vpop.f32.mrf.mxu1  ;;  %v774_v22 = vmax.f32 %v742_v8, 0.0  ;;  %v790_v23 = vmax.f32 %v758_v9, 0.0 }
 0x11f   : > { %v1288_v14 = vadd.f32 %v1287_v12, %v1286_v6  ;;  %v1336_v15 = vadd.f32 %v1335_v13, %v1334_v7  ;;  %v743_v16 = vadd.f32 %v1573_v59, %v704_v10  ;;  %v759_v17 = vadd.f32 %v1573_v59, %v720_v11 }
 0x120   : > { %v1289_v18 = vpop.f32.mrf.mxu0  ;;  %v1337_v19 = vpop.f32.mrf.mxu1 }
 0x121   : > { %v705_v20 = vmul.f32 %v1288_v14, %v1566_v51  ;;  %v721_v21 = vmul.f32 %v1336_v15, %v1566_v51  ;;  %v775_v24 = vmax.f32 %v743_v16, 0.0  ;;  %v791_v25 = vmax.f32 %v759_v17, 0.0 }
 0x122   : > { %v1290_v26 = vpop.f32.mrf.mxu0  ;;  %v1338_v27 = vpop.f32.mrf.mxu1 }
 0x123   : > { %v1291_v28 = vadd.f32 %v1290_v26, %v1289_v18  ;;  %v1339_v29 = vadd.f32 %v1338_v27, %v1337_v19  ;;  %v1167_v30 = vpack.c.bf16 %v775_v24, %v774_v22  ;;  %v1207_v31 = vpack.c.bf16 %v791_v25, %v790_v23 }
 0x124   : > { %v1292_v32 = vpop.f32.mrf.mxu0  ;;  %v1340_v33 = vpop.f32.mrf.mxu1  ;;  %v744_v34 = vadd.f32 %v1573_v59, %v705_v20  ;;  %v760_v35 = vadd.f32 %v1573_v59, %v721_v21 }
 0x125   : > { %v706_v36 = vmul.f32 %v1291_v28, %v1566_v51  ;;  %v722_v37 = vmul.f32 %v1339_v29, %v1566_v51  ;;  %1223 = vst [vmem:[%s1585_s11 + $0x28] sm:$0xff] %v1167_v30   ;;  %1231 = vst [vmem:[%s1585_s11 + $0x68] sm:$0xff] %v1207_v31  }
 0x126   : > { %v1293_v38 = vpop.f32.mrf.mxu0  ;;  %v1341_v39 = vpop.f32.mrf.mxu1  ;;  %v776_v46 = vmax.f32 %v744_v34, 0.0  ;;  %v792_v47 = vmax.f32 %v760_v35, 0.0 }
 0x127   : > { %v745_v40 = vadd.f32 %v1573_v59, %v706_v36  ;;  %v761_v41 = vadd.f32 %v1573_v59, %v722_v37  ;;  %v1294_v42 = vadd.f32 %v1293_v38, %v1292_v32  ;;  %v1342_v43 = vadd.f32 %v1341_v39, %v1340_v33 }
 0x128   : > { %v1295_v44 = vpop.f32.mrf.mxu0  ;;  %v1343_v45 = vpop.f32.mrf.mxu1 }
 0x129   : > { %v777_v48 = vmax.f32 %v745_v40, 0.0  ;;  %v793_v49 = vmax.f32 %v761_v41, 0.0  ;;  %v707_v50 = vmul.f32 %v1294_v42, %v1566_v51  ;;  %v723_v52 = vmul.f32 %v1342_v43, %v1566_v51 }
 0x12a   : > { %v1296_v53 = vpop.f32.mrf.mxu0  ;;  %v1344_v54 = vpop.f32.mrf.mxu1 }
 0x12b   : > { %v1172_v55 = vpack.c.bf16 %v777_v48, %v776_v46  ;;  %v1212_v56 = vpack.c.bf16 %v793_v49, %v792_v47  ;;  %v1297_v57 = vadd.f32 %v1296_v53, %v1295_v44  ;;  %v1345_v58 = vadd.f32 %v1344_v54, %v1343_v45 }
 0x12c   : > { %v746_v60 = vadd.f32 %v1573_v59, %v707_v50  ;;  %v762_v61 = vadd.f32 %v1573_v59, %v723_v52 }
 0x12d   : > { %1224 = vst [vmem:[%s1585_s11 + $0x30] sm:$0xff] %v1172_v55   ;;  %1232 = vst [vmem:[%s1585_s11 + $0x70] sm:$0xff] %v1212_v56   ;;  %v708_v62 = vmul.f32 %v1297_v57, %v1566_v51  ;;  %v724_v63 = vmul.f32 %v1345_v58, %v1566_v51 }
 0x12e   : > { %v778_v2 = vmax.f32 %v746_v60, 0.0  ;;  %v794_v3 = vmax.f32 %v762_v61, 0.0 }
 0x12f   : > { %v747_v0 = vadd.f32 %v1573_v59, %v708_v62  ;;  %v763_v1 = vadd.f32 %v1573_v59, %v724_v63 }
 0x131   : > { %v779_v4 = vmax.f32 %v747_v0, 0.0  ;;  %v795_v5 = vmax.f32 %v763_v1, 0.0 }
 0x133   : > { %v1177_v6 = vpack.c.bf16 %v779_v4, %v778_v2  ;;  %v1217_v7 = vpack.c.bf16 %v795_v5, %v794_v3 }
 0x135   : > { %1225 = vst [vmem:[%s1585_s11 + $0x38] sm:$0xff] %v1177_v6   ;;  %1233 = vst [vmem:[%s1585_s11 + $0x78] sm:$0xff] %v1217_v7  }
 0x136 PF: > { %s14_s15 = sadd.s32 1, %s1440_s15  }
 0x137   : > { %p11_p4 = scmp.ge.s32.totalorder %s14_s15, 10  }
 0x139   :  { %13 = sbr.rel (!%p11_p4) target bundleno = 1 (0x1), region = 66 }

// kernel: closed_call.52
= control target key start
LH: loop header
LB: loop body
LE: loop exit
PB: predicated region body
PF: predicated region fallthrough
CT: control target
= control target key end

     0   :  { %s1123_s21 = smov 0   ;;  %s1344_s0 = inlined_call_operand.vmem [shape: bf16[512,256], index: 0, kind: input, shape index: {}]   ;;  %s1345_s1 = inlined_call_operand.vmem [shape: f32[1,256], index: 1, kind: input, shape index: {}]   ;;  %s1346_s2 = inlined_call_operand.vmem [shape: f32[1,256], index: 2, kind: input, shape index: {}]   ;;  %s1347_s3 = inlined_call_operand.vmem [shape: bf16[256,128], index: 3, kind: input, shape index: {}]   ;;  %s1348_s4 = inlined_call_operand.vmem [shape: f32[1,128], index: 4, kind: input, shape index: {}]   ;;  %s1349_s5 = inlined_call_operand.vmem [shape: f32[1,128], index: 5, kind: input, shape index: {}]   ;;  %s1350_s6 = inlined_call_operand.vmem [shape: bf16[512,128], index: 6, kind: output, shape index: {}]  }
   0x1 LB: > { %s866_s22 = sadd.s32 4294967295, %s1086_s21   ;;  %p870_p0 = scmp.ge.s32.totalorder %s1086_s21, 1  ;;  %s1086_s21 = sphi %s1123_s21, %s16_s21  }
   0x2   : > { %p214_p1 = scmp.lt.s32.totalorder %s1086_s21, 5 }
   0x4   : > { %p215_p2 = pnand %p870_p0, %p214_p1 }
   0x5   : > { %s871_s25 = sshll.u32 (!%p215_p2), %s866_s22, 4 }
   0x6   : > { %218 = sbr.rel (%p215_p2) target bundleno = 278 (0x116), region = 44  ;;  %p246_p3 = scmp.lt.s32.totalorder (!%p215_p2), %s871_s25, 63 }
   0xb   : > { %v1064_v0 = vld [vmem:[%s1347_s3 + $0x78] sm:$0xff]   ;;  %v1066_v2 = vld [vmem:[%s1347_s3 + $0x70] sm:$0xff]   ;;  %v1068_v4 = vld [vmem:[%s1347_s3 + $0x68] sm:$0xff]   ;;  %v309_v5 = vlaneseq  ;;  %s1352_s25 = smov (!%p246_p3, %s871_s25), 63 }
   0xc   : > { %v1065_v1 = vld [vmem:[%s1347_s3 + $0x38] sm:$0xff]   ;;  %976 = vmatprep.subr.bf16.mxu0 %v1064_v0  ;;  %1040 = vmatprep.subr.bf16.mxu1 %v1064_v0  ;;  %v1067_v3 = vld [vmem:[%s1347_s3 + $0x30] sm:$0xff]   ;;  %v1069_v6 = vld [vmem:[%s1347_s3 + $0x28] sm:$0xff]   ;;  %s912_s14 = sshll.u32 %s1352_s25, 3  ;;  %s875_s23 = sshll.u32 %s1352_s25, 2 }
   0xd   : > { %977 = vmatpush3.bf16.msra.mxu0 %v1065_v1  ;;  %1048 = vmatpush3.bf16.msra.mxu1 %v1065_v1  ;;  %v1070_v7 = vld [vmem:[%s1347_s3 + $0x60] sm:$0xff]   ;;  %v310_v8 = vshrl.u32 %v309_v5, 7  ;;  %v1072_v10 = vld [vmem:[%s1347_s3 + $0x58] sm:$0xff]   ;;  %s1164_s22 = scalar_lea.vmem %s1344_s0, %s912_s14  ;;  %v1074_v14 = vld [vmem:[%s1347_s3 + $0x50] sm:$0xff]   ;;  %s1307_s27 = scalar_lea.vmem %s1350_s6, %s875_s23 }
   0xe   : > { %978 = vmatprep.subr.bf16.mxu0 %v1066_v2  ;;  %1041 = vmatprep.subr.bf16.mxu1 %v1066_v2  ;;  %v1071_v9 = vld [vmem:[%s1347_s3 + $0x20] sm:$0xff]   ;;  %v1073_v12 = vld [vmem:[%s1347_s3 + $0x18] sm:$0xff]   ;;  %v260_v16 = vld [vmem:[%s1164_s22 + $0x8] sm:$0xff] }
   0xf   : > { %v311_v11 = vsub.s32 0, %v310_v8  ;;  %v315_v13 = vsub.s32 1, %v310_v8  ;;  %v259_v15 = vld [vmem:[%s1164_s22] sm:$0xff]  ;;  %v277_v20 = vunpack.c.l.bf16 %v260_v16  ;;  %v278_v21 = vunpack.c.h.bf16 %v260_v16  ;;  %v268_v24 = vld [vmem:[%s1164_s22 + $0x48] sm:$0xff]  ;;  %v1191_v29 = vld [vmem:[%s1164_s22 + $0x10] sm:$0xff] }
  0x10   : > { %v307_v17 = vld [vmem:[%s1345_s1] sm:$0x3]  ;;  %v275_v18 = vunpack.c.l.bf16 %v259_v15  ;;  %v276_v19 = vunpack.c.h.bf16 %v259_v15  ;;  %v1075_v30 = vld [vmem:[%s1347_s3 + $0x10] sm:$0xff]   ;;  %v293_v33 = vunpack.c.l.bf16 %v268_v24  ;;  %v294_v34 = vunpack.c.h.bf16 %v268_v24  ;;  %v1076_v35 = vld [vmem:[%s1347_s3 + $0x48] sm:$0xff]  }
  0x11   : > { %979 = vmatpush3.bf16.msra.mxu0 %v1067_v3  ;;  %1049 = vmatpush3.bf16.msra.mxu1 %v1067_v3  ;;  %v351_v22 = vld [vmem:[%s1346_s2] sm:$0x3]  ;;  %v1182_v25 = vrot.slane %v307_v17, %v311_v11  ;;  %v1184_v26 = vrot.slane %v307_v17, %v315_v13  ;;  %v262_v39 = vld [vmem:[%s1164_s22 + $0x18] sm:$0xff]  ;;  %v280_v40 = vunpack.c.h.bf16 %v1191_v29  ;;  %v1077_v49 = vld [vmem:[%s1347_s3 + $0x8] sm:$0xff]  }
  0x12   : > { %980 = vmatprep.subr.bf16.mxu0 %v1068_v4  ;;  %1042 = vmatprep.subr.bf16.mxu1 %v1068_v4  ;;  %v267_v23 = vld [vmem:[%s1164_s22 + $0x40] sm:$0xff]  ;;  %v1186_v27 = vrot.slane %v351_v22, %v311_v11  ;;  %v1188_v28 = vrot.slane %v351_v22, %v315_v13  ;;  %v282_v53 = vunpack.c.h.bf16 %v262_v39  ;;  %v269_v59 = vld [vmem:[%s1164_s22 + $0x50] sm:$0xff]  ;;  %v270_v0 = vld [vmem:[%s1164_s22 + $0x58] sm:$0xff]  ;;  %v279_v13 = vunpack.c.l.bf16 %v1191_v29 }
  0x13   : > { %v291_v31 = vunpack.c.l.bf16 %v267_v23  ;;  %v292_v32 = vunpack.c.h.bf16 %v267_v23  ;;  %v320_v36 = vmul.f32 %v1184_v26, %v276_v19  ;;  %v322_v37 = vmul.f32 %v1184_v26, %v278_v21  ;;  %v1078_v54 = vld [vmem:[%s1347_s3 + $0x40] sm:$0xff]  }
  0x14   : > { %v319_v38 = vmul.f32 %v1182_v25, %v275_v18  ;;  %v338_v42 = vmul.f32 %v1184_v26, %v294_v34  ;;  %v321_v43 = vmul.f32 %v1182_v25, %v277_v20  ;;  %v337_v48 = vmul.f32 %v1182_v25, %v293_v33  ;;  %v1079_v5 = vld [vmem:[%s1347_s3] sm:$0xff]  }
  0x15   : > { %981 = vmatpush3.bf16.msra.mxu0 %v1069_v6  ;;  %1050 = vmatpush3.bf16.msra.mxu1 %v1069_v6  ;;  %v336_v41 = vmul.f32 %v1184_v26, %v292_v32  ;;  %v335_v44 = vmul.f32 %v1182_v25, %v291_v31  ;;  %v364_v45 = vadd.f32 %v1188_v28, %v320_v36  ;;  %v281_v16 = vunpack.c.l.bf16 %v262_v39  ;;  %v263_v18 = vld [vmem:[%s1164_s22 + $0x20] sm:$0xff]  ;;  %v264_v31 = vld [vmem:[%s1164_s22 + $0x28] sm:$0xff] }
  0x16   : > { %982 = vmatprep.subr.bf16.mxu0 %v1070_v7  ;;  %1043 = vmatprep.subr.bf16.mxu1 %v1070_v7  ;;  %v366_v46 = vadd.f32 %v1188_v28, %v322_v37  ;;  %v363_v47 = vadd.f32 %v1186_v27, %v319_v38  ;;  %v382_v51 = vadd.f32 %v1188_v28, %v338_v42  ;;  %v295_v17 = vunpack.c.l.bf16 %v269_v59  ;;  %v271_v36 = vld [vmem:[%s1164_s22 + $0x60] sm:$0xff] }
  0x17   : > { %v380_v50 = vadd.f32 %v1188_v28, %v336_v41  ;;  %v365_v52 = vadd.f32 %v1186_v27, %v321_v43  ;;  %v396_v55 = vmax.f32 %v364_v45, 0.0  ;;  %v379_v58 = vadd.f32 %v1186_v27, %v335_v44  ;;  %v272_v41 = vld [vmem:[%s1164_s22 + $0x68] sm:$0xff] }
  0x18   : > { %v398_v56 = vmax.f32 %v366_v46, 0.0  ;;  %v395_v57 = vmax.f32 %v363_v47, 0.0  ;;  %v414_v61 = vmax.f32 %v382_v51, 0.0  ;;  %v381_v63 = vadd.f32 %v1186_v27, %v337_v48 }
  0x19   : > { %983 = vmatpush3.bf16.msra.mxu0 %v1071_v9  ;;  %1051 = vmatpush3.bf16.msra.mxu1 %v1071_v9  ;;  %v412_v60 = vmax.f32 %v380_v50, 0.0  ;;  %v397_v62 = vmax.f32 %v365_v52, 0.0  ;;  %v411_v2 = vmax.f32 %v379_v58, 0.0  ;;  %v324_v3 = vmul.f32 %v1184_v26, %v280_v40 }
  0x1a   : > { %984 = vmatprep.subr.bf16.mxu0 %v1072_v10  ;;  %1044 = vmatprep.subr.bf16.mxu1 %v1072_v10  ;;  %v428_v1 = vpack.c.bf16 %v398_v56, %v396_v55  ;;  %v326_v4 = vmul.f32 %v1184_v26, %v282_v53  ;;  %v413_v8 = vmax.f32 %v381_v63, 0.0  ;;  %v296_v9 = vunpack.c.h.bf16 %v269_v59 }
  0x1b   : > { %v436_v6 = vpack.c.bf16 %v414_v61, %v412_v60  ;;  %v427_v7 = vpack.c.bf16 %v397_v62, %v395_v57  ;;  %v368_v10 = vadd.f32 %v1188_v28, %v324_v3  ;;  %v323_v22 = vmul.f32 %v1182_v25, %v279_v13  ;;  %v265_v62 = vld [vmem:[%s1164_s22 + $0x30] sm:$0xff] }
  0x1c   : > { %v370_v11 = vadd.f32 %v1188_v28, %v326_v4  ;;  %603 = vmatprep.mubr.bf16.mxu0 %v428_v1  ;;  %v340_v15 = vmul.f32 %v1184_v26, %v296_v9  ;;  %v325_v24 = vmul.f32 %v1182_v25, %v281_v16  ;;  %v297_v29 = vunpack.c.l.bf16 %v270_v0 }
  0x1d   : > { %985 = vmatpush3.bf16.msra.mxu0 %v1073_v12  ;;  %1052 = vmatpush3.bf16.msra.mxu1 %v1073_v12  ;;  %v298_v12 = vunpack.c.h.bf16 %v270_v0  ;;  %v400_v19 = vmax.f32 %v368_v10, 0.0  ;;  %v367_v34 = vadd.f32 %v1186_v27, %v323_v22  ;;  %v286_v44 = vunpack.c.h.bf16 %v264_v31 }
  0x1e   : > { %986 = vmatprep.subr.bf16.mxu0 %v1074_v14  ;;  %1045 = vmatprep.subr.bf16.mxu1 %v1074_v14  ;;  %v435_v14 = vpack.c.bf16 %v413_v8, %v411_v2  ;;  %v402_v20 = vmax.f32 %v370_v11, 0.0  ;;  %v384_v23 = vadd.f32 %v1188_v28, %v340_v15  ;;  %v369_v38 = vadd.f32 %v1186_v27, %v325_v24 }
  0x1f   : > { %635 = vmatprep.mubr.bf16.mxu1 %v436_v6  ;;  %v342_v21 = vmul.f32 %v1184_v26, %v298_v12  ;;  %v341_v39 = vmul.f32 %v1182_v25, %v297_v29  ;;  %v399_v43 = vmax.f32 %v367_v34, 0.0  ;;  %v330_v51 = vmul.f32 %v1184_v26, %v286_v44  ;;  %v273_v12 = vld [vmem:[%s1164_s22 + $0x70] sm:$0xff] }
  0x20   : > { %v430_v32 = vpack.c.bf16 %v402_v20, %v400_v19  ;;  %v416_v37 = vmax.f32 %v384_v23, 0.0  ;;  %v401_v46 = vmax.f32 %v369_v38, 0.0  ;;  %v302_v53 = vunpack.c.h.bf16 %v272_v41 }
  0x21   : > { %987 = vmatpush3.bf16.msra.mxu0 %v1075_v30  ;;  %1053 = vmatpush3.bf16.msra.mxu1 %v1075_v30  ;;  %v339_v30 = vmul.f32 %v1182_v25, %v295_v17  ;;  %v386_v33 = vadd.f32 %v1188_v28, %v342_v21  ;;  %v385_v47 = vadd.f32 %v1186_v27, %v341_v39  ;;  %v283_v57 = vunpack.c.l.bf16 %v263_v18  ;;  %v274_v17 = vld [vmem:[%s1164_s22 + $0x78] sm:$0xff] }
  0x22   : > { %988 = vmatprep.subr.bf16.mxu0 %v1076_v35  ;;  %1046 = vmatprep.subr.bf16.mxu1 %v1076_v35  ;;  %v284_v35 = vunpack.c.h.bf16 %v263_v18  ;;  %v374_v58 = vadd.f32 %v1188_v28, %v330_v51  ;;  %v346_v60 = vmul.f32 %v1184_v26, %v302_v53  ;;  %v285_v61 = vunpack.c.l.bf16 %v264_v31 }
  0x23   : > { %v383_v40 = vadd.f32 %v1186_v27, %v339_v30  ;;  %v418_v42 = vmax.f32 %v386_v33, 0.0  ;;  %v417_v55 = vmax.f32 %v385_v47, 0.0  ;;  %v327_v1 = vmul.f32 %v1182_v25, %v283_v57 }
  0x24   : > { %v328_v45 = vmul.f32 %v1184_v26, %v284_v35  ;;  %v299_v2 = vunpack.c.l.bf16 %v271_v36  ;;  %v406_v3 = vmax.f32 %v374_v58, 0.0  ;;  %v390_v4 = vadd.f32 %v1188_v28, %v346_v60 }
  0x25   : > { %989 = vmatpush3.bf16.msra.mxu0 %v1077_v49  ;;  %1054 = vmatpush3.bf16.msra.mxu1 %v1077_v49  ;;  %v415_v48 = vmax.f32 %v383_v40, 0.0  ;;  %v300_v49 = vunpack.c.h.bf16 %v271_v36  ;;  %v438_v50 = vpack.c.bf16 %v418_v42, %v416_v37  ;;  %v301_v6 = vunpack.c.l.bf16 %v272_v41 }
  0x26   : > { %990 = vmatprep.subr.bf16.mxu0 %v1078_v54  ;;  %1047 = vmatprep.subr.bf16.mxu1 %v1078_v54  ;;  %v372_v52 = vadd.f32 %v1188_v28, %v328_v45  ;;  %v429_v54 = vpack.c.bf16 %v401_v46, %v399_v43  ;;  %v371_v9 = vadd.f32 %v1186_v27, %v327_v1  ;;  %v288_v11 = vunpack.c.h.bf16 %v265_v62 }
  0x27   : > { %v344_v56 = vmul.f32 %v1184_v26, %v300_v49  ;;  %v437_v63 = vpack.c.bf16 %v417_v55, %v415_v48  ;;  %v343_v10 = vmul.f32 %v1182_v25, %v299_v2  ;;  %v345_v16 = vmul.f32 %v1182_v25, %v301_v6 }
  0x28   : > { %v404_v59 = vmax.f32 %v372_v52, 0.0  ;;  %v403_v18 = vmax.f32 %v371_v9, 0.0  ;;  %v332_v21 = vmul.f32 %v1184_v26, %v288_v11  ;;  %v304_v29 = vunpack.c.h.bf16 %v273_v12  ;;  %v1295_v9 = vld [vmem:[%s1349_s5] ss:$0 sm:$0xff] }
  0x29   : > { %991 = vmatpush3.bf16.msra.mxu0 %v1079_v5  ;;  %1055 = vmatpush3.bf16.msra.mxu1 %v1079_v5  ;;  %v388_v0 = vadd.f32 %v1188_v28, %v344_v56  ;;  %v329_v5 = vmul.f32 %v1182_v25, %v285_v61  ;;  %v387_v19 = vadd.f32 %v1186_v27, %v343_v10  ;;  %v306_v33 = vunpack.c.h.bf16 %v274_v17 }
  0x2a   : > { %v432_v13 = vpack.c.bf16 %v406_v3, %v404_v59  ;;  %v389_v24 = vadd.f32 %v1186_v27, %v345_v16  ;;  %v348_v36 = vmul.f32 %v1184_v26, %v304_v29  ;;  %v287_v37 = vunpack.c.l.bf16 %v265_v62 }
  0x2b   : > { %v420_v8 = vmax.f32 %v388_v0, 0.0  ;;  %v373_v15 = vadd.f32 %v1186_v27, %v329_v5  ;;  %v419_v30 = vmax.f32 %v387_v19, 0.0  ;;  %v350_v40 = vmul.f32 %v1184_v26, %v306_v33 }
  0x2c   : > { %604 = vmatmul.mubr.bf16.vlgmr.msra.gmra.mxu0 %v427_v7  ;;  %636 = vmatmul.mubr.bf16.vlgmr.msra.gmra.mxu1 %v435_v14  ;;  %v266_v7 = vld [vmem:[%s1164_s22 + $0x38] sm:$0xff]  ;;  %v422_v14 = vmax.f32 %v390_v4, 0.0  ;;  %v421_v35 = vmax.f32 %v389_v24, 0.0  ;;  %v392_v43 = vadd.f32 %v1188_v28, %v348_v36  ;;  %v331_v44 = vmul.f32 %v1182_v25, %v287_v37 }
  0x2d   : > { %611 = vmatprep.mubr.bf16.mxu0 %v430_v32  ;;  %643 = vmatprep.mubr.bf16.mxu1 %v438_v50  ;;  %v290_v20 = vunpack.c.h.bf16 %v266_v7  ;;  %v405_v23 = vmax.f32 %v373_v15, 0.0  ;;  %v376_v32 = vadd.f32 %v1188_v28, %v332_v21  ;;  %v289_v41 = vunpack.c.l.bf16 %v266_v7 }
  0x2e   : > { %v440_v22 = vpack.c.bf16 %v422_v14, %v420_v8  ;;  %v439_v42 = vpack.c.bf16 %v421_v35, %v419_v30  ;;  %v303_v45 = vunpack.c.l.bf16 %v273_v12  ;;  %v394_v47 = vadd.f32 %v1188_v28, %v350_v40 }
  0x2f   : > { %v334_v31 = vmul.f32 %v1184_v26, %v290_v20  ;;  %v431_v34 = vpack.c.bf16 %v405_v23, %v403_v18  ;;  %v408_v39 = vmax.f32 %v376_v32, 0.0  ;;  %v333_v48 = vmul.f32 %v1182_v25, %v289_v41 }
  0x30   : > { %v305_v49 = vunpack.c.l.bf16 %v274_v17  ;;  %v424_v50 = vmax.f32 %v392_v43, 0.0  ;;  %v375_v51 = vadd.f32 %v1186_v27, %v331_v44  ;;  %v347_v26 = vmul.f32 %v1182_v25, %v303_v45 }
  0x31   : > { %v378_v38 = vadd.f32 %v1188_v28, %v334_v31  ;;  %v426_v53 = vmax.f32 %v394_v47, 0.0 }
  0x32   : > { %v349_v55 = vmul.f32 %v1182_v25, %v305_v49  ;;  %v407_v56 = vmax.f32 %v375_v51, 0.0  ;;  %v391_v57 = vadd.f32 %v1186_v27, %v347_v26  ;;  %v1288_v25 = vld [vmem:[%s1348_s4] ss:$0 sm:$0xff] }
  0x33   : > { %v410_v46 = vmax.f32 %v378_v38, 0.0  ;;  %v442_v28 = vpack.c.bf16 %v426_v53, %v424_v50 }
  0x34   : > { %612 = vmatmul.mubr.bf16.gmra.mxu0 %v429_v54  ;;  %644 = vmatmul.mubr.bf16.gmra.mxu1 %v437_v63  ;;  %v377_v54 = vadd.f32 %v1186_v27, %v333_v48  ;;  %v393_v59 = vadd.f32 %v1186_v27, %v349_v55  ;;  %v423_v60 = vmax.f32 %v391_v57, 0.0 }
  0x35   : > { %619 = vmatprep.mubr.bf16.mxu0 %v432_v13  ;;  %651 = vmatprep.mubr.bf16.mxu1 %v440_v22  ;;  %v434_v52 = vpack.c.bf16 %v410_v46, %v408_v39 }
  0x36   : > { %v409_v58 = vmax.f32 %v377_v54, 0.0  ;;  %v425_v62 = vmax.f32 %v393_v59, 0.0 }
  0x38   : > { %v433_v61 = vpack.c.bf16 %v409_v58, %v407_v56  ;;  %v441_v63 = vpack.c.bf16 %v425_v62, %v423_v60 }
  0x3c   : > { %620 = vmatmul.mubr.bf16.gmra.mxu0 %v431_v34  ;;  %652 = vmatmul.mubr.bf16.gmra.mxu1 %v439_v42 }
  0x3d   : > { %627 = vmatprep.mubr.bf16.mxu0 %v434_v52  ;;  %659 = vmatprep.mubr.bf16.mxu1 %v442_v28 }
  0x44   : > { %628 = vmatmul.mubr.bf16.gmra.mxu0 %v433_v61  ;;  %660 = vmatmul.mubr.bf16.gmra.mxu1 %v441_v63 }
  0xec   : > { %v992_v0 = vpop.f32.mrf.mxu0  ;;  %v1016_v1 = vpop.f32.mrf.mxu1 }
  0xee   : > { %v993_v2 = vpop.f32.mrf.mxu0  ;;  %v1017_v3 = vpop.f32.mrf.mxu1 }
  0xef   : > { %v994_v4 = vadd.f32 %v993_v2, %v992_v0  ;;  %v1018_v5 = vadd.f32 %v1017_v3, %v1016_v1 }
  0xf0   : > { %v995_v6 = vpop.f32.mrf.mxu0  ;;  %v1019_v27 = vpop.f32.mrf.mxu1 }
  0xf1   : > { %v675_v7 = vmul.f32 %v994_v4, %v1288_v25  ;;  %v683_v8 = vmul.f32 %v1018_v5, %v1288_v25 }
  0xf2   : > { %v996_v10 = vpop.f32.mrf.mxu0  ;;  %v1020_v11 = vpop.f32.mrf.mxu1 }
  0xf3   : > { %v997_v12 = vadd.f32 %v996_v10, %v995_v6  ;;  %v1021_v13 = vadd.f32 %v1020_v11, %v1019_v27  ;;  %v698_v16 = vadd.f32 %v1295_v9, %v675_v7  ;;  %v706_v17 = vadd.f32 %v1295_v9, %v683_v8 }
  0xf4   : > { %v998_v14 = vpop.f32.mrf.mxu0  ;;  %v1022_v15 = vpop.f32.mrf.mxu1 }
  0xf5   : > { %v676_v18 = vmul.f32 %v997_v12, %v1288_v25  ;;  %v684_v19 = vmul.f32 %v1021_v13, %v1288_v25  ;;  %v714_v32 = vmax.f32 %v698_v16, 0.0  ;;  %v722_v33 = vmax.f32 %v706_v17, 0.0 }
  0xf6   : > { %v999_v20 = vpop.f32.mrf.mxu0  ;;  %v1023_v21 = vpop.f32.mrf.mxu1 }
  0xf7   : > { %v699_v22 = vadd.f32 %v1295_v9, %v676_v18  ;;  %v707_v23 = vadd.f32 %v1295_v9, %v684_v19  ;;  %v1000_v24 = vadd.f32 %v999_v20, %v998_v14  ;;  %v1024_v29 = vadd.f32 %v1023_v21, %v1022_v15 }
  0xf8   : > { %v1001_v30 = vpop.f32.mrf.mxu0  ;;  %v1025_v31 = vpop.f32.mrf.mxu1 }
  0xf9   : > { %v715_v34 = vmax.f32 %v699_v22, 0.0  ;;  %v723_v35 = vmax.f32 %v707_v23, 0.0  ;;  %v677_v36 = vmul.f32 %v1000_v24, %v1288_v25  ;;  %v685_v37 = vmul.f32 %v1024_v29, %v1288_v25 }
  0xfa   : > { %v1002_v38 = vpop.f32.mrf.mxu0  ;;  %v1026_v39 = vpop.f32.mrf.mxu1 }
  0xfb   : > { %v932_v40 = vpack.c.bf16 %v715_v34, %v714_v32  ;;  %v952_v41 = vpack.c.bf16 %v723_v35, %v722_v33  ;;  %v1003_v42 = vadd.f32 %v1002_v38, %v1001_v30  ;;  %v1027_v43 = vadd.f32 %v1026_v39, %v1025_v31 }
  0xfc   : > { %v1004_v44 = vpop.f32.mrf.mxu0  ;;  %v1028_v45 = vpop.f32.mrf.mxu1  ;;  %v700_v46 = vadd.f32 %v1295_v9, %v677_v36  ;;  %v708_v47 = vadd.f32 %v1295_v9, %v685_v37 }
  0xfd   : > { %933 = vst [vmem:[%s1307_s27] sm:$0xff] %v932_v40   ;;  %972 = vst [vmem:[%s1307_s27 + $0x20] sm:$0xff] %v952_v41   ;;  %v678_v48 = vmul.f32 %v1003_v42, %v1288_v25  ;;  %v686_v49 = vmul.f32 %v1027_v43, %v1288_v25 }
  0xfe   : > { %v1005_v50 = vpop.f32.mrf.mxu0  ;;  %v1029_v51 = vpop.f32.mrf.mxu1  ;;  %v716_v58 = vmax.f32 %v700_v46, 0.0  ;;  %v724_v59 = vmax.f32 %v708_v47, 0.0 }
  0xff   : > { %v1006_v26 = vadd.f32 %v1005_v50, %v1004_v44  ;;  %v1030_v52 = vadd.f32 %v1029_v51, %v1028_v45  ;;  %v701_v53 = vadd.f32 %v1295_v9, %v678_v48  ;;  %v709_v54 = vadd.f32 %v1295_v9, %v686_v49 }
 0x100   : > { %v1007_v55 = vpop.f32.mrf.mxu0  ;;  %v1031_v56 = vpop.f32.mrf.mxu1 }
 0x101   : > { %v679_v57 = vmul.f32 %v1006_v26, %v1288_v25  ;;  %v687_v28 = vmul.f32 %v1030_v52, %v1288_v25  ;;  %v717_v60 = vmax.f32 %v701_v53, 0.0  ;;  %v725_v61 = vmax.f32 %v709_v54, 0.0 }
 0x102   : > { %v1008_v62 = vpop.f32.mrf.mxu0  ;;  %v1032_v63 = vpop.f32.mrf.mxu1 }
 0x103   : > { %v1009_v0 = vadd.f32 %v1008_v62, %v1007_v55  ;;  %v1033_v1 = vadd.f32 %v1032_v63, %v1031_v56  ;;  %v937_v2 = vpack.c.bf16 %v717_v60, %v716_v58  ;;  %v957_v3 = vpack.c.bf16 %v725_v61, %v724_v59 }
 0x104   : > { %v702_v4 = vadd.f32 %v1295_v9, %v679_v57  ;;  %v1010_v5 = vpop.f32.mrf.mxu0  ;;  %v710_v6 = vadd.f32 %v1295_v9, %v687_v28  ;;  %v1034_v8 = vpop.f32.mrf.mxu1 }
 0x105   : > { %v680_v27 = vmul.f32 %v1009_v0, %v1288_v25  ;;  %v688_v7 = vmul.f32 %v1033_v1, %v1288_v25  ;;  %969 = vst [vmem:[%s1307_s27 + $0x8] sm:$0xff] %v937_v2   ;;  %973 = vst [vmem:[%s1307_s27 + $0x28] sm:$0xff] %v957_v3  }
 0x106   : > { %v1011_v10 = vpop.f32.mrf.mxu0  ;;  %v1035_v14 = vpop.f32.mrf.mxu1  ;;  %v718_v15 = vmax.f32 %v702_v4, 0.0  ;;  %v726_v18 = vmax.f32 %v710_v6, 0.0 }
 0x107   : > { %v703_v11 = vadd.f32 %v1295_v9, %v680_v27  ;;  %v711_v12 = vadd.f32 %v1295_v9, %v688_v7  ;;  %v1012_v13 = vadd.f32 %v1011_v10, %v1010_v5  ;;  %v1036_v16 = vadd.f32 %v1035_v14, %v1034_v8 }
 0x108   : > { %v1013_v17 = vpop.f32.mrf.mxu0  ;;  %v1037_v22 = vpop.f32.mrf.mxu1 }
 0x109   : > { %v719_v19 = vmax.f32 %v703_v11, 0.0  ;;  %v727_v20 = vmax.f32 %v711_v12, 0.0  ;;  %v681_v21 = vmul.f32 %v1012_v13, %v1288_v25  ;;  %v689_v23 = vmul.f32 %v1036_v16, %v1288_v25 }
 0x10a   : > { %v1014_v24 = vpop.f32.mrf.mxu0  ;;  %v1038_v32 = vpop.f32.mrf.mxu1 }
 0x10b   : > { %v942_v29 = vpack.c.bf16 %v719_v19, %v718_v15  ;;  %v962_v30 = vpack.c.bf16 %v727_v20, %v726_v18  ;;  %v1015_v31 = vadd.f32 %v1014_v24, %v1013_v17  ;;  %v1039_v33 = vadd.f32 %v1038_v32, %v1037_v22 }
 0x10c   : > { %v704_v34 = vadd.f32 %v1295_v9, %v681_v21  ;;  %v712_v36 = vadd.f32 %v1295_v9, %v689_v23 }
 0x10d   : > { %970 = vst [vmem:[%s1307_s27 + $0x10] sm:$0xff] %v942_v29   ;;  %974 = vst [vmem:[%s1307_s27 + $0x30] sm:$0xff] %v962_v30   ;;  %v682_v35 = vmul.f32 %v1015_v31, %v1288_v25  ;;  %v690_v37 = vmul.f32 %v1039_v33, %v1288_v25 }
 0x10e   : > { %v720_v40 = vmax.f32 %v704_v34, 0.0  ;;  %v728_v42 = vmax.f32 %v712_v36, 0.0 }
 0x10f   : > { %v705_v38 = vadd.f32 %v1295_v9, %v682_v35  ;;  %v713_v39 = vadd.f32 %v1295_v9, %v690_v37 }
 0x111   : > { %v721_v41 = vmax.f32 %v705_v38, 0.0  ;;  %v729_v43 = vmax.f32 %v713_v39, 0.0 }
 0x113   : > { %v947_v44 = vpack.c.bf16 %v721_v41, %v720_v40  ;;  %v967_v45 = vpack.c.bf16 %v729_v43, %v728_v42 }
 0x115   : > { %971 = vst [vmem:[%s1307_s27 + $0x18] sm:$0xff] %v947_v44   ;;  %975 = vst [vmem:[%s1307_s27 + $0x38] sm:$0xff] %v967_v45  }
 0x116 PF: > { %s16_s21 = sadd.s32 1, %s1086_s21  }
 0x117   : > { %p13_p4 = scmp.ge.s32.totalorder %s16_s21, 6  }
 0x119   :  { %15 = sbr.rel (!%p13_p4) target bundleno = 1 (0x1), region = 74 }

// kernel: closed_call.53
= control target key start
LH: loop header
LB: loop body
LE: loop exit
PB: predicated region body
PF: predicated region fallthrough
CT: control target
= control target key end

     0   :  { %s2670_s15 = smov 0   ;;  %s3131_s0 = inlined_call_operand.vmem [shape: bf16[512,1152], index: 0, kind: input, shape index: {}]   ;;  %s3132_s1 = inlined_call_operand.vmem [shape: bf16[1152,128], index: 1, kind: input, shape index: {}]   ;;  %s3133_s2 = inlined_call_operand.vmem [shape: f32[1,128], index: 2, kind: input, shape index: {}]   ;;  %s3134_s3 = inlined_call_operand.vmem [shape: f32[1,128], index: 3, kind: input, shape index: {}]   ;;  %s3135_s4 = inlined_call_operand.vmem [shape: bf16[512,128], index: 4, kind: output, shape index: {}]  }
   0x1 LB: > { %s1896_s16 = sadd.s32 4294967295, %s2643_s15   ;;  %p1900_p0 = scmp.ge.s32.totalorder %s2643_s15, 1  ;;  %s2643_s15 = sphi %s2670_s15, %s14_s15  }
   0x2   : > { %p164_p1 = scmp.lt.s32.totalorder %s2643_s15, 5 }
   0x4   : > { %p165_p2 = pnand %p1900_p0, %p164_p1 }
   0x6   : > { %168 = sbr.rel (%p165_p2) target bundleno = 390 (0x186), region = 36 }
   0xb   : > { %v2461_v0 = vld [vmem:[%s3132_s1 + $0x78] sm:$0xff]   ;;  %v2465_v4 = vld [vmem:[%s3132_s1 + $0x70] sm:$0xff]   ;;  %v2469_v8 = vld [vmem:[%s3132_s1 + $0x68] sm:$0xff]   ;;  %s1901_s23 = sshll.u32 %s1896_s16, 4 }
   0xc   : > { %v2462_v1 = vld [vmem:[%s3132_s1 + $0xf8] sm:$0xff]   ;;  %2132 = vmatprep.subr.bf16.mxu0 %v2461_v0  ;;  %v2466_v5 = vld [vmem:[%s3132_s1 + $0xf0] sm:$0xff]   ;;  %v2470_v9 = vld [vmem:[%s3132_s1 + $0xe8] sm:$0xff]   ;;  %p192_p3 = scmp.lt.s32.totalorder %s1901_s23, 63 }
   0xd   : > { %v2463_v2 = vld [vmem:[%s3132_s1 + $0x38] sm:$0xff]   ;;  %2196 = vmatprep.subr.bf16.mxu1 %v2462_v1  ;;  %v2467_v6 = vld [vmem:[%s3132_s1 + $0x30] sm:$0xff]   ;;  %v2471_v10 = vld [vmem:[%s3132_s1 + $0x28] sm:$0xff]  }
   0xe   : > { %v2464_v3 = vld [vmem:[%s3132_s1 + $0xb8] sm:$0xff]   ;;  %2133 = vmatpush3.bf16.msra.mxu0 %v2463_v2  ;;  %v2468_v7 = vld [vmem:[%s3132_s1 + $0xb0] sm:$0xff]   ;;  %v2472_v11 = vld [vmem:[%s3132_s1 + $0xa8] sm:$0xff]   ;;  %s3165_s23 = smov (!%p192_p3, %s1901_s23), 63 }
   0xf   : > { %2197 = vmatpush3.bf16.msra.mxu1 %v2464_v3  ;;  %2134 = vmatprep.subr.bf16.mxu0 %v2465_v4  ;;  %v2473_v12 = vld [vmem:[%s3132_s1 + $0x60] sm:$0xff]   ;;  %v2477_v16 = vld [vmem:[%s3132_s1 + $0x58] sm:$0xff]   ;;  %v2481_v20 = vld [vmem:[%s3132_s1 + $0x50] sm:$0xff]   ;;  %s2452_s21 = smul.u32 36, %s3165_s23  ;;  %s1904_s28 = sshll.u32 %s3165_s23, 2 }
  0x10   : > { %2198 = vmatprep.subr.bf16.mxu1 %v2466_v5  ;;  %v2474_v13 = vld [vmem:[%s3132_s1 + $0xe0] sm:$0xff]   ;;  %v2478_v17 = vld [vmem:[%s3132_s1 + $0xd8] sm:$0xff]   ;;  %v2482_v21 = vld [vmem:[%s3132_s1 + $0xd0] sm:$0xff]   ;;  %s3093_s30 = scalar_lea.vmem %s3135_s4, %s1904_s28 }
  0x11   : > { %v2475_v14 = vld [vmem:[%s3132_s1 + $0x20] sm:$0xff]   ;;  %v2479_v18 = vld [vmem:[%s3132_s1 + $0x18] sm:$0xff]   ;;  %v2483_v22 = vld [vmem:[%s3132_s1 + $0x10] sm:$0xff]   ;;  %s2776_s6 = scalar_lea.vmem %s3131_s0, %s2452_s21 }
  0x12   : > { %2135 = vmatpush3.bf16.msra.mxu0 %v2467_v6  ;;  %v2476_v15 = vld [vmem:[%s3132_s1 + $0xa0] sm:$0xff]   ;;  %v2480_v19 = vld [vmem:[%s3132_s1 + $0x98] sm:$0xff]   ;;  %v2484_v23 = vld [vmem:[%s3132_s1 + $0x90] sm:$0xff]  }
  0x13   : > { %2199 = vmatpush3.bf16.msra.mxu1 %v2468_v7  ;;  %2136 = vmatprep.subr.bf16.mxu0 %v2469_v8  ;;  %v2485_v24 = vld [vmem:[%s3132_s1 + $0x48] sm:$0xff]   ;;  %v2489_v28 = vld [vmem:[%s3132_s1 + $0x40] sm:$0xff]   ;;  %v2499_v36 = vld [vmem:[%s3132_s1 + $0x178] sm:$0xff]  }
  0x14   : > { %2200 = vmatprep.subr.bf16.mxu1 %v2470_v9  ;;  %v2486_v25 = vld [vmem:[%s3132_s1 + $0xc8] sm:$0xff]   ;;  %v2490_v29 = vld [vmem:[%s3132_s1 + $0xc0] sm:$0xff]   ;;  %v2500_v37 = vld [vmem:[%s3132_s1 + $0x1f8] sm:$0xff]  }
  0x15   : > { %v2487_v26 = vld [vmem:[%s3132_s1 + $0x8] sm:$0xff]   ;;  %v2491_v30 = vld [vmem:[%s3132_s1] sm:$0xff]   ;;  %v2501_v38 = vld [vmem:[%s3132_s1 + $0x138] sm:$0xff]  }
  0x16   : > { %2137 = vmatpush3.bf16.msra.mxu0 %v2471_v10  ;;  %v2488_v27 = vld [vmem:[%s3132_s1 + $0x88] sm:$0xff]   ;;  %v2492_v31 = vld [vmem:[%s3132_s1 + $0x80] sm:$0xff]   ;;  %v2502_v39 = vld [vmem:[%s3132_s1 + $0x1b8] sm:$0xff]  }
  0x17   : > { %2201 = vmatpush3.bf16.msra.mxu1 %v2472_v11  ;;  %2138 = vmatprep.subr.bf16.mxu0 %v2473_v12  ;;  %v2493_v32 = vld [vmem:[%s2776_s6] ss:$36 sps:$4 sm:$0xff]   ;;  %v2496_v34 = vld [vmem:[%s2776_s6 + $0x8] ss:$36 sps:$4 sm:$0xff]   ;;  %v2505_v41 = vld [vmem:[%s2776_s6 + $0x54] ss:$36 sps:$4 sm:$0xff]  }
  0x18   : > { %2202 = vmatprep.subr.bf16.mxu1 %v2474_v13  ;;  %v2495_v33 = vld [vmem:[%s2776_s6 + $0x4] ss:$36 sps:$4 sm:$0xff]   ;;  %v2498_v35 = vld [vmem:[%s2776_s6 + $0xc] ss:$36 sps:$4 sm:$0xff]   ;;  %v2513_v48 = vld [vmem:[%s2776_s6 + $0x94] ss:$36 sps:$4 sm:$0xff]  }
  0x19   : > { %1261 = vmatprep.mubr.bf16.mxu0 %v2495_v33  ;;  %1358 = vmatprep.mubr.bf16.mxu1 %v2498_v35  ;;  %v2503_v40 = vld [vmem:[%s2776_s6 + $0x4c] ss:$36 sps:$4 sm:$0xff]   ;;  %v2515_v49 = vld [vmem:[%s2776_s6 + $0x9c] ss:$36 sps:$4 sm:$0xff]   ;;  %v2525_v57 = vld [vmem:[%s2776_s6 + $0xe4] ss:$36 sps:$4 sm:$0xff]  }
  0x1a   : > { %2139 = vmatpush3.bf16.msra.mxu0 %v2475_v14  ;;  %v2507_v42 = vld [vmem:[%s2776_s6 + $0x48] ss:$36 sps:$4 sm:$0xff]   ;;  %v2508_v43 = vld [vmem:[%s2776_s6 + $0x50] ss:$36 sps:$4 sm:$0xff]   ;;  %v2518_v51 = vld [vmem:[%s2776_s6 + $0x98] ss:$36 sps:$4 sm:$0xff]  }
  0x1b   : > { %2203 = vmatpush3.bf16.msra.mxu1 %v2476_v15  ;;  %2140 = vmatprep.subr.bf16.mxu0 %v2477_v16  ;;  %v2509_v44 = vld [vmem:[%s3132_s1 + $0x170] sm:$0xff]   ;;  %v2519_v52 = vld [vmem:[%s3132_s1 + $0x168] sm:$0xff]   ;;  %v2523_v56 = vld [vmem:[%s2776_s6 + $0xdc] ss:$36 sps:$4 sm:$0xff]  }
  0x1c   : > { %2204 = vmatprep.subr.bf16.mxu1 %v2478_v17  ;;  %v2510_v45 = vld [vmem:[%s3132_s1 + $0x1f0] sm:$0xff]   ;;  %v2520_v53 = vld [vmem:[%s3132_s1 + $0x1e8] sm:$0xff]   ;;  %v2527_v58 = vld [vmem:[%s2776_s6 + $0xd8] ss:$36 sps:$4 sm:$0xff]  }
  0x1d   : > { %v2511_v46 = vld [vmem:[%s3132_s1 + $0x130] sm:$0xff]   ;;  %v2521_v54 = vld [vmem:[%s3132_s1 + $0x128] sm:$0xff]   ;;  %v2528_v59 = vld [vmem:[%s2776_s6 + $0xe0] ss:$36 sps:$4 sm:$0xff]  }
  0x1e   : > { %2141 = vmatpush3.bf16.msra.mxu0 %v2479_v18  ;;  %v2512_v47 = vld [vmem:[%s3132_s1 + $0x1b0] sm:$0xff]   ;;  %v2522_v55 = vld [vmem:[%s3132_s1 + $0x1a8] sm:$0xff]   ;;  %v2529_v60 = vld [vmem:[%s3132_s1 + $0x160] sm:$0xff]  }
  0x1f   : > { %2205 = vmatpush3.bf16.msra.mxu1 %v2480_v19  ;;  %2142 = vmatprep.subr.bf16.mxu0 %v2481_v20  ;;  %v2517_v50 = vld [vmem:[%s2776_s6 + $0x90] ss:$36 sps:$4 sm:$0xff]   ;;  %v2530_v61 = vld [vmem:[%s3132_s1 + $0x1e0] sm:$0xff]   ;;  %v2539_v3 = vld [vmem:[%s3132_s1 + $0x158] sm:$0xff]  }
  0x20   : > { %2206 = vmatprep.subr.bf16.mxu1 %v2482_v21  ;;  %v2531_v62 = vld [vmem:[%s3132_s1 + $0x120] sm:$0xff]   ;;  %v2535_v1 = vld [vmem:[%s2776_s6 + $0x12c] ss:$36 sps:$4 sm:$0xff]   ;;  %v2540_v5 = vld [vmem:[%s3132_s1 + $0x1d8] sm:$0xff]  }
  0x21   : > { %v2532_v63 = vld [vmem:[%s3132_s1 + $0x1a0] sm:$0xff]   ;;  %v2538_v4 = vld [vmem:[%s2776_s6 + $0x128] ss:$36 sps:$4 sm:$0xff]   ;;  %v2541_v6 = vld [vmem:[%s3132_s1 + $0x118] sm:$0xff]  }
  0x22   : > { %2143 = vmatpush3.bf16.msra.mxu0 %v2483_v22  ;;  %v2533_v0 = vld [vmem:[%s2776_s6 + $0x124] ss:$36 sps:$4 sm:$0xff]   ;;  %v2542_v7 = vld [vmem:[%s3132_s1 + $0x198] sm:$0xff]   ;;  %v2543_v8 = vld [vmem:[%s2776_s6 + $0x16c] ss:$36 sps:$4 sm:$0xff]  }
  0x23   : > { %2207 = vmatpush3.bf16.msra.mxu1 %v2484_v23  ;;  %2144 = vmatprep.subr.bf16.mxu0 %v2485_v24  ;;  %v2537_v2 = vld [vmem:[%s2776_s6 + $0x120] ss:$36 sps:$4 sm:$0xff]   ;;  %v2545_v9 = vld [vmem:[%s2776_s6 + $0x174] ss:$36 sps:$4 sm:$0xff]   ;;  %v2547_v12 = vld [vmem:[%s2776_s6 + $0x168] ss:$36 sps:$4 sm:$0xff]  }
  0x24   : > { %2208 = vmatprep.subr.bf16.mxu1 %v2486_v25  ;;  %v2549_v10 = vld [vmem:[%s3132_s1 + $0x150] sm:$0xff]   ;;  %v2555_v17 = vld [vmem:[%s2776_s6 + $0x1bc] ss:$36 sps:$4 sm:$0xff]   ;;  %v2559_v18 = vld [vmem:[%s3132_s1 + $0x148] sm:$0xff]  }
  0x25   : > { %v2550_v11 = vld [vmem:[%s3132_s1 + $0x1d0] sm:$0xff]   ;;  %v2560_v19 = vld [vmem:[%s3132_s1 + $0x1c8] sm:$0xff]   ;;  %v2558_v23 = vld [vmem:[%s2776_s6 + $0x1b8] ss:$36 sps:$4 sm:$0xff]  }
  0x26   : > { %2145 = vmatpush3.bf16.msra.mxu0 %v2487_v26  ;;  %v2551_v13 = vld [vmem:[%s3132_s1 + $0x110] sm:$0xff]   ;;  %v2561_v20 = vld [vmem:[%s3132_s1 + $0x108] sm:$0xff]   ;;  %v2563_v24 = vld [vmem:[%s2776_s6 + $0x1fc] ss:$36 sps:$4 sm:$0xff]  }
  0x27   : > { %2209 = vmatpush3.bf16.msra.mxu1 %v2488_v27  ;;  %2146 = vmatprep.subr.bf16.mxu0 %v2489_v28  ;;  %v2552_v14 = vld [vmem:[%s3132_s1 + $0x190] sm:$0xff]   ;;  %v2562_v21 = vld [vmem:[%s3132_s1 + $0x188] sm:$0xff]   ;;  %v2569_v26 = vld [vmem:[%s3132_s1 + $0x140] sm:$0xff]  }
  0x28   : > { %2210 = vmatprep.subr.bf16.mxu1 %v2490_v29  ;;  %v2548_v15 = vld [vmem:[%s2776_s6 + $0x170] ss:$36 sps:$4 sm:$0xff]   ;;  %v2565_v25 = vld [vmem:[%s2776_s6 + $0x204] ss:$36 sps:$4 sm:$0xff]  }
  0x29   : > { %v2553_v16 = vld [vmem:[%s2776_s6 + $0x1b4] ss:$36 sps:$4 sm:$0xff]   ;;  %v2570_v27 = vld [vmem:[%s3132_s1 + $0x1c0] sm:$0xff]  }
  0x2a   : > { %2147 = vmatpush3.bf16.msra.mxu0 %v2491_v30  ;;  %v2557_v22 = vld [vmem:[%s2776_s6 + $0x1b0] ss:$36 sps:$4 sm:$0xff]   ;;  %v2571_v28 = vld [vmem:[%s3132_s1 + $0x100] sm:$0xff]   ;;  %v2567_v30 = vld [vmem:[%s2776_s6 + $0x1f8] ss:$36 sps:$4 sm:$0xff]  }
  0x2b   : > { %2211 = vmatpush3.bf16.msra.mxu1 %v2492_v31  ;;  %2260 = vmatprep.subr.bf16.mxu0 %v2499_v36  ;;  %v2572_v29 = vld [vmem:[%s3132_s1 + $0x180] sm:$0xff]   ;;  %v2575_v33 = vld [vmem:[%s2776_s6 + $0x14] ss:$36 sps:$4 sm:$0xff]  }
  0x2c   : > { %2324 = vmatprep.subr.bf16.mxu1 %v2500_v37  ;;  %v2568_v31 = vld [vmem:[%s2776_s6 + $0x200] ss:$36 sps:$4 sm:$0xff]   ;;  %v2573_v35 = vld [vmem:[%s2776_s6 + $0x10] ss:$36 sps:$4 sm:$0xff]   ;;  %v2576_v36 = vld [vmem:[%s2776_s6 + $0x18] ss:$36 sps:$4 sm:$0xff]  }
  0x2d   : > { %1262 = vmatmul.mubr.bf16.vlgmr.msra.gmra.mxu0 %v2493_v32  ;;  %v2579_v32 = vld [vmem:[%s3132_s1 + $0x238] sm:$0xff]  }
  0x2e   : > { %1359 = vmatmul.mubr.bf16.vlgmr.msra.gmra.mxu1 %v2496_v34  ;;  %2261 = vmatpush3.bf16.msra.mxu0 %v2501_v38  ;;  %v2578_v34 = vld [vmem:[%s2776_s6 + $0x1c] ss:$36 sps:$4 sm:$0xff]   ;;  %v2582_v38 = vld [vmem:[%s2776_s6 + $0x64] ss:$36 sps:$4 sm:$0xff]  }
  0x2f   : > { %2325 = vmatpush3.bf16.msra.mxu1 %v2502_v39  ;;  %1269 = vmatprep.mubr.bf16.mxu0 %v2503_v40  ;;  %v2580_v37 = vld [vmem:[%s2776_s6 + $0x5c] ss:$36 sps:$4 sm:$0xff]   ;;  %v2586_v39 = vld [vmem:[%s3132_s1 + $0x230] sm:$0xff]   ;;  %v2593_v40 = vld [vmem:[%s3132_s1 + $0x228] sm:$0xff]  }
  0x30   : > { %1366 = vmatprep.mubr.bf16.mxu1 %v2505_v41  ;;  %2262 = vmatprep.subr.bf16.mxu0 %v2509_v44  ;;  %v2584_v41 = vld [vmem:[%s2776_s6 + $0x58] ss:$36 sps:$4 sm:$0xff]   ;;  %v2589_v44 = vld [vmem:[%s2776_s6 + $0xac] ss:$36 sps:$4 sm:$0xff]  }
  0x31   : > { %2326 = vmatprep.subr.bf16.mxu1 %v2510_v45  ;;  %v2600_v45 = vld [vmem:[%s3132_s1 + $0x220] sm:$0xff]  }
  0x32   : > { %2263 = vmatpush3.bf16.msra.mxu0 %v2511_v46  ;;  %v2607_v46 = vld [vmem:[%s3132_s1 + $0x218] sm:$0xff]  }
  0x33   : > { %2327 = vmatpush3.bf16.msra.mxu1 %v2512_v47  ;;  %2264 = vmatprep.subr.bf16.mxu0 %v2519_v52  ;;  %v2591_v47 = vld [vmem:[%s2776_s6 + $0xa0] ss:$36 sps:$4 sm:$0xff]   ;;  %v2598_v52 = vld [vmem:[%s2776_s6 + $0xe8] ss:$36 sps:$4 sm:$0xff]  }
  0x34   : > { %2328 = vmatprep.subr.bf16.mxu1 %v2520_v53  ;;  %v2621_v53 = vld [vmem:[%s3132_s1 + $0x208] sm:$0xff]  }
  0x35   : > { %1270 = vmatmul.mubr.bf16.gmra.mxu0 %v2507_v42  ;;  %v2585_v42 = vld [vmem:[%s2776_s6 + $0x60] ss:$36 sps:$4 sm:$0xff]  }
  0x36   : > { %1367 = vmatmul.mubr.bf16.gmra.mxu1 %v2508_v43  ;;  %1277 = vmatprep.mubr.bf16.mxu0 %v2513_v48  ;;  %v2587_v43 = vld [vmem:[%s2776_s6 + $0xa4] ss:$36 sps:$4 sm:$0xff]  }
  0x37   : > { %1374 = vmatprep.mubr.bf16.mxu1 %v2515_v49  ;;  %2265 = vmatpush3.bf16.msra.mxu0 %v2521_v54  ;;  %v2592_v48 = vld [vmem:[%s2776_s6 + $0xa8] ss:$36 sps:$4 sm:$0xff]   ;;  %v2599_v54 = vld [vmem:[%s2776_s6 + $0xf0] ss:$36 sps:$4 sm:$0xff]  }
  0x38   : > { %2329 = vmatpush3.bf16.msra.mxu1 %v2522_v55  ;;  %2266 = vmatprep.subr.bf16.mxu0 %v2529_v60  ;;  %v2594_v49 = vld [vmem:[%s2776_s6 + $0xec] ss:$36 sps:$4 sm:$0xff]   ;;  %v2601_v55 = vld [vmem:[%s2776_s6 + $0x134] ss:$36 sps:$4 sm:$0xff]   ;;  %v2608_v60 = vld [vmem:[%s2776_s6 + $0x17c] ss:$36 sps:$4 sm:$0xff]  }
  0x39   : > { %2330 = vmatprep.subr.bf16.mxu1 %v2530_v61  ;;  %v2610_v61 = vld [vmem:[%s2776_s6 + $0x184] ss:$36 sps:$4 sm:$0xff]  }
  0x3b   : > { %2267 = vmatpush3.bf16.msra.mxu0 %v2531_v62  ;;  %v2612_v62 = vld [vmem:[%s2776_s6 + $0x178] ss:$36 sps:$4 sm:$0xff]  }
  0x3c   : > { %2331 = vmatpush3.bf16.msra.mxu1 %v2532_v63  ;;  %2268 = vmatprep.subr.bf16.mxu0 %v2539_v3  ;;  %v2613_v63 = vld [vmem:[%s2776_s6 + $0x180] ss:$36 sps:$4 sm:$0xff]   ;;  %v2620_v3 = vld [vmem:[%s2776_s6 + $0x1c8] ss:$36 sps:$4 sm:$0xff]  }
  0x3d   : > { %1278 = vmatmul.mubr.bf16.gmra.mxu0 %v2517_v50  ;;  %2332 = vmatprep.subr.bf16.mxu1 %v2540_v5  ;;  %v2596_v50 = vld [vmem:[%s2776_s6 + $0xf4] ss:$36 sps:$4 sm:$0xff]  }
  0x3e   : > { %1375 = vmatmul.mubr.bf16.gmra.mxu1 %v2518_v51  ;;  %1285 = vmatprep.mubr.bf16.mxu0 %v2523_v56  ;;  %v2614_v51 = vld [vmem:[%s3132_s1 + $0x210] sm:$0xff]   ;;  %v2603_v56 = vld [vmem:[%s2776_s6 + $0x13c] ss:$36 sps:$4 sm:$0xff]  }
  0x3f   : > { %1382 = vmatprep.mubr.bf16.mxu1 %v2525_v57  ;;  %2269 = vmatpush3.bf16.msra.mxu0 %v2541_v6  ;;  %v2628_v57 = vld [vmem:[%s3132_s1 + $0x200] sm:$0xff]   ;;  %v2624_v5 = vld [vmem:[%s2776_s6 + $0x214] ss:$36 sps:$4 sm:$0xff]   ;;  %v2626_v6 = vld [vmem:[%s2776_s6 + $0x208] ss:$36 sps:$4 sm:$0xff]  }
  0x40   : > { %2333 = vmatpush3.bf16.msra.mxu1 %v2542_v7  ;;  %2270 = vmatprep.subr.bf16.mxu0 %v2549_v10  ;;  %v2627_v7 = vld [vmem:[%s2776_s6 + $0x210] ss:$36 sps:$4 sm:$0xff]   ;;  %v2631_v10 = vld [vmem:[%s2776_s6 + $0x68] ss:$36 sps:$4 sm:$0xff]  }
  0x41   : > { %2334 = vmatprep.subr.bf16.mxu1 %v2550_v11  ;;  %v2632_v11 = vld [vmem:[%s2776_s6 + $0x188] ss:$36 sps:$4 sm:$0xff]  }
  0x43   : > { %2271 = vmatpush3.bf16.msra.mxu0 %v2551_v13  ;;  %v2634_v13 = vld [vmem:[%s2776_s6 + $0x1d0] ss:$36 sps:$4 sm:$0xff]  }
  0x44   : > { %2335 = vmatpush3.bf16.msra.mxu1 %v2552_v14  ;;  %2272 = vmatprep.subr.bf16.mxu0 %v2559_v18  ;;  %v2635_v14 = vld [vmem:[%s2776_s6 + $0xf8] ss:$36 sps:$4 sm:$0xff]  }
  0x45   : > { %1286 = vmatmul.mubr.bf16.gmra.mxu0 %v2527_v58  ;;  %2336 = vmatprep.subr.bf16.mxu1 %v2560_v19  ;;  %v2605_v58 = vld [vmem:[%s2776_s6 + $0x130] ss:$36 sps:$4 sm:$0xff]  }
  0x46   : > { %1383 = vmatmul.mubr.bf16.gmra.mxu1 %v2528_v59  ;;  %1293 = vmatprep.mubr.bf16.mxu0 %v2533_v0  ;;  %v2606_v59 = vld [vmem:[%s2776_s6 + $0x138] ss:$36 sps:$4 sm:$0xff]   ;;  %v2615_v0 = vld [vmem:[%s2776_s6 + $0x1c4] ss:$36 sps:$4 sm:$0xff]  }
  0x47   : > { %1390 = vmatprep.mubr.bf16.mxu1 %v2535_v1  ;;  %2273 = vmatpush3.bf16.msra.mxu0 %v2561_v20  ;;  %v2617_v1 = vld [vmem:[%s2776_s6 + $0x1cc] ss:$36 sps:$4 sm:$0xff]  }
  0x48   : > { %2337 = vmatpush3.bf16.msra.mxu1 %v2562_v21  ;;  %2274 = vmatprep.subr.bf16.mxu0 %v2569_v26 }
  0x49   : > { %2338 = vmatprep.subr.bf16.mxu1 %v2570_v27 }
  0x4b   : > { %2275 = vmatpush3.bf16.msra.mxu0 %v2571_v28 }
  0x4c   : > { %2339 = vmatpush3.bf16.msra.mxu1 %v2572_v29  ;;  %2404 = vmatprep.subr.bf16.mxu0 %v2579_v32 }
  0x4d   : > { %1294 = vmatmul.mubr.bf16.gmra.mxu0 %v2537_v2  ;;  %2436 = vmatprep.subr.bf16.mxu1 %v2579_v32  ;;  %v2619_v2 = vld [vmem:[%s2776_s6 + $0x1c0] ss:$36 sps:$4 sm:$0xff]  }
  0x4e   : > { %1391 = vmatmul.mubr.bf16.gmra.mxu1 %v2538_v4  ;;  %1301 = vmatprep.mubr.bf16.mxu0 %v2543_v8  ;;  %v2622_v4 = vld [vmem:[%s2776_s6 + $0x20c] ss:$36 sps:$4 sm:$0xff]   ;;  %v2629_v8 = vld [vmem:[%s2776_s6 + $0x20] ss:$36 sps:$4 sm:$0xff]  }
  0x4f   : > { %1398 = vmatprep.mubr.bf16.mxu1 %v2545_v9  ;;  %v2630_v9 = vld [vmem:[%s2776_s6 + $0x140] ss:$36 sps:$4 sm:$0xff]  }
  0x55   : > { %1302 = vmatmul.mubr.bf16.gmra.mxu0 %v2547_v12  ;;  %v2633_v12 = vld [vmem:[%s2776_s6 + $0xb0] ss:$36 sps:$4 sm:$0xff]  }
  0x56   : > { %1399 = vmatmul.mubr.bf16.gmra.mxu1 %v2548_v15  ;;  %1309 = vmatprep.mubr.bf16.mxu0 %v2553_v16  ;;  %v2636_v15 = vld [vmem:[%s2776_s6 + $0x218] ss:$36 sps:$4 sm:$0xff]  }
  0x57   : > { %1406 = vmatprep.mubr.bf16.mxu1 %v2555_v17 }
  0x5d   : > { %1310 = vmatmul.mubr.bf16.gmra.mxu0 %v2557_v22 }
  0x5e   : > { %1407 = vmatmul.mubr.bf16.gmra.mxu1 %v2558_v23  ;;  %1317 = vmatprep.mubr.bf16.mxu0 %v2563_v24 }
  0x5f   : > { %1414 = vmatprep.mubr.bf16.mxu1 %v2565_v25 }
  0x65   : > { %1318 = vmatmul.mubr.bf16.gmra.mxu0 %v2567_v30 }
  0x66   : > { %1415 = vmatmul.mubr.bf16.gmra.mxu1 %v2568_v31  ;;  %1455 = vmatprep.mubr.bf16.mxu0 %v2575_v33 }
  0x67   : > { %1552 = vmatprep.mubr.bf16.mxu1 %v2578_v34 }
  0x6d   : > { %1456 = vmatmul.mubr.bf16.vlgmr.msra.gmra.mxu0 %v2573_v35 }
  0x6e   : > { %1553 = vmatmul.mubr.bf16.vlgmr.msra.gmra.mxu1 %v2576_v36  ;;  %2405 = vmatpush3.bf16.msra.mxu0 %v2579_v32 }
  0x6f   : > { %2444 = vmatpush3.bf16.msra.mxu1 %v2579_v32  ;;  %1463 = vmatprep.mubr.bf16.mxu0 %v2580_v37 }
  0x70   : > { %1560 = vmatprep.mubr.bf16.mxu1 %v2582_v38  ;;  %2406 = vmatprep.subr.bf16.mxu0 %v2586_v39 }
  0x71   : > { %2437 = vmatprep.subr.bf16.mxu1 %v2586_v39 }
  0x72   : > { %2407 = vmatpush3.bf16.msra.mxu0 %v2586_v39 }
  0x73   : > { %2445 = vmatpush3.bf16.msra.mxu1 %v2586_v39  ;;  %2408 = vmatprep.subr.bf16.mxu0 %v2593_v40 }
  0x74   : > { %2438 = vmatprep.subr.bf16.mxu1 %v2593_v40 }
  0x75   : > { %1464 = vmatmul.mubr.bf16.gmra.mxu0 %v2584_v41 }
  0x76   : > { %1561 = vmatmul.mubr.bf16.gmra.mxu1 %v2585_v42  ;;  %1471 = vmatprep.mubr.bf16.mxu0 %v2587_v43 }
  0x77   : > { %1568 = vmatprep.mubr.bf16.mxu1 %v2589_v44  ;;  %2409 = vmatpush3.bf16.msra.mxu0 %v2593_v40 }
  0x78   : > { %2446 = vmatpush3.bf16.msra.mxu1 %v2593_v40  ;;  %2410 = vmatprep.subr.bf16.mxu0 %v2600_v45 }
  0x79   : > { %2439 = vmatprep.subr.bf16.mxu1 %v2600_v45 }
  0x7b   : > { %2411 = vmatpush3.bf16.msra.mxu0 %v2600_v45 }
  0x7c   : > { %2447 = vmatpush3.bf16.msra.mxu1 %v2600_v45  ;;  %2412 = vmatprep.subr.bf16.mxu0 %v2607_v46 }
  0x7d   : > { %1472 = vmatmul.mubr.bf16.gmra.mxu0 %v2591_v47  ;;  %2440 = vmatprep.subr.bf16.mxu1 %v2607_v46 }
  0x7e   : > { %1569 = vmatmul.mubr.bf16.gmra.mxu1 %v2592_v48  ;;  %1479 = vmatprep.mubr.bf16.mxu0 %v2594_v49 }
  0x7f   : > { %1576 = vmatprep.mubr.bf16.mxu1 %v2596_v50  ;;  %2413 = vmatpush3.bf16.msra.mxu0 %v2607_v46 }
  0x80   : > { %2448 = vmatpush3.bf16.msra.mxu1 %v2607_v46  ;;  %2414 = vmatprep.subr.bf16.mxu0 %v2614_v51 }
  0x81   : > { %2441 = vmatprep.subr.bf16.mxu1 %v2614_v51 }
  0x83   : > { %2415 = vmatpush3.bf16.msra.mxu0 %v2614_v51 }
  0x84   : > { %2449 = vmatpush3.bf16.msra.mxu1 %v2614_v51  ;;  %2416 = vmatprep.subr.bf16.mxu0 %v2621_v53 }
  0x85   : > { %1480 = vmatmul.mubr.bf16.gmra.mxu0 %v2598_v52  ;;  %2442 = vmatprep.subr.bf16.mxu1 %v2621_v53 }
  0x86   : > { %1577 = vmatmul.mubr.bf16.gmra.mxu1 %v2599_v54  ;;  %1487 = vmatprep.mubr.bf16.mxu0 %v2601_v55 }
  0x87   : > { %1584 = vmatprep.mubr.bf16.mxu1 %v2603_v56  ;;  %2417 = vmatpush3.bf16.msra.mxu0 %v2621_v53 }
  0x88   : > { %2450 = vmatpush3.bf16.msra.mxu1 %v2621_v53  ;;  %2418 = vmatprep.subr.bf16.mxu0 %v2628_v57 }
  0x89   : > { %2443 = vmatprep.subr.bf16.mxu1 %v2628_v57 }
  0x8b   : > { %2419 = vmatpush3.bf16.msra.mxu0 %v2628_v57 }
  0x8c   : > { %2451 = vmatpush3.bf16.msra.mxu1 %v2628_v57 }
  0x8d   : > { %1488 = vmatmul.mubr.bf16.gmra.mxu0 %v2605_v58 }
  0x8e   : > { %1585 = vmatmul.mubr.bf16.gmra.mxu1 %v2606_v59  ;;  %1495 = vmatprep.mubr.bf16.mxu0 %v2608_v60 }
  0x8f   : > { %1592 = vmatprep.mubr.bf16.mxu1 %v2610_v61 }
  0x95   : > { %1496 = vmatmul.mubr.bf16.gmra.mxu0 %v2612_v62 }
  0x96   : > { %1593 = vmatmul.mubr.bf16.gmra.mxu1 %v2613_v63  ;;  %1503 = vmatprep.mubr.bf16.mxu0 %v2615_v0 }
  0x97   : > { %1600 = vmatprep.mubr.bf16.mxu1 %v2617_v1 }
  0x9d   : > { %1504 = vmatmul.mubr.bf16.gmra.mxu0 %v2619_v2 }
  0x9e   : > { %1601 = vmatmul.mubr.bf16.gmra.mxu1 %v2620_v3  ;;  %1511 = vmatprep.mubr.bf16.mxu0 %v2622_v4 }
  0x9f   : > { %1608 = vmatprep.mubr.bf16.mxu1 %v2624_v5 }
  0xa5   : > { %1512 = vmatmul.mubr.bf16.gmra.mxu0 %v2626_v6 }
  0xa6   : > { %1609 = vmatmul.mubr.bf16.gmra.mxu1 %v2627_v7  ;;  %2420 = vmatprep.mubr.bf16.mxu0 %v2629_v8 }
  0xa7   : > { %2428 = vmatprep.mubr.bf16.mxu1 %v2630_v9 }
  0xad   : > { %2421 = vmatmul.mubr.bf16.vlgmr.msra.gmra.mxu0 %v2631_v10 }
  0xae   : > { %2429 = vmatmul.mubr.bf16.vlgmr.msra.gmra.mxu1 %v2632_v11  ;;  %2424 = vmatprep.mubr.bf16.mxu0 %v2633_v12 }
  0xaf   : > { %2432 = vmatprep.mubr.bf16.mxu1 %v2634_v13 }
  0xb5   : > { %2425 = vmatmul.mubr.bf16.gmra.mxu0 %v2635_v14 }
  0xb6   : > { %2433 = vmatmul.mubr.bf16.gmra.mxu1 %v2636_v15 }
  0xed   : > { %v2148_v16 = vpop.f32.mrf.mxu0 }
  0xee   : > { %v2212_v17 = vpop.f32.mrf.mxu1 }
  0xef   : > { %v2149_v18 = vpop.f32.mrf.mxu0 }
  0xf0   : > { %v2150_v19 = vadd.f32 %v2149_v18, %v2148_v16  ;;  %v2213_v20 = vpop.f32.mrf.mxu1 }
  0xf1   : > { %v2214_v21 = vadd.f32 %v2213_v20, %v2212_v17  ;;  %v2151_v22 = vpop.f32.mrf.mxu0 }
  0xf2   : > { %v2215_v23 = vpop.f32.mrf.mxu1 }
  0xf3   : > { %v2976_v24 = vadd.f32 %v2214_v21, %v2150_v19  ;;  %v2152_v25 = vpop.f32.mrf.mxu0 }
  0xf4   : > { %v2153_v26 = vadd.f32 %v2152_v25, %v2151_v22  ;;  %v2216_v27 = vpop.f32.mrf.mxu1 }
  0xf5   : > { %v2217_v28 = vadd.f32 %v2216_v27, %v2215_v23  ;;  %v2154_v29 = vpop.f32.mrf.mxu0 }
  0xf6   : > { %v2218_v30 = vpop.f32.mrf.mxu1 }
  0xf7   : > { %v2978_v31 = vadd.f32 %v2217_v28, %v2153_v26  ;;  %v2155_v32 = vpop.f32.mrf.mxu0 }
  0xf8   : > { %v2156_v33 = vadd.f32 %v2155_v32, %v2154_v29  ;;  %v2219_v34 = vpop.f32.mrf.mxu1 }
  0xf9   : > { %v2220_v35 = vadd.f32 %v2219_v34, %v2218_v30  ;;  %v2157_v36 = vpop.f32.mrf.mxu0 }
  0xfa   : > { %v2221_v37 = vpop.f32.mrf.mxu1 }
  0xfb   : > { %v2980_v38 = vadd.f32 %v2220_v35, %v2156_v33  ;;  %v2158_v39 = vpop.f32.mrf.mxu0 }
  0xfc   : > { %v2159_v40 = vadd.f32 %v2158_v39, %v2157_v36  ;;  %v2222_v41 = vpop.f32.mrf.mxu1 }
  0xfd   : > { %v2223_v42 = vadd.f32 %v2222_v41, %v2221_v37  ;;  %v2160_v43 = vpop.f32.mrf.mxu0 }
  0xfe   : > { %v2224_v44 = vpop.f32.mrf.mxu1 }
  0xff   : > { %v2982_v45 = vadd.f32 %v2223_v42, %v2159_v40  ;;  %v2161_v46 = vpop.f32.mrf.mxu0 }
 0x100   : > { %v2162_v47 = vadd.f32 %v2161_v46, %v2160_v43  ;;  %v2225_v48 = vpop.f32.mrf.mxu1 }
 0x101   : > { %v2226_v49 = vadd.f32 %v2225_v48, %v2224_v44  ;;  %v2163_v50 = vpop.f32.mrf.mxu0 }
 0x102   : > { %v2227_v51 = vpop.f32.mrf.mxu1 }
 0x103   : > { %v2984_v52 = vadd.f32 %v2226_v49, %v2162_v47  ;;  %v2164_v53 = vpop.f32.mrf.mxu0 }
 0x104   : > { %v2165_v54 = vadd.f32 %v2164_v53, %v2163_v50  ;;  %v2228_v55 = vpop.f32.mrf.mxu1 }
 0x105   : > { %v2229_v56 = vadd.f32 %v2228_v55, %v2227_v51  ;;  %v2166_v57 = vpop.f32.mrf.mxu0 }
 0x106   : > { %v2230_v58 = vpop.f32.mrf.mxu1 }
 0x107   : > { %v2986_v59 = vadd.f32 %v2229_v56, %v2165_v54  ;;  %v2167_v60 = vpop.f32.mrf.mxu0 }
 0x108   : > { %v2168_v61 = vadd.f32 %v2167_v60, %v2166_v57  ;;  %v2231_v62 = vpop.f32.mrf.mxu1 }
 0x109   : > { %v2232_v63 = vadd.f32 %v2231_v62, %v2230_v58  ;;  %v2169_v0 = vpop.f32.mrf.mxu0 }
 0x10a   : > { %v2233_v1 = vpop.f32.mrf.mxu1 }
 0x10b   : > { %v2988_v2 = vadd.f32 %v2232_v63, %v2168_v61  ;;  %v2170_v3 = vpop.f32.mrf.mxu0 }
 0x10c   : > { %v2171_v4 = vadd.f32 %v2170_v3, %v2169_v0  ;;  %v2234_v5 = vpop.f32.mrf.mxu1 }
 0x10d   : > { %v2235_v6 = vadd.f32 %v2234_v5, %v2233_v1  ;;  %v2172_v7 = vpop.f32.mrf.mxu0 }
 0x10e   : > { %v2236_v8 = vpop.f32.mrf.mxu1 }
 0x10f   : > { %v2990_v9 = vadd.f32 %v2235_v6, %v2171_v4  ;;  %v2173_v10 = vpop.f32.mrf.mxu0 }
 0x110   : > { %v2174_v11 = vadd.f32 %v2173_v10, %v2172_v7  ;;  %v2237_v12 = vpop.f32.mrf.mxu1 }
 0x111   : > { %v2238_v13 = vadd.f32 %v2237_v12, %v2236_v8  ;;  %v2175_v14 = vpop.f32.mrf.mxu0 }
 0x112   : > { %v2239_v15 = vpop.f32.mrf.mxu1 }
 0x113   : > { %v2992_v16 = vadd.f32 %v2238_v13, %v2174_v11  ;;  %v2176_v17 = vpop.f32.mrf.mxu0 }
 0x114   : > { %v2177_v18 = vadd.f32 %v2176_v17, %v2175_v14  ;;  %v2240_v19 = vpop.f32.mrf.mxu1 }
 0x115   : > { %v2241_v20 = vadd.f32 %v2240_v19, %v2239_v15  ;;  %v2178_v21 = vpop.f32.mrf.mxu0 }
 0x116   : > { %v2242_v22 = vpop.f32.mrf.mxu1 }
 0x117   : > { %v2994_v23 = vadd.f32 %v2241_v20, %v2177_v18  ;;  %v2179_v25 = vpop.f32.mrf.mxu0 }
 0x118   : > { %v2180_v26 = vadd.f32 %v2179_v25, %v2178_v21  ;;  %v2243_v27 = vpop.f32.mrf.mxu1 }
 0x119   : > { %3136 = vst [vmem:[#allocation2_spill] sm:$0xff] %v2994_v23  ;;  %v2244_v28 = vadd.f32 %v2243_v27, %v2242_v22  ;;  %v2181_v29 = vpop.f32.mrf.mxu0 }
 0x11a   : > { %v2245_v30 = vpop.f32.mrf.mxu1 }
 0x11b   : > { %v2996_v32 = vadd.f32 %v2244_v28, %v2180_v26  ;;  %v2182_v33 = vpop.f32.mrf.mxu0 }
 0x11c   : > { %v2183_v34 = vadd.f32 %v2182_v33, %v2181_v29  ;;  %v2246_v35 = vpop.f32.mrf.mxu1 }
 0x11d   : > { %v2247_v36 = vadd.f32 %v2246_v35, %v2245_v30  ;;  %v2184_v37 = vpop.f32.mrf.mxu0 }
 0x11e   : > { %v2248_v39 = vpop.f32.mrf.mxu1 }
 0x11f   : > { %v2998_v40 = vadd.f32 %v2247_v36, %v2183_v34  ;;  %v2185_v41 = vpop.f32.mrf.mxu0 }
 0x120   : > { %v2186_v42 = vadd.f32 %v2185_v41, %v2184_v37  ;;  %v2249_v43 = vpop.f32.mrf.mxu1 }
 0x121   : > { %3137 = vst [vmem:[#allocation3_spill] sm:$0xff] %v2998_v40  ;;  %v2250_v44 = vadd.f32 %v2249_v43, %v2248_v39  ;;  %v2187_v46 = vpop.f32.mrf.mxu0 }
 0x122   : > { %v2251_v47 = vpop.f32.mrf.mxu1 }
 0x123   : > { %v3000_v48 = vadd.f32 %v2250_v44, %v2186_v42  ;;  %v2188_v49 = vpop.f32.mrf.mxu0 }
 0x124   : > { %v2189_v50 = vadd.f32 %v2188_v49, %v2187_v46  ;;  %v2252_v51 = vpop.f32.mrf.mxu1 }
 0x125   : > { %3138 = vst [vmem:[#allocation4_spill] sm:$0xff] %v3000_v48  ;;  %v2253_v53 = vadd.f32 %v2252_v51, %v2251_v47  ;;  %v2190_v54 = vpop.f32.mrf.mxu0 }
 0x126   : > { %v2254_v55 = vpop.f32.mrf.mxu1 }
 0x127   : > { %v3002_v56 = vadd.f32 %v2253_v53, %v2189_v50  ;;  %v2191_v57 = vpop.f32.mrf.mxu0 }
 0x128   : > { %v2192_v58 = vadd.f32 %v2191_v57, %v2190_v54  ;;  %v2255_v60 = vpop.f32.mrf.mxu1 }
 0x129   : > { %3139 = vst [vmem:[#allocation5_spill] sm:$0xff] %v3002_v56  ;;  %v2256_v61 = vadd.f32 %v2255_v60, %v2254_v55  ;;  %v2193_v62 = vpop.f32.mrf.mxu0 }
 0x12a   : > { %v2257_v63 = vpop.f32.mrf.mxu1 }
 0x12b   : > { %v3004_v0 = vadd.f32 %v2256_v61, %v2192_v58  ;;  %v2194_v1 = vpop.f32.mrf.mxu0 }
 0x12c   : > { %v2195_v3 = vadd.f32 %v2194_v1, %v2193_v62  ;;  %v2258_v4 = vpop.f32.mrf.mxu1 }
 0x12d   : > { %3140 = vst [vmem:[#allocation6_spill] sm:$0xff] %v3004_v0  ;;  %v2259_v5 = vadd.f32 %v2258_v4, %v2257_v63  ;;  %v2276_v6 = vpop.f32.mrf.mxu0 }
 0x12e   : > { %v2340_v7 = vpop.f32.mrf.mxu1 }
 0x12f   : > { %v3006_v8 = vadd.f32 %v2259_v5, %v2195_v3  ;;  %v2277_v10 = vpop.f32.mrf.mxu0 }
 0x130   : > { %v2278_v11 = vadd.f32 %v2277_v10, %v2276_v6  ;;  %v2341_v12 = vpop.f32.mrf.mxu1 }
 0x131   : > { %3141 = vst [vmem:[#allocation7_spill] sm:$0xff] %v3006_v8  ;;  %v2279_v13 = vpop.f32.mrf.mxu0  ;;  %v2342_v15 = vadd.f32 %v2341_v12, %v2340_v7 }
 0x132   : > { %v1458_v14 = vadd.f32 %v2278_v11, %v2976_v24  ;;  %v2343_v17 = vpop.f32.mrf.mxu1 }
 0x133   : > { %v2280_v18 = vpop.f32.mrf.mxu0 }
 0x134   : > { %v2344_v19 = vpop.f32.mrf.mxu1  ;;  %v3009_v20 = vadd.f32 %v2342_v15, %v1458_v14  ;;  %v2281_v14 = vadd.f32 %v2280_v18, %v2279_v13 }
 0x135   : > { %v2282_v21 = vpop.f32.mrf.mxu0 }
 0x136   : > { %3142 = vst [vmem:[#allocation8_spill] sm:$0xff] %v3009_v20  ;;  %v2346_v22 = vpop.f32.mrf.mxu1 }
 0x137   : > { %v2283_v25 = vpop.f32.mrf.mxu0 }
 0x138   : > { %v2347_v26 = vpop.f32.mrf.mxu1  ;;  %v2284_v20 = vadd.f32 %v2283_v25, %v2282_v21 }
 0x139   : > { %v2285_v27 = vpop.f32.mrf.mxu0 }
 0x13a   : > { %v2349_v28 = vpop.f32.mrf.mxu1 }
 0x13b   : > { %v2286_v29 = vpop.f32.mrf.mxu0 }
 0x13c   : > { %v2350_v30 = vpop.f32.mrf.mxu1  ;;  %v2287_v0 = vadd.f32 %v2286_v29, %v2285_v27  ;;  %v2348_v27 = vadd.f32 %v2347_v26, %v2346_v22 }
 0x13d   : > { %v2288_v33 = vpop.f32.mrf.mxu0 }
 0x13e   : > { %v2352_v34 = vpop.f32.mrf.mxu1  ;;  %v1469_v13 = vadd.f32 %v2287_v0, %v2982_v45 }
 0x13f   : > { %v2289_v35 = vpop.f32.mrf.mxu0 }
 0x140   : > { %v2353_v36 = vpop.f32.mrf.mxu1 }
 0x141   : > { %v2291_v37 = vpop.f32.mrf.mxu0 }
 0x142   : > { %v3011_v24 = vpop.f32.mrf.mxu1 }
 0x143   : > { %v2292_v39 = vpop.f32.mrf.mxu0 }
 0x144   : > { %v3013_v41 = vpop.f32.mrf.mxu1  ;;  %v2293_v29 = vadd.f32 %v2292_v39, %v2291_v37 }
 0x145   : > { %v2294_v42 = vpop.f32.mrf.mxu0 }
 0x146   : > { %v2358_v43 = vpop.f32.mrf.mxu1  ;;  %v3045_v39 = vadd.f32 %v2293_v29, %v2986_v59  ;;  %v3161_v29 = vld [vmem:[#allocation8_spill] sm:$0xff] }
 0x147   : > { %v2295_v44 = vpop.f32.mrf.mxu0 }
 0x148   : > { %v2359_v46 = vpop.f32.mrf.mxu1 }
 0x149   : > { %v2297_v47 = vpop.f32.mrf.mxu0 }
 0x14a   : > { %v3015_v49 = vpop.f32.mrf.mxu1 }
 0x14b   : > { %3143 = vst [vmem:[#allocation9_spill] sm:$0xff] %v3015_v49  ;;  %v2298_v50 = vpop.f32.mrf.mxu0  ;;  %v2296_v49 = vadd.f32 %v2295_v44, %v2294_v42  ;;  %v2351_v42 = vadd.f32 %v2350_v30, %v2349_v28  ;;  %v2354_v44 = vadd.f32 %v2353_v36, %v2352_v34  ;;  %v3049_v28 = vadd.f32 %v3013_v41, %v3011_v24 }
 0x14c   : > { %v3017_v51 = vpop.f32.mrf.mxu1 }
 0x14d   : > { %3144 = vst [vmem:[#allocation10_spill] sm:$0xff] %v3017_v51  ;;  %v2300_v53 = vpop.f32.mrf.mxu0  ;;  %v1461_v51 = vadd.f32 %v2281_v14, %v2978_v31  ;;  %v1566_v37 = vadd.f32 %v2351_v42, %v1469_v13 }
 0x14e   : > { %v3019_v54 = vpop.f32.mrf.mxu1 }
 0x14f   : > { %3145 = vst [vmem:[#allocation11_spill] sm:$0xff] %v3019_v54  ;;  %v2301_v55 = vpop.f32.mrf.mxu0  ;;  %v1466_v54 = vadd.f32 %v2284_v20, %v2980_v38 }
 0x150   : > { %v2365_v57 = vpop.f32.mrf.mxu1  ;;  %v2302_v21 = vadd.f32 %v2301_v55, %v2300_v53  ;;  %v3153_v53 = vld [vmem:[#allocation4_spill] sm:$0xff] }
 0x151   : > { %v2303_v58 = vpop.f32.mrf.mxu0  ;;  %v1563_v26 = vadd.f32 %v2348_v27, %v1466_v54 }
 0x152   : > { %v3021_v60 = vpop.f32.mrf.mxu1  ;;  %v1490_v20 = vadd.f32 %v2302_v21, %v2992_v16  ;;  %v3151_v16 = vld [vmem:[#allocation2_spill] sm:$0xff]  ;;  %v3154_v24 = vld [vmem:[#allocation9_spill] sm:$0xff] }
 0x153   : > { %3146 = vst [vmem:[#allocation12_spill] sm:$0xff] %v3021_v60  ;;  %v2304_v61 = vpop.f32.mrf.mxu0  ;;  %v2290_v60 = vadd.f32 %v2289_v35, %v2288_v33  ;;  %v1482_v33 = vadd.f32 %v2296_v49, %v2988_v2  ;;  %v3160_v21 = vld [vmem:[#allocation6_spill] sm:$0xff] }
 0x154   : > { %v3023_v62 = vpop.f32.mrf.mxu1  ;;  %v3155_v41 = vld [vmem:[#allocation10_spill] sm:$0xff] }
 0x155   : > { %3147 = vst [vmem:[#allocation13_spill] sm:$0xff] %v3023_v62  ;;  %v2306_v63 = vpop.f32.mrf.mxu0  ;;  %v1474_v18 = vadd.f32 %v2290_v60, %v2984_v52  ;;  %v2363_v60 = vadd.f32 %v3155_v41, %v3154_v24 }
 0x156   : > { %v2370_v1 = vpop.f32.mrf.mxu1  ;;  %v3150_v36 = vld [vmem:[#allocation11_spill] sm:$0xff] }
 0x157   : > { %v2307_v3 = vpop.f32.mrf.mxu0  ;;  %v3042_v2 = vadd.f32 %v2354_v44, %v1474_v18 }
 0x158   : > { %v2371_v4 = vpop.f32.mrf.mxu1  ;;  %v2308_v23 = vadd.f32 %v2307_v3, %v2306_v63  ;;  %v2360_v3 = vadd.f32 %v2359_v46, %v2358_v43  ;;  %v2366_v43 = vadd.f32 %v2365_v57, %v3150_v36 }
 0x159   : > { %v2309_v5 = vpop.f32.mrf.mxu0  ;;  %v2372_v30 = vadd.f32 %v2371_v4, %v2370_v1 }
 0x15a   : > { %v3025_v6 = vpop.f32.mrf.mxu1  ;;  %v1498_v38 = vadd.f32 %v2308_v23, %v2996_v32  ;;  %v1579_v23 = vadd.f32 %v2360_v3, %v1482_v33  ;;  %v1587_v57 = vadd.f32 %v2366_v43, %v1490_v20  ;;  %v3163_v20 = vld [vmem:[#allocation5_spill] sm:$0xff] }
 0x15b   : > { %3148 = vst [vmem:[#allocation14_spill] sm:$0xff] %v3025_v6  ;;  %v2310_v7 = vpop.f32.mrf.mxu0  ;;  %v2345_v6 = vadd.f32 %v2344_v19, %v2343_v17  ;;  %v2299_v17 = vadd.f32 %v2298_v50, %v2297_v47  ;;  %v2305_v19 = vadd.f32 %v2304_v61, %v2303_v58  ;;  %v3152_v50 = vld [vmem:[#allocation3_spill] sm:$0xff]  ;;  %v3156_v61 = vld [vmem:[#allocation12_spill] sm:$0xff] }
 0x15c   : > { %v3027_v10 = vpop.f32.mrf.mxu1  ;;  %v2311_v45 = vadd.f32 %v2310_v7, %v2309_v5  ;;  %v1595_v58 = vadd.f32 %v2372_v30, %v1498_v38  ;;  %v3157_v1 = vld [vmem:[#allocation13_spill] sm:$0xff] }
 0x15d   : > { %3149 = vst [vmem:[#allocation15_spill] sm:$0xff] %v3027_v10  ;;  %v2312_v11 = vpop.f32.mrf.mxu0  ;;  %v3038_v35 = vadd.f32 %v2345_v6, %v1461_v51  ;;  %v1485_v32 = vadd.f32 %v2299_v17, %v2990_v9  ;;  %v1493_v46 = vadd.f32 %v2305_v19, %v3151_v16  ;;  %v2369_v4 = vadd.f32 %v3157_v1, %v3156_v61  ;;  %v3162_v17 = vld [vmem:[#allocation7_spill] sm:$0xff] }
 0x15e   : > { %v2376_v12 = vpop.f32.mrf.mxu1  ;;  %v1501_v51 = vadd.f32 %v2311_v45, %v3152_v50 }
 0x15f   : > { %v2313_v15 = vpop.f32.mrf.mxu0  ;;  %v1590_v42 = vadd.f32 %v2369_v4, %v1493_v46  ;;  %v1582_v44 = vadd.f32 %v2363_v60, %v1485_v32 }
 0x160   : > { %v2377_v56 = vpop.f32.mrf.mxu1  ;;  %v2314_v0 = vadd.f32 %v2313_v15, %v2312_v11  ;;  %v3065_v15 = vld [vmem:[%s3133_s2] ss:$0 sm:$0xff] }
 0x161   : > { %v2315_v8 = vpop.f32.mrf.mxu0  ;;  %v2378_v11 = vadd.f32 %v2377_v56, %v2376_v12 }
 0x162   : > { %v3029_v62 = vpop.f32.mrf.mxu1  ;;  %v1506_v59 = vadd.f32 %v2314_v0, %v3153_v53  ;;  %v3158_v6 = vld [vmem:[#allocation14_spill] sm:$0xff] }
 0x163   : > { %v2316_v48 = vpop.f32.mrf.mxu0 }
 0x164   : > { %v3032_v40 = vpop.f32.mrf.mxu1  ;;  %v3159_v7 = vld [vmem:[#allocation15_spill] sm:$0xff]  ;;  %v2317_v14 = vadd.f32 %v2316_v48, %v2315_v8  ;;  %v1603_v8 = vadd.f32 %v2378_v11, %v1506_v59 }
 0x165   : > { %v2318_v10 = vpop.f32.mrf.mxu0  ;;  %v2381_v12 = vadd.f32 %v3032_v40, %v3029_v62 }
 0x166   : > { %v2382_v25 = vpop.f32.mrf.mxu1 }
 0x167   : > { %v2319_v31 = vpop.f32.mrf.mxu0 }
 0x168   : > { %v2383_v63 = vpop.f32.mrf.mxu1  ;;  %v2320_v47 = vadd.f32 %v2319_v31, %v2318_v10  ;;  %v2375_v10 = vadd.f32 %v3159_v7, %v3158_v6 }
 0x169   : > { %v2321_v52 = vpop.f32.mrf.mxu0  ;;  %v2384_v38 = vadd.f32 %v2383_v63, %v2382_v25 }
 0x16a   : > { %v2385_v22 = vpop.f32.mrf.mxu1  ;;  %v1514_v27 = vadd.f32 %v2320_v47, %v3160_v21  ;;  %v1598_v48 = vadd.f32 %v2375_v10, %v1501_v51 }
 0x16b   : > { %v2322_v34 = vpop.f32.mrf.mxu0 }
 0x16c   : > { %v2386_v49 = vpop.f32.mrf.mxu1  ;;  %v2323_v54 = vadd.f32 %v2322_v34, %v2321_v52  ;;  %v3077_v34 = vld [vmem:[%s3134_s3] ss:$0 sm:$0xff]  ;;  %v1611_v63 = vadd.f32 %v2384_v38, %v1514_v27 }
 0x16d   : > { %v2422_v55 = vpop.f32.mrf.mxu0  ;;  %v2387_v30 = vadd.f32 %v2386_v49, %v2385_v22 }
 0x16e   : > { %v1660_v9 = vadd.f32 %v2422_v55, %v1563_v26  ;;  %v2430_v5 = vpop.f32.mrf.mxu1  ;;  %v1517_v19 = vadd.f32 %v2323_v54, %v3162_v17  ;;  %v1509_v26 = vadd.f32 %v2317_v14, %v3163_v20 }
 0x16f   : > { %v1692_v13 = vadd.f32 %v2430_v5, %v1595_v58  ;;  %v1651_v18 = vpop.f32.mrf.mxu0 }
 0x170   : > { %v1652_v33 = vadd.f32 %v1651_v18, %v3161_v29  ;;  %v1683_v31 = vpop.f32.mrf.mxu1  ;;  %v1723_v45 = vmul.f32 %v3065_v15, %v1660_v9  ;;  %v1614_v49 = vadd.f32 %v2387_v30, %v1517_v19  ;;  %v1574_v18 = vadd.f32 %v3049_v28, %v3045_v39 }
 0x171   : > { %v1684_v3 = vadd.f32 %v1683_v31, %v1587_v57  ;;  %v2423_v56 = vpop.f32.mrf.mxu0  ;;  %v1731_v32 = vmul.f32 %v3065_v15, %v1692_v13 }
 0x172   : > { %v1663_v0 = vadd.f32 %v2423_v56, %v1566_v37  ;;  %v2431_v52 = vpop.f32.mrf.mxu1  ;;  %v1721_v16 = vmul.f32 %v3065_v15, %v1652_v33  ;;  %v1746_v50 = vadd.f32 %v3077_v34, %v1723_v45  ;;  %v1606_v33 = vadd.f32 %v2381_v12, %v1509_v26 }
 0x173   : > { %v1695_v36 = vadd.f32 %v2431_v52, %v1598_v48  ;;  %v1654_v43 = vpop.f32.mrf.mxu0  ;;  %v1729_v22 = vmul.f32 %v3065_v15, %v1684_v3  ;;  %v1754_v55 = vadd.f32 %v3077_v34, %v1731_v32 }
 0x174   : > { %v1724_v40 = vmul.f32 %v3065_v15, %v1663_v0  ;;  %v1655_v62 = vadd.f32 %v1654_v43, %v3038_v35  ;;  %v1686_v25 = vpop.f32.mrf.mxu1  ;;  %v1744_v60 = vadd.f32 %v3077_v34, %v1721_v16 }
 0x175   : > { %v1732_v37 = vmul.f32 %v3065_v15, %v1695_v36  ;;  %v1687_v46 = vadd.f32 %v1686_v25, %v1590_v42  ;;  %v2426_v47 = vpop.f32.mrf.mxu0  ;;  %v1752_v9 = vadd.f32 %v3077_v34, %v1729_v22 }
 0x176   : > { %v1747_v51 = vadd.f32 %v3077_v34, %v1724_v40  ;;  %v1722_v53 = vmul.f32 %v3065_v15, %v1655_v62  ;;  %v1676_v59 = vadd.f32 %v2426_v47, %v1579_v23  ;;  %v2434_v54 = vpop.f32.mrf.mxu1 }
 0x177   : > { %v1755_v35 = vadd.f32 %v3077_v34, %v1732_v37  ;;  %v1730_v58 = vmul.f32 %v3065_v15, %v1687_v46  ;;  %v1708_v24 = vadd.f32 %v2434_v54, %v1611_v63  ;;  %v1667_v41 = vpop.f32.mrf.mxu0 }
 0x178   : > { %v2093_v61 = vpack.c.bf16 %v1747_v51, %v1746_v50  ;;  %v1745_v23 = vadd.f32 %v3077_v34, %v1722_v53  ;;  %v1668_v1 = vadd.f32 %v1667_v41, %v3042_v2  ;;  %v1699_v4 = vpop.f32.mrf.mxu1  ;;  %v1727_v11 = vmul.f32 %v3065_v15, %v1676_v59 }
 0x179   : > { %v2113_v5 = vpack.c.bf16 %v1755_v35, %v1754_v55  ;;  %v1753_v57 = vadd.f32 %v3077_v34, %v1730_v58  ;;  %v1700_v6 = vadd.f32 %v1699_v4, %v1603_v8  ;;  %v2427_v7 = vpop.f32.mrf.mxu0  ;;  %v1735_v21 = vmul.f32 %v3065_v15, %v1708_v24 }
 0x17a   : > { %2125 = vst [vmem:[%s3093_s30 + $0x8] sm:$0xff] %v2093_v61   ;;  %v2088_v10 = vpack.c.bf16 %v1745_v23, %v1744_v60  ;;  %v1679_v14 = vadd.f32 %v2427_v7, %v1582_v44  ;;  %v2435_v13 = vpop.f32.mrf.mxu1  ;;  %v1725_v31 = vmul.f32 %v3065_v15, %v1668_v1  ;;  %v1750_v3 = vadd.f32 %v3077_v34, %v1727_v11 }
 0x17b   : > { %2129 = vst [vmem:[%s3093_s30 + $0x28] sm:$0xff] %v2113_v5   ;;  %v2108_v2 = vpack.c.bf16 %v1753_v57, %v1752_v9  ;;  %v1711_v27 = vadd.f32 %v2435_v13, %v1614_v49  ;;  %v1670_v29 = vpop.f32.mrf.mxu0  ;;  %v1733_v44 = vmul.f32 %v3065_v15, %v1700_v6  ;;  %v1758_v8 = vadd.f32 %v3077_v34, %v1735_v21 }
 0x17c   : > { %2089 = vst [vmem:[%s3093_s30] sm:$0xff] %v2088_v10   ;;  %v1728_v42 = vmul.f32 %v3065_v15, %v1679_v14  ;;  %v1671_v17 = vadd.f32 %v1670_v29, %v1574_v18  ;;  %v1702_v19 = vpop.f32.mrf.mxu1  ;;  %v1748_v45 = vadd.f32 %v3077_v34, %v1725_v31 }
 0x17d   : > { %2128 = vst [vmem:[%s3093_s30 + $0x20] sm:$0xff] %v2108_v2   ;;  %v1736_v39 = vmul.f32 %v3065_v15, %v1711_v27  ;;  %v1703_v28 = vadd.f32 %v1702_v19, %v1606_v33  ;;  %v1756_v20 = vadd.f32 %v3077_v34, %v1733_v44 }
 0x17e   : > { %v1751_v56 = vadd.f32 %v3077_v34, %v1728_v42  ;;  %v1726_v48 = vmul.f32 %v3065_v15, %v1671_v17 }
 0x17f   : > { %v1759_v12 = vadd.f32 %v3077_v34, %v1736_v39  ;;  %v1734_v38 = vmul.f32 %v3065_v15, %v1703_v28 }
 0x180   : > { %v2103_v0 = vpack.c.bf16 %v1751_v56, %v1750_v3  ;;  %v1749_v52 = vadd.f32 %v3077_v34, %v1726_v48 }
 0x181   : > { %v2123_v26 = vpack.c.bf16 %v1759_v12, %v1758_v8  ;;  %v1757_v30 = vadd.f32 %v3077_v34, %v1734_v38 }
 0x182   : > { %2127 = vst [vmem:[%s3093_s30 + $0x18] sm:$0xff] %v2103_v0   ;;  %v2098_v32 = vpack.c.bf16 %v1749_v52, %v1748_v45 }
 0x183   : > { %2131 = vst [vmem:[%s3093_s30 + $0x38] sm:$0xff] %v2123_v26   ;;  %v2118_v36 = vpack.c.bf16 %v1757_v30, %v1756_v20 }
 0x184   : > { %2126 = vst [vmem:[%s3093_s30 + $0x10] sm:$0xff] %v2098_v32  }
 0x185   : > { %2130 = vst [vmem:[%s3093_s30 + $0x30] sm:$0xff] %v2118_v36  }
 0x186 PF: > { %s14_s15 = sadd.s32 1, %s2643_s15  }
 0x187   : > { %p11_p4 = scmp.ge.s32.totalorder %s14_s15, 6  }
 0x189   :  { %13 = sbr.rel (!%p11_p4) target bundleno = 1 (0x1), region = 66 }

// kernel: model_forward.8
= control target key start
LH: loop header
LB: loop body
LE: loop exit
PB: predicated region body
PF: predicated region fallthrough
CT: control target
= control target key end

     0   :  { %s1107_s21 = smov 0   ;;  %s1328_s0 = inlined_call_operand.vmem [shape: bf16[512,256], index: 0, kind: input, shape index: {}]   ;;  %s1329_s1 = inlined_call_operand.vmem [shape: f32[1,256], index: 1, kind: input, shape index: {}]   ;;  %s1330_s2 = inlined_call_operand.vmem [shape: f32[1,256], index: 2, kind: input, shape index: {}]   ;;  %s1331_s3 = inlined_call_operand.vmem [shape: bf16[256,128], index: 3, kind: input, shape index: {}]   ;;  %s1332_s4 = inlined_call_operand.vmem [shape: f32[1,128], index: 4, kind: input, shape index: {}]   ;;  %s1333_s5 = inlined_call_operand.vmem [shape: f32[1,128], index: 5, kind: input, shape index: {}]   ;;  %s1334_s6 = inlined_call_operand.vmem [shape: bf16[512,128], index: 6, kind: output, shape index: {}]  }
   0x1 LB: > { %s850_s22 = sadd.s32 4294967295, %s1070_s21   ;;  %p854_p0 = scmp.ge.s32.totalorder %s1070_s21, 1  ;;  %s1070_s21 = sphi %s1107_s21, %s16_s21  }
   0x2   : > { %p214_p1 = scmp.lt.s32.totalorder %s1070_s21, 5 }
   0x4   : > { %p215_p2 = pnand %p854_p0, %p214_p1 }
   0x5   : > { %s855_s25 = sshll.u32 (!%p215_p2), %s850_s22, 4 }
   0x6   : > { %218 = sbr.rel (%p215_p2) target bundleno = 276 (0x114), region = 44  ;;  %p246_p3 = scmp.lt.s32.totalorder (!%p215_p2), %s855_s25, 63 }
   0xb   : > { %v1048_v0 = vld [vmem:[%s1331_s3 + $0x78] sm:$0xff]   ;;  %v1050_v2 = vld [vmem:[%s1331_s3 + $0x70] sm:$0xff]   ;;  %v1052_v4 = vld [vmem:[%s1331_s3 + $0x68] sm:$0xff]   ;;  %v309_v5 = vlaneseq  ;;  %s1336_s25 = smov (!%p246_p3, %s855_s25), 63 }
   0xc   : > { %v1049_v1 = vld [vmem:[%s1331_s3 + $0x38] sm:$0xff]   ;;  %960 = vmatprep.subr.bf16.mxu0 %v1048_v0  ;;  %1024 = vmatprep.subr.bf16.mxu1 %v1048_v0  ;;  %v1051_v3 = vld [vmem:[%s1331_s3 + $0x30] sm:$0xff]   ;;  %v1053_v6 = vld [vmem:[%s1331_s3 + $0x28] sm:$0xff]   ;;  %s896_s14 = sshll.u32 %s1336_s25, 3  ;;  %s859_s23 = sshll.u32 %s1336_s25, 2 }
   0xd   : > { %961 = vmatpush3.bf16.msra.mxu0 %v1049_v1  ;;  %1032 = vmatpush3.bf16.msra.mxu1 %v1049_v1  ;;  %v1054_v7 = vld [vmem:[%s1331_s3 + $0x60] sm:$0xff]   ;;  %v310_v8 = vshrl.u32 %v309_v5, 7  ;;  %v1056_v10 = vld [vmem:[%s1331_s3 + $0x58] sm:$0xff]   ;;  %s1148_s22 = scalar_lea.vmem %s1328_s0, %s896_s14  ;;  %v1058_v14 = vld [vmem:[%s1331_s3 + $0x50] sm:$0xff]   ;;  %s1291_s25 = scalar_lea.vmem %s1334_s6, %s859_s23 }
   0xe   : > { %962 = vmatprep.subr.bf16.mxu0 %v1050_v2  ;;  %1025 = vmatprep.subr.bf16.mxu1 %v1050_v2  ;;  %v1055_v9 = vld [vmem:[%s1331_s3 + $0x20] sm:$0xff]   ;;  %v1057_v12 = vld [vmem:[%s1331_s3 + $0x18] sm:$0xff]   ;;  %v260_v16 = vld [vmem:[%s1148_s22 + $0x8] sm:$0xff] }
   0xf   : > { %v311_v11 = vsub.s32 0, %v310_v8  ;;  %v315_v13 = vsub.s32 1, %v310_v8  ;;  %v259_v15 = vld [vmem:[%s1148_s22] sm:$0xff]  ;;  %v277_v20 = vunpack.c.l.bf16 %v260_v16  ;;  %v278_v21 = vunpack.c.h.bf16 %v260_v16  ;;  %v268_v24 = vld [vmem:[%s1148_s22 + $0x48] sm:$0xff]  ;;  %v1175_v29 = vld [vmem:[%s1148_s22 + $0x10] sm:$0xff] }
  0x10   : > { %v307_v17 = vld [vmem:[%s1329_s1] sm:$0x3]  ;;  %v275_v18 = vunpack.c.l.bf16 %v259_v15  ;;  %v276_v19 = vunpack.c.h.bf16 %v259_v15  ;;  %v1059_v30 = vld [vmem:[%s1331_s3 + $0x10] sm:$0xff]   ;;  %v293_v33 = vunpack.c.l.bf16 %v268_v24  ;;  %v294_v34 = vunpack.c.h.bf16 %v268_v24  ;;  %v1060_v35 = vld [vmem:[%s1331_s3 + $0x48] sm:$0xff]  }
  0x11   : > { %963 = vmatpush3.bf16.msra.mxu0 %v1051_v3  ;;  %1033 = vmatpush3.bf16.msra.mxu1 %v1051_v3  ;;  %v351_v22 = vld [vmem:[%s1330_s2] sm:$0x3]  ;;  %v1166_v25 = vrot.slane %v307_v17, %v311_v11  ;;  %v1168_v26 = vrot.slane %v307_v17, %v315_v13  ;;  %v262_v39 = vld [vmem:[%s1148_s22 + $0x18] sm:$0xff]  ;;  %v280_v40 = vunpack.c.h.bf16 %v1175_v29  ;;  %v1061_v49 = vld [vmem:[%s1331_s3 + $0x8] sm:$0xff]  }
  0x12   : > { %964 = vmatprep.subr.bf16.mxu0 %v1052_v4  ;;  %1026 = vmatprep.subr.bf16.mxu1 %v1052_v4  ;;  %v267_v23 = vld [vmem:[%s1148_s22 + $0x40] sm:$0xff]  ;;  %v1170_v27 = vrot.slane %v351_v22, %v311_v11  ;;  %v1172_v28 = vrot.slane %v351_v22, %v315_v13  ;;  %v282_v53 = vunpack.c.h.bf16 %v262_v39  ;;  %v269_v59 = vld [vmem:[%s1148_s22 + $0x50] sm:$0xff]  ;;  %v270_v0 = vld [vmem:[%s1148_s22 + $0x58] sm:$0xff]  ;;  %v279_v13 = vunpack.c.l.bf16 %v1175_v29 }
  0x13   : > { %v291_v31 = vunpack.c.l.bf16 %v267_v23  ;;  %v292_v32 = vunpack.c.h.bf16 %v267_v23  ;;  %v320_v36 = vmul.f32 %v1168_v26, %v276_v19  ;;  %v322_v37 = vmul.f32 %v1168_v26, %v278_v21  ;;  %v1062_v54 = vld [vmem:[%s1331_s3 + $0x40] sm:$0xff]  }
  0x14   : > { %v319_v38 = vmul.f32 %v1166_v25, %v275_v18  ;;  %v338_v42 = vmul.f32 %v1168_v26, %v294_v34  ;;  %v321_v43 = vmul.f32 %v1166_v25, %v277_v20  ;;  %v337_v48 = vmul.f32 %v1166_v25, %v293_v33  ;;  %v1063_v5 = vld [vmem:[%s1331_s3] sm:$0xff]  }
  0x15   : > { %965 = vmatpush3.bf16.msra.mxu0 %v1053_v6  ;;  %1034 = vmatpush3.bf16.msra.mxu1 %v1053_v6  ;;  %v336_v41 = vmul.f32 %v1168_v26, %v292_v32  ;;  %v335_v44 = vmul.f32 %v1166_v25, %v291_v31  ;;  %v364_v45 = vadd.f32 %v1172_v28, %v320_v36  ;;  %v281_v16 = vunpack.c.l.bf16 %v262_v39  ;;  %v263_v18 = vld [vmem:[%s1148_s22 + $0x20] sm:$0xff]  ;;  %v264_v31 = vld [vmem:[%s1148_s22 + $0x28] sm:$0xff] }
  0x16   : > { %966 = vmatprep.subr.bf16.mxu0 %v1054_v7  ;;  %1027 = vmatprep.subr.bf16.mxu1 %v1054_v7  ;;  %v366_v46 = vadd.f32 %v1172_v28, %v322_v37  ;;  %v363_v47 = vadd.f32 %v1170_v27, %v319_v38  ;;  %v382_v51 = vadd.f32 %v1172_v28, %v338_v42  ;;  %v295_v17 = vunpack.c.l.bf16 %v269_v59  ;;  %v271_v36 = vld [vmem:[%s1148_s22 + $0x60] sm:$0xff] }
  0x17   : > { %v380_v50 = vadd.f32 %v1172_v28, %v336_v41  ;;  %v365_v52 = vadd.f32 %v1170_v27, %v321_v43  ;;  %v396_v55 = vmax.f32 %v364_v45, 0.0  ;;  %v379_v58 = vadd.f32 %v1170_v27, %v335_v44  ;;  %v272_v41 = vld [vmem:[%s1148_s22 + $0x68] sm:$0xff] }
  0x18   : > { %v398_v56 = vmax.f32 %v366_v46, 0.0  ;;  %v395_v57 = vmax.f32 %v363_v47, 0.0  ;;  %v414_v61 = vmax.f32 %v382_v51, 0.0  ;;  %v381_v63 = vadd.f32 %v1170_v27, %v337_v48 }
  0x19   : > { %967 = vmatpush3.bf16.msra.mxu0 %v1055_v9  ;;  %1035 = vmatpush3.bf16.msra.mxu1 %v1055_v9  ;;  %v412_v60 = vmax.f32 %v380_v50, 0.0  ;;  %v397_v62 = vmax.f32 %v365_v52, 0.0  ;;  %v411_v2 = vmax.f32 %v379_v58, 0.0  ;;  %v324_v3 = vmul.f32 %v1168_v26, %v280_v40 }
  0x1a   : > { %968 = vmatprep.subr.bf16.mxu0 %v1056_v10  ;;  %1028 = vmatprep.subr.bf16.mxu1 %v1056_v10  ;;  %v428_v1 = vpack.c.bf16 %v398_v56, %v396_v55  ;;  %v326_v4 = vmul.f32 %v1168_v26, %v282_v53  ;;  %v413_v8 = vmax.f32 %v381_v63, 0.0  ;;  %v296_v9 = vunpack.c.h.bf16 %v269_v59 }
  0x1b   : > { %v436_v6 = vpack.c.bf16 %v414_v61, %v412_v60  ;;  %v427_v7 = vpack.c.bf16 %v397_v62, %v395_v57  ;;  %v368_v10 = vadd.f32 %v1172_v28, %v324_v3  ;;  %v323_v22 = vmul.f32 %v1166_v25, %v279_v13  ;;  %v265_v62 = vld [vmem:[%s1148_s22 + $0x30] sm:$0xff] }
  0x1c   : > { %v370_v11 = vadd.f32 %v1172_v28, %v326_v4  ;;  %603 = vmatprep.mubr.bf16.mxu0 %v428_v1  ;;  %v340_v15 = vmul.f32 %v1168_v26, %v296_v9  ;;  %v325_v24 = vmul.f32 %v1166_v25, %v281_v16  ;;  %v297_v29 = vunpack.c.l.bf16 %v270_v0 }
  0x1d   : > { %969 = vmatpush3.bf16.msra.mxu0 %v1057_v12  ;;  %1036 = vmatpush3.bf16.msra.mxu1 %v1057_v12  ;;  %v298_v12 = vunpack.c.h.bf16 %v270_v0  ;;  %v400_v19 = vmax.f32 %v368_v10, 0.0  ;;  %v367_v34 = vadd.f32 %v1170_v27, %v323_v22  ;;  %v286_v44 = vunpack.c.h.bf16 %v264_v31 }
  0x1e   : > { %970 = vmatprep.subr.bf16.mxu0 %v1058_v14  ;;  %1029 = vmatprep.subr.bf16.mxu1 %v1058_v14  ;;  %v435_v14 = vpack.c.bf16 %v413_v8, %v411_v2  ;;  %v402_v20 = vmax.f32 %v370_v11, 0.0  ;;  %v384_v23 = vadd.f32 %v1172_v28, %v340_v15  ;;  %v369_v38 = vadd.f32 %v1170_v27, %v325_v24 }
  0x1f   : > { %635 = vmatprep.mubr.bf16.mxu1 %v436_v6  ;;  %v342_v21 = vmul.f32 %v1168_v26, %v298_v12  ;;  %v341_v39 = vmul.f32 %v1166_v25, %v297_v29  ;;  %v399_v43 = vmax.f32 %v367_v34, 0.0  ;;  %v330_v51 = vmul.f32 %v1168_v26, %v286_v44  ;;  %v273_v12 = vld [vmem:[%s1148_s22 + $0x70] sm:$0xff] }
  0x20   : > { %v430_v32 = vpack.c.bf16 %v402_v20, %v400_v19  ;;  %v416_v37 = vmax.f32 %v384_v23, 0.0  ;;  %v401_v46 = vmax.f32 %v369_v38, 0.0  ;;  %v302_v53 = vunpack.c.h.bf16 %v272_v41 }
  0x21   : > { %971 = vmatpush3.bf16.msra.mxu0 %v1059_v30  ;;  %1037 = vmatpush3.bf16.msra.mxu1 %v1059_v30  ;;  %v339_v30 = vmul.f32 %v1166_v25, %v295_v17  ;;  %v386_v33 = vadd.f32 %v1172_v28, %v342_v21  ;;  %v385_v47 = vadd.f32 %v1170_v27, %v341_v39  ;;  %v283_v57 = vunpack.c.l.bf16 %v263_v18  ;;  %v274_v17 = vld [vmem:[%s1148_s22 + $0x78] sm:$0xff] }
  0x22   : > { %972 = vmatprep.subr.bf16.mxu0 %v1060_v35  ;;  %1030 = vmatprep.subr.bf16.mxu1 %v1060_v35  ;;  %v284_v35 = vunpack.c.h.bf16 %v263_v18  ;;  %v374_v58 = vadd.f32 %v1172_v28, %v330_v51  ;;  %v346_v60 = vmul.f32 %v1168_v26, %v302_v53  ;;  %v285_v61 = vunpack.c.l.bf16 %v264_v31 }
  0x23   : > { %v383_v40 = vadd.f32 %v1170_v27, %v339_v30  ;;  %v418_v42 = vmax.f32 %v386_v33, 0.0  ;;  %v417_v55 = vmax.f32 %v385_v47, 0.0  ;;  %v327_v1 = vmul.f32 %v1166_v25, %v283_v57 }
  0x24   : > { %v328_v45 = vmul.f32 %v1168_v26, %v284_v35  ;;  %v299_v2 = vunpack.c.l.bf16 %v271_v36  ;;  %v406_v3 = vmax.f32 %v374_v58, 0.0  ;;  %v390_v4 = vadd.f32 %v1172_v28, %v346_v60 }
  0x25   : > { %973 = vmatpush3.bf16.msra.mxu0 %v1061_v49  ;;  %1038 = vmatpush3.bf16.msra.mxu1 %v1061_v49  ;;  %v415_v48 = vmax.f32 %v383_v40, 0.0  ;;  %v300_v49 = vunpack.c.h.bf16 %v271_v36  ;;  %v438_v50 = vpack.c.bf16 %v418_v42, %v416_v37  ;;  %v301_v6 = vunpack.c.l.bf16 %v272_v41 }
  0x26   : > { %974 = vmatprep.subr.bf16.mxu0 %v1062_v54  ;;  %1031 = vmatprep.subr.bf16.mxu1 %v1062_v54  ;;  %v372_v52 = vadd.f32 %v1172_v28, %v328_v45  ;;  %v429_v54 = vpack.c.bf16 %v401_v46, %v399_v43  ;;  %v371_v9 = vadd.f32 %v1170_v27, %v327_v1  ;;  %v288_v11 = vunpack.c.h.bf16 %v265_v62 }
  0x27   : > { %v344_v56 = vmul.f32 %v1168_v26, %v300_v49  ;;  %v437_v63 = vpack.c.bf16 %v417_v55, %v415_v48  ;;  %v343_v10 = vmul.f32 %v1166_v25, %v299_v2  ;;  %v345_v16 = vmul.f32 %v1166_v25, %v301_v6 }
  0x28   : > { %v404_v59 = vmax.f32 %v372_v52, 0.0  ;;  %v403_v18 = vmax.f32 %v371_v9, 0.0  ;;  %v332_v21 = vmul.f32 %v1168_v26, %v288_v11  ;;  %v304_v29 = vunpack.c.h.bf16 %v273_v12  ;;  %v1279_v11 = vld [vmem:[%s1333_s5] ss:$0 sm:$0xff] }
  0x29   : > { %975 = vmatpush3.bf16.msra.mxu0 %v1063_v5  ;;  %1039 = vmatpush3.bf16.msra.mxu1 %v1063_v5  ;;  %v388_v0 = vadd.f32 %v1172_v28, %v344_v56  ;;  %v329_v5 = vmul.f32 %v1166_v25, %v285_v61  ;;  %v387_v19 = vadd.f32 %v1170_v27, %v343_v10  ;;  %v306_v33 = vunpack.c.h.bf16 %v274_v17 }
  0x2a   : > { %v432_v13 = vpack.c.bf16 %v406_v3, %v404_v59  ;;  %v389_v24 = vadd.f32 %v1170_v27, %v345_v16  ;;  %v348_v36 = vmul.f32 %v1168_v26, %v304_v29  ;;  %v287_v37 = vunpack.c.l.bf16 %v265_v62 }
  0x2b   : > { %v420_v8 = vmax.f32 %v388_v0, 0.0  ;;  %v373_v15 = vadd.f32 %v1170_v27, %v329_v5  ;;  %v419_v30 = vmax.f32 %v387_v19, 0.0  ;;  %v350_v40 = vmul.f32 %v1168_v26, %v306_v33 }
  0x2c   : > { %604 = vmatmul.mubr.bf16.vlgmr.msra.gmra.mxu0 %v427_v7  ;;  %636 = vmatmul.mubr.bf16.vlgmr.msra.gmra.mxu1 %v435_v14  ;;  %v266_v7 = vld [vmem:[%s1148_s22 + $0x38] sm:$0xff]  ;;  %v422_v14 = vmax.f32 %v390_v4, 0.0  ;;  %v421_v35 = vmax.f32 %v389_v24, 0.0  ;;  %v392_v43 = vadd.f32 %v1172_v28, %v348_v36  ;;  %v331_v44 = vmul.f32 %v1166_v25, %v287_v37  ;;  %v1272_v4 = vld [vmem:[%s1332_s4] ss:$0 sm:$0xff] }
  0x2d   : > { %611 = vmatprep.mubr.bf16.mxu0 %v430_v32  ;;  %643 = vmatprep.mubr.bf16.mxu1 %v438_v50  ;;  %v290_v20 = vunpack.c.h.bf16 %v266_v7  ;;  %v405_v23 = vmax.f32 %v373_v15, 0.0  ;;  %v376_v32 = vadd.f32 %v1172_v28, %v332_v21  ;;  %v289_v41 = vunpack.c.l.bf16 %v266_v7 }
  0x2e   : > { %v440_v22 = vpack.c.bf16 %v422_v14, %v420_v8  ;;  %v439_v42 = vpack.c.bf16 %v421_v35, %v419_v30  ;;  %v303_v45 = vunpack.c.l.bf16 %v273_v12  ;;  %v394_v47 = vadd.f32 %v1172_v28, %v350_v40 }
  0x2f   : > { %v334_v31 = vmul.f32 %v1168_v26, %v290_v20  ;;  %v431_v34 = vpack.c.bf16 %v405_v23, %v403_v18  ;;  %v408_v39 = vmax.f32 %v376_v32, 0.0  ;;  %v333_v48 = vmul.f32 %v1166_v25, %v289_v41 }
  0x30   : > { %v305_v49 = vunpack.c.l.bf16 %v274_v17  ;;  %v424_v50 = vmax.f32 %v392_v43, 0.0  ;;  %v375_v51 = vadd.f32 %v1170_v27, %v331_v44  ;;  %v347_v26 = vmul.f32 %v1166_v25, %v303_v45 }
  0x31   : > { %v378_v38 = vadd.f32 %v1172_v28, %v334_v31  ;;  %v426_v53 = vmax.f32 %v394_v47, 0.0 }
  0x32   : > { %v349_v55 = vmul.f32 %v1166_v25, %v305_v49  ;;  %v407_v56 = vmax.f32 %v375_v51, 0.0  ;;  %v391_v57 = vadd.f32 %v1170_v27, %v347_v26 }
  0x33   : > { %v410_v46 = vmax.f32 %v378_v38, 0.0  ;;  %v442_v28 = vpack.c.bf16 %v426_v53, %v424_v50 }
  0x34   : > { %612 = vmatmul.mubr.bf16.gmra.mxu0 %v429_v54  ;;  %644 = vmatmul.mubr.bf16.gmra.mxu1 %v437_v63  ;;  %v377_v54 = vadd.f32 %v1170_v27, %v333_v48  ;;  %v393_v59 = vadd.f32 %v1170_v27, %v349_v55  ;;  %v423_v60 = vmax.f32 %v391_v57, 0.0 }
  0x35   : > { %619 = vmatprep.mubr.bf16.mxu0 %v432_v13  ;;  %651 = vmatprep.mubr.bf16.mxu1 %v440_v22  ;;  %v434_v52 = vpack.c.bf16 %v410_v46, %v408_v39 }
  0x36   : > { %v409_v58 = vmax.f32 %v377_v54, 0.0  ;;  %v425_v62 = vmax.f32 %v393_v59, 0.0 }
  0x38   : > { %v433_v61 = vpack.c.bf16 %v409_v58, %v407_v56  ;;  %v441_v63 = vpack.c.bf16 %v425_v62, %v423_v60 }
  0x3c   : > { %620 = vmatmul.mubr.bf16.gmra.mxu0 %v431_v34  ;;  %652 = vmatmul.mubr.bf16.gmra.mxu1 %v439_v42 }
  0x3d   : > { %627 = vmatprep.mubr.bf16.mxu0 %v434_v52  ;;  %659 = vmatprep.mubr.bf16.mxu1 %v442_v28 }
  0x44   : > { %628 = vmatmul.mubr.bf16.gmra.mxu0 %v433_v61  ;;  %660 = vmatmul.mubr.bf16.gmra.mxu1 %v441_v63 }
  0xec   : > { %v976_v0 = vpop.f32.mrf.mxu0  ;;  %v1000_v1 = vpop.f32.mrf.mxu1 }
  0xee   : > { %v977_v2 = vpop.f32.mrf.mxu0  ;;  %v1001_v25 = vpop.f32.mrf.mxu1 }
  0xef   : > { %v978_v3 = vadd.f32 %v977_v2, %v976_v0  ;;  %v1002_v5 = vadd.f32 %v1001_v25, %v1000_v1 }
  0xf0   : > { %v979_v27 = vpop.f32.mrf.mxu0  ;;  %v1003_v6 = vpop.f32.mrf.mxu1 }
  0xf1   : > { %v675_v7 = vmul.f32 %v978_v3, %v1272_v4  ;;  %v683_v8 = vmul.f32 %v1002_v5, %v1272_v4 }
  0xf2   : > { %v980_v9 = vpop.f32.mrf.mxu0  ;;  %v1004_v10 = vpop.f32.mrf.mxu1 }
  0xf3   : > { %v981_v12 = vadd.f32 %v980_v9, %v979_v27  ;;  %v1005_v13 = vadd.f32 %v1004_v10, %v1003_v6  ;;  %v698_v18 = vadd.f32 %v1279_v11, %v675_v7  ;;  %v706_v19 = vadd.f32 %v1279_v11, %v683_v8 }
  0xf4   : > { %v982_v14 = vpop.f32.mrf.mxu0  ;;  %v1006_v15 = vpop.f32.mrf.mxu1 }
  0xf5   : > { %v676_v16 = vmul.f32 %v981_v12, %v1272_v4  ;;  %v684_v17 = vmul.f32 %v1005_v13, %v1272_v4 }
  0xf6   : > { %v983_v20 = vpop.f32.mrf.mxu0  ;;  %v1007_v21 = vpop.f32.mrf.mxu1 }
  0xf7   : > { %v699_v22 = vadd.f32 %v1279_v11, %v676_v16  ;;  %v707_v23 = vadd.f32 %v1279_v11, %v684_v17  ;;  %v984_v24 = vadd.f32 %v983_v20, %v982_v14  ;;  %v1008_v29 = vadd.f32 %v1007_v21, %v1006_v15 }
  0xf8   : > { %v985_v30 = vpop.f32.mrf.mxu0  ;;  %v1009_v31 = vpop.f32.mrf.mxu1 }
  0xf9   : > { %v916_v32 = vpack.c.bf16 %v699_v22, %v698_v18  ;;  %v936_v33 = vpack.c.bf16 %v707_v23, %v706_v19  ;;  %v677_v34 = vmul.f32 %v984_v24, %v1272_v4  ;;  %v685_v35 = vmul.f32 %v1008_v29, %v1272_v4 }
  0xfa   : > { %v986_v36 = vpop.f32.mrf.mxu0  ;;  %v1010_v37 = vpop.f32.mrf.mxu1 }
  0xfb   : > { %917 = vst [vmem:[%s1291_s25] sm:$0xff] %v916_v32   ;;  %956 = vst [vmem:[%s1291_s25 + $0x20] sm:$0xff] %v936_v33   ;;  %v987_v38 = vadd.f32 %v986_v36, %v985_v30  ;;  %v1011_v39 = vadd.f32 %v1010_v37, %v1009_v31  ;;  %v700_v44 = vadd.f32 %v1279_v11, %v677_v34 }
  0xfc   : > { %v988_v40 = vpop.f32.mrf.mxu0  ;;  %v1012_v41 = vpop.f32.mrf.mxu1  ;;  %v708_v45 = vadd.f32 %v1279_v11, %v685_v35 }
  0xfd   : > { %v678_v42 = vmul.f32 %v987_v38, %v1272_v4  ;;  %v686_v43 = vmul.f32 %v1011_v39, %v1272_v4 }
  0xfe   : > { %v989_v46 = vpop.f32.mrf.mxu0  ;;  %v1013_v47 = vpop.f32.mrf.mxu1 }
  0xff   : > { %v701_v48 = vadd.f32 %v1279_v11, %v678_v42  ;;  %v709_v49 = vadd.f32 %v1279_v11, %v686_v43  ;;  %v990_v50 = vadd.f32 %v989_v46, %v988_v40  ;;  %v1014_v51 = vadd.f32 %v1013_v47, %v1012_v41 }
 0x100   : > { %v991_v26 = vpop.f32.mrf.mxu0  ;;  %v1015_v52 = vpop.f32.mrf.mxu1 }
 0x101   : > { %v921_v53 = vpack.c.bf16 %v701_v48, %v700_v44  ;;  %v941_v54 = vpack.c.bf16 %v709_v49, %v708_v45  ;;  %v679_v55 = vmul.f32 %v990_v50, %v1272_v4  ;;  %v687_v28 = vmul.f32 %v1014_v51, %v1272_v4 }
 0x102   : > { %v992_v56 = vpop.f32.mrf.mxu0  ;;  %v1016_v57 = vpop.f32.mrf.mxu1 }
 0x103   : > { %953 = vst [vmem:[%s1291_s25 + $0x8] sm:$0xff] %v921_v53   ;;  %957 = vst [vmem:[%s1291_s25 + $0x28] sm:$0xff] %v941_v54   ;;  %v993_v58 = vadd.f32 %v992_v56, %v991_v26  ;;  %v1017_v59 = vadd.f32 %v1016_v57, %v1015_v52  ;;  %v702_v0 = vadd.f32 %v1279_v11, %v679_v55 }
 0x104   : > { %v994_v60 = vpop.f32.mrf.mxu0  ;;  %v1018_v63 = vpop.f32.mrf.mxu1  ;;  %v710_v2 = vadd.f32 %v1279_v11, %v687_v28 }
 0x105   : > { %v680_v61 = vmul.f32 %v993_v58, %v1272_v4  ;;  %v688_v62 = vmul.f32 %v1017_v59, %v1272_v4 }
 0x106   : > { %v995_v1 = vpop.f32.mrf.mxu0  ;;  %v1019_v27 = vpop.f32.mrf.mxu1 }
 0x107   : > { %v703_v25 = vadd.f32 %v1279_v11, %v680_v61  ;;  %v711_v3 = vadd.f32 %v1279_v11, %v688_v62  ;;  %v996_v5 = vadd.f32 %v995_v1, %v994_v60  ;;  %v1020_v6 = vadd.f32 %v1019_v27, %v1018_v63 }
 0x108   : > { %v997_v7 = vpop.f32.mrf.mxu0  ;;  %v1021_v10 = vpop.f32.mrf.mxu1 }
 0x109   : > { %v926_v8 = vpack.c.bf16 %v703_v25, %v702_v0  ;;  %v946_v9 = vpack.c.bf16 %v711_v3, %v710_v2  ;;  %v681_v13 = vmul.f32 %v996_v5, %v1272_v4  ;;  %v689_v16 = vmul.f32 %v1020_v6, %v1272_v4 }
 0x10a   : > { %v998_v12 = vpop.f32.mrf.mxu0  ;;  %v1022_v15 = vpop.f32.mrf.mxu1 }
 0x10b   : > { %954 = vst [vmem:[%s1291_s25 + $0x10] sm:$0xff] %v926_v8   ;;  %958 = vst [vmem:[%s1291_s25 + $0x30] sm:$0xff] %v946_v9   ;;  %v999_v14 = vadd.f32 %v998_v12, %v997_v7  ;;  %v1023_v17 = vadd.f32 %v1022_v15, %v1021_v10  ;;  %v704_v20 = vadd.f32 %v1279_v11, %v681_v13 }
 0x10c   : > { %v712_v22 = vadd.f32 %v1279_v11, %v689_v16 }
 0x10d   : > { %v682_v18 = vmul.f32 %v999_v14, %v1272_v4  ;;  %v690_v19 = vmul.f32 %v1023_v17, %v1272_v4 }
 0x10f   : > { %v705_v21 = vadd.f32 %v1279_v11, %v682_v18  ;;  %v713_v23 = vadd.f32 %v1279_v11, %v690_v19 }
 0x111   : > { %v931_v24 = vpack.c.bf16 %v705_v21, %v704_v20  ;;  %v951_v29 = vpack.c.bf16 %v713_v23, %v712_v22 }
 0x113   : > { %955 = vst [vmem:[%s1291_s25 + $0x18] sm:$0xff] %v931_v24   ;;  %959 = vst [vmem:[%s1291_s25 + $0x38] sm:$0xff] %v951_v29  }
 0x114 PF: > { %s16_s21 = sadd.s32 1, %s1070_s21  }
 0x115   : > { %p13_p4 = scmp.ge.s32.totalorder %s16_s21, 6  }
 0x117   :  { %15 = sbr.rel (!%p13_p4) target bundleno = 1 (0x1), region = 74 }

// kernel: closed_call.54
= control target key start
LH: loop header
LB: loop body
LE: loop exit
PB: predicated region body
PF: predicated region fallthrough
CT: control target
= control target key end

     0   :  { %s1044_s21 = smov 0   ;;  %s1191_s0 = inlined_call_operand.vmem [shape: bf16[128,512], index: 0, kind: input, shape index: {}]   ;;  %s1192_s1 = inlined_call_operand.vmem [shape: f32[1,512], index: 1, kind: input, shape index: {}]   ;;  %s1193_s2 = inlined_call_operand.vmem [shape: f32[1,512], index: 2, kind: input, shape index: {}]   ;;  %s1194_s3 = inlined_call_operand.vmem [shape: bf16[512,128], index: 3, kind: input, shape index: {}]   ;;  %s1195_s4 = inlined_call_operand.vmem [shape: f32[1,128], index: 4, kind: input, shape index: {}]   ;;  %s1196_s5 = inlined_call_operand.vmem [shape: f32[1,128], index: 5, kind: input, shape index: {}]   ;;  %s1197_s6 = inlined_call_operand.vmem [shape: bf16[128,128], index: 6, kind: output, shape index: {}]  }
   0x1 LB: > { %s839_s22 = sadd.s32 4294967295, %s1007_s21   ;;  %p843_p0 = scmp.ge.s32.totalorder %s1007_s21, 1  ;;  %s1007_s21 = sphi %s1044_s21, %s16_s21  }
   0x2   : > { %p214_p1 = scmp.lt.s32.totalorder %s1007_s21, 5 }
   0x4   : > { %p215_p2 = pnand %p843_p0, %p214_p1 }
   0x5   : > { %s844_s9 = sshll.u32 (!%p215_p2), %s839_s22, 2 }
   0x6   : > { %218 = sbr.rel (%p215_p2) target bundleno = 266 (0x10a), region = 44  ;;  %p246_p3 = scmp.lt.s32.totalorder (!%p215_p2), %s844_s9, 15 }
   0xb   : > { %v969_v0 = vld [vmem:[%s1194_s3 + $0x78] sm:$0xff]   ;;  %v973_v4 = vld [vmem:[%s1194_s3 + $0x70] sm:$0xff]   ;;  %v977_v8 = vld [vmem:[%s1194_s3 + $0x68] sm:$0xff]   ;;  %v285_v22 = vlaneseq  ;;  %s1199_s9 = smov (!%p246_p3, %s844_s9), 15 }
   0xc   : > { %v970_v1 = vld [vmem:[%s1194_s3 + $0xf8] sm:$0xff]   ;;  %905 = vmatprep.subr.bf16.mxu0 %v969_v0  ;;  %v974_v5 = vld [vmem:[%s1194_s3 + $0xf0] sm:$0xff]   ;;  %v978_v9 = vld [vmem:[%s1194_s3 + $0xe8] sm:$0xff]   ;;  %s889_s10 = sshll.u32 %s1199_s9, 4 }
   0xd   : > { %v971_v2 = vld [vmem:[%s1194_s3 + $0x38] sm:$0xff]   ;;  %933 = vmatprep.subr.bf16.mxu1 %v970_v1  ;;  %v975_v6 = vld [vmem:[%s1194_s3 + $0x30] sm:$0xff]   ;;  %v979_v10 = vld [vmem:[%s1194_s3 + $0x28] sm:$0xff]   ;;  %v286_v27 = vshrl.u32 %v285_v22, 7  ;;  %s1150_s18 = scalar_lea.vmem %s1191_s0, %s889_s10  ;;  %s848_s10 = sshll.u32 %s1199_s9, 2 }
   0xe   : > { %v972_v3 = vld [vmem:[%s1194_s3 + $0xb8] sm:$0xff]   ;;  %906 = vmatpush3.bf16.msra.mxu0 %v971_v2  ;;  %v976_v7 = vld [vmem:[%s1194_s3 + $0xb0] sm:$0xff]   ;;  %v980_v11 = vld [vmem:[%s1194_s3 + $0xa8] sm:$0xff]   ;;  %s256_s13 = scalar_lea.vmem %s1197_s6, %s848_s10 }
   0xf   : > { %934 = vmatpush3.bf16.msra.mxu1 %v972_v3  ;;  %907 = vmatprep.subr.bf16.mxu0 %v973_v4  ;;  %v981_v12 = vld [vmem:[%s1194_s3 + $0x60] sm:$0xff]   ;;  %v985_v16 = vld [vmem:[%s1194_s3 + $0x58] sm:$0xff]   ;;  %v989_v20 = vld [vmem:[%s1194_s3 + $0x50] sm:$0xff]   ;;  %v291_v33 = vsub.s32 1, %v286_v27  ;;  %v299_v35 = vsub.s32 3, %v286_v27  ;;  %v287_v39 = vsub.s32 0, %v286_v27 }
  0x10   : > { %935 = vmatprep.subr.bf16.mxu1 %v974_v5  ;;  %v982_v13 = vld [vmem:[%s1194_s3 + $0xe0] sm:$0xff]   ;;  %v986_v17 = vld [vmem:[%s1194_s3 + $0xd8] sm:$0xff]   ;;  %v990_v21 = vld [vmem:[%s1194_s3 + $0xd0] sm:$0xff]   ;;  %v295_v40 = vsub.s32 2, %v286_v27 }
  0x11   : > { %v983_v14 = vld [vmem:[%s1194_s3 + $0x20] sm:$0xff]   ;;  %v987_v18 = vld [vmem:[%s1194_s3 + $0x18] sm:$0xff]   ;;  %v991_v23 = vld [vmem:[%s1194_s3 + $0x10] sm:$0xff]  }
  0x12   : > { %908 = vmatpush3.bf16.msra.mxu0 %v975_v6  ;;  %v984_v15 = vld [vmem:[%s1194_s3 + $0xa0] sm:$0xff]   ;;  %v988_v19 = vld [vmem:[%s1194_s3 + $0x98] sm:$0xff]   ;;  %v992_v24 = vld [vmem:[%s1194_s3 + $0x90] sm:$0xff]  }
  0x13   : > { %936 = vmatpush3.bf16.msra.mxu1 %v976_v7  ;;  %909 = vmatprep.subr.bf16.mxu0 %v977_v8  ;;  %v993_v25 = vld [vmem:[%s1194_s3 + $0x48] sm:$0xff]   ;;  %v997_v30 = vld [vmem:[%s1194_s3 + $0x40] sm:$0xff]   ;;  %v261_v37 = vld [vmem:[%s1150_s18 + $0x10] sm:$0xff] }
  0x14   : > { %937 = vmatprep.subr.bf16.mxu1 %v978_v9  ;;  %v994_v26 = vld [vmem:[%s1194_s3 + $0xc8] sm:$0xff]   ;;  %v998_v31 = vld [vmem:[%s1194_s3 + $0xc0] sm:$0xff]   ;;  %v271_v43 = vunpack.c.l.bf16 %v261_v37  ;;  %v272_v44 = vunpack.c.h.bf16 %v261_v37  ;;  %v262_v47 = vld [vmem:[%s1150_s18 + $0x18] sm:$0xff] }
  0x15   : > { %v995_v28 = vld [vmem:[%s1194_s3 + $0x8] sm:$0xff]   ;;  %v999_v32 = vld [vmem:[%s1194_s3] sm:$0xff]   ;;  %v273_v52 = vunpack.c.l.bf16 %v262_v47  ;;  %v274_v53 = vunpack.c.h.bf16 %v262_v47 }
  0x16   : > { %910 = vmatpush3.bf16.msra.mxu0 %v979_v10  ;;  %v996_v29 = vld [vmem:[%s1194_s3 + $0x88] sm:$0xff]   ;;  %v1000_v34 = vld [vmem:[%s1194_s3 + $0x80] sm:$0xff]  }
  0x17   : > { %938 = vmatpush3.bf16.msra.mxu1 %v980_v11  ;;  %911 = vmatprep.subr.bf16.mxu0 %v981_v12  ;;  %v259_v36 = vld [vmem:[%s1150_s18] sm:$0xff]  ;;  %v260_v46 = vld [vmem:[%s1150_s18 + $0x8] sm:$0xff] }
  0x18   : > { %939 = vmatprep.subr.bf16.mxu1 %v982_v13  ;;  %v283_v38 = vld [vmem:[%s1192_s1] sm:$0xf]  ;;  %v267_v41 = vunpack.c.l.bf16 %v259_v36  ;;  %v268_v42 = vunpack.c.h.bf16 %v259_v36  ;;  %v269_v50 = vunpack.c.l.bf16 %v260_v46  ;;  %v270_v51 = vunpack.c.h.bf16 %v260_v46  ;;  %v265_v13 = vld [vmem:[%s1150_s18 + $0x30] sm:$0xff] }
  0x19   : > { %v321_v45 = vld [vmem:[%s1193_s2] sm:$0xf]  ;;  %v292_v48 = vrot.slane %v283_v38, %v291_v33  ;;  %v300_v54 = vrot.slane %v283_v38, %v299_v35  ;;  %v288_v58 = vrot.slane %v283_v38, %v287_v39  ;;  %v296_v62 = vrot.slane %v283_v38, %v295_v40 }
  0x1a   : > { %912 = vmatpush3.bf16.msra.mxu0 %v983_v14  ;;  %v330_v49 = vrot.slane %v321_v45, %v291_v33  ;;  %v338_v55 = vrot.slane %v321_v45, %v299_v35  ;;  %v326_v59 = vrot.slane %v321_v45, %v287_v39  ;;  %v1168_v63 = vrot.slane %v321_v45, %v295_v40  ;;  %v263_v8 = vld [vmem:[%s1150_s18 + $0x20] sm:$0xff] }
  0x1b   : > { %940 = vmatpush3.bf16.msra.mxu1 %v984_v15  ;;  %913 = vmatprep.subr.bf16.mxu0 %v985_v16  ;;  %v306_v56 = vmul.f32 %v292_v48, %v268_v42  ;;  %v310_v57 = vmul.f32 %v292_v48, %v272_v44  ;;  %v308_v60 = vmul.f32 %v300_v54, %v270_v51  ;;  %v280_v27 = vunpack.c.h.bf16 %v265_v13 }
  0x1c   : > { %941 = vmatprep.subr.bf16.mxu1 %v986_v17  ;;  %v312_v61 = vmul.f32 %v300_v54, %v274_v53  ;;  %v305_v2 = vmul.f32 %v288_v58, %v267_v41  ;;  %v309_v3 = vmul.f32 %v288_v58, %v271_v43  ;;  %v307_v6 = vmul.f32 %v296_v62, %v269_v50 }
  0x1d   : > { %v344_v0 = vadd.f32 %v330_v49, %v306_v56  ;;  %v348_v1 = vadd.f32 %v330_v49, %v310_v57  ;;  %v346_v4 = vadd.f32 %v338_v55, %v308_v60  ;;  %v311_v7 = vmul.f32 %v296_v62, %v273_v52 }
  0x1e   : > { %914 = vmatpush3.bf16.msra.mxu0 %v987_v18  ;;  %v350_v5 = vadd.f32 %v338_v55, %v312_v61  ;;  %v343_v11 = vadd.f32 %v326_v59, %v305_v2  ;;  %v347_v12 = vadd.f32 %v326_v59, %v309_v3  ;;  %v345_v16 = vadd.f32 %v1168_v63, %v307_v6  ;;  %v264_v18 = vld [vmem:[%s1150_s18 + $0x28] sm:$0xff] }
  0x1f   : > { %942 = vmatpush3.bf16.msra.mxu1 %v988_v19  ;;  %915 = vmatprep.subr.bf16.mxu0 %v989_v20  ;;  %v360_v9 = vmax.f32 %v344_v0, 0.0  ;;  %v364_v10 = vmax.f32 %v348_v1, 0.0  ;;  %v362_v14 = vmax.f32 %v346_v4, 0.0  ;;  %v349_v17 = vadd.f32 %v1168_v63, %v311_v7  ;;  %v266_v19 = vld [vmem:[%s1150_s18 + $0x38] sm:$0xff] }
  0x20   : > { %943 = vmatprep.subr.bf16.mxu1 %v990_v21  ;;  %v366_v15 = vmax.f32 %v350_v5, 0.0  ;;  %v359_v21 = vmax.f32 %v343_v11, 0.0  ;;  %v363_v22 = vmax.f32 %v347_v12, 0.0  ;;  %v318_v33 = vmul.f32 %v292_v48, %v280_v27 }
  0x21   : > { %v376_v20 = vpack.c.bf16 %v364_v10, %v360_v9  ;;  %v279_v35 = vunpack.c.l.bf16 %v265_v13  ;;  %v277_v39 = vunpack.c.l.bf16 %v264_v18  ;;  %v281_v43 = vunpack.c.l.bf16 %v266_v19 }
  0x22   : > { %916 = vmatpush3.bf16.msra.mxu0 %v991_v23  ;;  %v276_v23 = vunpack.c.h.bf16 %v263_v8  ;;  %v356_v40 = vadd.f32 %v330_v49, %v318_v33 }
  0x23   : > { %944 = vmatpush3.bf16.msra.mxu1 %v992_v24  ;;  %917 = vmatprep.subr.bf16.mxu0 %v993_v25  ;;  %v378_v24 = vpack.c.bf16 %v366_v15, %v362_v14  ;;  %v361_v25 = vmax.f32 %v345_v16, 0.0  ;;  %v317_v42 = vmul.f32 %v288_v58, %v279_v35  ;;  %v315_v47 = vmul.f32 %v296_v62, %v277_v39  ;;  %v882_v15 = vld [vmem:[%s1196_s5] ss:$0 sm:$0xff] }
  0x24   : > { %945 = vmatprep.subr.bf16.mxu1 %v994_v26  ;;  %v365_v26 = vmax.f32 %v349_v17, 0.0  ;;  %671 = vmatprep.mubr.bf16.mxu0 %v376_v20  ;;  %v372_v50 = vmax.f32 %v356_v40, 0.0 }
  0x25   : > { %720 = vmatprep.mubr.bf16.mxu1 %v378_v24  ;;  %v355_v52 = vadd.f32 %v326_v59, %v317_v42  ;;  %v353_v57 = vadd.f32 %v1168_v63, %v315_v47 }
  0x26   : > { %918 = vmatpush3.bf16.msra.mxu0 %v995_v28  ;;  %v375_v28 = vpack.c.bf16 %v363_v22, %v359_v21 }
  0x27   : > { %946 = vmatpush3.bf16.msra.mxu1 %v996_v29  ;;  %919 = vmatprep.subr.bf16.mxu0 %v997_v30  ;;  %v314_v29 = vmul.f32 %v292_v48, %v276_v23  ;;  %v278_v30 = vunpack.c.h.bf16 %v264_v18  ;;  %v319_v48 = vmul.f32 %v296_v62, %v281_v43  ;;  %v371_v61 = vmax.f32 %v355_v52, 0.0 }
  0x28   : > { %947 = vmatprep.subr.bf16.mxu1 %v998_v31  ;;  %v282_v31 = vunpack.c.h.bf16 %v266_v19 }
  0x29   : > { %v352_v36 = vadd.f32 %v330_v49, %v314_v29  ;;  %v316_v37 = vmul.f32 %v300_v54, %v278_v30  ;;  %v357_v49 = vadd.f32 %v1168_v63, %v319_v48  ;;  %v881_v63 = vld [vmem:[%s1195_s4] ss:$0 sm:$0xff] }
  0x2a   : > { %920 = vmatpush3.bf16.msra.mxu0 %v999_v32  ;;  %v377_v32 = vpack.c.bf16 %v365_v26, %v361_v25  ;;  %v320_v38 = vmul.f32 %v300_v54, %v282_v31 }
  0x2b   : > { %948 = vmatpush3.bf16.msra.mxu1 %v1000_v34  ;;  %v275_v34 = vunpack.c.l.bf16 %v263_v8  ;;  %v368_v44 = vmax.f32 %v352_v36, 0.0  ;;  %v354_v45 = vadd.f32 %v338_v55, %v316_v37  ;;  %v373_v2 = vmax.f32 %v357_v49, 0.0 }
  0x2c   : > { %v358_v46 = vadd.f32 %v338_v55, %v320_v38 }
  0x2d   : > { %672 = vmatmul.mubr.bf16.vlgmr.msra.gmra.mxu0 %v375_v28  ;;  %v313_v41 = vmul.f32 %v288_v58, %v275_v34  ;;  %v370_v53 = vmax.f32 %v354_v45, 0.0  ;;  %v380_v60 = vpack.c.bf16 %v372_v50, %v368_v44  ;;  %v369_v58 = vmax.f32 %v353_v57, 0.0 }
  0x2e   : > { %721 = vmatmul.mubr.bf16.vlgmr.msra.gmra.mxu1 %v377_v32  ;;  %v374_v56 = vmax.f32 %v358_v46, 0.0 }
  0x2f   : > { %v351_v51 = vadd.f32 %v326_v59, %v313_v41  ;;  %679 = vmatprep.mubr.bf16.mxu0 %v380_v60  ;;  %v381_v55 = vpack.c.bf16 %v373_v2, %v369_v58 }
  0x30   : > { %v382_v0 = vpack.c.bf16 %v374_v56, %v370_v53 }
  0x31   : > { %v367_v54 = vmax.f32 %v351_v51, 0.0 }
  0x32   : > { %728 = vmatprep.mubr.bf16.mxu1 %v382_v0 }
  0x33   : > { %v379_v1 = vpack.c.bf16 %v371_v61, %v367_v54 }
  0x35   : > { %680 = vmatmul.mubr.bf16.gmra.mxu0 %v379_v1 }
  0x36   : > { %729 = vmatmul.mubr.bf16.gmra.mxu1 %v381_v55 }
  0xed   : > { %v921_v59 = vpop.f32.mrf.mxu0 }
  0xee   : > { %v949_v62 = vpop.f32.mrf.mxu1 }
  0xef   : > { %v922_v3 = vpop.f32.mrf.mxu0 }
  0xf0   : > { %v923_v4 = vadd.f32 %v922_v3, %v921_v59  ;;  %v950_v5 = vpop.f32.mrf.mxu1 }
  0xf1   : > { %v951_v6 = vadd.f32 %v950_v5, %v949_v62  ;;  %v924_v7 = vpop.f32.mrf.mxu0 }
  0xf2   : > { %v952_v8 = vpop.f32.mrf.mxu1 }
  0xf3   : > { %v723_v9 = vadd.f32 %v951_v6, %v923_v4  ;;  %v925_v10 = vpop.f32.mrf.mxu0 }
  0xf4   : > { %v926_v11 = vadd.f32 %v925_v10, %v924_v7  ;;  %v953_v12 = vpop.f32.mrf.mxu1 }
  0xf5   : > { %v744_v13 = vmul.f32 %v881_v63, %v723_v9  ;;  %v954_v14 = vadd.f32 %v953_v12, %v952_v8  ;;  %v927_v16 = vpop.f32.mrf.mxu0 }
  0xf6   : > { %v955_v18 = vpop.f32.mrf.mxu1 }
  0xf7   : > { %v726_v17 = vadd.f32 %v954_v14, %v926_v11  ;;  %v928_v19 = vpop.f32.mrf.mxu0  ;;  %v755_v20 = vadd.f32 %v882_v15, %v744_v13 }
  0xf8   : > { %v929_v22 = vadd.f32 %v928_v19, %v927_v16  ;;  %v956_v23 = vpop.f32.mrf.mxu1 }
  0xf9   : > { %v745_v21 = vmul.f32 %v881_v63, %v726_v17  ;;  %v930_v24 = vpop.f32.mrf.mxu0  ;;  %v957_v26 = vadd.f32 %v956_v23, %v955_v18  ;;  %v759_v29 = vmax.f32 %v755_v20, 0.0 }
  0xfa   : > { %v958_v27 = vpop.f32.mrf.mxu1 }
  0xfb   : > { %v756_v25 = vadd.f32 %v882_v15, %v745_v21  ;;  %v931_v28 = vpop.f32.mrf.mxu0  ;;  %v731_v31 = vadd.f32 %v957_v26, %v929_v22 }
  0xfc   : > { %v932_v32 = vadd.f32 %v931_v28, %v930_v24  ;;  %v959_v33 = vpop.f32.mrf.mxu1 }
  0xfd   : > { %v760_v30 = vmax.f32 %v756_v25, 0.0  ;;  %v746_v35 = vmul.f32 %v881_v63, %v731_v31  ;;  %v960_v36 = vadd.f32 %v959_v33, %v958_v27 }
  0xff   : > { %v897_v34 = vpack.c.bf16 %v760_v30, %v759_v29  ;;  %v734_v37 = vadd.f32 %v960_v36, %v932_v32  ;;  %v757_v38 = vadd.f32 %v882_v15, %v746_v35 }
 0x101   : > { %898 = vst [vmem:[%s256_s13] sm:$0xff] %v897_v34   ;;  %v747_v39 = vmul.f32 %v881_v63, %v734_v37  ;;  %v761_v41 = vmax.f32 %v757_v38, 0.0 }
 0x103   : > { %v758_v40 = vadd.f32 %v882_v15, %v747_v39 }
 0x105   : > { %v762_v42 = vmax.f32 %v758_v40, 0.0 }
 0x107   : > { %v902_v43 = vpack.c.bf16 %v762_v42, %v761_v41 }
 0x109   : > { %904 = vst [vmem:[%s256_s13 + $0x8] sm:$0xff] %v902_v43  }
 0x10a PF: > { %s16_s21 = sadd.s32 1, %s1007_s21  }
 0x10b   : > { %p13_p4 = scmp.ge.s32.totalorder %s16_s21, 6  }
 0x10d   :  { %15 = sbr.rel (!%p13_p4) target bundleno = 1 (0x1), region = 74 }

// kernel: model_forward.9
= control target key start
LH: loop header
LB: loop body
LE: loop exit
PB: predicated region body
PF: predicated region fallthrough
CT: control target
= control target key end

     0   :  { %s1234_s21 = smov 0   ;;  %s1545_s0 = inlined_call_operand.vmem [shape: bf16[128,512], index: 0, kind: input, shape index: {}]   ;;  %s1546_s1 = inlined_call_operand.vmem [shape: f32[1,512], index: 1, kind: input, shape index: {}]   ;;  %s1547_s2 = inlined_call_operand.vmem [shape: f32[1,512], index: 2, kind: input, shape index: {}]   ;;  %s1548_s3 = inlined_call_operand.vmem [shape: bf16[512,256], index: 3, kind: input, shape index: {}]   ;;  %s1549_s4 = inlined_call_operand.vmem [shape: f32[1,256], index: 4, kind: input, shape index: {}]   ;;  %s1550_s5 = inlined_call_operand.vmem [shape: f32[1,256], index: 5, kind: input, shape index: {}]   ;;  %s1551_s6 = inlined_call_operand.vmem [shape: bf16[128,256], index: 6, kind: output, shape index: {}]  }
   0x1 LB: > { %s1000_s22 = sadd.s32 4294967295, %s1197_s21   ;;  %p1004_p0 = scmp.ge.s32.totalorder %s1197_s21, 1  ;;  %s1197_s21 = sphi %s1234_s21, %s16_s21  }
   0x2   : > { %p214_p1 = scmp.lt.s32.totalorder %s1197_s21, 5 }
   0x4   : > { %p215_p2 = pnand %p1004_p0, %p214_p1 }
   0x5   : > { %s1005_s15 = sshll.u32 (!%p215_p2), %s1000_s22, 2 }
   0x6   : > { %218 = sbr.rel (%p215_p2) target bundleno = 293 (0x125), region = 44  ;;  %p247_p3 = scmp.lt.s32.totalorder (!%p215_p2), %s1005_s15, 15 }
   0xb   : > { %v1095_v0 = vld [vmem:[%s1548_s3 + $0x74] ss:$8 sps:$4 sm:$0xff]   ;;  %v1099_v2 = vld [vmem:[%s1548_s3 + $0x70] ss:$8 sps:$4 sm:$0xff]   ;;  %v1101_v4 = vld [vmem:[%s1548_s3 + $0x64] ss:$8 sps:$4 sm:$0xff]   ;;  %v286_v36 = vlaneseq }
   0xc   : > { %v1097_v1 = vld [vmem:[%s1548_s3 + $0x174] ss:$8 sps:$4 sm:$0xff]   ;;  %768 = vmatprep.subr.bf16.mxu0 %v1095_v0  ;;  %v1100_v3 = vld [vmem:[%s1548_s3 + $0x170] ss:$8 sps:$4 sm:$0xff]   ;;  %v1103_v5 = vld [vmem:[%s1548_s3 + $0x164] ss:$8 sps:$4 sm:$0xff]  }
   0xd   : > { %821 = vmatprep.subr.bf16.mxu1 %v1097_v1  ;;  %769 = vmatpush1.bf16.msra.mxu0 %v1099_v2  ;;  %v1105_v6 = vld [vmem:[%s1548_s3 + $0x60] ss:$8 sps:$4 sm:$0xff]   ;;  %v1107_v8 = vld [vmem:[%s1548_s3 + $0x54] ss:$8 sps:$4 sm:$0xff]   ;;  %v1111_v10 = vld [vmem:[%s1548_s3 + $0x50] ss:$8 sps:$4 sm:$0xff]  }
   0xe   : > { %822 = vmatpush1.bf16.msra.mxu1 %v1100_v3  ;;  %770 = vmatprep.subr.bf16.mxu0 %v1101_v4  ;;  %v1106_v7 = vld [vmem:[%s1548_s3 + $0x160] ss:$8 sps:$4 sm:$0xff]   ;;  %v1109_v9 = vld [vmem:[%s1548_s3 + $0x154] ss:$8 sps:$4 sm:$0xff]   ;;  %v1112_v11 = vld [vmem:[%s1548_s3 + $0x150] ss:$8 sps:$4 sm:$0xff]  }
   0xf   : > { %823 = vmatprep.subr.bf16.mxu1 %v1103_v5  ;;  %v1113_v12 = vld [vmem:[%s1548_s3 + $0x44] ss:$8 sps:$4 sm:$0xff]   ;;  %v1117_v14 = vld [vmem:[%s1548_s3 + $0x40] ss:$8 sps:$4 sm:$0xff]   ;;  %v1119_v16 = vld [vmem:[%s1548_s3 + $0x34] ss:$8 sps:$4 sm:$0xff]  }
  0x10   : > { %v1115_v13 = vld [vmem:[%s1548_s3 + $0x144] ss:$8 sps:$4 sm:$0xff]   ;;  %v1118_v15 = vld [vmem:[%s1548_s3 + $0x140] ss:$8 sps:$4 sm:$0xff]   ;;  %v1121_v17 = vld [vmem:[%s1548_s3 + $0x134] ss:$8 sps:$4 sm:$0xff]  }
  0x11   : > { %771 = vmatpush1.bf16.msra.mxu0 %v1105_v6  ;;  %v1123_v18 = vld [vmem:[%s1548_s3 + $0x30] ss:$8 sps:$4 sm:$0xff]   ;;  %v1125_v20 = vld [vmem:[%s1548_s3 + $0x24] ss:$8 sps:$4 sm:$0xff]   ;;  %v1129_v22 = vld [vmem:[%s1548_s3 + $0x20] ss:$8 sps:$4 sm:$0xff]  }
  0x12   : > { %824 = vmatpush1.bf16.msra.mxu1 %v1106_v7  ;;  %772 = vmatprep.subr.bf16.mxu0 %v1107_v8  ;;  %v1124_v19 = vld [vmem:[%s1548_s3 + $0x130] ss:$8 sps:$4 sm:$0xff]   ;;  %v1127_v21 = vld [vmem:[%s1548_s3 + $0x124] ss:$8 sps:$4 sm:$0xff]   ;;  %v1130_v23 = vld [vmem:[%s1548_s3 + $0x120] ss:$8 sps:$4 sm:$0xff]  }
  0x13   : > { %825 = vmatprep.subr.bf16.mxu1 %v1109_v9  ;;  %v1131_v24 = vld [vmem:[%s1548_s3 + $0x14] ss:$8 sps:$4 sm:$0xff]   ;;  %v1135_v26 = vld [vmem:[%s1548_s3 + $0x10] ss:$8 sps:$4 sm:$0xff]   ;;  %v1137_v28 = vld [vmem:[%s1548_s3 + $0x4] ss:$8 sps:$4 sm:$0xff]  }
  0x14   : > { %v1133_v25 = vld [vmem:[%s1548_s3 + $0x114] ss:$8 sps:$4 sm:$0xff]   ;;  %v1136_v27 = vld [vmem:[%s1548_s3 + $0x110] ss:$8 sps:$4 sm:$0xff]   ;;  %v1139_v29 = vld [vmem:[%s1548_s3 + $0x104] ss:$8 sps:$4 sm:$0xff]  }
  0x15   : > { %773 = vmatpush1.bf16.msra.mxu0 %v1111_v10  ;;  %v1141_v30 = vld [vmem:[%s1548_s3] ss:$8 sps:$4 sm:$0xff]   ;;  %v1143_v32 = vld [vmem:[%s1548_s3 + $0xf4] ss:$8 sps:$4 sm:$0xff]   ;;  %v1147_v34 = vld [vmem:[%s1548_s3 + $0xf0] ss:$8 sps:$4 sm:$0xff]  }
  0x16   : > { %826 = vmatpush1.bf16.msra.mxu1 %v1112_v11  ;;  %774 = vmatprep.subr.bf16.mxu0 %v1113_v12  ;;  %v1142_v31 = vld [vmem:[%s1548_s3 + $0x100] ss:$8 sps:$4 sm:$0xff]   ;;  %v1145_v33 = vld [vmem:[%s1548_s3 + $0x1f4] ss:$8 sps:$4 sm:$0xff]   ;;  %v1148_v35 = vld [vmem:[%s1548_s3 + $0x1f0] ss:$8 sps:$4 sm:$0xff]  }
  0x17   : > { %827 = vmatprep.subr.bf16.mxu1 %v1115_v13  ;;  %v1149_v37 = vld [vmem:[%s1548_s3 + $0xe4] ss:$8 sps:$4 sm:$0xff]   ;;  %s1553_s15 = smov (!%p247_p3, %s1005_s15), 15  ;;  %v1153_v39 = vld [vmem:[%s1548_s3 + $0xe0] ss:$8 sps:$4 sm:$0xff]   ;;  %v287_v40 = vshrl.u32 %v286_v36, 7 }
  0x18   : > { %v1151_v38 = vld [vmem:[%s1548_s3 + $0x1e4] ss:$8 sps:$4 sm:$0xff]   ;;  %v1154_v41 = vld [vmem:[%s1548_s3 + $0x1e0] ss:$8 sps:$4 sm:$0xff]   ;;  %v1155_v42 = vld [vmem:[%s1548_s3 + $0xd4] ss:$8 sps:$4 sm:$0xff]  }
  0x19   : > { %775 = vmatpush1.bf16.msra.mxu0 %v1117_v14  ;;  %s1081_s16 = sshll.u32 %s1553_s15, 4  ;;  %v1157_v43 = vld [vmem:[%s1548_s3 + $0x1d4] ss:$8 sps:$4 sm:$0xff]   ;;  %v1159_v44 = vld [vmem:[%s1548_s3 + $0xd0] ss:$8 sps:$4 sm:$0xff]   ;;  %v1387_v47 = vsub.s32 1, %v287_v40 }
  0x1a   : > { %828 = vmatpush1.bf16.msra.mxu1 %v1118_v15  ;;  %776 = vmatprep.subr.bf16.mxu0 %v1119_v16  ;;  %v1160_v45 = vld [vmem:[%s1548_s3 + $0x1d0] ss:$8 sps:$4 sm:$0xff]   ;;  %s1382_s26 = scalar_lea.vmem %s1545_s0, %s1081_s16  ;;  %v1161_v46 = vld [vmem:[%s1548_s3 + $0xc4] ss:$8 sps:$4 sm:$0xff]   ;;  %v1165_v49 = vld [vmem:[%s1548_s3 + $0xc0] ss:$8 sps:$4 sm:$0xff]  }
  0x1b   : > { %829 = vmatprep.subr.bf16.mxu1 %v1121_v17  ;;  %v1163_v48 = vld [vmem:[%s1548_s3 + $0x1c4] ss:$8 sps:$4 sm:$0xff]   ;;  %v300_v51 = vsub.s32 3, %v287_v40  ;;  %v1396_v52 = vsub.s32 0, %v287_v40  ;;  %v262_v53 = vld [vmem:[%s1382_s26 + $0x10] sm:$0xff]  ;;  %v296_v58 = vsub.s32 2, %v287_v40 }
  0x1c   : > { %v260_v50 = vld [vmem:[%s1382_s26] sm:$0xff]  ;;  %v272_v60 = vunpack.c.l.bf16 %v262_v53  ;;  %v273_v61 = vunpack.c.h.bf16 %v262_v53  ;;  %v261_v0 = vld [vmem:[%s1382_s26 + $0x8] sm:$0xff]  ;;  %v263_v1 = vld [vmem:[%s1382_s26 + $0x18] sm:$0xff]  ;;  %s1082_s8 = sshll.u32 %s1553_s15, 3 }
  0x1d   : > { %777 = vmatpush1.bf16.msra.mxu0 %v1123_v18  ;;  %v268_v54 = vunpack.c.l.bf16 %v260_v50  ;;  %v269_v55 = vunpack.c.h.bf16 %v260_v50  ;;  %v284_v56 = vld [vmem:[%s1546_s1] sm:$0xf]  ;;  %v1167_v2 = vld [vmem:[%s1548_s3 + $0xb4] ss:$8 sps:$4 sm:$0xff]   ;;  %v270_v4 = vunpack.c.l.bf16 %v261_v0  ;;  %v271_v5 = vunpack.c.h.bf16 %v261_v0  ;;  %v1171_v18 = vld [vmem:[%s1548_s3 + $0xb0] ss:$8 sps:$4 sm:$0xff]   ;;  %s1536_s11 = scalar_lea.vmem %s1551_s6, %s1082_s8 }
  0x1e   : > { %830 = vmatpush1.bf16.msra.mxu1 %v1124_v19  ;;  %778 = vmatprep.subr.bf16.mxu0 %v1125_v20  ;;  %v322_v57 = vld [vmem:[%s1547_s2] sm:$0xf]  ;;  %v1409_v62 = vrot.slane %v284_v56, %v1387_v47  ;;  %v1169_v3 = vld [vmem:[%s1548_s3 + $0x1b4] ss:$8 sps:$4 sm:$0xff]   ;;  %v274_v6 = vunpack.c.l.bf16 %v263_v1  ;;  %v275_v7 = vunpack.c.h.bf16 %v263_v1  ;;  %v1427_v11 = vrot.slane %v284_v56, %v300_v51  ;;  %v1172_v19 = vld [vmem:[%s1548_s3 + $0x1b0] ss:$8 sps:$4 sm:$0xff]  }
  0x1f   : > { %831 = vmatprep.subr.bf16.mxu1 %v1127_v21  ;;  %v1166_v59 = vld [vmem:[%s1548_s3 + $0x1c0] ss:$8 sps:$4 sm:$0xff]   ;;  %v1412_v63 = vrot.slane %v322_v57, %v1387_v47  ;;  %v1429_v12 = vrot.slane %v322_v57, %v300_v51  ;;  %v1432_v13 = vld [vmem:[%s1382_s26 + $0x30] sm:$0xff]  ;;  %v1435_v14 = vrot.slane %v284_v56, %v1396_v52  ;;  %v1438_v15 = vrot.slane %v322_v57, %v1396_v52  ;;  %v1185_v0 = vld [vmem:[%s1548_s3 + $0x84] ss:$8 sps:$4 sm:$0xff]  }
  0x20   : > { %v1423_v8 = vld [vmem:[%s1382_s26 + $0x20] sm:$0xff]  ;;  %v307_v9 = vmul.f32 %v1409_v62, %v269_v55  ;;  %v311_v10 = vmul.f32 %v1409_v62, %v273_v61  ;;  %v1440_v16 = vrot.slane %v284_v56, %v296_v58  ;;  %v1442_v17 = vrot.slane %v322_v57, %v296_v58  ;;  %v1183_v57 = vld [vmem:[%s1548_s3 + $0x90] ss:$8 sps:$4 sm:$0xff]  }
  0x21   : > { %779 = vmatpush1.bf16.msra.mxu0 %v1129_v22  ;;  %v309_v22 = vmul.f32 %v1427_v11, %v271_v5  ;;  %v1184_v58 = vld [vmem:[%s1548_s3 + $0x190] ss:$8 sps:$4 sm:$0xff]   ;;  %v1187_v1 = vld [vmem:[%s1548_s3 + $0x184] ss:$8 sps:$4 sm:$0xff]  }
  0x22   : > { %832 = vmatpush1.bf16.msra.mxu1 %v1130_v23  ;;  %780 = vmatprep.subr.bf16.mxu0 %v1131_v24  ;;  %v345_v20 = vadd.f32 %v1412_v63, %v307_v9  ;;  %v349_v21 = vadd.f32 %v1412_v63, %v311_v10  ;;  %v277_v23 = vunpack.c.h.bf16 %v1423_v8  ;;  %v1173_v24 = vld [vmem:[%s1548_s3 + $0xa4] ss:$8 sps:$4 sm:$0xff]   ;;  %v312_v36 = vmul.f32 %v1440_v16, %v274_v6  ;;  %v1189_v9 = vld [vmem:[%s1548_s3 + $0x80] ss:$8 sps:$4 sm:$0xff]  }
  0x23   : > { %833 = vmatprep.subr.bf16.mxu1 %v1133_v25  ;;  %v1175_v25 = vld [vmem:[%s1548_s3 + $0x1a4] ss:$8 sps:$4 sm:$0xff]  }
  0x24   : > { %v350_v50 = vadd.f32 %v1442_v17, %v312_v36 }
  0x25   : > { %781 = vmatpush1.bf16.msra.mxu0 %v1135_v26  ;;  %v313_v26 = vmul.f32 %v1427_v11, %v275_v7 }
  0x26   : > { %834 = vmatpush1.bf16.msra.mxu1 %v1136_v27  ;;  %782 = vmatprep.subr.bf16.mxu0 %v1137_v28  ;;  %v306_v27 = vmul.f32 %v1435_v14, %v268_v54  ;;  %v310_v28 = vmul.f32 %v1435_v14, %v272_v60  ;;  %v366_v6 = vmax.f32 %v350_v50, 0.0 }
  0x27   : > { %835 = vmatprep.subr.bf16.mxu1 %v1139_v29  ;;  %v281_v29 = vunpack.c.h.bf16 %v1432_v13 }
  0x29   : > { %783 = vmatpush1.bf16.msra.mxu0 %v1141_v30  ;;  %v361_v30 = vmax.f32 %v345_v20, 0.0  ;;  %v319_v51 = vmul.f32 %v1409_v62, %v281_v29 }
  0x2a   : > { %836 = vmatpush1.bf16.msra.mxu1 %v1142_v31  ;;  %784 = vmatprep.subr.bf16.mxu0 %v1143_v32  ;;  %v365_v31 = vmax.f32 %v349_v21, 0.0  ;;  %v347_v32 = vadd.f32 %v1429_v12, %v309_v22 }
  0x2b   : > { %837 = vmatprep.subr.bf16.mxu1 %v1145_v33  ;;  %v308_v33 = vmul.f32 %v1440_v16, %v270_v4  ;;  %v357_v60 = vadd.f32 %v1412_v63, %v319_v51  ;;  %v280_v4 = vunpack.c.l.bf16 %v1432_v13  ;;  %v1190_v13 = vld [vmem:[%s1548_s3 + $0x180] ss:$8 sps:$4 sm:$0xff]  }
  0x2c   : > { %v377_v40 = vpack.c.bf16 %v365_v31, %v361_v30 }
  0x2d   : > { %785 = vmatpush2.bf16.msra.mxu0 %v1147_v34  ;;  %v351_v34 = vadd.f32 %v1429_v12, %v313_v26  ;;  %v373_v21 = vmax.f32 %v357_v60, 0.0 }
  0x2e   : > { %838 = vmatpush2.bf16.msra.mxu1 %v1148_v35  ;;  %786 = vmatprep.subr.bf16.mxu0 %v1149_v37  ;;  %v344_v35 = vadd.f32 %v1438_v15, %v306_v27  ;;  %v265_v37 = vld [vmem:[%s1382_s26 + $0x28] sm:$0xff] }
  0x2f   : > { %839 = vmatprep.subr.bf16.mxu1 %v1151_v38  ;;  %v1177_v38 = vld [vmem:[%s1548_s3 + $0xa0] ss:$8 sps:$4 sm:$0xff]   ;;  %800 = vmatprep.mubr.bf16.mxu0 %v377_v40  ;;  %v279_v53 = vunpack.c.h.bf16 %v265_v37 }
  0x30   : > { %v360_v55 = vmax.f32 %v344_v35, 0.0 }
  0x31   : > { %787 = vmatpush2.bf16.msra.mxu0 %v1153_v39  ;;  %v1178_v39 = vld [vmem:[%s1548_s3 + $0x1a0] ss:$8 sps:$4 sm:$0xff]   ;;  %v317_v61 = vmul.f32 %v1427_v11, %v279_v53 }
  0x32   : > { %840 = vmatpush2.bf16.msra.mxu1 %v1154_v41  ;;  %788 = vmatprep.subr.bf16.mxu0 %v1155_v42  ;;  %v363_v41 = vmax.f32 %v347_v32, 0.0  ;;  %v315_v42 = vmul.f32 %v1409_v62, %v277_v23  ;;  %v276_v62 = vunpack.c.l.bf16 %v1423_v8 }
  0x33   : > { %841 = vmatprep.subr.bf16.mxu1 %v1157_v43  ;;  %v267_v43 = vld [vmem:[%s1382_s26 + $0x38] sm:$0xff]  ;;  %v355_v7 = vadd.f32 %v1429_v12, %v317_v61 }
  0x34   : > { %v283_v56 = vunpack.c.h.bf16 %v267_v43  ;;  %v282_v8 = vunpack.c.l.bf16 %v267_v43 }
  0x35   : > { %789 = vmatpush2.bf16.msra.mxu0 %v1159_v44  ;;  %v1179_v44 = vld [vmem:[%s1548_s3 + $0x94] ss:$8 sps:$4 sm:$0xff]   ;;  %v371_v22 = vmax.f32 %v355_v7, 0.0 }
  0x36   : > { %842 = vmatpush2.bf16.msra.mxu1 %v1160_v45  ;;  %790 = vmatprep.subr.bf16.mxu0 %v1161_v46  ;;  %v1181_v45 = vld [vmem:[%s1548_s3 + $0x194] ss:$8 sps:$4 sm:$0xff]   ;;  %v367_v46 = vmax.f32 %v351_v34, 0.0  ;;  %v320_v23 = vmul.f32 %v1440_v16, %v282_v8 }
  0x37   : > { %843 = vmatprep.subr.bf16.mxu1 %v1163_v48  ;;  %v348_v48 = vadd.f32 %v1438_v15, %v310_v28 }
  0x38   : > { %v379_v54 = vpack.c.bf16 %v367_v46, %v363_v41  ;;  %v358_v28 = vadd.f32 %v1442_v17, %v320_v23 }
  0x39   : > { %791 = vmatpush2.bf16.msra.mxu0 %v1165_v49  ;;  %v346_v49 = vadd.f32 %v1442_v17, %v308_v33 }
  0x3a   : > { %844 = vmatpush2.bf16.msra.mxu1 %v1166_v59  ;;  %792 = vmatprep.subr.bf16.mxu0 %v1167_v2  ;;  %v353_v59 = vadd.f32 %v1412_v63, %v315_v42  ;;  %v364_v2 = vmax.f32 %v348_v48, 0.0  ;;  %v278_v63 = vunpack.c.l.bf16 %v265_v37  ;;  %v374_v33 = vmax.f32 %v358_v28, 0.0 }
  0x3b   : > { %845 = vmatprep.subr.bf16.mxu1 %v1169_v3  ;;  %v321_v3 = vmul.f32 %v1427_v11, %v283_v56  ;;  %853 = vmatprep.mubr.bf16.mxu1 %v379_v54  ;;  %v362_v5 = vmax.f32 %v346_v49, 0.0 }
  0x3c   : > { %v316_v11 = vmul.f32 %v1440_v16, %v278_v63  ;;  %v369_v20 = vmax.f32 %v353_v59, 0.0 }
  0x3d   : > { %793 = vmatpush2.bf16.msra.mxu0 %v1171_v18  ;;  %v359_v10 = vadd.f32 %v1429_v12, %v321_v3  ;;  %v314_v18 = vmul.f32 %v1435_v14, %v276_v62 }
  0x3e   : > { %846 = vmatpush2.bf16.msra.mxu1 %v1172_v19  ;;  %794 = vmatprep.subr.bf16.mxu0 %v1173_v24  ;;  %v318_v19 = vmul.f32 %v1435_v14, %v280_v4  ;;  %v376_v24 = vpack.c.bf16 %v364_v2, %v360_v55  ;;  %v354_v27 = vadd.f32 %v1442_v17, %v316_v11 }
  0x3f   : > { %847 = vmatprep.subr.bf16.mxu1 %v1175_v25  ;;  %v375_v12 = vmax.f32 %v359_v10, 0.0  ;;  %v378_v25 = vpack.c.bf16 %v366_v6, %v362_v5  ;;  %v352_v14 = vadd.f32 %v1438_v15, %v314_v18  ;;  %v381_v29 = vpack.c.bf16 %v373_v21, %v369_v20 }
  0x40   : > { %v356_v26 = vadd.f32 %v1438_v15, %v318_v19  ;;  %v370_v32 = vmax.f32 %v354_v27, 0.0  ;;  %v874_v15 = vld [vmem:[%s1549_s4] sm:$0x3] }
  0x41   : > { %795 = vmatpush2.bf16.msra.mxu0 %v1177_v38  ;;  %v383_v30 = vpack.c.bf16 %v375_v12, %v371_v22  ;;  %v368_v16 = vmax.f32 %v352_v14, 0.0  ;;  %v879_v17 = vrot.slane %v874_v15, %v1396_v52  ;;  %v894_v38 = vld [vmem:[%s1550_s5] sm:$0x3]  ;;  %v883_v40 = vrot.slane %v874_v15, %v1387_v47 }
  0x42   : > { %848 = vmatpush2.bf16.msra.mxu1 %v1178_v39  ;;  %796 = vmatprep.subr.bf16.mxu0 %v1179_v44  ;;  %v372_v31 = vmax.f32 %v356_v26, 0.0  ;;  %v382_v35 = vpack.c.bf16 %v374_v33, %v370_v32  ;;  %v899_v44 = vrot.slane %v894_v38, %v1396_v52  ;;  %v903_v46 = vrot.slane %v894_v38, %v1387_v47 }
  0x43   : > { %849 = vmatprep.subr.bf16.mxu1 %v1181_v45 }
  0x44   : > { %v380_v34 = vpack.c.bf16 %v372_v31, %v368_v16 }
  0x45   : > { %797 = vmatpush2.bf16.msra.mxu0 %v1183_v57 }
  0x46   : > { %850 = vmatpush2.bf16.msra.mxu1 %v1184_v58  ;;  %798 = vmatprep.subr.bf16.mxu0 %v1185_v0 }
  0x47   : > { %851 = vmatprep.subr.bf16.mxu1 %v1187_v1 }
  0x49   : > { %799 = vmatpush2.bf16.msra.mxu0 %v1189_v9 }
  0x4a   : > { %852 = vmatpush2.bf16.msra.mxu1 %v1190_v13 }
  0x4c   : > { %801 = vmatmul.mubr.bf16.vlgmr.msra.gmra.mxu0 %v376_v24 }
  0x4d   : > { %854 = vmatmul.mubr.bf16.vlgmr.msra.gmra.mxu1 %v378_v25  ;;  %810 = vmatprep.mubr.bf16.mxu0 %v381_v29 }
  0x4e   : > { %863 = vmatprep.mubr.bf16.mxu1 %v383_v30 }
  0x54   : > { %811 = vmatmul.mubr.bf16.gmra.mxu0 %v380_v34 }
  0x55   : > { %864 = vmatmul.mubr.bf16.gmra.mxu1 %v382_v35 }
 0x10c   : > { %v802_v36 = vpop.f32.mrf.mxu0 }
 0x10d   : > { %v855_v37 = vpop.f32.mrf.mxu1 }
 0x10e   : > { %v856_v39 = vadd.f32 %v855_v37, %v802_v36  ;;  %v804_v41 = vpop.f32.mrf.mxu0 }
 0x10f   : > { %v857_v42 = vpop.f32.mrf.mxu1 }
 0x110   : > { %v886_v43 = vmul.f32 %v879_v17, %v856_v39  ;;  %v858_v45 = vadd.f32 %v857_v42, %v804_v41  ;;  %v806_v48 = vpop.f32.mrf.mxu0 }
 0x111   : > { %v859_v49 = vpop.f32.mrf.mxu1 }
 0x112   : > { %v887_v50 = vmul.f32 %v883_v40, %v858_v45  ;;  %v860_v51 = vadd.f32 %v859_v49, %v806_v48  ;;  %v808_v53 = vpop.f32.mrf.mxu0  ;;  %v906_v55 = vadd.f32 %v899_v44, %v886_v43 }
 0x113   : > { %v861_v54 = vpop.f32.mrf.mxu1 }
 0x114   : > { %v907_v56 = vadd.f32 %v903_v46, %v887_v50  ;;  %v888_v57 = vmul.f32 %v879_v17, %v860_v51  ;;  %v862_v58 = vadd.f32 %v861_v54, %v808_v53  ;;  %v812_v52 = vpop.f32.mrf.mxu0 }
 0x115   : > { %v865_v59 = vpop.f32.mrf.mxu1 }
 0x116   : > { %v1083_v47 = vpack.c.bf16 %v907_v56, %v906_v55  ;;  %v889_v60 = vmul.f32 %v883_v40, %v862_v58  ;;  %v866_v61 = vadd.f32 %v865_v59, %v812_v52  ;;  %v814_v62 = vpop.f32.mrf.mxu0  ;;  %v908_v1 = vadd.f32 %v899_v44, %v888_v57 }
 0x117   : > { %v867_v0 = vpop.f32.mrf.mxu1 }
 0x118   : > { %938 = vst [vmem:[%s1536_s11] sm:$0xff] %v1083_v47  ;;  %v909_v2 = vadd.f32 %v903_v46, %v889_v60  ;;  %v890_v3 = vmul.f32 %v879_v17, %v866_v61  ;;  %v868_v4 = vadd.f32 %v867_v0, %v814_v62  ;;  %v816_v63 = vpop.f32.mrf.mxu0 }
 0x119   : > { %v869_v5 = vpop.f32.mrf.mxu1 }
 0x11a   : > { %v1084_v6 = vpack.c.bf16 %v909_v2, %v908_v1  ;;  %v891_v7 = vmul.f32 %v883_v40, %v868_v4  ;;  %v870_v8 = vadd.f32 %v869_v5, %v816_v63  ;;  %v818_v9 = vpop.f32.mrf.mxu0  ;;  %v910_v18 = vadd.f32 %v899_v44, %v890_v3 }
 0x11b   : > { %v871_v10 = vpop.f32.mrf.mxu1 }
 0x11c   : > { %939 = vst [vmem:[%s1536_s11 + $0x8] sm:$0xff] %v1084_v6  ;;  %v911_v19 = vadd.f32 %v903_v46, %v891_v7  ;;  %v892_v11 = vmul.f32 %v879_v17, %v870_v8  ;;  %v872_v13 = vadd.f32 %v871_v10, %v818_v9 }
 0x11e   : > { %v1085_v20 = vpack.c.bf16 %v911_v19, %v910_v18  ;;  %v893_v21 = vmul.f32 %v883_v40, %v872_v13  ;;  %v912_v22 = vadd.f32 %v899_v44, %v892_v11 }
 0x120   : > { %940 = vst [vmem:[%s1536_s11 + $0x10] sm:$0xff] %v1085_v20  ;;  %v913_v23 = vadd.f32 %v903_v46, %v893_v21 }
 0x122   : > { %v1086_v12 = vpack.c.bf16 %v913_v23, %v912_v22 }
 0x124   : > { %941 = vst [vmem:[%s1536_s11 + $0x18] sm:$0xff] %v1086_v12 }
 0x125 PF: > { %s16_s21 = sadd.s32 1, %s1197_s21  }
 0x126   : > { %p13_p4 = scmp.ge.s32.totalorder %s16_s21, 6  }
 0x128   :  { %15 = sbr.rel (!%p13_p4) target bundleno = 1 (0x1), region = 74 }

// kernel: closed_call.55
= control target key start
LH: loop header
LB: loop body
LE: loop exit
PB: predicated region body
PF: predicated region fallthrough
CT: control target
= control target key end

     0   :  { %s1640_s15 = smov 0   ;;  %s1905_s0 = inlined_call_operand.vmem [shape: bf16[128,1152], index: 0, kind: input, shape index: {}]   ;;  %s1906_s1 = inlined_call_operand.vmem [shape: bf16[1152,128], index: 1, kind: input, shape index: {}]   ;;  %s1907_s2 = inlined_call_operand.vmem [shape: f32[1,128], index: 2, kind: input, shape index: {}]   ;;  %s1908_s3 = inlined_call_operand.vmem [shape: f32[1,128], index: 3, kind: input, shape index: {}]   ;;  %s1909_s4 = inlined_call_operand.vmem [shape: bf16[128,128], index: 4, kind: output, shape index: {}]  }
   0x1 LB: > { %s1236_s16 = sadd.s32 4294967295, %s1613_s15   ;;  %p1240_p0 = scmp.ge.s32.totalorder %s1613_s15, 1  ;;  %s1613_s15 = sphi %s1640_s15, %s14_s15  }
   0x2   : > { %p164_p1 = scmp.lt.s32.totalorder %s1613_s15, 5 }
   0x4   : > { %p165_p2 = pnand %p1240_p0, %p164_p1 }
   0x5   : > { %s1241_s23 = sshll.u32 (!%p165_p2), %s1236_s16, 2 }
   0x6   : > { %168 = sbr.rel (%p165_p2) target bundleno = 317 (0x13d), region = 36  ;;  %p192_p3 = scmp.lt.s32.totalorder (!%p165_p2), %s1241_s23, 15 }
   0xb   : > { %v1509_v0 = vld [vmem:[%s1906_s1 + $0x78] sm:$0xff]   ;;  %v1513_v4 = vld [vmem:[%s1906_s1 + $0x70] sm:$0xff]   ;;  %v1517_v8 = vld [vmem:[%s1906_s1 + $0x68] sm:$0xff]   ;;  %s1911_s23 = smov (!%p192_p3, %s1241_s23), 15 }
   0xc   : > { %v1510_v1 = vld [vmem:[%s1906_s1 + $0xf8] sm:$0xff]   ;;  %1358 = vmatprep.subr.bf16.mxu0 %v1509_v0  ;;  %v1514_v5 = vld [vmem:[%s1906_s1 + $0xf0] sm:$0xff]   ;;  %v1518_v9 = vld [vmem:[%s1906_s1 + $0xe8] sm:$0xff]   ;;  %s1500_s21 = smul.u32 36, %s1911_s23  ;;  %s1244_s28 = sshll.u32 %s1911_s23, 2 }
   0xd   : > { %v1511_v2 = vld [vmem:[%s1906_s1 + $0x38] sm:$0xff]   ;;  %1386 = vmatprep.subr.bf16.mxu1 %v1510_v1  ;;  %v1515_v6 = vld [vmem:[%s1906_s1 + $0x30] sm:$0xff]   ;;  %v1519_v10 = vld [vmem:[%s1906_s1 + $0x28] sm:$0xff]   ;;  %s202_s5 = scalar_lea.vmem %s1909_s4, %s1244_s28 }
   0xe   : > { %v1512_v3 = vld [vmem:[%s1906_s1 + $0xb8] sm:$0xff]   ;;  %1359 = vmatpush3.bf16.msra.mxu0 %v1511_v2  ;;  %v1516_v7 = vld [vmem:[%s1906_s1 + $0xb0] sm:$0xff]   ;;  %v1520_v11 = vld [vmem:[%s1906_s1 + $0xa8] sm:$0xff]   ;;  %s1746_s6 = scalar_lea.vmem %s1905_s0, %s1500_s21 }
   0xf   : > { %1387 = vmatpush3.bf16.msra.mxu1 %v1512_v3  ;;  %1360 = vmatprep.subr.bf16.mxu0 %v1513_v4  ;;  %v1521_v12 = vld [vmem:[%s1906_s1 + $0x60] sm:$0xff]   ;;  %v1525_v16 = vld [vmem:[%s1906_s1 + $0x58] sm:$0xff]   ;;  %v1529_v20 = vld [vmem:[%s1906_s1 + $0x50] sm:$0xff]  }
  0x10   : > { %1388 = vmatprep.subr.bf16.mxu1 %v1514_v5  ;;  %v1522_v13 = vld [vmem:[%s1906_s1 + $0xe0] sm:$0xff]   ;;  %v1526_v17 = vld [vmem:[%s1906_s1 + $0xd8] sm:$0xff]   ;;  %v1530_v21 = vld [vmem:[%s1906_s1 + $0xd0] sm:$0xff]  }
  0x11   : > { %v1523_v14 = vld [vmem:[%s1906_s1 + $0x20] sm:$0xff]   ;;  %v1527_v18 = vld [vmem:[%s1906_s1 + $0x18] sm:$0xff]   ;;  %v1531_v22 = vld [vmem:[%s1906_s1 + $0x10] sm:$0xff]  }
  0x12   : > { %1361 = vmatpush3.bf16.msra.mxu0 %v1515_v6  ;;  %v1524_v15 = vld [vmem:[%s1906_s1 + $0xa0] sm:$0xff]   ;;  %v1528_v19 = vld [vmem:[%s1906_s1 + $0x98] sm:$0xff]   ;;  %v1532_v23 = vld [vmem:[%s1906_s1 + $0x90] sm:$0xff]  }
  0x13   : > { %1389 = vmatpush3.bf16.msra.mxu1 %v1516_v7  ;;  %1362 = vmatprep.subr.bf16.mxu0 %v1517_v8  ;;  %v1533_v24 = vld [vmem:[%s1906_s1 + $0x48] sm:$0xff]   ;;  %v1537_v28 = vld [vmem:[%s1906_s1 + $0x40] sm:$0xff]   ;;  %v1547_v36 = vld [vmem:[%s1906_s1 + $0x178] sm:$0xff]  }
  0x14   : > { %1390 = vmatprep.subr.bf16.mxu1 %v1518_v9  ;;  %v1534_v25 = vld [vmem:[%s1906_s1 + $0xc8] sm:$0xff]   ;;  %v1538_v29 = vld [vmem:[%s1906_s1 + $0xc0] sm:$0xff]   ;;  %v1548_v37 = vld [vmem:[%s1906_s1 + $0x138] sm:$0xff]  }
  0x15   : > { %v1535_v26 = vld [vmem:[%s1906_s1 + $0x8] sm:$0xff]   ;;  %v1539_v30 = vld [vmem:[%s1906_s1] sm:$0xff]   ;;  %v1549_v38 = vld [vmem:[%s1906_s1 + $0x1f8] sm:$0xff]  }
  0x16   : > { %1363 = vmatpush3.bf16.msra.mxu0 %v1519_v10  ;;  %v1536_v27 = vld [vmem:[%s1906_s1 + $0x88] sm:$0xff]   ;;  %v1540_v31 = vld [vmem:[%s1906_s1 + $0x80] sm:$0xff]   ;;  %v1550_v39 = vld [vmem:[%s1906_s1 + $0x1b8] sm:$0xff]  }
  0x17   : > { %1391 = vmatpush3.bf16.msra.mxu1 %v1520_v11  ;;  %1364 = vmatprep.subr.bf16.mxu0 %v1521_v12  ;;  %v1541_v32 = vld [vmem:[%s1746_s6] ss:$36 sps:$4 sm:$0xff]   ;;  %v1544_v34 = vld [vmem:[%s1746_s6 + $0x8] ss:$36 sps:$4 sm:$0xff]   ;;  %v1551_v40 = vld [vmem:[%s1906_s1 + $0x170] sm:$0xff]  }
  0x18   : > { %1392 = vmatprep.subr.bf16.mxu1 %v1522_v13  ;;  %v1543_v33 = vld [vmem:[%s1746_s6 + $0x4] ss:$36 sps:$4 sm:$0xff]   ;;  %v1546_v35 = vld [vmem:[%s1746_s6 + $0xc] ss:$36 sps:$4 sm:$0xff]   ;;  %v1563_v52 = vld [vmem:[%s1906_s1 + $0x158] sm:$0xff]  }
  0x19   : > { %925 = vmatprep.mubr.bf16.mxu0 %v1543_v33  ;;  %974 = vmatprep.mubr.bf16.mxu1 %v1546_v35  ;;  %v1552_v41 = vld [vmem:[%s1906_s1 + $0x130] sm:$0xff]   ;;  %v1555_v44 = vld [vmem:[%s1906_s1 + $0x168] sm:$0xff]   ;;  %v1559_v48 = vld [vmem:[%s1906_s1 + $0x160] sm:$0xff]  }
  0x1a   : > { %1365 = vmatpush3.bf16.msra.mxu0 %v1523_v14  ;;  %v1553_v42 = vld [vmem:[%s1906_s1 + $0x1f0] sm:$0xff]   ;;  %v1556_v45 = vld [vmem:[%s1906_s1 + $0x128] sm:$0xff]   ;;  %v1560_v49 = vld [vmem:[%s1906_s1 + $0x120] sm:$0xff]  }
  0x1b   : > { %1393 = vmatpush3.bf16.msra.mxu1 %v1524_v15  ;;  %1366 = vmatprep.subr.bf16.mxu0 %v1525_v16  ;;  %v1554_v43 = vld [vmem:[%s1906_s1 + $0x1b0] sm:$0xff]   ;;  %v1557_v46 = vld [vmem:[%s1906_s1 + $0x1e8] sm:$0xff]   ;;  %v1561_v50 = vld [vmem:[%s1906_s1 + $0x1e0] sm:$0xff]  }
  0x1c   : > { %1394 = vmatprep.subr.bf16.mxu1 %v1526_v17  ;;  %v1558_v47 = vld [vmem:[%s1906_s1 + $0x1a8] sm:$0xff]   ;;  %v1562_v51 = vld [vmem:[%s1906_s1 + $0x1a0] sm:$0xff]   ;;  %v1564_v53 = vld [vmem:[%s1906_s1 + $0x118] sm:$0xff]  }
  0x1d   : > { %v1565_v54 = vld [vmem:[%s1746_s6 + $0x4c] ss:$36 sps:$4 sm:$0xff]   ;;  %v1567_v55 = vld [vmem:[%s1746_s6 + $0x54] ss:$36 sps:$4 sm:$0xff]   ;;  %v1581_v4 = vld [vmem:[%s1906_s1 + $0x140] sm:$0xff]  }
  0x1e   : > { %1367 = vmatpush3.bf16.msra.mxu0 %v1527_v18  ;;  %v1569_v56 = vld [vmem:[%s1906_s1 + $0x1d8] sm:$0xff]   ;;  %v1570_v57 = vld [vmem:[%s1746_s6 + $0x48] ss:$36 sps:$4 sm:$0xff]   ;;  %v1571_v58 = vld [vmem:[%s1746_s6 + $0x50] ss:$36 sps:$4 sm:$0xff]  }
  0x1f   : > { %1395 = vmatpush3.bf16.msra.mxu1 %v1528_v19  ;;  %1368 = vmatprep.subr.bf16.mxu0 %v1529_v20  ;;  %v1572_v59 = vld [vmem:[%s1906_s1 + $0x198] sm:$0xff]   ;;  %v1573_v60 = vld [vmem:[%s1906_s1 + $0x150] sm:$0xff]   ;;  %v1577_v0 = vld [vmem:[%s1906_s1 + $0x148] sm:$0xff]  }
  0x20   : > { %1396 = vmatprep.subr.bf16.mxu1 %v1530_v21  ;;  %v1574_v61 = vld [vmem:[%s1906_s1 + $0x110] sm:$0xff]   ;;  %v1578_v1 = vld [vmem:[%s1906_s1 + $0x108] sm:$0xff]   ;;  %v1582_v5 = vld [vmem:[%s1906_s1 + $0x100] sm:$0xff]  }
  0x21   : > { %v1575_v62 = vld [vmem:[%s1906_s1 + $0x1d0] sm:$0xff]   ;;  %v1579_v2 = vld [vmem:[%s1906_s1 + $0x1c8] sm:$0xff]   ;;  %v1583_v6 = vld [vmem:[%s1906_s1 + $0x1c0] sm:$0xff]  }
  0x22   : > { %1369 = vmatpush3.bf16.msra.mxu0 %v1531_v22  ;;  %v1576_v63 = vld [vmem:[%s1906_s1 + $0x190] sm:$0xff]   ;;  %v1580_v3 = vld [vmem:[%s1906_s1 + $0x188] sm:$0xff]   ;;  %v1587_v9 = vld [vmem:[%s1906_s1 + $0x180] sm:$0xff]  }
  0x23   : > { %1397 = vmatpush3.bf16.msra.mxu1 %v1532_v23  ;;  %1370 = vmatprep.subr.bf16.mxu0 %v1533_v24  ;;  %v1584_v7 = vld [vmem:[%s1746_s6 + $0x10] ss:$36 sps:$4 sm:$0xff]   ;;  %v1588_v10 = vld [vmem:[%s1906_s1 + $0x238] sm:$0xff]   ;;  %v1596_v16 = vld [vmem:[%s1906_s1 + $0x228] sm:$0xff]  }
  0x24   : > { %1398 = vmatprep.subr.bf16.mxu1 %v1534_v25  ;;  %v1586_v8 = vld [vmem:[%s1746_s6 + $0x14] ss:$36 sps:$4 sm:$0xff]   ;;  %v1591_v12 = vld [vmem:[%s1746_s6 + $0x1c] ss:$36 sps:$4 sm:$0xff]   ;;  %v1597_v17 = vld [vmem:[%s1746_s6 + $0x64] ss:$36 sps:$4 sm:$0xff]  }
  0x25   : > { %v1589_v11 = vld [vmem:[%s1746_s6 + $0x18] ss:$36 sps:$4 sm:$0xff]   ;;  %v1592_v13 = vld [vmem:[%s1906_s1 + $0x230] sm:$0xff]   ;;  %v1599_v18 = vld [vmem:[%s1746_s6 + $0x60] ss:$36 sps:$4 sm:$0xff]  }
  0x26   : > { %1371 = vmatpush3.bf16.msra.mxu0 %v1535_v26  ;;  %v1593_v14 = vld [vmem:[%s1746_s6 + $0x5c] ss:$36 sps:$4 sm:$0xff]   ;;  %v1602_v22 = vld [vmem:[%s1906_s1 + $0x210] sm:$0xff]   ;;  %v1603_v23 = vld [vmem:[%s1906_s1 + $0x208] sm:$0xff]  }
  0x27   : > { %1399 = vmatpush3.bf16.msra.mxu1 %v1536_v27  ;;  %1372 = vmatprep.subr.bf16.mxu0 %v1537_v28  ;;  %v1595_v15 = vld [vmem:[%s1746_s6 + $0x58] ss:$36 sps:$4 sm:$0xff]   ;;  %v1600_v19 = vld [vmem:[%s1906_s1 + $0x220] sm:$0xff]   ;;  %v1606_v25 = vld [vmem:[%s1746_s6 + $0x68] ss:$36 sps:$4 sm:$0xff]  }
  0x28   : > { %1400 = vmatprep.subr.bf16.mxu1 %v1538_v29  ;;  %v1601_v20 = vld [vmem:[%s1906_s1 + $0x218] sm:$0xff]   ;;  %v1605_v21 = vld [vmem:[%s1746_s6 + $0x20] ss:$36 sps:$4 sm:$0xff]  }
  0x29   : > { %v1604_v24 = vld [vmem:[%s1906_s1 + $0x200] sm:$0xff]  }
  0x2a   : > { %1373 = vmatpush3.bf16.msra.mxu0 %v1539_v30 }
  0x2b   : > { %1401 = vmatpush3.bf16.msra.mxu1 %v1540_v31  ;;  %1414 = vmatprep.subr.bf16.mxu0 %v1547_v36 }
  0x2c   : > { %1442 = vmatprep.subr.bf16.mxu1 %v1549_v38 }
  0x2d   : > { %926 = vmatmul.mubr.bf16.vlgmr.msra.gmra.mxu0 %v1541_v32 }
  0x2e   : > { %975 = vmatmul.mubr.bf16.vlgmr.msra.gmra.mxu1 %v1544_v34  ;;  %1415 = vmatpush3.bf16.msra.mxu0 %v1548_v37 }
  0x2f   : > { %1443 = vmatpush3.bf16.msra.mxu1 %v1550_v39  ;;  %1416 = vmatprep.subr.bf16.mxu0 %v1551_v40 }
  0x30   : > { %1444 = vmatprep.subr.bf16.mxu1 %v1553_v42  ;;  %933 = vmatprep.mubr.bf16.mxu0 %v1565_v54 }
  0x31   : > { %982 = vmatprep.mubr.bf16.mxu1 %v1567_v55 }
  0x32   : > { %1417 = vmatpush3.bf16.msra.mxu0 %v1552_v41 }
  0x33   : > { %1445 = vmatpush3.bf16.msra.mxu1 %v1554_v43  ;;  %1418 = vmatprep.subr.bf16.mxu0 %v1555_v44 }
  0x34   : > { %1446 = vmatprep.subr.bf16.mxu1 %v1557_v46 }
  0x35   : > { %934 = vmatmul.mubr.bf16.gmra.mxu0 %v1570_v57 }
  0x36   : > { %1419 = vmatpush3.bf16.msra.mxu0 %v1556_v45  ;;  %983 = vmatmul.mubr.bf16.gmra.mxu1 %v1571_v58 }
  0x37   : > { %1447 = vmatpush3.bf16.msra.mxu1 %v1558_v47  ;;  %1420 = vmatprep.subr.bf16.mxu0 %v1559_v48 }
  0x38   : > { %1448 = vmatprep.subr.bf16.mxu1 %v1561_v50  ;;  %1023 = vmatprep.mubr.bf16.mxu0 %v1586_v8 }
  0x39   : > { %1072 = vmatprep.mubr.bf16.mxu1 %v1591_v12 }
  0x3a   : > { %1421 = vmatpush3.bf16.msra.mxu0 %v1560_v49 }
  0x3b   : > { %1449 = vmatpush3.bf16.msra.mxu1 %v1562_v51  ;;  %1422 = vmatprep.subr.bf16.mxu0 %v1563_v52 }
  0x3c   : > { %1450 = vmatprep.subr.bf16.mxu1 %v1569_v56 }
  0x3e   : > { %1423 = vmatpush3.bf16.msra.mxu0 %v1564_v53 }
  0x3f   : > { %1451 = vmatpush3.bf16.msra.mxu1 %v1572_v59  ;;  %1424 = vmatprep.subr.bf16.mxu0 %v1573_v60 }
  0x40   : > { %1452 = vmatprep.subr.bf16.mxu1 %v1575_v62 }
  0x42   : > { %1425 = vmatpush3.bf16.msra.mxu0 %v1574_v61 }
  0x43   : > { %1453 = vmatpush3.bf16.msra.mxu1 %v1576_v63  ;;  %1426 = vmatprep.subr.bf16.mxu0 %v1577_v0 }
  0x44   : > { %1454 = vmatprep.subr.bf16.mxu1 %v1579_v2 }
  0x46   : > { %1427 = vmatpush3.bf16.msra.mxu0 %v1578_v1 }
  0x47   : > { %1455 = vmatpush3.bf16.msra.mxu1 %v1580_v3  ;;  %1428 = vmatprep.subr.bf16.mxu0 %v1581_v4 }
  0x48   : > { %1456 = vmatprep.subr.bf16.mxu1 %v1583_v6 }
  0x4a   : > { %1429 = vmatpush3.bf16.msra.mxu0 %v1582_v5 }
  0x4b   : > { %1457 = vmatpush3.bf16.msra.mxu1 %v1587_v9  ;;  %1480 = vmatprep.subr.bf16.mxu0 %v1588_v10 }
  0x4d   : > { %1024 = vmatmul.mubr.bf16.vlgmr.msra.gmra.mxu0 %v1584_v7 }
  0x4e   : > { %1481 = vmatpush3.bf16.msra.mxu0 %v1588_v10  ;;  %1073 = vmatmul.mubr.bf16.vlgmr.msra.gmra.mxu1 %v1589_v11 }
  0x4f   : > { %1482 = vmatprep.subr.bf16.mxu0 %v1592_v13  ;;  %1031 = vmatprep.mubr.bf16.mxu0 %v1593_v14 }
  0x50   : > { %1080 = vmatprep.mubr.bf16.mxu1 %v1597_v17 }
  0x52   : > { %1483 = vmatpush3.bf16.msra.mxu0 %v1592_v13 }
  0x53   : > { %1484 = vmatprep.subr.bf16.mxu0 %v1596_v16 }
  0x55   : > { %1032 = vmatmul.mubr.bf16.gmra.mxu0 %v1595_v15 }
  0x56   : > { %1485 = vmatpush3.bf16.msra.mxu0 %v1596_v16  ;;  %1081 = vmatmul.mubr.bf16.gmra.mxu1 %v1599_v18 }
  0x57   : > { %1486 = vmatprep.subr.bf16.mxu0 %v1600_v19  ;;  %1496 = vmatprep.mubr.bf16.mxu0 %v1605_v21 }
  0x5a   : > { %1487 = vmatpush3.bf16.msra.mxu0 %v1600_v19 }
  0x5b   : > { %1488 = vmatprep.subr.bf16.mxu0 %v1601_v20 }
  0x5e   : > { %1489 = vmatpush3.bf16.msra.mxu0 %v1601_v20 }
  0x5f   : > { %1490 = vmatprep.subr.bf16.mxu0 %v1602_v22 }
  0x62   : > { %1491 = vmatpush3.bf16.msra.mxu0 %v1602_v22  ;;  %v1335_v22 = vld [vmem:[%s1907_s2] ss:$0 sm:$0xff] }
  0x63   : > { %1492 = vmatprep.subr.bf16.mxu0 %v1603_v23 }
  0x66   : > { %1493 = vmatpush3.bf16.msra.mxu0 %v1603_v23 }
  0x67   : > { %1494 = vmatprep.subr.bf16.mxu0 %v1604_v24 }
  0x6a   : > { %1495 = vmatpush3.bf16.msra.mxu0 %v1604_v24 }
  0x6d   : > { %1497 = vmatmul.mubr.bf16.vlgmr.msra.gmra.mxu0 %v1606_v25 }
  0xed   : > { %v1374_v26 = vpop.f32.mrf.mxu0 }
  0xee   : > { %v1402_v27 = vpop.f32.mrf.mxu1 }
  0xef   : > { %v1375_v28 = vpop.f32.mrf.mxu0 }
  0xf0   : > { %v1403_v29 = vpop.f32.mrf.mxu1  ;;  %v1376_v57 = vadd.f32 %v1375_v28, %v1374_v26 }
  0xf1   : > { %v1377_v30 = vpop.f32.mrf.mxu0  ;;  %v1404_v58 = vadd.f32 %v1403_v29, %v1402_v27 }
  0xf2   : > { %v1405_v31 = vpop.f32.mrf.mxu1 }
  0xf3   : > { %v1378_v32 = vpop.f32.mrf.mxu0  ;;  %v977_v2 = vadd.f32 %v1404_v58, %v1376_v57 }
  0xf4   : > { %v1406_v34 = vpop.f32.mrf.mxu1  ;;  %v1379_v3 = vadd.f32 %v1378_v32, %v1377_v30  ;;  %v1336_v30 = vld [vmem:[%s1908_s3] ss:$0 sm:$0xff] }
  0xf5   : > { %v1380_v33 = vpop.f32.mrf.mxu0  ;;  %v1407_v4 = vadd.f32 %v1406_v34, %v1405_v31 }
  0xf6   : > { %v1408_v35 = vpop.f32.mrf.mxu1 }
  0xf7   : > { %v1381_v36 = vpop.f32.mrf.mxu0  ;;  %v980_v13 = vadd.f32 %v1407_v4, %v1379_v3 }
  0xf8   : > { %v1409_v37 = vpop.f32.mrf.mxu1  ;;  %v1382_v55 = vadd.f32 %v1381_v36, %v1380_v33 }
  0xf9   : > { %v1383_v38 = vpop.f32.mrf.mxu0  ;;  %v1410_v56 = vadd.f32 %v1409_v37, %v1408_v35 }
  0xfa   : > { %v1411_v39 = vpop.f32.mrf.mxu1 }
  0xfb   : > { %v1384_v40 = vpop.f32.mrf.mxu0  ;;  %v985_v62 = vadd.f32 %v1410_v56, %v1382_v55 }
  0xfc   : > { %v1412_v42 = vpop.f32.mrf.mxu1  ;;  %v1385_v63 = vadd.f32 %v1384_v40, %v1383_v38 }
  0xfd   : > { %v1413_v0 = vadd.f32 %v1412_v42, %v1411_v39 }
  0xff   : > { %v988_v9 = vadd.f32 %v1413_v0, %v1385_v63 }
 0x10d   : > { %v1430_v41 = vpop.f32.mrf.mxu0 }
 0x10e   : > { %v1458_v44 = vpop.f32.mrf.mxu1 }
 0x10f   : > { %v1431_v43 = vpop.f32.mrf.mxu0 }
 0x110   : > { %v1459_v46 = vpop.f32.mrf.mxu1  ;;  %v1432_v1 = vadd.f32 %v1431_v43, %v1430_v41 }
 0x111   : > { %v1433_v45 = vpop.f32.mrf.mxu0  ;;  %v1460_v11 = vadd.f32 %v1459_v46, %v1458_v44 }
 0x112   : > { %v1461_v48 = vpop.f32.mrf.mxu1  ;;  %v1026_v10 = vadd.f32 %v1432_v1, %v977_v2 }
 0x113   : > { %v1434_v47 = vpop.f32.mrf.mxu0 }
 0x114   : > { %v1462_v50 = vpop.f32.mrf.mxu1  ;;  %v1435_v12 = vadd.f32 %v1434_v47, %v1433_v45  ;;  %v1075_v21 = vadd.f32 %v1460_v11, %v1026_v10 }
 0x115   : > { %v1436_v49 = vpop.f32.mrf.mxu0  ;;  %v1463_v19 = vadd.f32 %v1462_v50, %v1461_v48 }
 0x116   : > { %v1464_v52 = vpop.f32.mrf.mxu1  ;;  %v1029_v18 = vadd.f32 %v1435_v12, %v980_v13 }
 0x117   : > { %v1437_v51 = vpop.f32.mrf.mxu0 }
 0x118   : > { %v1465_v54 = vpop.f32.mrf.mxu1  ;;  %v1438_v59 = vadd.f32 %v1437_v51, %v1436_v49  ;;  %v1078_v29 = vadd.f32 %v1463_v19, %v1029_v18 }
 0x119   : > { %v1439_v53 = vpop.f32.mrf.mxu0  ;;  %v1466_v6 = vadd.f32 %v1465_v54, %v1464_v52 }
 0x11a   : > { %v1467_v61 = vpop.f32.mrf.mxu1  ;;  %v1034_v5 = vadd.f32 %v1438_v59, %v985_v62 }
 0x11b   : > { %v1440_v60 = vpop.f32.mrf.mxu0 }
 0x11c   : > { %v1441_v7 = vadd.f32 %v1440_v60, %v1439_v53  ;;  %v1468_v8 = vpop.f32.mrf.mxu1  ;;  %v1083_v16 = vadd.f32 %v1466_v6, %v1034_v5 }
 0x11d   : > { %v1469_v15 = vadd.f32 %v1468_v8, %v1467_v61 }
 0x11e   : > { %v1037_v14 = vadd.f32 %v1441_v7, %v988_v9 }
 0x120   : > { %v1086_v25 = vadd.f32 %v1469_v15, %v1037_v14 }
 0x12d   : > { %v1498_v17 = vpop.f32.mrf.mxu0 }
 0x12e   : > { %v1132_v20 = vadd.f32 %v1498_v17, %v1083_v16 }
 0x12f   : > { %v1123_v23 = vpop.f32.mrf.mxu0 }
 0x130   : > { %v1124_v24 = vadd.f32 %v1123_v23, %v1075_v21  ;;  %v1147_v27 = vmul.f32 %v1335_v22, %v1132_v20 }
 0x131   : > { %v1499_v26 = vpop.f32.mrf.mxu0 }
 0x132   : > { %v1135_v28 = vadd.f32 %v1499_v26, %v1086_v25  ;;  %v1145_v32 = vmul.f32 %v1335_v22, %v1124_v24  ;;  %v1158_v35 = vadd.f32 %v1336_v30, %v1147_v27 }
 0x133   : > { %v1126_v31 = vpop.f32.mrf.mxu0 }
 0x134   : > { %v1148_v33 = vmul.f32 %v1335_v22, %v1135_v28  ;;  %v1127_v34 = vadd.f32 %v1126_v31, %v1078_v29  ;;  %v1156_v38 = vadd.f32 %v1336_v30, %v1145_v32 }
 0x136   : > { %v1159_v36 = vadd.f32 %v1336_v30, %v1148_v33  ;;  %v1146_v37 = vmul.f32 %v1335_v22, %v1127_v34 }
 0x138   : > { %v1355_v39 = vpack.c.bf16 %v1159_v36, %v1158_v35  ;;  %v1157_v40 = vadd.f32 %v1336_v30, %v1146_v37 }
 0x13a   : > { %1357 = vst [vmem:[%s202_s5 + $0x8] sm:$0xff] %v1355_v39   ;;  %v1350_v41 = vpack.c.bf16 %v1157_v40, %v1156_v38 }
 0x13c   : > { %1351 = vst [vmem:[%s202_s5] sm:$0xff] %v1350_v41  }
 0x13d PF: > { %s14_s15 = sadd.s32 1, %s1613_s15  }
 0x13e   : > { %p11_p4 = scmp.ge.s32.totalorder %s14_s15, 6  }
 0x140   :  { %13 = sbr.rel (!%p11_p4) target bundleno = 1 (0x1), region = 66 }

// kernel: closed_call.56
= control target key start
LH: loop header
LB: loop body
LE: loop exit
PB: predicated region body
PF: predicated region fallthrough
CT: control target
= control target key end

     0   :  { %s1742_s21 = smov 0   ;;  %s2077_s0 = inlined_call_operand.vmem [shape: bf16[32,1280], index: 0, kind: input, shape index: {}]   ;;  %s2078_s1 = inlined_call_operand.vmem [shape: f32[1,1280], index: 1, kind: input, shape index: {}]   ;;  %s2079_s2 = inlined_call_operand.vmem [shape: f32[1,1280], index: 2, kind: input, shape index: {}]   ;;  %s2080_s3 = inlined_call_operand.vmem [shape: bf16[1280,128], index: 3, kind: input, shape index: {}]   ;;  %s2081_s4 = inlined_call_operand.vmem [shape: f32[1,128], index: 4, kind: input, shape index: {}]   ;;  %s2082_s5 = inlined_call_operand.vmem [shape: f32[1,128], index: 5, kind: input, shape index: {}]   ;;  %s2083_s6 = inlined_call_operand.vmem [shape: bf16[32,128], index: 6, kind: output, shape index: {}]  }
   0x1 LB: > { %s1398_s22 = sadd.s32 4294967295, %s1705_s21   ;;  %p1402_p0 = scmp.ge.s32.totalorder %s1705_s21, 1  ;;  %s1705_s21 = sphi %s1742_s21, %s16_s21  }
   0x2   : > { %p214_p1 = scmp.lt.s32.totalorder %s1705_s21, 3 }
   0x4   : > { %p215_p2 = pnand %p1402_p0, %p214_p1 }
   0x5   : > { %s1403_s7 = sshll.u32 (!%p215_p2), %s1398_s22, 1 }
   0x6   : > { %218 = sbr.rel (%p215_p2) target bundleno = 321 (0x141), region = 44  ;;  %p246_p3 = scmp.lt.s32.totalorder (!%p215_p2), %s1403_s7, 3 }
   0xb   : > { %v1619_v0 = vld [vmem:[%s2080_s3 + $0x78] sm:$0xff]   ;;  %v1623_v4 = vld [vmem:[%s2080_s3 + $0x70] sm:$0xff]   ;;  %v1627_v8 = vld [vmem:[%s2080_s3 + $0x68] sm:$0xff]   ;;  %s2085_s7 = smov (!%p246_p3, %s1403_s7), 3  ;;  %v293_v23 = vlaneseq }
   0xc   : > { %v1620_v1 = vld [vmem:[%s2080_s3 + $0xf8] sm:$0xff]   ;;  %1500 = vmatprep.subr.bf16.mxu0 %v1619_v0  ;;  %v1624_v5 = vld [vmem:[%s2080_s3 + $0xf0] sm:$0xff]   ;;  %v1628_v9 = vld [vmem:[%s2080_s3 + $0xe8] sm:$0xff]   ;;  %s1610_s8 = smul.u32 40, %s2085_s7  ;;  %s1406_s27 = sshll.u32 %s2085_s7, 2 }
   0xd   : > { %v1621_v2 = vld [vmem:[%s2080_s3 + $0x38] sm:$0xff]   ;;  %1522 = vmatprep.subr.bf16.mxu1 %v1620_v1  ;;  %v1625_v6 = vld [vmem:[%s2080_s3 + $0x30] sm:$0xff]   ;;  %v1629_v10 = vld [vmem:[%s2080_s3 + $0x28] sm:$0xff]   ;;  %v1836_v28 = vshrl.u32 %v293_v23, 7  ;;  %s256_s29 = scalar_lea.vmem %s2083_s6, %s1406_s27 }
   0xe   : > { %v1622_v3 = vld [vmem:[%s2080_s3 + $0xb8] sm:$0xff]   ;;  %1501 = vmatpush3.bf16.msra.mxu0 %v1621_v2  ;;  %v1626_v7 = vld [vmem:[%s2080_s3 + $0xb0] sm:$0xff]   ;;  %v1630_v11 = vld [vmem:[%s2080_s3 + $0xa8] sm:$0xff]   ;;  %s1850_s18 = scalar_lea.vmem %s2077_s0, %s1610_s8 }
   0xf   : > { %1523 = vmatpush3.bf16.msra.mxu1 %v1622_v3  ;;  %1502 = vmatprep.subr.bf16.mxu0 %v1623_v4  ;;  %v1631_v12 = vld [vmem:[%s2080_s3 + $0x60] sm:$0xff]   ;;  %v1635_v16 = vld [vmem:[%s2080_s3 + $0x58] sm:$0xff]   ;;  %v1639_v20 = vld [vmem:[%s2080_s3 + $0x50] sm:$0xff]   ;;  %v1856_v33 = vsub.s32 1, %v1836_v28  ;;  %v307_v35 = vsub.s32 3, %v1836_v28  ;;  %v1870_v39 = vsub.s32 0, %v1836_v28 }
  0x10   : > { %1524 = vmatprep.subr.bf16.mxu1 %v1624_v5  ;;  %v1632_v13 = vld [vmem:[%s2080_s3 + $0xe0] sm:$0xff]   ;;  %v1636_v17 = vld [vmem:[%s2080_s3 + $0xd8] sm:$0xff]   ;;  %v1640_v21 = vld [vmem:[%s2080_s3 + $0xd0] sm:$0xff]   ;;  %v303_v40 = vsub.s32 2, %v1836_v28 }
  0x11   : > { %v1633_v14 = vld [vmem:[%s2080_s3 + $0x20] sm:$0xff]   ;;  %v1637_v18 = vld [vmem:[%s2080_s3 + $0x18] sm:$0xff]   ;;  %v1641_v22 = vld [vmem:[%s2080_s3 + $0x10] sm:$0xff]  }
  0x12   : > { %1503 = vmatpush3.bf16.msra.mxu0 %v1625_v6  ;;  %v1634_v15 = vld [vmem:[%s2080_s3 + $0xa0] sm:$0xff]   ;;  %v1638_v19 = vld [vmem:[%s2080_s3 + $0x98] sm:$0xff]   ;;  %v1642_v24 = vld [vmem:[%s2080_s3 + $0x90] sm:$0xff]  }
  0x13   : > { %1525 = vmatpush3.bf16.msra.mxu1 %v1626_v7  ;;  %1504 = vmatprep.subr.bf16.mxu0 %v1627_v8  ;;  %v1643_v25 = vld [vmem:[%s2080_s3 + $0x48] sm:$0xff]   ;;  %v1647_v30 = vld [vmem:[%s2080_s3 + $0x40] sm:$0xff]   ;;  %v265_v47 = vld [vmem:[%s1850_s18 + $0x30] sm:$0xff] }
  0x14   : > { %1526 = vmatprep.subr.bf16.mxu1 %v1628_v9  ;;  %v1644_v26 = vld [vmem:[%s2080_s3 + $0xc8] sm:$0xff]   ;;  %v1648_v31 = vld [vmem:[%s2080_s3 + $0xc0] sm:$0xff]   ;;  %v1651_v52 = vld [vmem:[%s2080_s3 + $0x178] sm:$0xff]   ;;  %v281_v53 = vunpack.c.l.bf16 %v265_v47  ;;  %v282_v54 = vunpack.c.h.bf16 %v265_v47 }
  0x15   : > { %v1645_v27 = vld [vmem:[%s2080_s3 + $0x8] sm:$0xff]   ;;  %v1649_v32 = vld [vmem:[%s2080_s3] sm:$0xff]   ;;  %v1653_v61 = vld [vmem:[%s2080_s3 + $0x1f8] sm:$0xff]  }
  0x16   : > { %1505 = vmatpush3.bf16.msra.mxu0 %v1629_v10  ;;  %v1646_v29 = vld [vmem:[%s2080_s3 + $0x88] sm:$0xff]   ;;  %v1650_v34 = vld [vmem:[%s2080_s3 + $0x80] sm:$0xff]   ;;  %v1668_v47 = vld [vmem:[%s2080_s3 + $0x118] sm:$0xff]  }
  0x17   : > { %1527 = vmatpush3.bf16.msra.mxu1 %v1630_v11  ;;  %1506 = vmatprep.subr.bf16.mxu0 %v1631_v12  ;;  %v259_v36 = vld [vmem:[%s1850_s18] sm:$0xff]  ;;  %v264_v37 = vld [vmem:[%s1850_s18 + $0x28] sm:$0xff] }
  0x18   : > { %1528 = vmatprep.subr.bf16.mxu1 %v1632_v13  ;;  %v1867_v38 = vld [vmem:[%s2078_s1] sm:$0xff]  ;;  %v269_v41 = vunpack.c.l.bf16 %v259_v36  ;;  %v270_v42 = vunpack.c.h.bf16 %v259_v36  ;;  %v279_v43 = vunpack.c.l.bf16 %v264_v37  ;;  %v280_v44 = vunpack.c.h.bf16 %v264_v37  ;;  %v260_v46 = vld [vmem:[%s1850_s18 + $0x8] sm:$0xff] }
  0x19   : > { %v1876_v45 = vld [vmem:[%s2079_s2] sm:$0xff]  ;;  %v300_v48 = vrot.slane %v1867_v38, %v1856_v33  ;;  %v271_v50 = vunpack.c.l.bf16 %v260_v46  ;;  %v272_v51 = vunpack.c.h.bf16 %v260_v46  ;;  %v308_v55 = vrot.slane %v1867_v38, %v307_v35  ;;  %v1660_v36 = vld [vmem:[%s2080_s3 + $0x128] sm:$0xff]   ;;  %v1669_v46 = vld [vmem:[%s2080_s3 + $0x1d8] sm:$0xff]  }
  0x1a   : > { %1507 = vmatpush3.bf16.msra.mxu0 %v1633_v14  ;;  %v374_v49 = vrot.slane %v1876_v45, %v1856_v33  ;;  %v382_v56 = vrot.slane %v1876_v45, %v307_v35  ;;  %v296_v59 = vrot.slane %v1867_v38, %v1870_v39  ;;  %v370_v60 = vrot.slane %v1876_v45, %v1870_v39  ;;  %v1661_v35 = vld [vmem:[%s2080_s3 + $0x1e8] sm:$0xff]  }
  0x1b   : > { %1529 = vmatpush3.bf16.msra.mxu1 %v1634_v15  ;;  %1508 = vmatprep.subr.bf16.mxu0 %v1635_v16  ;;  %v344_v57 = vmul.f32 %v300_v48, %v270_v42  ;;  %v354_v58 = vmul.f32 %v300_v48, %v280_v44  ;;  %v346_v62 = vmul.f32 %v308_v55, %v272_v51  ;;  %v1662_v37 = vld [vmem:[%s2080_s3 + $0x1a8] sm:$0xff]   ;;  %v1664_v42 = vld [vmem:[%s2080_s3 + $0x120] sm:$0xff]   ;;  %v1667_v44 = vld [vmem:[%s2080_s3 + $0x158] sm:$0xff]   ;;  %v311_v51 = vsub.s32 4, %v1836_v28 }
  0x1c   : > { %1530 = vmatprep.subr.bf16.mxu1 %v1636_v17  ;;  %v356_v63 = vmul.f32 %v308_v55, %v282_v54  ;;  %v304_v0 = vrot.slane %v1867_v38, %v303_v40  ;;  %v378_v1 = vrot.slane %v1876_v45, %v303_v40  ;;  %v343_v4 = vmul.f32 %v296_v59, %v269_v41  ;;  %v1663_v40 = vld [vmem:[%s2080_s3 + $0x160] sm:$0xff]   ;;  %v1670_v48 = vld [vmem:[%s2080_s3 + $0x198] sm:$0xff]   ;;  %v1674_v55 = vld [vmem:[%s2080_s3 + $0x190] sm:$0xff]  }
  0x1d   : > { %v418_v2 = vadd.f32 %v374_v49, %v344_v57  ;;  %v428_v3 = vadd.f32 %v374_v49, %v354_v58  ;;  %v353_v5 = vmul.f32 %v296_v59, %v279_v43  ;;  %v420_v6 = vadd.f32 %v382_v56, %v346_v62  ;;  %v1665_v41 = vld [vmem:[%s2080_s3 + $0x1e0] sm:$0xff]   ;;  %v1675_v57 = vld [vmem:[%s2080_s3 + $0x148] sm:$0xff]  }
  0x1e   : > { %1509 = vmatpush3.bf16.msra.mxu0 %v1637_v18  ;;  %v430_v7 = vadd.f32 %v382_v56, %v356_v63  ;;  %v345_v8 = vmul.f32 %v304_v0, %v271_v50  ;;  %v355_v9 = vmul.f32 %v304_v0, %v281_v53  ;;  %v417_v12 = vadd.f32 %v370_v60, %v343_v4  ;;  %v1652_v18 = vld [vmem:[%s2080_s3 + $0x138] sm:$0xff]   ;;  %v1666_v43 = vld [vmem:[%s2080_s3 + $0x1a0] sm:$0xff]   ;;  %v1671_v50 = vld [vmem:[%s2080_s3 + $0x150] sm:$0xff]  }
  0x1f   : > { %1531 = vmatpush3.bf16.msra.mxu1 %v1638_v19  ;;  %1510 = vmatprep.subr.bf16.mxu0 %v1639_v20  ;;  %v438_v10 = vmax.f32 %v418_v2, 0.0  ;;  %v448_v11 = vmax.f32 %v428_v3, 0.0  ;;  %v427_v13 = vadd.f32 %v370_v60, %v353_v5  ;;  %v440_v14 = vmax.f32 %v420_v6, 0.0  ;;  %v1672_v53 = vld [vmem:[%s2080_s3 + $0x110] sm:$0xff]   ;;  %v1676_v60 = vld [vmem:[%s2080_s3 + $0x108] sm:$0xff]   ;;  %v266_v63 = vld [vmem:[%s1850_s18 + $0x38] sm:$0xff] }
  0x20   : > { %1532 = vmatprep.subr.bf16.mxu1 %v1640_v21  ;;  %v450_v15 = vmax.f32 %v430_v7, 0.0  ;;  %v419_v16 = vadd.f32 %v378_v1, %v345_v8  ;;  %v429_v17 = vadd.f32 %v378_v1, %v355_v9  ;;  %v437_v20 = vmax.f32 %v417_v12, 0.0  ;;  %v1678_v4 = vld [vmem:[%s2080_s3 + $0x188] sm:$0xff]   ;;  %v1679_v9 = vld [vmem:[%s2080_s3 + $0x140] sm:$0xff]   ;;  %v262_v12 = vld [vmem:[%s1850_s18 + $0x18] sm:$0xff] }
  0x21   : > { %v458_v19 = vpack.c.bf16 %v448_v11, %v438_v10  ;;  %v447_v21 = vmax.f32 %v427_v13, 0.0  ;;  %v315_v49 = vsub.s32 5, %v1836_v28  ;;  %v323_v54 = vsub.s32 7, %v1836_v28  ;;  %v267_v13 = vld [vmem:[%s1850_s18 + $0x40] sm:$0xff] }
  0x22   : > { %1511 = vmatpush3.bf16.msra.mxu0 %v1641_v22  ;;  %v460_v22 = vpack.c.bf16 %v450_v15, %v440_v14  ;;  %v439_v23 = vmax.f32 %v419_v16, 0.0  ;;  %v319_v56 = vsub.s32 6, %v1836_v28  ;;  %v312_v59 = vrot.slane %v1867_v38, %v311_v51  ;;  %v261_v28 = vld [vmem:[%s1850_s18 + $0x10] sm:$0xff]  ;;  %v1680_v15 = vld [vmem:[%s2080_s3 + $0x100] sm:$0xff]  }
  0x23   : > { %1533 = vmatpush3.bf16.msra.mxu1 %v1642_v24  ;;  %1512 = vmatprep.subr.bf16.mxu0 %v1643_v25  ;;  %v449_v24 = vmax.f32 %v429_v17, 0.0  ;;  %v1654_v25 = vld [vmem:[%s2080_s3 + $0x1b8] sm:$0xff]   ;;  %v316_v58 = vrot.slane %v1867_v38, %v315_v49  ;;  %v390_v62 = vrot.slane %v1876_v45, %v315_v49  ;;  %v273_v0 = vunpack.c.l.bf16 %v261_v28  ;;  %v1685_v49 = vld [vmem:[%s2080_s3 + $0x270] sm:$0xff]  }
  0x24   : > { %1534 = vmatprep.subr.bf16.mxu1 %v1644_v26  ;;  %v1655_v26 = vld [vmem:[%s2080_s3 + $0x170] sm:$0xff]   ;;  %1139 = vmatprep.mubr.bf16.mxu0 %v458_v19  ;;  %v274_v1 = vunpack.c.h.bf16 %v261_v28  ;;  %v386_v2 = vrot.slane %v1876_v45, %v311_v51  ;;  %v324_v3 = vrot.slane %v1867_v38, %v323_v54  ;;  %v283_v5 = vunpack.c.l.bf16 %v266_v63  ;;  %v364_v28 = vld [vmem:[%s2079_s2 + $0x8] sm:$0x3] }
  0x25   : > { %1180 = vmatprep.mubr.bf16.mxu1 %v460_v22  ;;  %v284_v6 = vunpack.c.h.bf16 %v266_v63  ;;  %v398_v7 = vrot.slane %v1876_v45, %v323_v54  ;;  %v320_v8 = vrot.slane %v1867_v38, %v319_v56  ;;  %v347_v11 = vmul.f32 %v312_v59, %v273_v0  ;;  %v1681_v38 = vld [vmem:[%s2080_s3 + $0x1c0] sm:$0xff]   ;;  %v1686_v54 = vld [vmem:[%s2080_s3 + $0x230] sm:$0xff]  }
  0x26   : > { %1513 = vmatpush3.bf16.msra.mxu0 %v1645_v27  ;;  %v457_v27 = vpack.c.bf16 %v447_v21, %v437_v20  ;;  %v348_v10 = vmul.f32 %v316_v58, %v274_v1  ;;  %v394_v14 = vrot.slane %v1876_v45, %v319_v56  ;;  %v357_v17 = vmul.f32 %v312_v59, %v283_v5  ;;  %v1682_v21 = vld [vmem:[%s2080_s3 + $0x180] sm:$0xff]   ;;  %v1688_v56 = vld [vmem:[%s2080_s3 + $0x228] sm:$0xff]  }
  0x27   : > { %1535 = vmatpush3.bf16.msra.mxu1 %v1646_v29  ;;  %1514 = vmatprep.subr.bf16.mxu0 %v1647_v30  ;;  %v459_v29 = vpack.c.bf16 %v449_v24, %v439_v23  ;;  %v1657_v30 = vld [vmem:[%s2080_s3 + $0x1f0] sm:$0xff]   ;;  %v358_v16 = vmul.f32 %v316_v58, %v284_v6  ;;  %v276_v19 = vunpack.c.h.bf16 %v262_v12  ;;  %v421_v22 = vadd.f32 %v386_v2, %v347_v11  ;;  %v263_v58 = vld [vmem:[%s1850_s18 + $0x20] sm:$0xff]  ;;  %v268_v59 = vld [vmem:[%s1850_s18 + $0x48] sm:$0xff] }
  0x28   : > { %1536 = vmatprep.subr.bf16.mxu1 %v1648_v31  ;;  %v1656_v31 = vld [vmem:[%s2080_s3 + $0x130] sm:$0xff]   ;;  %v422_v20 = vadd.f32 %v390_v62, %v348_v10  ;;  %v285_v45 = vunpack.c.l.bf16 %v267_v13  ;;  %v286_v23 = vunpack.c.h.bf16 %v267_v13  ;;  %v1690_v0 = vld [vmem:[%s2080_s3 + $0x220] sm:$0xff]   ;;  %v406_v1 = vrot.slane %v364_v28, %v1856_v33  ;;  %v1692_v10 = vld [vmem:[%s2080_s3 + $0x218] sm:$0xff]  }
  0x29   : > { %v432_v24 = vadd.f32 %v390_v62, %v358_v16  ;;  %v288_v62 = vunpack.c.h.bf16 %v268_v59  ;;  %v277_v5 = vunpack.c.l.bf16 %v263_v58  ;;  %v287_v6 = vunpack.c.l.bf16 %v268_v59  ;;  %v1694_v16 = vld [vmem:[%s2080_s3 + $0x210] sm:$0xff]  }
  0x2a   : > { %1515 = vmatpush3.bf16.msra.mxu0 %v1649_v32  ;;  %v1658_v32 = vld [vmem:[%s2080_s3 + $0x1b0] sm:$0xff]   ;;  %v402_v13 = vrot.slane %v364_v28, %v1870_v39 }
  0x2b   : > { %1537 = vmatpush3.bf16.msra.mxu1 %v1650_v34  ;;  %1544 = vmatprep.subr.bf16.mxu0 %v1651_v52  ;;  %v1659_v34 = vld [vmem:[%s2080_s3 + $0x168] sm:$0xff]   ;;  %v1673_v52 = vld [vmem:[%s2080_s3 + $0x1d0] sm:$0xff]  }
  0x2c   : > { %1566 = vmatprep.subr.bf16.mxu1 %v1653_v61  ;;  %v1677_v61 = vld [vmem:[%s2080_s3 + $0x1c8] sm:$0xff]  }
  0x2d   : > { %1140 = vmatmul.mubr.bf16.vlgmr.msra.gmra.mxu0 %v457_v27  ;;  %v350_v27 = vmul.f32 %v324_v3, %v276_v19 }
  0x2e   : > { %1181 = vmatmul.mubr.bf16.vlgmr.msra.gmra.mxu1 %v459_v29  ;;  %1545 = vmatpush3.bf16.msra.mxu0 %v1652_v18  ;;  %v275_v18 = vunpack.c.l.bf16 %v262_v12 }
  0x2f   : > { %1567 = vmatpush3.bf16.msra.mxu1 %v1654_v25  ;;  %1546 = vmatprep.subr.bf16.mxu0 %v1655_v26  ;;  %v431_v25 = vadd.f32 %v386_v2, %v357_v17  ;;  %v1683_v26 = vld [vmem:[%s2080_s3 + $0x278] sm:$0xff]   ;;  %v1695_v17 = vld [vmem:[%s2080_s3 + $0x248] sm:$0xff]  }
  0x30   : > { %1568 = vmatprep.subr.bf16.mxu1 %v1657_v30  ;;  %v349_v29 = vmul.f32 %v320_v8, %v275_v18  ;;  %v442_v30 = vmax.f32 %v422_v20, 0.0  ;;  %v1691_v2 = vld [vmem:[%s2080_s3 + $0x258] sm:$0xff]   ;;  %v1697_v20 = vld [vmem:[%s2080_s3 + $0x240] sm:$0xff]  }
  0x32   : > { %1547 = vmatpush3.bf16.msra.mxu0 %v1656_v31  ;;  %v441_v31 = vmax.f32 %v421_v22, 0.0 }
  0x33   : > { %1569 = vmatpush3.bf16.msra.mxu1 %v1658_v32  ;;  %1548 = vmatprep.subr.bf16.mxu0 %v1659_v34  ;;  %v360_v32 = vmul.f32 %v324_v3, %v286_v23  ;;  %v359_v34 = vmul.f32 %v320_v8, %v285_v45  ;;  %v1698_v45 = vld [vmem:[%s2080_s3 + $0x200] sm:$0xff]  }
  0x34   : > { %1570 = vmatprep.subr.bf16.mxu1 %v1661_v35  ;;  %v452_v35 = vmax.f32 %v432_v24, 0.0 }
  0x36   : > { %1549 = vmatpush3.bf16.msra.mxu0 %v1660_v36  ;;  %v451_v36 = vmax.f32 %v431_v25, 0.0 }
  0x37   : > { %1571 = vmatpush3.bf16.msra.mxu1 %v1662_v37  ;;  %1550 = vmatprep.subr.bf16.mxu0 %v1663_v40  ;;  %v424_v37 = vadd.f32 %v398_v7, %v350_v27  ;;  %v423_v40 = vadd.f32 %v394_v14, %v349_v29 }
  0x38   : > { %1572 = vmatprep.subr.bf16.mxu1 %v1665_v41  ;;  %v434_v41 = vadd.f32 %v398_v7, %v360_v32 }
  0x3a   : > { %1551 = vmatpush3.bf16.msra.mxu0 %v1664_v42  ;;  %v433_v42 = vadd.f32 %v394_v14, %v359_v34 }
  0x3b   : > { %1573 = vmatpush3.bf16.msra.mxu1 %v1666_v43  ;;  %1552 = vmatprep.subr.bf16.mxu0 %v1667_v44  ;;  %v462_v43 = vpack.c.bf16 %v452_v35, %v442_v30  ;;  %v461_v44 = vpack.c.bf16 %v451_v36, %v441_v31 }
  0x3c   : > { %1574 = vmatprep.subr.bf16.mxu1 %v1669_v46  ;;  %v444_v46 = vmax.f32 %v424_v37, 0.0  ;;  %v453_v51 = vmax.f32 %v433_v42, 0.0 }
  0x3d   : > { %1221 = vmatprep.mubr.bf16.mxu0 %v462_v43 }
  0x3e   : > { %1553 = vmatpush3.bf16.msra.mxu0 %v1668_v47  ;;  %v1684_v47 = vld [vmem:[%s2080_s3 + $0x238] sm:$0xff]  }
  0x3f   : > { %1575 = vmatpush3.bf16.msra.mxu1 %v1670_v48  ;;  %1554 = vmatprep.subr.bf16.mxu0 %v1671_v50  ;;  %v443_v48 = vmax.f32 %v423_v40, 0.0  ;;  %v454_v50 = vmax.f32 %v434_v41, 0.0 }
  0x40   : > { %1576 = vmatprep.subr.bf16.mxu1 %v1673_v52 }
  0x41   : > { %v464_v52 = vpack.c.bf16 %v454_v50, %v444_v46 }
  0x42   : > { %1555 = vmatpush3.bf16.msra.mxu0 %v1672_v53  ;;  %v463_v53 = vpack.c.bf16 %v453_v51, %v443_v48 }
  0x43   : > { %1577 = vmatpush3.bf16.msra.mxu1 %v1674_v55  ;;  %1556 = vmatprep.subr.bf16.mxu0 %v1675_v57  ;;  %v1687_v55 = vld [vmem:[%s2080_s3 + $0x268] sm:$0xff]   ;;  %v1689_v57 = vld [vmem:[%s2080_s3 + $0x260] sm:$0xff]  }
  0x44   : > { %1578 = vmatprep.subr.bf16.mxu1 %v1677_v61  ;;  %1262 = vmatprep.mubr.bf16.mxu1 %v464_v52  ;;  %v290_v61 = vld [vmem:[%s2078_s1 + $0x8] sm:$0x3] }
  0x45   : > { %v332_v63 = vrot.slane %v290_v61, %v1856_v33  ;;  %v328_v7 = vrot.slane %v290_v61, %v1870_v39  ;;  %v1693_v33 = vld [vmem:[%s2080_s3 + $0x250] sm:$0xff]   ;;  %v1696_v39 = vld [vmem:[%s2080_s3 + $0x208] sm:$0xff]   ;;  %v1487_v61 = vld [vmem:[%s2081_s4] ss:$0 sm:$0xff] }
  0x46   : > { %1557 = vmatpush3.bf16.msra.mxu0 %v1676_v60  ;;  %v278_v60 = vunpack.c.h.bf16 %v263_v58 }
  0x47   : > { %1579 = vmatpush3.bf16.msra.mxu1 %v1678_v4  ;;  %1558 = vmatprep.subr.bf16.mxu0 %v1679_v9  ;;  %v362_v4 = vmul.f32 %v332_v63, %v288_v62 }
  0x48   : > { %1580 = vmatprep.subr.bf16.mxu1 %v1681_v38  ;;  %v352_v3 = vmul.f32 %v332_v63, %v278_v60  ;;  %v361_v38 = vmul.f32 %v328_v7, %v287_v6 }
  0x49   : > { %v436_v9 = vadd.f32 %v406_v1, %v362_v4 }
  0x4a   : > { %1559 = vmatpush3.bf16.msra.mxu0 %v1680_v15  ;;  %v426_v8 = vadd.f32 %v406_v1, %v352_v3  ;;  %v351_v15 = vmul.f32 %v328_v7, %v277_v5  ;;  %v435_v19 = vadd.f32 %v402_v13, %v361_v38  ;;  %v1488_v3 = vld [vmem:[%s2082_s5] ss:$0 sm:$0xff] }
  0x4b   : > { %1581 = vmatpush3.bf16.msra.mxu1 %v1682_v21  ;;  %1588 = vmatprep.subr.bf16.mxu0 %v1683_v26  ;;  %v456_v12 = vmax.f32 %v436_v9, 0.0 }
  0x4c   : > { %v446_v11 = vmax.f32 %v426_v8, 0.0  ;;  %v425_v18 = vadd.f32 %v402_v13, %v351_v15  ;;  %v455_v22 = vmax.f32 %v435_v19, 0.0 }
  0x4d   : > { %1222 = vmatmul.mubr.bf16.vlgmr.msra.gmra.mxu0 %v461_v44 }
  0x4e   : > { %1589 = vmatpush3.bf16.msra.mxu0 %v1684_v47  ;;  %1263 = vmatmul.mubr.bf16.vlgmr.msra.gmra.mxu1 %v463_v53  ;;  %v466_v14 = vpack.c.bf16 %v456_v12, %v446_v11  ;;  %v445_v21 = vmax.f32 %v425_v18, 0.0 }
  0x4f   : > { %1590 = vmatprep.subr.bf16.mxu0 %v1685_v49 }
  0x50   : > { %1303 = vmatprep.mubr.bf16.mxu0 %v466_v14  ;;  %v465_v23 = vpack.c.bf16 %v455_v22, %v445_v21 }
  0x52   : > { %1591 = vmatpush3.bf16.msra.mxu0 %v1686_v54 }
  0x53   : > { %1592 = vmatprep.subr.bf16.mxu0 %v1687_v55 }
  0x56   : > { %1593 = vmatpush3.bf16.msra.mxu0 %v1688_v56 }
  0x57   : > { %1594 = vmatprep.subr.bf16.mxu0 %v1689_v57 }
  0x5a   : > { %1595 = vmatpush3.bf16.msra.mxu0 %v1690_v0 }
  0x5b   : > { %1596 = vmatprep.subr.bf16.mxu0 %v1691_v2 }
  0x5e   : > { %1597 = vmatpush3.bf16.msra.mxu0 %v1692_v10 }
  0x5f   : > { %1598 = vmatprep.subr.bf16.mxu0 %v1693_v33 }
  0x62   : > { %1599 = vmatpush3.bf16.msra.mxu0 %v1694_v16 }
  0x63   : > { %1600 = vmatprep.subr.bf16.mxu0 %v1695_v17 }
  0x66   : > { %1601 = vmatpush3.bf16.msra.mxu0 %v1696_v39 }
  0x67   : > { %1602 = vmatprep.subr.bf16.mxu0 %v1697_v20 }
  0x6a   : > { %1603 = vmatpush3.bf16.msra.mxu0 %v1698_v45 }
  0x6d   : > { %1304 = vmatmul.mubr.bf16.vlgmr.msra.gmra.mxu0 %v465_v23 }
  0xed   : > { %v1516_v24 = vpop.f32.mrf.mxu0 }
  0xee   : > { %v1538_v25 = vpop.f32.mrf.mxu1 }
  0xef   : > { %v1517_v26 = vpop.f32.mrf.mxu0 }
  0xf0   : > { %v1539_v27 = vpop.f32.mrf.mxu1  ;;  %v1518_v41 = vadd.f32 %v1517_v26, %v1516_v24 }
  0xf1   : > { %v1519_v29 = vpop.f32.mrf.mxu0  ;;  %v1540_v42 = vadd.f32 %v1539_v27, %v1538_v25 }
  0xf2   : > { %v1541_v30 = vpop.f32.mrf.mxu1 }
  0xf3   : > { %v1520_v31 = vpop.f32.mrf.mxu0  ;;  %v1183_v47 = vadd.f32 %v1540_v42, %v1518_v41 }
  0xf4   : > { %v1542_v34 = vpop.f32.mrf.mxu1  ;;  %v1521_v48 = vadd.f32 %v1520_v31, %v1519_v29 }
  0xf5   : > { %v1543_v49 = vadd.f32 %v1542_v34, %v1541_v30 }
  0xf7   : > { %v1186_v55 = vadd.f32 %v1543_v49, %v1521_v48 }
 0x10d   : > { %v1560_v32 = vpop.f32.mrf.mxu0 }
 0x10e   : > { %v1582_v36 = vpop.f32.mrf.mxu1 }
 0x10f   : > { %v1561_v35 = vpop.f32.mrf.mxu0 }
 0x110   : > { %v1583_v40 = vpop.f32.mrf.mxu1  ;;  %v1562_v43 = vadd.f32 %v1561_v35, %v1560_v32 }
 0x111   : > { %v1563_v37 = vpop.f32.mrf.mxu0  ;;  %v1584_v51 = vadd.f32 %v1583_v40, %v1582_v36 }
 0x112   : > { %v1585_v46 = vpop.f32.mrf.mxu1  ;;  %v1224_v50 = vadd.f32 %v1562_v43, %v1183_v47 }
 0x113   : > { %v1564_v44 = vpop.f32.mrf.mxu0 }
 0x114   : > { %v1565_v52 = vadd.f32 %v1564_v44, %v1563_v37  ;;  %v1586_v53 = vpop.f32.mrf.mxu1  ;;  %v1265_v57 = vadd.f32 %v1584_v51, %v1224_v50 }
 0x115   : > { %v1587_v59 = vadd.f32 %v1586_v53, %v1585_v46 }
 0x116   : > { %v1227_v58 = vadd.f32 %v1565_v52, %v1186_v55 }
 0x118   : > { %v1268_v0 = vadd.f32 %v1587_v59, %v1227_v58 }
 0x12d   : > { %v1604_v54 = vpop.f32.mrf.mxu0 }
 0x12f   : > { %v1605_v56 = vpop.f32.mrf.mxu0 }
 0x130   : > { %v1606_v60 = vadd.f32 %v1605_v56, %v1604_v54 }
 0x131   : > { %v1607_v28 = vpop.f32.mrf.mxu0 }
 0x132   : > { %v1306_v62 = vadd.f32 %v1606_v60, %v1265_v57 }
 0x133   : > { %v1608_v63 = vpop.f32.mrf.mxu0 }
 0x134   : > { %v1319_v1 = vmul.f32 %v1487_v61, %v1306_v62  ;;  %v1609_v2 = vadd.f32 %v1608_v63, %v1607_v28 }
 0x136   : > { %v1309_v4 = vadd.f32 %v1609_v2, %v1268_v0  ;;  %v1328_v5 = vadd.f32 %v1488_v3, %v1319_v1 }
 0x138   : > { %v1320_v6 = vmul.f32 %v1487_v61, %v1309_v4  ;;  %v1330_v8 = vmax.f32 %v1328_v5, 0.0 }
 0x13a   : > { %v1329_v7 = vadd.f32 %v1488_v3, %v1320_v6 }
 0x13c   : > { %v1331_v9 = vmax.f32 %v1329_v7, 0.0 }
 0x13e   : > { %v1498_v10 = vpack.c.bf16 %v1331_v9, %v1330_v8 }
 0x140   : > { %1499 = vst [vmem:[%s256_s29] sm:$0xff] %v1498_v10  }
 0x141 PF: > { %s16_s21 = sadd.s32 1, %s1705_s21  }
 0x142   : > { %p13_p4 = scmp.ge.s32.totalorder %s16_s21, 4  }
 0x144   :  { %15 = sbr.rel (!%p13_p4) target bundleno = 1 (0x1), region = 74 }

// kernel: closed_call.57
= control target key start
LH: loop header
LB: loop body
LE: loop exit
PB: predicated region body
PF: predicated region fallthrough
CT: control target
= control target key end

     0   :  { %s1477_s15 = smov 0   ;;  %s1733_s0 = inlined_call_operand.vmem [shape: bf16[32,1152], index: 0, kind: input, shape index: {}]   ;;  %s1734_s1 = inlined_call_operand.vmem [shape: bf16[1152,128], index: 1, kind: input, shape index: {}]   ;;  %s1735_s2 = inlined_call_operand.vmem [shape: f32[1,128], index: 2, kind: input, shape index: {}]   ;;  %s1736_s3 = inlined_call_operand.vmem [shape: f32[1,128], index: 3, kind: input, shape index: {}]   ;;  %s1737_s4 = inlined_call_operand.vmem [shape: bf16[32,128], index: 4, kind: output, shape index: {}]  }
   0x1 LB: > { %s1126_s16 = sadd.s32 4294967295, %s1448_s15   ;;  %p1130_p0 = scmp.ge.s32.totalorder %s1448_s15, 1  ;;  %s1448_s15 = sphi %s1477_s15, %s14_s15  }
   0x2   : > { %p164_p1 = scmp.lt.s32.totalorder %s1448_s15, 3 }
   0x4   : > { %p165_p2 = pnand %p1130_p0, %p164_p1 }
   0x5   : > { %s1131_s23 = sshll.u32 (!%p165_p2), %s1126_s16, 1 }
   0x6   : > { %168 = sbr.rel (%p165_p2) target bundleno = 315 (0x13b), region = 36  ;;  %p192_p3 = scmp.lt.s32.totalorder (!%p165_p2), %s1131_s23, 3 }
   0xb   : > { %v1357_v0 = vld [vmem:[%s1734_s1 + $0x78] sm:$0xff]   ;;  %v1361_v4 = vld [vmem:[%s1734_s1 + $0x70] sm:$0xff]   ;;  %v1365_v8 = vld [vmem:[%s1734_s1 + $0x68] sm:$0xff]   ;;  %s1739_s23 = smov (!%p192_p3, %s1131_s23), 3  ;;  %vm1451_vm0 = vmmov 0  }
   0xc   : > { %v1358_v1 = vld [vmem:[%s1734_s1 + $0xf8] sm:$0xff]   ;;  %1229 = vmatprep.subr.bf16.mxu0 %v1357_v0  ;;  %v1362_v5 = vld [vmem:[%s1734_s1 + $0xf0] sm:$0xff]   ;;  %v1366_v9 = vld [vmem:[%s1734_s1 + $0xe8] sm:$0xff]   ;;  %s1346_s21 = smul.u32 36, %s1739_s23  ;;  %s1134_s28 = sshll.u32 %s1739_s23, 2 }
   0xd   : > { %v1359_v2 = vld [vmem:[%s1734_s1 + $0x38] sm:$0xff]   ;;  %1251 = vmatprep.subr.bf16.mxu1 %v1358_v1  ;;  %v1363_v6 = vld [vmem:[%s1734_s1 + $0x30] sm:$0xff]   ;;  %v1367_v10 = vld [vmem:[%s1734_s1 + $0x28] sm:$0xff]   ;;  %s202_s5 = scalar_lea.vmem %s1737_s4, %s1134_s28 }
   0xe   : > { %v1360_v3 = vld [vmem:[%s1734_s1 + $0xb8] sm:$0xff]   ;;  %1230 = vmatpush3.bf16.msra.mxu0 %v1359_v2  ;;  %v1364_v7 = vld [vmem:[%s1734_s1 + $0xb0] sm:$0xff]   ;;  %v1368_v11 = vld [vmem:[%s1734_s1 + $0xa8] sm:$0xff]   ;;  %s1583_s6 = scalar_lea.vmem %s1733_s0, %s1346_s21 }
   0xf   : > { %1252 = vmatpush3.bf16.msra.mxu1 %v1360_v3  ;;  %1231 = vmatprep.subr.bf16.mxu0 %v1361_v4  ;;  %v1369_v12 = vld [vmem:[%s1734_s1 + $0x60] sm:$0xff]   ;;  %v1373_v16 = vld [vmem:[%s1734_s1 + $0x58] sm:$0xff]   ;;  %v1377_v20 = vld [vmem:[%s1734_s1 + $0x50] sm:$0xff]  }
  0x10   : > { %1253 = vmatprep.subr.bf16.mxu1 %v1362_v5  ;;  %v1370_v13 = vld [vmem:[%s1734_s1 + $0xe0] sm:$0xff]   ;;  %v1374_v17 = vld [vmem:[%s1734_s1 + $0xd8] sm:$0xff]   ;;  %v1378_v21 = vld [vmem:[%s1734_s1 + $0xd0] sm:$0xff]  }
  0x11   : > { %v1371_v14 = vld [vmem:[%s1734_s1 + $0x20] sm:$0xff]   ;;  %v1375_v18 = vld [vmem:[%s1734_s1 + $0x18] sm:$0xff]   ;;  %v1379_v22 = vld [vmem:[%s1734_s1 + $0x10] sm:$0xff]  }
  0x12   : > { %1232 = vmatpush3.bf16.msra.mxu0 %v1363_v6  ;;  %v1372_v15 = vld [vmem:[%s1734_s1 + $0xa0] sm:$0xff]   ;;  %v1376_v19 = vld [vmem:[%s1734_s1 + $0x98] sm:$0xff]   ;;  %v1380_v23 = vld [vmem:[%s1734_s1 + $0x90] sm:$0xff]   ;;  %v1450_v6 = vmov 0.0  }
  0x13   : > { %1254 = vmatpush3.bf16.msra.mxu1 %v1364_v7  ;;  %1233 = vmatprep.subr.bf16.mxu0 %v1365_v8  ;;  %v1381_v24 = vld [vmem:[%s1734_s1 + $0x48] sm:$0xff]   ;;  %v1385_v28 = vld [vmem:[%s1734_s1 + $0x40] sm:$0xff]   ;;  %v1395_v36 = vld [vmem:[%s1734_s1 + $0x178] sm:$0xff]  }
  0x14   : > { %1255 = vmatprep.subr.bf16.mxu1 %v1366_v9  ;;  %v1382_v25 = vld [vmem:[%s1734_s1 + $0xc8] sm:$0xff]   ;;  %v1386_v29 = vld [vmem:[%s1734_s1 + $0xc0] sm:$0xff]   ;;  %v1396_v37 = vld [vmem:[%s1734_s1 + $0x138] sm:$0xff]  }
  0x15   : > { %v1383_v26 = vld [vmem:[%s1734_s1 + $0x8] sm:$0xff]   ;;  %v1387_v30 = vld [vmem:[%s1734_s1] sm:$0xff]   ;;  %v1397_v38 = vld [vmem:[%s1734_s1 + $0x1f8] sm:$0xff]  }
  0x16   : > { %1234 = vmatpush3.bf16.msra.mxu0 %v1367_v10  ;;  %v1384_v27 = vld [vmem:[%s1734_s1 + $0x88] sm:$0xff]   ;;  %v1388_v31 = vld [vmem:[%s1734_s1 + $0x80] sm:$0xff]   ;;  %v1398_v39 = vld [vmem:[%s1734_s1 + $0x1b8] sm:$0xff]  }
  0x17   : > { %1256 = vmatpush3.bf16.msra.mxu1 %v1368_v11  ;;  %1235 = vmatprep.subr.bf16.mxu0 %v1369_v12  ;;  %v1389_v32 = vld [vmem:[%s1583_s6] ss:$36 sps:$4 sm:$0xff]   ;;  %v1392_v34 = vld [vmem:[%s1583_s6 + $0x8] ss:$36 sps:$4 sm:$0xff]   ;;  %v1399_v40 = vld [vmem:[%s1734_s1 + $0x170] sm:$0xff]  }
  0x18   : > { %1257 = vmatprep.subr.bf16.mxu1 %v1370_v13  ;;  %v1391_v33 = vld [vmem:[%s1583_s6 + $0x4] ss:$36 sps:$4 sm:$0xff]   ;;  %v1394_v35 = vld [vmem:[%s1583_s6 + $0xc] ss:$36 sps:$4 sm:$0xff]   ;;  %v1411_v52 = vld [vmem:[%s1734_s1 + $0x158] sm:$0xff]  }
  0x19   : > { %869 = vmatprep.mubr.bf16.mxu0 %v1391_v33  ;;  %910 = vmatprep.mubr.bf16.mxu1 %v1394_v35  ;;  %v1400_v41 = vld [vmem:[%s1734_s1 + $0x130] sm:$0xff]   ;;  %v1403_v44 = vld [vmem:[%s1734_s1 + $0x168] sm:$0xff]   ;;  %v1407_v48 = vld [vmem:[%s1734_s1 + $0x160] sm:$0xff]  }
  0x1a   : > { %1236 = vmatpush3.bf16.msra.mxu0 %v1371_v14  ;;  %v1401_v42 = vld [vmem:[%s1734_s1 + $0x1f0] sm:$0xff]   ;;  %v1404_v45 = vld [vmem:[%s1734_s1 + $0x128] sm:$0xff]   ;;  %v1408_v49 = vld [vmem:[%s1734_s1 + $0x120] sm:$0xff]  }
  0x1b   : > { %1258 = vmatpush3.bf16.msra.mxu1 %v1372_v15  ;;  %1237 = vmatprep.subr.bf16.mxu0 %v1373_v16  ;;  %v1402_v43 = vld [vmem:[%s1734_s1 + $0x1b0] sm:$0xff]   ;;  %v1405_v46 = vld [vmem:[%s1734_s1 + $0x1e8] sm:$0xff]   ;;  %v1409_v50 = vld [vmem:[%s1734_s1 + $0x1e0] sm:$0xff]  }
  0x1c   : > { %1259 = vmatprep.subr.bf16.mxu1 %v1374_v17  ;;  %v1406_v47 = vld [vmem:[%s1734_s1 + $0x1a8] sm:$0xff]   ;;  %v1410_v51 = vld [vmem:[%s1734_s1 + $0x1a0] sm:$0xff]   ;;  %v1412_v53 = vld [vmem:[%s1734_s1 + $0x118] sm:$0xff]  }
  0x1d   : > { %v1413_v54 = vld [vmem:[%s1734_s1 + $0x1d8] sm:$0xff]   ;;  %v1415_v56 = vld [vmem:[%s1734_s1 + $0x150] sm:$0xff]   ;;  %v1419_v60 = vld [vmem:[%s1734_s1 + $0x148] sm:$0xff]  }
  0x1e   : > { %1238 = vmatpush3.bf16.msra.mxu0 %v1375_v18  ;;  %v1414_v55 = vld [vmem:[%s1734_s1 + $0x198] sm:$0xff]   ;;  %v1416_v57 = vld [vmem:[%s1734_s1 + $0x110] sm:$0xff]   ;;  %v1420_v61 = vld [vmem:[%s1734_s1 + $0x108] sm:$0xff]  }
  0x1f   : > { %1260 = vmatpush3.bf16.msra.mxu1 %v1376_v19  ;;  %1239 = vmatprep.subr.bf16.mxu0 %v1377_v20  ;;  %v1417_v58 = vld [vmem:[%s1734_s1 + $0x1d0] sm:$0xff]   ;;  %v1421_v62 = vld [vmem:[%s1734_s1 + $0x1c8] sm:$0xff]   ;;  %v1423_v0 = vld [vmem:[%s1734_s1 + $0x140] sm:$0xff]  }
  0x20   : > { %1261 = vmatprep.subr.bf16.mxu1 %v1378_v21  ;;  %v1418_v59 = vld [vmem:[%s1734_s1 + $0x190] sm:$0xff]   ;;  %v1422_v63 = vld [vmem:[%s1734_s1 + $0x188] sm:$0xff]   ;;  %v1424_v1 = vld [vmem:[%s1734_s1 + $0x100] sm:$0xff]  }
  0x21   : > { %v1425_v2 = vld [vmem:[%s1734_s1 + $0x1c0] sm:$0xff]   ;;  %v1426_v3 = vld [vmem:[%s1583_s6 + $0x10] ss:$36 sps:$4 sm:$0xff]   ;;  %v1430_v7 = vld [vmem:[%s1583_s6 + $0x18] ss:$36 sps:$4 sm:$0xff]  }
  0x22   : > { %1240 = vmatpush3.bf16.msra.mxu0 %v1379_v22  ;;  %v1428_v4 = vld [vmem:[%s1583_s6 + $0x14] ss:$36 sps:$4 sm:$0xff]   ;;  %v1429_v5 = vld [vmem:[%s1734_s1 + $0x180] sm:$0xff]   ;;  %v1435_v11 = vld [vmem:[%s1734_s1 + $0x228] sm:$0xff]  }
  0x23   : > { %1262 = vmatpush3.bf16.msra.mxu1 %v1380_v23  ;;  %1241 = vmatprep.subr.bf16.mxu0 %v1381_v24  ;;  %v1432_v8 = vld [vmem:[%s1583_s6 + $0x1c] ss:$36 sps:$4 sm:$0xff]   ;;  %v1434_v10 = vld [vmem:[%s1734_s1 + $0x230] sm:$0xff]   ;;  %v1439_v15 = vld [vmem:[%s1734_s1 + $0x208] sm:$0xff]  }
  0x24   : > { %1263 = vmatprep.subr.bf16.mxu1 %v1382_v25  ;;  %v1433_v9 = vld [vmem:[%s1734_s1 + $0x238] sm:$0xff]   ;;  %v1436_v12 = vld [vmem:[%s1734_s1 + $0x220] sm:$0xff]   ;;  %v1438_v14 = vld [vmem:[%s1734_s1 + $0x210] sm:$0xff]  }
  0x25   : > { %v1437_v13 = vld [vmem:[%s1734_s1 + $0x218] sm:$0xff]   ;;  %v1440_v16 = vld [vmem:[%s1734_s1 + $0x200] sm:$0xff]  }
  0x26   : > { %1242 = vmatpush3.bf16.msra.mxu0 %v1383_v26  ;;  %v1441_v17 = vld [vmem:[%s1583_s6 + $0x20] ss:$36 sps:$4 sm:$0xff]  }
  0x27   : > { %1264 = vmatpush3.bf16.msra.mxu1 %v1384_v27  ;;  %1243 = vmatprep.subr.bf16.mxu0 %v1385_v28 }
  0x28   : > { %1265 = vmatprep.subr.bf16.mxu1 %v1386_v29 }
  0x2a   : > { %1244 = vmatpush3.bf16.msra.mxu0 %v1387_v30 }
  0x2b   : > { %1266 = vmatpush3.bf16.msra.mxu1 %v1388_v31  ;;  %1273 = vmatprep.subr.bf16.mxu0 %v1395_v36 }
  0x2c   : > { %1295 = vmatprep.subr.bf16.mxu1 %v1397_v38 }
  0x2d   : > { %870 = vmatmul.mubr.bf16.vlgmr.msra.gmra.mxu0 %v1389_v32 }
  0x2e   : > { %911 = vmatmul.mubr.bf16.vlgmr.msra.gmra.mxu1 %v1392_v34  ;;  %1274 = vmatpush3.bf16.msra.mxu0 %v1396_v37 }
  0x2f   : > { %1296 = vmatpush3.bf16.msra.mxu1 %v1398_v39  ;;  %1275 = vmatprep.subr.bf16.mxu0 %v1399_v40 }
  0x30   : > { %1297 = vmatprep.subr.bf16.mxu1 %v1401_v42  ;;  %951 = vmatprep.mubr.bf16.mxu0 %v1428_v4 }
  0x31   : > { %992 = vmatprep.mubr.bf16.mxu1 %v1432_v8 }
  0x32   : > { %1276 = vmatpush3.bf16.msra.mxu0 %v1400_v41 }
  0x33   : > { %1298 = vmatpush3.bf16.msra.mxu1 %v1402_v43  ;;  %1277 = vmatprep.subr.bf16.mxu0 %v1403_v44 }
  0x34   : > { %1299 = vmatprep.subr.bf16.mxu1 %v1405_v46 }
  0x36   : > { %1278 = vmatpush3.bf16.msra.mxu0 %v1404_v45 }
  0x37   : > { %1300 = vmatpush3.bf16.msra.mxu1 %v1406_v47  ;;  %1279 = vmatprep.subr.bf16.mxu0 %v1407_v48 }
  0x38   : > { %1301 = vmatprep.subr.bf16.mxu1 %v1409_v50 }
  0x3a   : > { %1280 = vmatpush3.bf16.msra.mxu0 %v1408_v49  ;;  %v1216_v49 = vld [vmem:[%s1735_s2] ss:$0 sm:$0xff] }
  0x3b   : > { %1302 = vmatpush3.bf16.msra.mxu1 %v1410_v51  ;;  %1281 = vmatprep.subr.bf16.mxu0 %v1411_v52 }
  0x3c   : > { %1303 = vmatprep.subr.bf16.mxu1 %v1413_v54 }
  0x3e   : > { %1282 = vmatpush3.bf16.msra.mxu0 %v1412_v53 }
  0x3f   : > { %1304 = vmatpush3.bf16.msra.mxu1 %v1414_v55  ;;  %1283 = vmatprep.subr.bf16.mxu0 %v1415_v56  ;;  %v1217_v55 = vld [vmem:[%s1736_s3] ss:$0 sm:$0xff] }
  0x40   : > { %1305 = vmatprep.subr.bf16.mxu1 %v1417_v58 }
  0x42   : > { %1284 = vmatpush3.bf16.msra.mxu0 %v1416_v57 }
  0x43   : > { %1306 = vmatpush3.bf16.msra.mxu1 %v1418_v59  ;;  %1285 = vmatprep.subr.bf16.mxu0 %v1419_v60 }
  0x44   : > { %1307 = vmatprep.subr.bf16.mxu1 %v1421_v62 }
  0x46   : > { %1286 = vmatpush3.bf16.msra.mxu0 %v1420_v61 }
  0x47   : > { %1308 = vmatpush3.bf16.msra.mxu1 %v1422_v63  ;;  %1287 = vmatprep.subr.bf16.mxu0 %v1423_v0 }
  0x48   : > { %1309 = vmatprep.subr.bf16.mxu1 %v1425_v2 }
  0x4a   : > { %1288 = vmatpush3.bf16.msra.mxu0 %v1424_v1 }
  0x4b   : > { %1326 = vmatprep.subr.bf16.mxu0 %v1450_v6  ;;  %1310 = vmatpush3.bf16.msra.mxu1 %v1429_v5 }
  0x4d   : > { %952 = vmatmul.mubr.bf16.vlgmr.msra.gmra.mxu0 %v1426_v3 }
  0x4e   : > { %1342 = vmatprep.mubr.msk.bf16.mxu0 %vm1451_vm0, %v1450_v6  ;;  %1327 = vmatpush3.bf16.msra.mxu0 %v1433_v9 }
  0x4f   : > { %993 = vmatmul.mubr.bf16.vlgmr.msra.gmra.mxu1 %v1430_v7  ;;  %1328 = vmatprep.subr.bf16.mxu0 %v1450_v6 }
  0x52   : > { %1329 = vmatpush3.bf16.msra.mxu0 %v1434_v10 }
  0x53   : > { %1330 = vmatprep.subr.bf16.mxu0 %v1450_v6 }
  0x56   : > { %1331 = vmatpush3.bf16.msra.mxu0 %v1435_v11 }
  0x57   : > { %1332 = vmatprep.subr.bf16.mxu0 %v1450_v6 }
  0x5a   : > { %1333 = vmatpush3.bf16.msra.mxu0 %v1436_v12 }
  0x5b   : > { %1334 = vmatprep.subr.bf16.mxu0 %v1450_v6 }
  0x5e   : > { %1335 = vmatpush3.bf16.msra.mxu0 %v1437_v13 }
  0x5f   : > { %1336 = vmatprep.subr.bf16.mxu0 %v1450_v6 }
  0x62   : > { %1337 = vmatpush3.bf16.msra.mxu0 %v1438_v14 }
  0x63   : > { %1338 = vmatprep.subr.bf16.mxu0 %v1450_v6 }
  0x66   : > { %1339 = vmatpush3.bf16.msra.mxu0 %v1439_v15 }
  0x67   : > { %1340 = vmatprep.subr.bf16.mxu0 %v1450_v6 }
  0x6a   : > { %1341 = vmatpush3.bf16.msra.mxu0 %v1440_v16 }
  0x6d   : > { %1343 = vmatmul.mubr.bf16.vlgmr.msra.gmra.mxu0 %v1441_v17 }
  0xed   : > { %v1245_v18 = vpop.f32.mrf.mxu0 }
  0xee   : > { %v1267_v19 = vpop.f32.mrf.mxu1 }
  0xef   : > { %v1246_v20 = vpop.f32.mrf.mxu0 }
  0xf0   : > { %v1268_v21 = vpop.f32.mrf.mxu1  ;;  %v1247_v31 = vadd.f32 %v1246_v20, %v1245_v18 }
  0xf1   : > { %v1248_v22 = vpop.f32.mrf.mxu0  ;;  %v1269_v32 = vadd.f32 %v1268_v21, %v1267_v19 }
  0xf2   : > { %v1270_v23 = vpop.f32.mrf.mxu1 }
  0xf3   : > { %v1249_v24 = vpop.f32.mrf.mxu0  ;;  %v913_v36 = vadd.f32 %v1269_v32, %v1247_v31 }
  0xf4   : > { %v1271_v26 = vpop.f32.mrf.mxu1  ;;  %v1250_v37 = vadd.f32 %v1249_v24, %v1248_v22 }
  0xf5   : > { %v1272_v38 = vadd.f32 %v1271_v26, %v1270_v23 }
  0xf7   : > { %v916_v43 = vadd.f32 %v1272_v38, %v1250_v37 }
 0x10d   : > { %v1289_v25 = vpop.f32.mrf.mxu0 }
 0x10f   : > { %v1290_v27 = vpop.f32.mrf.mxu0  ;;  %v1311_v28 = vpop.f32.mrf.mxu1 }
 0x110   : > { %v1291_v33 = vadd.f32 %v1290_v27, %v1289_v25 }
 0x111   : > { %v1292_v29 = vpop.f32.mrf.mxu0  ;;  %v1312_v30 = vpop.f32.mrf.mxu1 }
 0x112   : > { %v954_v39 = vadd.f32 %v1291_v33, %v913_v36  ;;  %v1313_v40 = vadd.f32 %v1312_v30, %v1311_v28 }
 0x113   : > { %v1293_v34 = vpop.f32.mrf.mxu0  ;;  %v1314_v35 = vpop.f32.mrf.mxu1 }
 0x114   : > { %v1294_v41 = vadd.f32 %v1293_v34, %v1292_v29  ;;  %v995_v46 = vadd.f32 %v1313_v40, %v954_v39 }
 0x115   : > { %v1315_v42 = vpop.f32.mrf.mxu1 }
 0x116   : > { %v957_v44 = vadd.f32 %v1294_v41, %v916_v43  ;;  %v1316_v45 = vadd.f32 %v1315_v42, %v1314_v35 }
 0x118   : > { %v998_v51 = vadd.f32 %v1316_v45, %v957_v44 }
 0x12d   : > { %v1035_v47 = vpop.f32.mrf.mxu0 }
 0x12e   : > { %v1036_v48 = vadd.f32 %v1035_v47, %v995_v46 }
 0x12f   : > { %v1344_v50 = vpop.f32.mrf.mxu0 }
 0x130   : > { %v1049_v53 = vmul.f32 %v1216_v49, %v1036_v48 }
 0x131   : > { %v1038_v52 = vpop.f32.mrf.mxu0 }
 0x132   : > { %v1039_v54 = vadd.f32 %v1038_v52, %v998_v51  ;;  %v1058_v58 = vadd.f32 %v1217_v55, %v1049_v53 }
 0x133   : > { %v1345_v56 = vpop.f32.mrf.mxu0 }
 0x134   : > { %v1050_v57 = vmul.f32 %v1216_v49, %v1039_v54 }
 0x136   : > { %v1059_v59 = vadd.f32 %v1217_v55, %v1050_v57 }
 0x138   : > { %v1227_v60 = vpack.c.bf16 %v1059_v59, %v1058_v58 }
 0x13a   : > { %1228 = vst [vmem:[%s202_s5] sm:$0xff] %v1227_v60  }
 0x13b PF: > { %s14_s15 = sadd.s32 1, %s1448_s15  }
 0x13c   : > { %p11_p4 = scmp.ge.s32.totalorder %s14_s15, 4  }
 0x13e   :  { %13 = sbr.rel (!%p11_p4) target bundleno = 1 (0x1), region = 66 }

// kernel: model_forward.10
= control target key start
LH: loop header
LB: loop body
LE: loop exit
PB: predicated region body
PF: predicated region fallthrough
CT: control target
= control target key end

     0   :  { %s4980_s21 = smov 0   ;;  %s6393_s0 = inlined_call_operand.vmem [shape: bf16[32,1280], index: 0, kind: input, shape index: {}]   ;;  %s6394_s1 = inlined_call_operand.vmem [shape: f32[1,1280], index: 1, kind: input, shape index: {}]   ;;  %s6395_s2 = inlined_call_operand.vmem [shape: f32[1,1280], index: 2, kind: input, shape index: {}]   ;;  %s6396_s3 = inlined_call_operand.vmem [shape: bf16[1280,640], index: 3, kind: input, shape index: {}]   ;;  %s6397_s4 = inlined_call_operand.vmem [shape: f32[1,640], index: 4, kind: input, shape index: {}]   ;;  %s6398_s5 = inlined_call_operand.vmem [shape: f32[1,640], index: 5, kind: input, shape index: {}]   ;;  %s6399_s6 = inlined_call_operand.vmem [shape: bf16[32,640], index: 6, kind: output, shape index: {}]  }
   0x1 LB: > { %s3834_s22 = sadd.s32 4294967295, %s4943_s21   ;;  %p3838_p0 = scmp.ge.s32.totalorder %s4943_s21, 1  ;;  %s4943_s21 = sphi %s4980_s21, %s16_s21  }
   0x2   : > { %p214_p1 = scmp.lt.s32.totalorder %s4943_s21, 3 }
   0x4   : > { %p215_p2 = pnand %p3838_p0, %p214_p1 }
   0x5   : > { %s3839_s13 = sshll.u32 (!%p215_p2), %s3834_s22, 1 }
   0x6   : > { %218 = sbr.rel (%p215_p2) target bundleno = 638 (0x27e), region = 44  ;;  %p247_p3 = scmp.lt.s32.totalorder (!%p215_p2), %s3839_s13, 3 }
   0xb   : > { %v4377_v0 = vld [vmem:[%s6396_s3 + $0x11c] ss:$20 sps:$4 sm:$0xff]   ;;  %v4381_v2 = vld [vmem:[%s6396_s3 + $0x118] ss:$20 sps:$4 sm:$0xff]   ;;  %v4383_v4 = vld [vmem:[%s6396_s3 + $0xf4] ss:$20 sps:$4 sm:$0xff]   ;;  %v295_v37 = vlaneseq }
   0xc   : > { %v4379_v1 = vld [vmem:[%s6396_s3 + $0x39c] ss:$20 sps:$4 sm:$0xff]   ;;  %3029 = vmatprep.subr.bf16.mxu0 %v4377_v0  ;;  %v4382_v3 = vld [vmem:[%s6396_s3 + $0x398] ss:$20 sps:$4 sm:$0xff]   ;;  %v4385_v5 = vld [vmem:[%s6396_s3 + $0x374] ss:$20 sps:$4 sm:$0xff]  }
   0xd   : > { %3072 = vmatprep.subr.bf16.mxu1 %v4379_v1  ;;  %3030 = vmatpush1.bf16.msra.mxu0 %v4381_v2  ;;  %v4387_v6 = vld [vmem:[%s6396_s3 + $0xf0] ss:$20 sps:$4 sm:$0xff]   ;;  %v4389_v8 = vld [vmem:[%s6396_s3 + $0xcc] ss:$20 sps:$4 sm:$0xff]   ;;  %v4393_v10 = vld [vmem:[%s6396_s3 + $0xc8] ss:$20 sps:$4 sm:$0xff]  }
   0xe   : > { %3073 = vmatpush1.bf16.msra.mxu1 %v4382_v3  ;;  %3031 = vmatprep.subr.bf16.mxu0 %v4383_v4  ;;  %v4388_v7 = vld [vmem:[%s6396_s3 + $0x370] ss:$20 sps:$4 sm:$0xff]   ;;  %v4391_v9 = vld [vmem:[%s6396_s3 + $0x34c] ss:$20 sps:$4 sm:$0xff]   ;;  %v4394_v11 = vld [vmem:[%s6396_s3 + $0x348] ss:$20 sps:$4 sm:$0xff]  }
   0xf   : > { %3074 = vmatprep.subr.bf16.mxu1 %v4385_v5  ;;  %v4395_v12 = vld [vmem:[%s6396_s3 + $0xa4] ss:$20 sps:$4 sm:$0xff]   ;;  %v4399_v14 = vld [vmem:[%s6396_s3 + $0xa0] ss:$20 sps:$4 sm:$0xff]   ;;  %v4401_v16 = vld [vmem:[%s6396_s3 + $0x7c] ss:$20 sps:$4 sm:$0xff]  }
  0x10   : > { %v4397_v13 = vld [vmem:[%s6396_s3 + $0x324] ss:$20 sps:$4 sm:$0xff]   ;;  %v4400_v15 = vld [vmem:[%s6396_s3 + $0x320] ss:$20 sps:$4 sm:$0xff]   ;;  %v4403_v17 = vld [vmem:[%s6396_s3 + $0x2fc] ss:$20 sps:$4 sm:$0xff]  }
  0x11   : > { %3032 = vmatpush1.bf16.msra.mxu0 %v4387_v6  ;;  %v4405_v18 = vld [vmem:[%s6396_s3 + $0x78] ss:$20 sps:$4 sm:$0xff]   ;;  %v4407_v20 = vld [vmem:[%s6396_s3 + $0x54] ss:$20 sps:$4 sm:$0xff]   ;;  %v4411_v22 = vld [vmem:[%s6396_s3 + $0x50] ss:$20 sps:$4 sm:$0xff]  }
  0x12   : > { %3075 = vmatpush1.bf16.msra.mxu1 %v4388_v7  ;;  %3033 = vmatprep.subr.bf16.mxu0 %v4389_v8  ;;  %v4406_v19 = vld [vmem:[%s6396_s3 + $0x2f8] ss:$20 sps:$4 sm:$0xff]   ;;  %v4409_v21 = vld [vmem:[%s6396_s3 + $0x2d4] ss:$20 sps:$4 sm:$0xff]   ;;  %v4412_v23 = vld [vmem:[%s6396_s3 + $0x2d0] ss:$20 sps:$4 sm:$0xff]  }
  0x13   : > { %3076 = vmatprep.subr.bf16.mxu1 %v4391_v9  ;;  %v4413_v24 = vld [vmem:[%s6396_s3 + $0x2c] ss:$20 sps:$4 sm:$0xff]   ;;  %v4417_v26 = vld [vmem:[%s6396_s3 + $0x28] ss:$20 sps:$4 sm:$0xff]   ;;  %v4419_v28 = vld [vmem:[%s6396_s3 + $0x4] ss:$20 sps:$4 sm:$0xff]  }
  0x14   : > { %v4415_v25 = vld [vmem:[%s6396_s3 + $0x2ac] ss:$20 sps:$4 sm:$0xff]   ;;  %v4418_v27 = vld [vmem:[%s6396_s3 + $0x2a8] ss:$20 sps:$4 sm:$0xff]   ;;  %v4421_v29 = vld [vmem:[%s6396_s3 + $0x284] ss:$20 sps:$4 sm:$0xff]  }
  0x15   : > { %3034 = vmatpush1.bf16.msra.mxu0 %v4393_v10  ;;  %v4423_v30 = vld [vmem:[%s6396_s3] ss:$20 sps:$4 sm:$0xff]   ;;  %v4425_v32 = vld [vmem:[%s6396_s3 + $0x25c] ss:$20 sps:$4 sm:$0xff]   ;;  %v4429_v34 = vld [vmem:[%s6396_s3 + $0x258] ss:$20 sps:$4 sm:$0xff]  }
  0x16   : > { %3077 = vmatpush1.bf16.msra.mxu1 %v4394_v11  ;;  %3035 = vmatprep.subr.bf16.mxu0 %v4395_v12  ;;  %v4424_v31 = vld [vmem:[%s6396_s3 + $0x280] ss:$20 sps:$4 sm:$0xff]   ;;  %v4427_v33 = vld [vmem:[%s6396_s3 + $0x4dc] ss:$20 sps:$4 sm:$0xff]   ;;  %v4430_v35 = vld [vmem:[%s6396_s3 + $0x4d8] ss:$20 sps:$4 sm:$0xff]  }
  0x17   : > { %3078 = vmatprep.subr.bf16.mxu1 %v4397_v13  ;;  %s6401_s13 = smov (!%p247_p3, %s3839_s13), 3  ;;  %v4431_v36 = vld [vmem:[%s6396_s3 + $0x234] ss:$20 sps:$4 sm:$0xff]   ;;  %v4435_v39 = vld [vmem:[%s6396_s3 + $0x230] ss:$20 sps:$4 sm:$0xff]   ;;  %v5116_v42 = vshrl.u32 %v295_v37, 7 }
  0x18   : > { %v4433_v38 = vld [vmem:[%s6396_s3 + $0x4b4] ss:$20 sps:$4 sm:$0xff]   ;;  %s4367_s11 = smul.u32 40, %s6401_s13  ;;  %v4436_v40 = vld [vmem:[%s6396_s3 + $0x4b0] ss:$20 sps:$4 sm:$0xff]  }
  0x19   : > { %3036 = vmatpush1.bf16.msra.mxu0 %v4399_v14  ;;  %v4437_v41 = vld [vmem:[%s6396_s3 + $0x20c] ss:$20 sps:$4 sm:$0xff]   ;;  %v4441_v44 = vld [vmem:[%s6396_s3 + $0x208] ss:$20 sps:$4 sm:$0xff]   ;;  %v4443_v46 = vld [vmem:[%s6396_s3 + $0x1e4] ss:$20 sps:$4 sm:$0xff]  }
  0x1a   : > { %3079 = vmatpush1.bf16.msra.mxu1 %v4400_v15  ;;  %3037 = vmatprep.subr.bf16.mxu0 %v4401_v16  ;;  %v4439_v43 = vld [vmem:[%s6396_s3 + $0x48c] ss:$20 sps:$4 sm:$0xff]   ;;  %v4442_v45 = vld [vmem:[%s6396_s3 + $0x488] ss:$20 sps:$4 sm:$0xff]   ;;  %s5130_s26 = scalar_lea.vmem %s6393_s0, %s4367_s11  ;;  %v5136_v47 = vsub.s32 1, %v5116_v42  ;;  %v5139_v48 = vsub.s32 3, %v5116_v42 }
  0x1b   : > { %3080 = vmatprep.subr.bf16.mxu1 %v4403_v17  ;;  %v4445_v49 = vld [vmem:[%s6396_s3 + $0x464] ss:$20 sps:$4 sm:$0xff]   ;;  %v4447_v50 = vld [vmem:[%s6396_s3 + $0x1e0] ss:$20 sps:$4 sm:$0xff]   ;;  %v5152_v53 = vsub.s32 0, %v5116_v42  ;;  %v266_v54 = vld [vmem:[%s5130_s26 + $0x28] sm:$0xff] }
  0x1c   : > { %v4448_v51 = vld [vmem:[%s6396_s3 + $0x460] ss:$20 sps:$4 sm:$0xff]   ;;  %v282_v58 = vunpack.c.h.bf16 %v266_v54  ;;  %v262_v61 = vld [vmem:[%s5130_s26 + $0x8] sm:$0xff]  ;;  %v4449_v0 = vld [vmem:[%s6396_s3 + $0x1bc] ss:$20 sps:$4 sm:$0xff]   ;;  %v5182_v5 = vsub.s32 2, %v5116_v42  ;;  %v281_v12 = vunpack.c.l.bf16 %v266_v54 }
  0x1d   : > { %3038 = vmatpush1.bf16.msra.mxu0 %v4405_v18  ;;  %v261_v52 = vld [vmem:[%s5130_s26] sm:$0xff]  ;;  %v267_v62 = vld [vmem:[%s5130_s26 + $0x30] sm:$0xff]  ;;  %v274_v2 = vunpack.c.h.bf16 %v262_v61  ;;  %v4453_v13 = vld [vmem:[%s6396_s3 + $0x1b8] ss:$20 sps:$4 sm:$0xff]   ;;  %v273_v17 = vunpack.c.l.bf16 %v262_v61 }
  0x1e   : > { %3081 = vmatpush1.bf16.msra.mxu1 %v4406_v19  ;;  %3039 = vmatprep.subr.bf16.mxu0 %v4407_v20  ;;  %v272_v55 = vunpack.c.h.bf16 %v261_v52  ;;  %v5158_v56 = vld [vmem:[%s6394_s1] sm:$0xff]  ;;  %v4451_v1 = vld [vmem:[%s6396_s3 + $0x43c] ss:$20 sps:$4 sm:$0xff]   ;;  %v284_v3 = vunpack.c.h.bf16 %v267_v62  ;;  %v271_v8 = vunpack.c.l.bf16 %v261_v52  ;;  %v4454_v14 = vld [vmem:[%s6396_s3 + $0x438] ss:$20 sps:$4 sm:$0xff]   ;;  %v283_v18 = vunpack.c.l.bf16 %v267_v62 }
  0x1f   : > { %3082 = vmatprep.subr.bf16.mxu1 %v4409_v21  ;;  %v5163_v57 = vld [vmem:[%s6395_s2] sm:$0xff]  ;;  %v302_v59 = vrot.slane %v5158_v56, %v5136_v47  ;;  %v310_v63 = vrot.slane %v5158_v56, %v5139_v48  ;;  %v298_v9 = vrot.slane %v5158_v56, %v5152_v53  ;;  %v4455_v19 = vld [vmem:[%s6396_s3 + $0x194] ss:$20 sps:$4 sm:$0xff]  }
  0x20   : > { %v376_v60 = vrot.slane %v5163_v57, %v5136_v47  ;;  %v384_v4 = vrot.slane %v5163_v57, %v5139_v48  ;;  %v4457_v20 = vld [vmem:[%s6396_s3 + $0x414] ss:$20 sps:$4 sm:$0xff]   ;;  %v4469_v54 = vld [vmem:[%s6396_s3 + $0x3c4] ss:$20 sps:$4 sm:$0xff]  }
  0x21   : > { %3040 = vmatpush1.bf16.msra.mxu0 %v4411_v22  ;;  %v346_v6 = vmul.f32 %v302_v59, %v272_v55  ;;  %v356_v7 = vmul.f32 %v302_v59, %v282_v58  ;;  %v348_v10 = vmul.f32 %v310_v63, %v274_v2  ;;  %v358_v11 = vmul.f32 %v310_v63, %v284_v3  ;;  %v4471_v55 = vld [vmem:[%s6396_s3 + $0x140] ss:$20 sps:$4 sm:$0xff]   ;;  %v4475_v63 = vld [vmem:[%s6396_s3 + $0x61c] ss:$20 sps:$4 sm:$0xff]   ;;  %v4473_v3 = vld [vmem:[%s6396_s3 + $0x618] ss:$20 sps:$4 sm:$0xff]  }
  0x22   : > { %3083 = vmatpush1.bf16.msra.mxu1 %v4412_v23  ;;  %3041 = vmatprep.subr.bf16.mxu0 %v4413_v24  ;;  %v372_v23 = vrot.slane %v5163_v57, %v5152_v53  ;;  %v321_v24 = vsub.s32 6, %v5116_v42  ;;  %v4472_v62 = vld [vmem:[%s6396_s3 + $0x3c0] ss:$20 sps:$4 sm:$0xff]  }
  0x23   : > { %3084 = vmatprep.subr.bf16.mxu1 %v4415_v25  ;;  %v420_v15 = vadd.f32 %v376_v60, %v346_v6  ;;  %v430_v16 = vadd.f32 %v376_v60, %v356_v7  ;;  %v422_v21 = vadd.f32 %v384_v4, %v348_v10  ;;  %v432_v22 = vadd.f32 %v384_v4, %v358_v11  ;;  %v4476_v4 = vld [vmem:[%s6396_s3 + $0x898] ss:$20 sps:$4 sm:$0xff]   ;;  %v4481_v6 = vld [vmem:[%s6396_s3 + $0x5f4] ss:$20 sps:$4 sm:$0xff]  }
  0x24   : > { %v5236_v52 = vrot.slane %v5163_v57, %v321_v24  ;;  %v4484_v7 = vld [vmem:[%s6396_s3 + $0x874] ss:$20 sps:$4 sm:$0xff]   ;;  %v4487_v10 = vld [vmem:[%s6396_s3 + $0x5cc] ss:$20 sps:$4 sm:$0xff]  }
  0x25   : > { %3042 = vmatpush1.bf16.msra.mxu0 %v4417_v26  ;;  %v440_v25 = vmax.f32 %v420_v15, 0.0  ;;  %v450_v26 = vmax.f32 %v430_v16, 0.0  ;;  %v4490_v11 = vld [vmem:[%s6396_s3 + $0x84c] ss:$20 sps:$4 sm:$0xff]   ;;  %v4496_v15 = vld [vmem:[%s6396_s3 + $0x824] ss:$20 sps:$4 sm:$0xff]  }
  0x26   : > { %3085 = vmatpush1.bf16.msra.mxu1 %v4418_v27  ;;  %3043 = vmatprep.subr.bf16.mxu0 %v4419_v28  ;;  %v345_v27 = vmul.f32 %v298_v9, %v271_v8  ;;  %v306_v28 = vrot.slane %v5158_v56, %v5182_v5  ;;  %v4479_v8 = vld [vmem:[%s6396_s3 + $0x5f0] ss:$20 sps:$4 sm:$0xff]   ;;  %v4491_v16 = vld [vmem:[%s6396_s3 + $0x5a0] ss:$20 sps:$4 sm:$0xff]  }
  0x27   : > { %3086 = vmatprep.subr.bf16.mxu1 %v4421_v29  ;;  %v442_v29 = vmax.f32 %v422_v21, 0.0  ;;  %v4500_v21 = vld [vmem:[%s6396_s3 + $0x7f8] ss:$20 sps:$4 sm:$0xff]  }
  0x28   : > { %v357_v37 = vmul.f32 %v306_v28, %v283_v18  ;;  %v4499_v18 = vld [vmem:[%s6396_s3 + $0x57c] ss:$20 sps:$4 sm:$0xff]  }
  0x29   : > { %3044 = vmatpush1.bf16.msra.mxu0 %v4423_v30  ;;  %v452_v30 = vmax.f32 %v432_v22, 0.0  ;;  %v4505_v22 = vld [vmem:[%s6396_s3 + $0x554] ss:$20 sps:$4 sm:$0xff]  }
  0x2a   : > { %3087 = vmatpush1.bf16.msra.mxu1 %v4424_v31  ;;  %3045 = vmatprep.subr.bf16.mxu0 %v4425_v32  ;;  %v355_v31 = vmul.f32 %v298_v9, %v281_v12  ;;  %v380_v32 = vrot.slane %v5163_v57, %v5182_v5  ;;  %v4482_v9 = vld [vmem:[%s6396_s3 + $0x870] ss:$20 sps:$4 sm:$0xff]   ;;  %v4485_v12 = vld [vmem:[%s6396_s3 + $0x5c8] ss:$20 sps:$4 sm:$0xff]  }
  0x2b   : > { %3088 = vmatprep.subr.bf16.mxu1 %v4427_v33  ;;  %v4459_v33 = vld [vmem:[%s6396_s3 + $0x190] ss:$20 sps:$4 sm:$0xff]  }
  0x2d   : > { %3046 = vmatpush2.bf16.msra.mxu0 %v4429_v34  ;;  %v4460_v34 = vld [vmem:[%s6396_s3 + $0x410] ss:$20 sps:$4 sm:$0xff]  }
  0x2e   : > { %3089 = vmatpush2.bf16.msra.mxu1 %v4430_v35  ;;  %3047 = vmatprep.subr.bf16.mxu0 %v4431_v36  ;;  %v5211_v35 = vpack.c.bf16 %v450_v26, %v440_v25  ;;  %v347_v36 = vmul.f32 %v306_v28, %v273_v17  ;;  %v4494_v17 = vld [vmem:[%s6396_s3 + $0x820] ss:$20 sps:$4 sm:$0xff]   ;;  %v5321_v25 = vsub.s32 4, %v5116_v42  ;;  %v4503_v26 = vld [vmem:[%s6396_s3 + $0x550] ss:$20 sps:$4 sm:$0xff]  }
  0x2f   : > { %3090 = vmatprep.subr.bf16.mxu1 %v4433_v38  ;;  %v4461_v38 = vld [vmem:[%s6396_s3 + $0x16c] ss:$20 sps:$4 sm:$0xff]   ;;  %v4506_v28 = vld [vmem:[%s6396_s3 + $0x7d0] ss:$20 sps:$4 sm:$0xff]  }
  0x30   : > { %3061 = vmatprep.mubr.bf16.mxu0 %v5211_v35 }
  0x31   : > { %3048 = vmatpush2.bf16.msra.mxu0 %v4435_v39  ;;  %v4463_v39 = vld [vmem:[%s6396_s3 + $0x3ec] ss:$20 sps:$4 sm:$0xff]  }
  0x32   : > { %3091 = vmatpush2.bf16.msra.mxu1 %v4436_v40  ;;  %3049 = vmatprep.subr.bf16.mxu0 %v4437_v41  ;;  %v5219_v40 = vpack.c.bf16 %v452_v30, %v442_v29  ;;  %v419_v41 = vadd.f32 %v372_v23, %v345_v27  ;;  %v325_v27 = vsub.s32 7, %v5116_v42  ;;  %v4511_v29 = vld [vmem:[%s6396_s3 + $0x52c] ss:$20 sps:$4 sm:$0xff]  }
  0x33   : > { %3092 = vmatprep.subr.bf16.mxu1 %v4439_v43  ;;  %v429_v43 = vadd.f32 %v372_v23, %v355_v31  ;;  %v4508_v23 = vld [vmem:[%s6396_s3 + $0x7d4] ss:$20 sps:$4 sm:$0xff]   ;;  %v4514_v30 = vld [vmem:[%s6396_s3 + $0x7ac] ss:$20 sps:$4 sm:$0xff]  }
  0x34   : > { %3104 = vmatprep.mubr.bf16.mxu1 %v5219_v40  ;;  %v439_v58 = vmax.f32 %v419_v41, 0.0 }
  0x35   : > { %3050 = vmatpush2.bf16.msra.mxu0 %v4441_v44  ;;  %v421_v44 = vadd.f32 %v380_v32, %v347_v36  ;;  %v449_v59 = vmax.f32 %v429_v43, 0.0  ;;  %v263_v36 = vld [vmem:[%s5130_s26 + $0x10] sm:$0xff] }
  0x36   : > { %3093 = vmatpush2.bf16.msra.mxu1 %v4442_v45  ;;  %3051 = vmatprep.subr.bf16.mxu0 %v4443_v46  ;;  %v431_v45 = vadd.f32 %v380_v32, %v357_v37  ;;  %v5224_v46 = vrot.slane %v5158_v56, %v321_v24  ;;  %v317_v24 = vsub.s32 5, %v5116_v42  ;;  %v4509_v42 = vld [vmem:[%s6396_s3 + $0x528] ss:$20 sps:$4 sm:$0xff]   ;;  %v314_v32 = vrot.slane %v5158_v56, %v5321_v25 }
  0x37   : > { %3094 = vmatprep.subr.bf16.mxu1 %v4445_v49  ;;  %v4465_v49 = vld [vmem:[%s6396_s3 + $0x168] ss:$20 sps:$4 sm:$0xff]   ;;  %v441_v60 = vmax.f32 %v421_v44, 0.0  ;;  %v275_v41 = vunpack.c.l.bf16 %v263_v36  ;;  %v276_v43 = vunpack.c.h.bf16 %v263_v36  ;;  %v388_v44 = vrot.slane %v5163_v57, %v5321_v25 }
  0x38   : > { %v451_v61 = vmax.f32 %v431_v45, 0.0  ;;  %v318_v31 = vrot.slane %v5158_v56, %v317_v24  ;;  %v392_v37 = vrot.slane %v5163_v57, %v317_v24  ;;  %v264_v45 = vld [vmem:[%s5130_s26 + $0x18] sm:$0xff] }
  0x39   : > { %3052 = vmatpush2.bf16.msra.mxu0 %v4447_v50  ;;  %v4466_v50 = vld [vmem:[%s6396_s3 + $0x3e8] ss:$20 sps:$4 sm:$0xff]   ;;  %v4524_v24 = vld [vmem:[%s6396_s3 + $0x9d8] ss:$20 sps:$4 sm:$0xff]  }
  0x3a   : > { %3095 = vmatpush2.bf16.msra.mxu1 %v4448_v51  ;;  %3053 = vmatprep.subr.bf16.mxu0 %v4449_v0  ;;  %v4467_v51 = vld [vmem:[%s6396_s3 + $0x144] ss:$20 sps:$4 sm:$0xff]   ;;  %v4478_v0 = vld [vmem:[%s6396_s3 + $0x89c] ss:$20 sps:$4 sm:$0xff]   ;;  %v5255_v2 = vpack.c.bf16 %v451_v61, %v441_v60  ;;  %v349_v60 = vmul.f32 %v314_v32, %v275_v41 }
  0x3b   : > { %3096 = vmatprep.subr.bf16.mxu1 %v4451_v1  ;;  %v5253_v1 = vpack.c.bf16 %v449_v59, %v439_v58  ;;  %v278_v58 = vunpack.c.h.bf16 %v264_v45  ;;  %v350_v59 = vmul.f32 %v318_v31, %v276_v43  ;;  %v4541_v41 = vld [vmem:[%s6396_s3 + $0x6e4] ss:$20 sps:$4 sm:$0xff]  }
  0x3c   : > { %v4544_v43 = vld [vmem:[%s6396_s3 + $0x964] ss:$20 sps:$4 sm:$0xff]  }
  0x3d   : > { %3054 = vmatpush2.bf16.msra.mxu0 %v4453_v13  ;;  %v4488_v13 = vld [vmem:[%s6396_s3 + $0x848] ss:$20 sps:$4 sm:$0xff]  }
  0x3e   : > { %3097 = vmatpush2.bf16.msra.mxu1 %v4454_v14  ;;  %3055 = vmatprep.subr.bf16.mxu0 %v4455_v19  ;;  %v4493_v14 = vld [vmem:[%s6396_s3 + $0x5a4] ss:$20 sps:$4 sm:$0xff]   ;;  %v4502_v19 = vld [vmem:[%s6396_s3 + $0x7fc] ss:$20 sps:$4 sm:$0xff]  }
  0x3f   : > { %3098 = vmatprep.subr.bf16.mxu1 %v4457_v20  ;;  %v4497_v20 = vld [vmem:[%s6396_s3 + $0x578] ss:$20 sps:$4 sm:$0xff]  }
  0x41   : > { %3056 = vmatpush2.bf16.msra.mxu0 %v4459_v33  ;;  %v4512_v33 = vld [vmem:[%s6396_s3 + $0x7a8] ss:$20 sps:$4 sm:$0xff]  }
  0x42   : > { %3099 = vmatpush2.bf16.msra.mxu1 %v4460_v34  ;;  %3057 = vmatprep.subr.bf16.mxu0 %v4461_v38  ;;  %v4517_v34 = vld [vmem:[%s6396_s3 + $0x504] ss:$20 sps:$4 sm:$0xff]   ;;  %v326_v38 = vrot.slane %v5158_v56, %v325_v27 }
  0x43   : > { %3100 = vmatprep.subr.bf16.mxu1 %v4463_v39  ;;  %v268_v39 = vld [vmem:[%s5130_s26 + $0x38] sm:$0xff] }
  0x44   : > { %v286_v56 = vunpack.c.h.bf16 %v268_v39 }
  0x45   : > { %3058 = vmatpush2.bf16.msra.mxu0 %v4465_v49  ;;  %v269_v49 = vld [vmem:[%s5130_s26 + $0x40] sm:$0xff] }
  0x46   : > { %3101 = vmatpush2.bf16.msra.mxu1 %v4466_v50  ;;  %3059 = vmatprep.subr.bf16.mxu0 %v4467_v51  ;;  %v400_v50 = vrot.slane %v5163_v57, %v325_v27  ;;  %v4520_v51 = vld [vmem:[%s6396_s3 + $0x784] ss:$20 sps:$4 sm:$0xff]   ;;  %v287_v61 = vunpack.c.l.bf16 %v269_v49 }
  0x47   : > { %3102 = vmatprep.subr.bf16.mxu1 %v4469_v54  ;;  %v285_v54 = vunpack.c.l.bf16 %v268_v39  ;;  %v4536_v39 = vld [vmem:[%s6396_s3 + $0x988] ss:$20 sps:$4 sm:$0xff]  }
  0x49   : > { %3060 = vmatpush2.bf16.msra.mxu0 %v4471_v55  ;;  %v277_v55 = vunpack.c.l.bf16 %v264_v45  ;;  %v359_v57 = vmul.f32 %v314_v32, %v285_v54  ;;  %v4542_v45 = vld [vmem:[%s6396_s3 + $0x960] ss:$20 sps:$4 sm:$0xff]   ;;  %v4548_v54 = vld [vmem:[%s6396_s3 + $0x938] ss:$20 sps:$4 sm:$0xff]  }
  0x4a   : > { %3103 = vmatpush2.bf16.msra.mxu1 %v4472_v62  ;;  %3115 = vmatprep.subr.bf16.mxu0 %v4475_v63  ;;  %v288_v62 = vunpack.c.h.bf16 %v269_v49  ;;  %v4515_v63 = vld [vmem:[%s6396_s3 + $0x500] ss:$20 sps:$4 sm:$0xff]   ;;  %v4547_v49 = vld [vmem:[%s6396_s3 + $0x6bc] ss:$20 sps:$4 sm:$0xff]  }
  0x4b   : > { %3158 = vmatprep.subr.bf16.mxu1 %v4478_v0  ;;  %v360_v0 = vmul.f32 %v318_v31, %v286_v56  ;;  %v4553_v56 = vld [vmem:[%s6396_s3 + $0x694] ss:$20 sps:$4 sm:$0xff]  }
  0x4c   : > { %3062 = vmatmul.mubr.bf16.vlgmr.msra.gmra.mxu0 %v5253_v1 }
  0x4d   : > { %3105 = vmatmul.mubr.bf16.vlgmr.msra.gmra.mxu1 %v5255_v2  ;;  %3116 = vmatpush1.bf16.msra.mxu0 %v4473_v3  ;;  %v352_v3 = vmul.f32 %v326_v38, %v278_v58  ;;  %v4551_v58 = vld [vmem:[%s6396_s3 + $0x690] ss:$20 sps:$4 sm:$0xff]  }
  0x4e   : > { %3159 = vmatpush1.bf16.msra.mxu1 %v4476_v4  ;;  %3117 = vmatprep.subr.bf16.mxu0 %v4481_v6  ;;  %v351_v4 = vmul.f32 %v5224_v46, %v277_v55  ;;  %v4518_v6 = vld [vmem:[%s6396_s3 + $0x780] ss:$20 sps:$4 sm:$0xff]  }
  0x4f   : > { %3160 = vmatprep.subr.bf16.mxu1 %v4484_v7  ;;  %v4523_v7 = vld [vmem:[%s6396_s3 + $0x75c] ss:$20 sps:$4 sm:$0xff]   ;;  %v4556_v55 = vld [vmem:[%s6396_s3 + $0x914] ss:$20 sps:$4 sm:$0xff]  }
  0x51   : > { %3118 = vmatpush1.bf16.msra.mxu0 %v4479_v8  ;;  %v424_v8 = vadd.f32 %v392_v37, %v350_v59  ;;  %v4554_v59 = vld [vmem:[%s6396_s3 + $0x910] ss:$20 sps:$4 sm:$0xff]  }
  0x52   : > { %3161 = vmatpush1.bf16.msra.mxu1 %v4482_v9  ;;  %3119 = vmatprep.subr.bf16.mxu0 %v4487_v10  ;;  %v423_v9 = vadd.f32 %v388_v44, %v349_v60  ;;  %v362_v10 = vmul.f32 %v326_v38, %v288_v62  ;;  %v4533_v38 = vld [vmem:[%s6396_s3 + $0x708] ss:$20 sps:$4 sm:$0xff]   ;;  %v4559_v60 = vld [vmem:[%s6396_s3 + $0x66c] ss:$20 sps:$4 sm:$0xff]  }
  0x53   : > { %3162 = vmatprep.subr.bf16.mxu1 %v4490_v11  ;;  %v4526_v11 = vld [vmem:[%s6396_s3 + $0x9dc] ss:$20 sps:$4 sm:$0xff]  }
  0x54   : > { %v4557_v62 = vld [vmem:[%s6396_s3 + $0x668] ss:$20 sps:$4 sm:$0xff]  }
  0x55   : > { %3120 = vmatpush1.bf16.msra.mxu0 %v4485_v12  ;;  %v434_v12 = vadd.f32 %v392_v37, %v360_v0  ;;  %v4538_v37 = vld [vmem:[%s6396_s3 + $0x98c] ss:$20 sps:$4 sm:$0xff]   ;;  %v4565_v0 = vld [vmem:[%s6396_s3 + $0x644] ss:$20 sps:$4 sm:$0xff]  }
  0x56   : > { %3163 = vmatpush1.bf16.msra.mxu1 %v4488_v13  ;;  %3121 = vmatprep.subr.bf16.mxu0 %v4493_v14  ;;  %v433_v13 = vadd.f32 %v388_v44, %v359_v57  ;;  %v426_v14 = vadd.f32 %v400_v50, %v352_v3  ;;  %v4539_v44 = vld [vmem:[%s6396_s3 + $0x6e0] ss:$20 sps:$4 sm:$0xff]   ;;  %v4568_v57 = vld [vmem:[%s6396_s3 + $0x8c4] ss:$20 sps:$4 sm:$0xff]  }
  0x57   : > { %3164 = vmatprep.subr.bf16.mxu1 %v4496_v15  ;;  %v444_v15 = vmax.f32 %v424_v8, 0.0  ;;  %v4563_v3 = vld [vmem:[%s6396_s3 + $0x640] ss:$20 sps:$4 sm:$0xff]   ;;  %v4569_v8 = vld [vmem:[%s6396_s3 + $0xb18] ss:$20 sps:$4 sm:$0xff]  }
  0x59   : > { %3122 = vmatpush1.bf16.msra.mxu0 %v4491_v16  ;;  %v443_v16 = vmax.f32 %v423_v9, 0.0  ;;  %v4572_v9 = vld [vmem:[%s6396_s3 + $0x120] ss:$20 sps:$4 sm:$0xff]  }
  0x5a   : > { %3165 = vmatpush1.bf16.msra.mxu1 %v4494_v17  ;;  %3123 = vmatprep.subr.bf16.mxu0 %v4499_v18  ;;  %v436_v17 = vadd.f32 %v400_v50, %v362_v10  ;;  %v361_v18 = vmul.f32 %v5224_v46, %v287_v61  ;;  %v4550_v50 = vld [vmem:[%s6396_s3 + $0x93c] ss:$20 sps:$4 sm:$0xff]   ;;  %v4562_v61 = vld [vmem:[%s6396_s3 + $0x8ec] ss:$20 sps:$4 sm:$0xff]   ;;  %v4577_v10 = vld [vmem:[%s6396_s3 + $0xaf4] ss:$20 sps:$4 sm:$0xff]  }
  0x5b   : > { %3166 = vmatprep.subr.bf16.mxu1 %v4502_v19  ;;  %v4521_v19 = vld [vmem:[%s6396_s3 + $0x758] ss:$20 sps:$4 sm:$0xff]  }
  0x5c   : > { %v456_v46 = vmax.f32 %v436_v17, 0.0  ;;  %v435_v27 = vadd.f32 %v5236_v52, %v361_v18  ;;  %v5512_v17 = vld [vmem:[%s5130_s26 + $0x48] sm:$0xff] }
  0x5d   : > { %3124 = vmatpush1.bf16.msra.mxu0 %v4497_v20  ;;  %v454_v20 = vmax.f32 %v434_v12, 0.0  ;;  %v4575_v12 = vld [vmem:[%s6396_s3 + $0xaf0] ss:$20 sps:$4 sm:$0xff]   ;;  %v5517_v18 = vld [vmem:[%s6394_s1 + $0x8] sm:$0x3] }
  0x5e   : > { %3167 = vmatpush1.bf16.msra.mxu1 %v4500_v21  ;;  %3125 = vmatprep.subr.bf16.mxu0 %v4505_v22  ;;  %v453_v21 = vmax.f32 %v433_v13, 0.0  ;;  %v446_v22 = vmax.f32 %v426_v14, 0.0  ;;  %v455_v32 = vmax.f32 %v435_v27, 0.0  ;;  %v4578_v13 = vld [vmem:[%s6396_s3 + $0xf8] ss:$20 sps:$4 sm:$0xff]  }
  0x5f   : > { %3168 = vmatprep.subr.bf16.mxu1 %v4508_v23  ;;  %v425_v23 = vadd.f32 %v5236_v52, %v351_v4  ;;  %v4530_v52 = vld [vmem:[%s6396_s3 + $0x9b0] ss:$20 sps:$4 sm:$0xff]   ;;  %v4566_v4 = vld [vmem:[%s6396_s3 + $0x8c0] ss:$20 sps:$4 sm:$0xff]  }
  0x60   : > { %v5392_v31 = vpack.c.bf16 %v456_v46, %v446_v22  ;;  %v4583_v14 = vld [vmem:[%s6396_s3 + $0xacc] ss:$20 sps:$4 sm:$0xff]   ;;  %v334_v22 = vrot.slane %v5517_v18, %v5136_v47  ;;  %v4589_v46 = vld [vmem:[%s6396_s3 + $0xaa4] ss:$20 sps:$4 sm:$0xff]  }
  0x61   : > { %3126 = vmatpush1.bf16.msra.mxu0 %v4503_v26  ;;  %v4529_v26 = vld [vmem:[%s6396_s3 + $0x734] ss:$20 sps:$4 sm:$0xff]  }
  0x62   : > { %3169 = vmatpush1.bf16.msra.mxu1 %v4506_v28  ;;  %3127 = vmatprep.subr.bf16.mxu0 %v4511_v29  ;;  %v4532_v28 = vld [vmem:[%s6396_s3 + $0x9b4] ss:$20 sps:$4 sm:$0xff]   ;;  %v5388_v29 = vpack.c.bf16 %v454_v20, %v444_v15  ;;  %v290_v20 = vunpack.c.h.bf16 %v5512_v17 }
  0x63   : > { %3170 = vmatprep.subr.bf16.mxu1 %v4514_v30  ;;  %v5390_v30 = vpack.c.bf16 %v453_v21, %v443_v16  ;;  %3190 = vmatprep.mubr.bf16.mxu1 %v5392_v31  ;;  %v4586_v15 = vld [vmem:[%s6396_s3 + $0xd4] ss:$20 sps:$4 sm:$0xff]   ;;  %v5509_v16 = vld [vmem:[%s5130_s26 + $0x20] sm:$0xff]  ;;  %s4368_s26 = smul.u32 20, %s6401_s13 }
  0x64   : > { %3147 = vmatprep.mubr.bf16.mxu0 %v5388_v29  ;;  %v5524_v21 = vld [vmem:[%s6395_s2 + $0x8] sm:$0x3] }
  0x65   : > { %3128 = vmatpush1.bf16.msra.mxu0 %v4509_v42  ;;  %v445_v42 = vmax.f32 %v425_v23, 0.0  ;;  %v408_v23 = vrot.slane %v5524_v21, %v5136_v47  ;;  %s6342_s16 = scalar_lea.vmem %s6399_s6, %s4368_s26 }
  0x66   : > { %3171 = vmatpush1.bf16.msra.mxu1 %v4512_v33  ;;  %3129 = vmatprep.subr.bf16.mxu0 %v4517_v34  ;;  %v4527_v33 = vld [vmem:[%s6396_s3 + $0x730] ss:$20 sps:$4 sm:$0xff]   ;;  %v4535_v34 = vld [vmem:[%s6396_s3 + $0x70c] ss:$20 sps:$4 sm:$0xff]  }
  0x67   : > { %3172 = vmatprep.subr.bf16.mxu1 %v4520_v51  ;;  %v5404_v36 = vpack.c.bf16 %v455_v32, %v445_v42  ;;  %v4545_v51 = vld [vmem:[%s6396_s3 + $0x6b8] ss:$20 sps:$4 sm:$0xff]  }
  0x68   : > { %v4592_v42 = vld [vmem:[%s6396_s3 + $0xac] ss:$20 sps:$4 sm:$0xff]  }
  0x69   : > { %3130 = vmatpush1.bf16.msra.mxu0 %v4515_v63  ;;  %v4560_v63 = vld [vmem:[%s6396_s3 + $0x8e8] ss:$20 sps:$4 sm:$0xff]  }
  0x6a   : > { %3173 = vmatpush1.bf16.msra.mxu1 %v4518_v6  ;;  %3131 = vmatprep.subr.bf16.mxu0 %v4523_v7  ;;  %v4571_v6 = vld [vmem:[%s6396_s3 + $0xb1c] ss:$20 sps:$4 sm:$0xff]   ;;  %v4574_v7 = vld [vmem:[%s6396_s3 + $0x124] ss:$20 sps:$4 sm:$0xff]  }
  0x6b   : > { %3174 = vmatprep.subr.bf16.mxu1 %v4526_v11  ;;  %v4580_v11 = vld [vmem:[%s6396_s3 + $0xfc] ss:$20 sps:$4 sm:$0xff]  }
  0x6d   : > { %3132 = vmatpush2.bf16.msra.mxu0 %v4521_v19  ;;  %v280_v19 = vunpack.c.h.bf16 %v5509_v16 }
  0x6e   : > { %3175 = vmatpush2.bf16.msra.mxu1 %v4524_v24  ;;  %3133 = vmatprep.subr.bf16.mxu0 %v4529_v26  ;;  %v4581_v24 = vld [vmem:[%s6396_s3 + $0xac8] ss:$20 sps:$4 sm:$0xff]   ;;  %v4584_v26 = vld [vmem:[%s6396_s3 + $0xd0] ss:$20 sps:$4 sm:$0xff]  }
  0x6f   : > { %3176 = vmatprep.subr.bf16.mxu1 %v4532_v28  ;;  %v354_v27 = vmul.f32 %v334_v22, %v280_v19  ;;  %v364_v28 = vmul.f32 %v334_v22, %v290_v20  ;;  %v4635_v19 = vld [vmem:[%s6396_s3 + $0xbe0] ss:$20 sps:$4 sm:$0xff]   ;;  %v4638_v20 = vld [vmem:[%s6396_s3 + $0x1e8] ss:$20 sps:$4 sm:$0xff]  }
  0x70   : > { %v4643_v22 = vld [vmem:[%s6396_s3 + $0xbbc] ss:$20 sps:$4 sm:$0xff]  }
  0x71   : > { %3134 = vmatpush2.bf16.msra.mxu0 %v4527_v33  ;;  %v428_v32 = vadd.f32 %v408_v23, %v354_v27  ;;  %v438_v33 = vadd.f32 %v408_v23, %v364_v28  ;;  %v4646_v23 = vld [vmem:[%s6396_s3 + $0x1c4] ss:$20 sps:$4 sm:$0xff]   ;;  %v289_v27 = vunpack.c.l.bf16 %v5512_v17  ;;  %v330_v28 = vrot.slane %v5517_v18, %v5152_v53 }
  0x72   : > { %3177 = vmatpush2.bf16.msra.mxu1 %v4530_v52  ;;  %3135 = vmatprep.subr.bf16.mxu0 %v4535_v34  ;;  %v4587_v52 = vld [vmem:[%s6396_s3 + $0xaa0] ss:$20 sps:$4 sm:$0xff]   ;;  %v4590_v34 = vld [vmem:[%s6396_s3 + $0xa8] ss:$20 sps:$4 sm:$0xff]   ;;  %v4650_v17 = vld [vmem:[%s6396_s3 + $0x198] ss:$20 sps:$4 sm:$0xff]   ;;  %v404_v18 = vrot.slane %v5524_v21, %v5152_v53 }
  0x73   : > { %3178 = vmatprep.subr.bf16.mxu1 %v4538_v37  ;;  %v448_v37 = vmax.f32 %v428_v32, 0.0  ;;  %v4652_v32 = vld [vmem:[%s6396_s3 + $0x19c] ss:$20 sps:$4 sm:$0xff]  }
  0x74   : > { %v4656_v21 = vld [vmem:[%s6396_s3 + $0x170] ss:$20 sps:$4 sm:$0xff]  }
  0x75   : > { %3136 = vmatpush2.bf16.msra.mxu0 %v4533_v38  ;;  %v458_v38 = vmax.f32 %v438_v33, 0.0 }
  0x76   : > { %3179 = vmatpush2.bf16.msra.mxu1 %v4536_v39  ;;  %3137 = vmatprep.subr.bf16.mxu0 %v4541_v41  ;;  %v4595_v39 = vld [vmem:[%s6396_s3 + $0xa7c] ss:$20 sps:$4 sm:$0xff]   ;;  %v4598_v41 = vld [vmem:[%s6396_s3 + $0x84] ss:$20 sps:$4 sm:$0xff]  }
  0x77   : > { %3180 = vmatprep.subr.bf16.mxu1 %v4544_v43  ;;  %v5555_v43 = vpack.c.bf16 %v458_v38, %v448_v37  ;;  %v4658_v37 = vld [vmem:[%s6396_s3 + $0x174] ss:$20 sps:$4 sm:$0xff]  }
  0x78   : > { %v4653_v38 = vld [vmem:[%s6396_s3 + $0xb68] ss:$20 sps:$4 sm:$0xff]  }
  0x79   : > { %3138 = vmatpush2.bf16.msra.mxu0 %v4539_v44  ;;  %v4593_v44 = vld [vmem:[%s6396_s3 + $0xa78] ss:$20 sps:$4 sm:$0xff]  }
  0x7a   : > { %3181 = vmatpush2.bf16.msra.mxu1 %v4542_v45  ;;  %3139 = vmatprep.subr.bf16.mxu0 %v4547_v49  ;;  %v4596_v45 = vld [vmem:[%s6396_s3 + $0x80] ss:$20 sps:$4 sm:$0xff]  }
  0x7b   : > { %3182 = vmatprep.subr.bf16.mxu1 %v4550_v50  ;;  %v4601_v49 = vld [vmem:[%s6396_s3 + $0xa54] ss:$20 sps:$4 sm:$0xff]   ;;  %v4604_v50 = vld [vmem:[%s6396_s3 + $0x5c] ss:$20 sps:$4 sm:$0xff]  }
  0x7d   : > { %3140 = vmatpush2.bf16.msra.mxu0 %v4545_v51  ;;  %v4599_v51 = vld [vmem:[%s6396_s3 + $0xa50] ss:$20 sps:$4 sm:$0xff]  }
  0x7e   : > { %3183 = vmatpush2.bf16.msra.mxu1 %v4548_v54  ;;  %3141 = vmatprep.subr.bf16.mxu0 %v4553_v56  ;;  %v4602_v54 = vld [vmem:[%s6396_s3 + $0x58] ss:$20 sps:$4 sm:$0xff]  }
  0x7f   : > { %3184 = vmatprep.subr.bf16.mxu1 %v4556_v55  ;;  %v4607_v56 = vld [vmem:[%s6396_s3 + $0xa2c] ss:$20 sps:$4 sm:$0xff]   ;;  %v4610_v55 = vld [vmem:[%s6396_s3 + $0x34] ss:$20 sps:$4 sm:$0xff]  }
  0x81   : > { %3142 = vmatpush2.bf16.msra.mxu0 %v4551_v58  ;;  %v4605_v58 = vld [vmem:[%s6396_s3 + $0xa28] ss:$20 sps:$4 sm:$0xff]  }
  0x82   : > { %3185 = vmatpush2.bf16.msra.mxu1 %v4554_v59  ;;  %3143 = vmatprep.subr.bf16.mxu0 %v4559_v60  ;;  %v4608_v59 = vld [vmem:[%s6396_s3 + $0x30] ss:$20 sps:$4 sm:$0xff]  }
  0x83   : > { %3186 = vmatprep.subr.bf16.mxu1 %v4562_v61  ;;  %v4613_v60 = vld [vmem:[%s6396_s3 + $0xa04] ss:$20 sps:$4 sm:$0xff]   ;;  %v4616_v61 = vld [vmem:[%s6396_s3 + $0xc] ss:$20 sps:$4 sm:$0xff]  }
  0x85   : > { %3144 = vmatpush2.bf16.msra.mxu0 %v4557_v62  ;;  %v4611_v62 = vld [vmem:[%s6396_s3 + $0xa00] ss:$20 sps:$4 sm:$0xff]  }
  0x86   : > { %3187 = vmatpush2.bf16.msra.mxu1 %v4560_v63  ;;  %3145 = vmatprep.subr.bf16.mxu0 %v4565_v0  ;;  %v4614_v63 = vld [vmem:[%s6396_s3 + $0x8] ss:$20 sps:$4 sm:$0xff]  }
  0x87   : > { %3188 = vmatprep.subr.bf16.mxu1 %v4568_v57  ;;  %v4619_v0 = vld [vmem:[%s6396_s3 + $0xc5c] ss:$20 sps:$4 sm:$0xff]   ;;  %v4622_v57 = vld [vmem:[%s6396_s3 + $0x264] ss:$20 sps:$4 sm:$0xff]  }
  0x89   : > { %3146 = vmatpush2.bf16.msra.mxu0 %v4563_v3  ;;  %v4617_v3 = vld [vmem:[%s6396_s3 + $0xc58] ss:$20 sps:$4 sm:$0xff]  }
  0x8a   : > { %3189 = vmatpush2.bf16.msra.mxu1 %v4566_v4  ;;  %3201 = vmatprep.subr.bf16.mxu0 %v4571_v6  ;;  %v4620_v4 = vld [vmem:[%s6396_s3 + $0x260] ss:$20 sps:$4 sm:$0xff]  }
  0x8b   : > { %3244 = vmatprep.subr.bf16.mxu1 %v4574_v7  ;;  %v4625_v6 = vld [vmem:[%s6396_s3 + $0xc34] ss:$20 sps:$4 sm:$0xff]   ;;  %v4628_v7 = vld [vmem:[%s6396_s3 + $0x23c] ss:$20 sps:$4 sm:$0xff]  }
  0x8c   : > { %3148 = vmatmul.mubr.bf16.vlgmr.msra.gmra.mxu0 %v5390_v30 }
  0x8d   : > { %3191 = vmatmul.mubr.bf16.vlgmr.msra.gmra.mxu1 %v5404_v36  ;;  %3202 = vmatpush1.bf16.msra.mxu0 %v4569_v8  ;;  %v4623_v8 = vld [vmem:[%s6396_s3 + $0xc30] ss:$20 sps:$4 sm:$0xff]  }
  0x8e   : > { %3245 = vmatpush1.bf16.msra.mxu1 %v4572_v9  ;;  %3203 = vmatprep.subr.bf16.mxu0 %v4577_v10  ;;  %v4626_v9 = vld [vmem:[%s6396_s3 + $0x238] ss:$20 sps:$4 sm:$0xff]  }
  0x8f   : > { %3246 = vmatprep.subr.bf16.mxu1 %v4580_v11  ;;  %3276 = vmatprep.mubr.bf16.mxu1 %v5211_v35  ;;  %v4631_v10 = vld [vmem:[%s6396_s3 + $0xc0c] ss:$20 sps:$4 sm:$0xff]   ;;  %v4634_v11 = vld [vmem:[%s6396_s3 + $0x214] ss:$20 sps:$4 sm:$0xff]  }
  0x90   : > { %3233 = vmatprep.mubr.bf16.mxu0 %v5555_v43 }
  0x91   : > { %3204 = vmatpush1.bf16.msra.mxu0 %v4575_v12  ;;  %v4629_v12 = vld [vmem:[%s6396_s3 + $0xc08] ss:$20 sps:$4 sm:$0xff]  }
  0x92   : > { %3247 = vmatpush1.bf16.msra.mxu1 %v4578_v13  ;;  %3205 = vmatprep.subr.bf16.mxu0 %v4583_v14  ;;  %v4632_v13 = vld [vmem:[%s6396_s3 + $0x210] ss:$20 sps:$4 sm:$0xff]  }
  0x93   : > { %3248 = vmatprep.subr.bf16.mxu1 %v4586_v15  ;;  %v4637_v14 = vld [vmem:[%s6396_s3 + $0xbe4] ss:$20 sps:$4 sm:$0xff]   ;;  %v4640_v15 = vld [vmem:[%s6396_s3 + $0x1ec] ss:$20 sps:$4 sm:$0xff]  }
  0x95   : > { %3206 = vmatpush1.bf16.msra.mxu0 %v4581_v24  ;;  %v4641_v24 = vld [vmem:[%s6396_s3 + $0xbb8] ss:$20 sps:$4 sm:$0xff]  }
  0x96   : > { %3249 = vmatpush1.bf16.msra.mxu1 %v4584_v26  ;;  %3207 = vmatprep.subr.bf16.mxu0 %v4589_v46  ;;  %v4644_v26 = vld [vmem:[%s6396_s3 + $0x1c0] ss:$20 sps:$4 sm:$0xff]   ;;  %v279_v46 = vunpack.c.l.bf16 %v5509_v16  ;;  %v4647_v16 = vld [vmem:[%s6396_s3 + $0xb90] ss:$20 sps:$4 sm:$0xff]  }
  0x97   : > { %3250 = vmatprep.subr.bf16.mxu1 %v4592_v42  ;;  %v4649_v42 = vld [vmem:[%s6396_s3 + $0xb94] ss:$20 sps:$4 sm:$0xff]  }
  0x98   : > { %v353_v33 = vmul.f32 %v330_v28, %v279_v46  ;;  %v4704_v46 = vld [vmem:[%s6396_s3 + $0x530] ss:$20 sps:$4 sm:$0xff]  }
  0x99   : > { %3208 = vmatpush1.bf16.msra.mxu0 %v4587_v52  ;;  %v363_v52 = vmul.f32 %v330_v28, %v289_v27  ;;  %v4709_v27 = vld [vmem:[%s6396_s3 + $0x28c] ss:$20 sps:$4 sm:$0xff]  }
  0x9a   : > { %3251 = vmatpush1.bf16.msra.mxu1 %v4590_v34  ;;  %3209 = vmatprep.subr.bf16.mxu0 %v4595_v39  ;;  %v4655_v34 = vld [vmem:[%s6396_s3 + $0xb6c] ss:$20 sps:$4 sm:$0xff]   ;;  %v427_v39 = vadd.f32 %v404_v18, %v353_v33 }
  0x9b   : > { %3252 = vmatprep.subr.bf16.mxu1 %v4598_v41  ;;  %v437_v41 = vadd.f32 %v404_v18, %v363_v52  ;;  %v4712_v28 = vld [vmem:[%s6396_s3 + $0x50c] ss:$20 sps:$4 sm:$0xff]   ;;  %v4721_v52 = vld [vmem:[%s6396_s3 + $0x4bc] ss:$20 sps:$4 sm:$0xff]  }
  0x9c   : > { %v4713_v18 = vld [vmem:[%s6396_s3 + $0x4e0] ss:$20 sps:$4 sm:$0xff]  }
  0x9d   : > { %3210 = vmatpush1.bf16.msra.mxu0 %v4593_v44  ;;  %v4661_v44 = vld [vmem:[%s6396_s3 + $0xb44] ss:$20 sps:$4 sm:$0xff]   ;;  %v4716_v33 = vld [vmem:[%s6396_s3 + $0x760] ss:$20 sps:$4 sm:$0xff]  }
  0x9e   : > { %3253 = vmatpush1.bf16.msra.mxu1 %v4596_v45  ;;  %3211 = vmatprep.subr.bf16.mxu0 %v4601_v49  ;;  %v4664_v45 = vld [vmem:[%s6396_s3 + $0x14c] ss:$20 sps:$4 sm:$0xff]  }
  0x9f   : > { %3254 = vmatprep.subr.bf16.mxu1 %v4604_v50  ;;  %v4659_v49 = vld [vmem:[%s6396_s3 + $0xb40] ss:$20 sps:$4 sm:$0xff]   ;;  %v4662_v50 = vld [vmem:[%s6396_s3 + $0x148] ss:$20 sps:$4 sm:$0xff]  }
  0xa1   : > { %3212 = vmatpush1.bf16.msra.mxu0 %v4599_v51  ;;  %v447_v51 = vmax.f32 %v427_v39, 0.0  ;;  %v4730_v39 = vld [vmem:[%s6396_s3 + $0x714] ss:$20 sps:$4 sm:$0xff]  }
  0xa2   : > { %3255 = vmatpush1.bf16.msra.mxu1 %v4602_v54  ;;  %3213 = vmatprep.subr.bf16.mxu0 %v4607_v56  ;;  %v457_v54 = vmax.f32 %v437_v41, 0.0  ;;  %v4667_v56 = vld [vmem:[%s6396_s3 + $0x3a4] ss:$20 sps:$4 sm:$0xff]  }
  0xa3   : > { %3256 = vmatprep.subr.bf16.mxu1 %v4610_v55  ;;  %v4670_v55 = vld [vmem:[%s6396_s3 + $0x624] ss:$20 sps:$4 sm:$0xff]  }
  0xa4   : > { %v4725_v41 = vld [vmem:[%s6396_s3 + $0x490] ss:$20 sps:$4 sm:$0xff]  }
  0xa5   : > { %3214 = vmatpush1.bf16.msra.mxu0 %v4605_v58  ;;  %v5708_v58 = vpack.c.bf16 %v457_v54, %v447_v51  ;;  %v4734_v51 = vld [vmem:[%s6396_s3 + $0x6e8] ss:$20 sps:$4 sm:$0xff]   ;;  %v4739_v54 = vld [vmem:[%s6396_s3 + $0x444] ss:$20 sps:$4 sm:$0xff]  }
  0xa6   : > { %3257 = vmatpush1.bf16.msra.mxu1 %v4608_v59  ;;  %3215 = vmatprep.subr.bf16.mxu0 %v4613_v60  ;;  %v4665_v59 = vld [vmem:[%s6396_s3 + $0x3a0] ss:$20 sps:$4 sm:$0xff]  }
  0xa7   : > { %3258 = vmatprep.subr.bf16.mxu1 %v4616_v61  ;;  %v4668_v60 = vld [vmem:[%s6396_s3 + $0x620] ss:$20 sps:$4 sm:$0xff]   ;;  %v4673_v61 = vld [vmem:[%s6396_s3 + $0x37c] ss:$20 sps:$4 sm:$0xff]  }
  0xa9   : > { %3216 = vmatpush1.bf16.msra.mxu0 %v4611_v62  ;;  %v4676_v62 = vld [vmem:[%s6396_s3 + $0x5fc] ss:$20 sps:$4 sm:$0xff]  }
  0xaa   : > { %3259 = vmatpush1.bf16.msra.mxu1 %v4614_v63  ;;  %3217 = vmatprep.subr.bf16.mxu0 %v4619_v0  ;;  %v4671_v63 = vld [vmem:[%s6396_s3 + $0x378] ss:$20 sps:$4 sm:$0xff]  }
  0xab   : > { %3260 = vmatprep.subr.bf16.mxu1 %v4622_v57  ;;  %v4674_v0 = vld [vmem:[%s6396_s3 + $0x5f8] ss:$20 sps:$4 sm:$0xff]   ;;  %v4679_v57 = vld [vmem:[%s6396_s3 + $0x354] ss:$20 sps:$4 sm:$0xff]  }
  0xad   : > { %3218 = vmatpush2.bf16.msra.mxu0 %v4617_v3  ;;  %v4682_v3 = vld [vmem:[%s6396_s3 + $0x5d4] ss:$20 sps:$4 sm:$0xff]  }
  0xae   : > { %3261 = vmatpush2.bf16.msra.mxu1 %v4620_v4  ;;  %3219 = vmatprep.subr.bf16.mxu0 %v4625_v6  ;;  %v4677_v4 = vld [vmem:[%s6396_s3 + $0x350] ss:$20 sps:$4 sm:$0xff]  }
  0xaf   : > { %3262 = vmatprep.subr.bf16.mxu1 %v4628_v7  ;;  %v4680_v6 = vld [vmem:[%s6396_s3 + $0x5d0] ss:$20 sps:$4 sm:$0xff]   ;;  %v4685_v7 = vld [vmem:[%s6396_s3 + $0x32c] ss:$20 sps:$4 sm:$0xff]  }
  0xb1   : > { %3220 = vmatpush2.bf16.msra.mxu0 %v4623_v8  ;;  %v4688_v8 = vld [vmem:[%s6396_s3 + $0x5ac] ss:$20 sps:$4 sm:$0xff]  }
  0xb2   : > { %3263 = vmatpush2.bf16.msra.mxu1 %v4626_v9  ;;  %3221 = vmatprep.subr.bf16.mxu0 %v4631_v10  ;;  %v4683_v9 = vld [vmem:[%s6396_s3 + $0x328] ss:$20 sps:$4 sm:$0xff]  }
  0xb3   : > { %3264 = vmatprep.subr.bf16.mxu1 %v4634_v11  ;;  %v4686_v10 = vld [vmem:[%s6396_s3 + $0x5a8] ss:$20 sps:$4 sm:$0xff]   ;;  %v4691_v11 = vld [vmem:[%s6396_s3 + $0x304] ss:$20 sps:$4 sm:$0xff]  }
  0xb5   : > { %3222 = vmatpush2.bf16.msra.mxu0 %v4629_v12  ;;  %v4694_v12 = vld [vmem:[%s6396_s3 + $0x584] ss:$20 sps:$4 sm:$0xff]  }
  0xb6   : > { %3265 = vmatpush2.bf16.msra.mxu1 %v4632_v13  ;;  %3223 = vmatprep.subr.bf16.mxu0 %v4637_v14  ;;  %v4689_v13 = vld [vmem:[%s6396_s3 + $0x300] ss:$20 sps:$4 sm:$0xff]  }
  0xb7   : > { %3266 = vmatprep.subr.bf16.mxu1 %v4640_v15  ;;  %v4692_v14 = vld [vmem:[%s6396_s3 + $0x580] ss:$20 sps:$4 sm:$0xff]   ;;  %v4697_v15 = vld [vmem:[%s6396_s3 + $0x2dc] ss:$20 sps:$4 sm:$0xff]  }
  0xb9   : > { %3224 = vmatpush2.bf16.msra.mxu0 %v4635_v19  ;;  %v4700_v19 = vld [vmem:[%s6396_s3 + $0x55c] ss:$20 sps:$4 sm:$0xff]  }
  0xba   : > { %3267 = vmatpush2.bf16.msra.mxu1 %v4638_v20  ;;  %3225 = vmatprep.subr.bf16.mxu0 %v4643_v22  ;;  %v4695_v20 = vld [vmem:[%s6396_s3 + $0x2d8] ss:$20 sps:$4 sm:$0xff]  }
  0xbb   : > { %3268 = vmatprep.subr.bf16.mxu1 %v4646_v23  ;;  %v4698_v22 = vld [vmem:[%s6396_s3 + $0x558] ss:$20 sps:$4 sm:$0xff]   ;;  %v4703_v23 = vld [vmem:[%s6396_s3 + $0x2b4] ss:$20 sps:$4 sm:$0xff]  }
  0xbd   : > { %3226 = vmatpush2.bf16.msra.mxu0 %v4641_v24  ;;  %v4706_v24 = vld [vmem:[%s6396_s3 + $0x534] ss:$20 sps:$4 sm:$0xff]  }
  0xbe   : > { %3269 = vmatpush2.bf16.msra.mxu1 %v4644_v26  ;;  %3227 = vmatprep.subr.bf16.mxu0 %v4649_v42  ;;  %v4701_v26 = vld [vmem:[%s6396_s3 + $0x2b0] ss:$20 sps:$4 sm:$0xff]   ;;  %v4707_v42 = vld [vmem:[%s6396_s3 + $0x288] ss:$20 sps:$4 sm:$0xff]  }
  0xbf   : > { %3270 = vmatprep.subr.bf16.mxu1 %v4652_v32  ;;  %v4710_v32 = vld [vmem:[%s6396_s3 + $0x508] ss:$20 sps:$4 sm:$0xff]  }
  0xc1   : > { %3228 = vmatpush2.bf16.msra.mxu0 %v4647_v16  ;;  %v4715_v16 = vld [vmem:[%s6396_s3 + $0x4e4] ss:$20 sps:$4 sm:$0xff]  }
  0xc2   : > { %3271 = vmatpush2.bf16.msra.mxu1 %v4650_v17  ;;  %3229 = vmatprep.subr.bf16.mxu0 %v4655_v34  ;;  %v4718_v17 = vld [vmem:[%s6396_s3 + $0x764] ss:$20 sps:$4 sm:$0xff]   ;;  %v4724_v34 = vld [vmem:[%s6396_s3 + $0x73c] ss:$20 sps:$4 sm:$0xff]  }
  0xc3   : > { %3272 = vmatprep.subr.bf16.mxu1 %v4658_v37  ;;  %v4719_v37 = vld [vmem:[%s6396_s3 + $0x4b8] ss:$20 sps:$4 sm:$0xff]  }
  0xc5   : > { %3230 = vmatpush2.bf16.msra.mxu0 %v4653_v38  ;;  %v4722_v38 = vld [vmem:[%s6396_s3 + $0x738] ss:$20 sps:$4 sm:$0xff]  }
  0xc6   : > { %3273 = vmatpush2.bf16.msra.mxu1 %v4656_v21  ;;  %3231 = vmatprep.subr.bf16.mxu0 %v4661_v44  ;;  %v4727_v21 = vld [vmem:[%s6396_s3 + $0x494] ss:$20 sps:$4 sm:$0xff]   ;;  %v4728_v44 = vld [vmem:[%s6396_s3 + $0x710] ss:$20 sps:$4 sm:$0xff]  }
  0xc7   : > { %3274 = vmatprep.subr.bf16.mxu1 %v4664_v45  ;;  %v4733_v45 = vld [vmem:[%s6396_s3 + $0x46c] ss:$20 sps:$4 sm:$0xff]  }
  0xc9   : > { %3232 = vmatpush2.bf16.msra.mxu0 %v4659_v49  ;;  %v4736_v49 = vld [vmem:[%s6396_s3 + $0x6ec] ss:$20 sps:$4 sm:$0xff]  }
  0xca   : > { %3275 = vmatpush2.bf16.msra.mxu1 %v4662_v50  ;;  %3287 = vmatprep.subr.bf16.mxu0 %v4667_v56  ;;  %v4731_v50 = vld [vmem:[%s6396_s3 + $0x468] ss:$20 sps:$4 sm:$0xff]   ;;  %v4742_v56 = vld [vmem:[%s6396_s3 + $0x6c4] ss:$20 sps:$4 sm:$0xff]  }
  0xcb   : > { %3330 = vmatprep.subr.bf16.mxu1 %v4670_v55  ;;  %v4737_v55 = vld [vmem:[%s6396_s3 + $0x440] ss:$20 sps:$4 sm:$0xff]  }
  0xcc   : > { %3234 = vmatmul.mubr.bf16.vlgmr.msra.gmra.mxu0 %v5708_v58 }
  0xcd   : > { %3277 = vmatmul.mubr.bf16.vlgmr.msra.gmra.mxu1 %v5253_v1  ;;  %3288 = vmatpush1.bf16.msra.mxu0 %v4665_v59  ;;  %v4740_v59 = vld [vmem:[%s6396_s3 + $0x6c0] ss:$20 sps:$4 sm:$0xff]  }
  0xce   : > { %3331 = vmatpush1.bf16.msra.mxu1 %v4668_v60  ;;  %3289 = vmatprep.subr.bf16.mxu0 %v4673_v61  ;;  %v4745_v60 = vld [vmem:[%s6396_s3 + $0x41c] ss:$20 sps:$4 sm:$0xff]  }
  0xcf   : > { %3332 = vmatprep.subr.bf16.mxu1 %v4676_v62  ;;  %3319 = vmatprep.mubr.bf16.mxu0 %v5219_v40  ;;  %v4748_v61 = vld [vmem:[%s6396_s3 + $0x69c] ss:$20 sps:$4 sm:$0xff]   ;;  %v4743_v62 = vld [vmem:[%s6396_s3 + $0x418] ss:$20 sps:$4 sm:$0xff]  }
  0xd0   : > { %3362 = vmatprep.mubr.bf16.mxu1 %v5388_v29 }
  0xd1   : > { %3290 = vmatpush1.bf16.msra.mxu0 %v4671_v63  ;;  %v4746_v63 = vld [vmem:[%s6396_s3 + $0x698] ss:$20 sps:$4 sm:$0xff]  }
  0xd2   : > { %3333 = vmatpush1.bf16.msra.mxu1 %v4674_v0  ;;  %3291 = vmatprep.subr.bf16.mxu0 %v4679_v57  ;;  %v4751_v0 = vld [vmem:[%s6396_s3 + $0x3f4] ss:$20 sps:$4 sm:$0xff]  }
  0xd3   : > { %3334 = vmatprep.subr.bf16.mxu1 %v4682_v3  ;;  %v4754_v57 = vld [vmem:[%s6396_s3 + $0x674] ss:$20 sps:$4 sm:$0xff]   ;;  %v4749_v3 = vld [vmem:[%s6396_s3 + $0x3f0] ss:$20 sps:$4 sm:$0xff]  }
  0xd5   : > { %3292 = vmatpush1.bf16.msra.mxu0 %v4677_v4  ;;  %v4752_v4 = vld [vmem:[%s6396_s3 + $0x670] ss:$20 sps:$4 sm:$0xff]  }
  0xd6   : > { %3335 = vmatpush1.bf16.msra.mxu1 %v4680_v6  ;;  %3293 = vmatprep.subr.bf16.mxu0 %v4685_v7  ;;  %v4757_v6 = vld [vmem:[%s6396_s3 + $0x3cc] ss:$20 sps:$4 sm:$0xff]  }
  0xd7   : > { %3336 = vmatprep.subr.bf16.mxu1 %v4688_v8  ;;  %v4760_v7 = vld [vmem:[%s6396_s3 + $0x64c] ss:$20 sps:$4 sm:$0xff]   ;;  %v4755_v8 = vld [vmem:[%s6396_s3 + $0x3c8] ss:$20 sps:$4 sm:$0xff]  }
  0xd9   : > { %3294 = vmatpush1.bf16.msra.mxu0 %v4683_v9  ;;  %v4758_v9 = vld [vmem:[%s6396_s3 + $0x648] ss:$20 sps:$4 sm:$0xff]  }
  0xda   : > { %3337 = vmatpush1.bf16.msra.mxu1 %v4686_v10  ;;  %3295 = vmatprep.subr.bf16.mxu0 %v4691_v11  ;;  %v4763_v10 = vld [vmem:[%s6396_s3 + $0x8a4] ss:$20 sps:$4 sm:$0xff]  }
  0xdb   : > { %3338 = vmatprep.subr.bf16.mxu1 %v4694_v12  ;;  %v4766_v11 = vld [vmem:[%s6396_s3 + $0xb24] ss:$20 sps:$4 sm:$0xff]   ;;  %v4761_v12 = vld [vmem:[%s6396_s3 + $0x8a0] ss:$20 sps:$4 sm:$0xff]  }
  0xdd   : > { %3296 = vmatpush1.bf16.msra.mxu0 %v4689_v13  ;;  %v4764_v13 = vld [vmem:[%s6396_s3 + $0xb20] ss:$20 sps:$4 sm:$0xff]  }
  0xde   : > { %3339 = vmatpush1.bf16.msra.mxu1 %v4692_v14  ;;  %3297 = vmatprep.subr.bf16.mxu0 %v4697_v15  ;;  %v4769_v14 = vld [vmem:[%s6396_s3 + $0x87c] ss:$20 sps:$4 sm:$0xff]  }
  0xdf   : > { %3340 = vmatprep.subr.bf16.mxu1 %v4700_v19  ;;  %v4772_v15 = vld [vmem:[%s6396_s3 + $0xafc] ss:$20 sps:$4 sm:$0xff]   ;;  %v4767_v19 = vld [vmem:[%s6396_s3 + $0x878] ss:$20 sps:$4 sm:$0xff]  }
  0xe1   : > { %3298 = vmatpush1.bf16.msra.mxu0 %v4695_v20  ;;  %v4770_v20 = vld [vmem:[%s6396_s3 + $0xaf8] ss:$20 sps:$4 sm:$0xff]  }
  0xe2   : > { %3341 = vmatpush1.bf16.msra.mxu1 %v4698_v22  ;;  %3299 = vmatprep.subr.bf16.mxu0 %v4703_v23  ;;  %v4775_v22 = vld [vmem:[%s6396_s3 + $0x854] ss:$20 sps:$4 sm:$0xff]  }
  0xe3   : > { %3342 = vmatprep.subr.bf16.mxu1 %v4706_v24  ;;  %v4778_v23 = vld [vmem:[%s6396_s3 + $0xad4] ss:$20 sps:$4 sm:$0xff]   ;;  %v4773_v24 = vld [vmem:[%s6396_s3 + $0x850] ss:$20 sps:$4 sm:$0xff]  }
  0xe5   : > { %3300 = vmatpush1.bf16.msra.mxu0 %v4701_v26  ;;  %v4776_v26 = vld [vmem:[%s6396_s3 + $0xad0] ss:$20 sps:$4 sm:$0xff]  }
  0xe6   : > { %3343 = vmatpush1.bf16.msra.mxu1 %v4704_v46  ;;  %3301 = vmatprep.subr.bf16.mxu0 %v4709_v27  ;;  %v4781_v46 = vld [vmem:[%s6396_s3 + $0x82c] ss:$20 sps:$4 sm:$0xff]  }
  0xe7   : > { %3344 = vmatprep.subr.bf16.mxu1 %v4712_v28  ;;  %v4784_v27 = vld [vmem:[%s6396_s3 + $0xaac] ss:$20 sps:$4 sm:$0xff]   ;;  %v4779_v28 = vld [vmem:[%s6396_s3 + $0x828] ss:$20 sps:$4 sm:$0xff]  }
  0xe9   : > { %3302 = vmatpush1.bf16.msra.mxu0 %v4707_v42  ;;  %v4782_v42 = vld [vmem:[%s6396_s3 + $0xaa8] ss:$20 sps:$4 sm:$0xff]  }
  0xea   : > { %3345 = vmatpush1.bf16.msra.mxu1 %v4710_v32  ;;  %3303 = vmatprep.subr.bf16.mxu0 %v4715_v16  ;;  %v4787_v32 = vld [vmem:[%s6396_s3 + $0x804] ss:$20 sps:$4 sm:$0xff]  }
  0xeb   : > { %3346 = vmatprep.subr.bf16.mxu1 %v4718_v17  ;;  %v4790_v16 = vld [vmem:[%s6396_s3 + $0xa84] ss:$20 sps:$4 sm:$0xff]   ;;  %v4785_v17 = vld [vmem:[%s6396_s3 + $0x800] ss:$20 sps:$4 sm:$0xff]  }
  0xed   : > { %3304 = vmatpush2.bf16.msra.mxu0 %v4713_v18  ;;  %v4788_v18 = vld [vmem:[%s6396_s3 + $0xa80] ss:$20 sps:$4 sm:$0xff]  }
  0xee   : > { %3347 = vmatpush2.bf16.msra.mxu1 %v4716_v33  ;;  %3305 = vmatprep.subr.bf16.mxu0 %v4721_v52  ;;  %v4793_v33 = vld [vmem:[%s6396_s3 + $0x7dc] ss:$20 sps:$4 sm:$0xff]  }
  0xef   : > { %3348 = vmatprep.subr.bf16.mxu1 %v4724_v34  ;;  %v4796_v52 = vld [vmem:[%s6396_s3 + $0xa5c] ss:$20 sps:$4 sm:$0xff]   ;;  %v4791_v34 = vld [vmem:[%s6396_s3 + $0x7d8] ss:$20 sps:$4 sm:$0xff]  }
  0xf1   : > { %3306 = vmatpush2.bf16.msra.mxu0 %v4719_v37  ;;  %v4794_v37 = vld [vmem:[%s6396_s3 + $0xa58] ss:$20 sps:$4 sm:$0xff]  }
  0xf2   : > { %3349 = vmatpush2.bf16.msra.mxu1 %v4722_v38  ;;  %3307 = vmatprep.subr.bf16.mxu0 %v4727_v21  ;;  %v4799_v38 = vld [vmem:[%s6396_s3 + $0x7b4] ss:$20 sps:$4 sm:$0xff]  }
  0xf3   : > { %3350 = vmatprep.subr.bf16.mxu1 %v4730_v39  ;;  %v4802_v21 = vld [vmem:[%s6396_s3 + $0xa34] ss:$20 sps:$4 sm:$0xff]   ;;  %v4797_v39 = vld [vmem:[%s6396_s3 + $0x7b0] ss:$20 sps:$4 sm:$0xff]  }
  0xf5   : > { %3308 = vmatpush2.bf16.msra.mxu0 %v4725_v41  ;;  %v4800_v41 = vld [vmem:[%s6396_s3 + $0xa30] ss:$20 sps:$4 sm:$0xff]  }
  0xf6   : > { %3351 = vmatpush2.bf16.msra.mxu1 %v4728_v44  ;;  %3309 = vmatprep.subr.bf16.mxu0 %v4733_v45  ;;  %v4805_v44 = vld [vmem:[%s6396_s3 + $0x78c] ss:$20 sps:$4 sm:$0xff]  }
  0xf7   : > { %3352 = vmatprep.subr.bf16.mxu1 %v4736_v49  ;;  %v4808_v45 = vld [vmem:[%s6396_s3 + $0xa0c] ss:$20 sps:$4 sm:$0xff]   ;;  %v4803_v49 = vld [vmem:[%s6396_s3 + $0x788] ss:$20 sps:$4 sm:$0xff]  }
  0xf9   : > { %3310 = vmatpush2.bf16.msra.mxu0 %v4731_v50  ;;  %v4806_v50 = vld [vmem:[%s6396_s3 + $0xa08] ss:$20 sps:$4 sm:$0xff]  }
  0xfa   : > { %3353 = vmatpush2.bf16.msra.mxu1 %v4734_v51  ;;  %3311 = vmatprep.subr.bf16.mxu0 %v4739_v54  ;;  %v4811_v51 = vld [vmem:[%s6396_s3 + $0x9e4] ss:$20 sps:$4 sm:$0xff]  }
  0xfb   : > { %3354 = vmatprep.subr.bf16.mxu1 %v4742_v56  ;;  %v4814_v54 = vld [vmem:[%s6396_s3 + $0xc64] ss:$20 sps:$4 sm:$0xff]   ;;  %v4809_v56 = vld [vmem:[%s6396_s3 + $0x9e0] ss:$20 sps:$4 sm:$0xff]  }
  0xfd   : > { %3312 = vmatpush2.bf16.msra.mxu0 %v4737_v55  ;;  %v4812_v55 = vld [vmem:[%s6396_s3 + $0xc60] ss:$20 sps:$4 sm:$0xff]  }
  0xfe   : > { %3355 = vmatpush2.bf16.msra.mxu1 %v4740_v59  ;;  %3313 = vmatprep.subr.bf16.mxu0 %v4745_v60  ;;  %v4817_v59 = vld [vmem:[%s6396_s3 + $0x9bc] ss:$20 sps:$4 sm:$0xff]  }
  0xff   : > { %3356 = vmatprep.subr.bf16.mxu1 %v4748_v61  ;;  %v4820_v60 = vld [vmem:[%s6396_s3 + $0xc3c] ss:$20 sps:$4 sm:$0xff]   ;;  %v4815_v61 = vld [vmem:[%s6396_s3 + $0x9b8] ss:$20 sps:$4 sm:$0xff]  }
 0x101   : > { %3314 = vmatpush2.bf16.msra.mxu0 %v4743_v62  ;;  %v4818_v62 = vld [vmem:[%s6396_s3 + $0xc38] ss:$20 sps:$4 sm:$0xff]  }
 0x102   : > { %3357 = vmatpush2.bf16.msra.mxu1 %v4746_v63  ;;  %3315 = vmatprep.subr.bf16.mxu0 %v4751_v0  ;;  %v4823_v63 = vld [vmem:[%s6396_s3 + $0x994] ss:$20 sps:$4 sm:$0xff]  }
 0x103   : > { %3358 = vmatprep.subr.bf16.mxu1 %v4754_v57  ;;  %v4826_v0 = vld [vmem:[%s6396_s3 + $0xc14] ss:$20 sps:$4 sm:$0xff]   ;;  %v4821_v57 = vld [vmem:[%s6396_s3 + $0x990] ss:$20 sps:$4 sm:$0xff]  }
 0x105   : > { %3316 = vmatpush2.bf16.msra.mxu0 %v4749_v3  ;;  %v4824_v3 = vld [vmem:[%s6396_s3 + $0xc10] ss:$20 sps:$4 sm:$0xff]  }
 0x106   : > { %3359 = vmatpush2.bf16.msra.mxu1 %v4752_v4  ;;  %3317 = vmatprep.subr.bf16.mxu0 %v4757_v6  ;;  %v4829_v4 = vld [vmem:[%s6396_s3 + $0x96c] ss:$20 sps:$4 sm:$0xff]  }
 0x107   : > { %3360 = vmatprep.subr.bf16.mxu1 %v4760_v7  ;;  %v4832_v6 = vld [vmem:[%s6396_s3 + $0xbec] ss:$20 sps:$4 sm:$0xff]   ;;  %v4827_v7 = vld [vmem:[%s6396_s3 + $0x968] ss:$20 sps:$4 sm:$0xff]  }
 0x109   : > { %3318 = vmatpush2.bf16.msra.mxu0 %v4755_v8  ;;  %v4830_v8 = vld [vmem:[%s6396_s3 + $0xbe8] ss:$20 sps:$4 sm:$0xff]  }
 0x10a   : > { %3361 = vmatpush2.bf16.msra.mxu1 %v4758_v9  ;;  %3373 = vmatprep.subr.bf16.mxu0 %v4763_v10  ;;  %v4835_v9 = vld [vmem:[%s6396_s3 + $0x944] ss:$20 sps:$4 sm:$0xff]  }
 0x10b   : > { %3416 = vmatprep.subr.bf16.mxu1 %v4766_v11  ;;  %v4838_v10 = vld [vmem:[%s6396_s3 + $0xbc4] ss:$20 sps:$4 sm:$0xff]   ;;  %v4833_v11 = vld [vmem:[%s6396_s3 + $0x940] ss:$20 sps:$4 sm:$0xff]  }
 0x10c   : > { %3320 = vmatmul.mubr.bf16.vlgmr.msra.gmra.mxu0 %v5255_v2 }
 0x10d   : > { %3363 = vmatmul.mubr.bf16.vlgmr.msra.gmra.mxu1 %v5390_v30  ;;  %3374 = vmatpush1.bf16.msra.mxu0 %v4761_v12  ;;  %v4836_v12 = vld [vmem:[%s6396_s3 + $0xbc0] ss:$20 sps:$4 sm:$0xff]  }
 0x10e   : > { %3417 = vmatpush1.bf16.msra.mxu1 %v4764_v13  ;;  %3375 = vmatprep.subr.bf16.mxu0 %v4769_v14  ;;  %v4841_v13 = vld [vmem:[%s6396_s3 + $0x91c] ss:$20 sps:$4 sm:$0xff]  }
 0x10f   : > { %3418 = vmatprep.subr.bf16.mxu1 %v4772_v15  ;;  %3405 = vmatprep.mubr.bf16.mxu0 %v5392_v31  ;;  %v4844_v14 = vld [vmem:[%s6396_s3 + $0xb9c] ss:$20 sps:$4 sm:$0xff]   ;;  %v4839_v15 = vld [vmem:[%s6396_s3 + $0x918] ss:$20 sps:$4 sm:$0xff]  }
 0x110   : > { %3448 = vmatprep.mubr.bf16.mxu1 %v5555_v43 }
 0x111   : > { %3376 = vmatpush1.bf16.msra.mxu0 %v4767_v19  ;;  %v4842_v19 = vld [vmem:[%s6396_s3 + $0xb98] ss:$20 sps:$4 sm:$0xff]  }
 0x112   : > { %3419 = vmatpush1.bf16.msra.mxu1 %v4770_v20  ;;  %3377 = vmatprep.subr.bf16.mxu0 %v4775_v22  ;;  %v4847_v20 = vld [vmem:[%s6396_s3 + $0x8f4] ss:$20 sps:$4 sm:$0xff]  }
 0x113   : > { %3420 = vmatprep.subr.bf16.mxu1 %v4778_v23  ;;  %v4850_v22 = vld [vmem:[%s6396_s3 + $0xb74] ss:$20 sps:$4 sm:$0xff]   ;;  %v4845_v23 = vld [vmem:[%s6396_s3 + $0x8f0] ss:$20 sps:$4 sm:$0xff]  }
 0x115   : > { %3378 = vmatpush1.bf16.msra.mxu0 %v4773_v24  ;;  %v4848_v24 = vld [vmem:[%s6396_s3 + $0xb70] ss:$20 sps:$4 sm:$0xff]  }
 0x116   : > { %3421 = vmatpush1.bf16.msra.mxu1 %v4776_v26  ;;  %3379 = vmatprep.subr.bf16.mxu0 %v4781_v46  ;;  %v4853_v26 = vld [vmem:[%s6396_s3 + $0x8cc] ss:$20 sps:$4 sm:$0xff]  }
 0x117   : > { %3422 = vmatprep.subr.bf16.mxu1 %v4784_v27  ;;  %v4856_v46 = vld [vmem:[%s6396_s3 + $0xb4c] ss:$20 sps:$4 sm:$0xff]   ;;  %v4851_v27 = vld [vmem:[%s6396_s3 + $0x8c8] ss:$20 sps:$4 sm:$0xff]  }
 0x119   : > { %3380 = vmatpush1.bf16.msra.mxu0 %v4779_v28  ;;  %v4854_v28 = vld [vmem:[%s6396_s3 + $0xb48] ss:$20 sps:$4 sm:$0xff]  }
 0x11a   : > { %3423 = vmatpush1.bf16.msra.mxu1 %v4782_v42  ;;  %3381 = vmatprep.subr.bf16.mxu0 %v4787_v32  ;;  %v4857_v42 = vld [vmem:[%s6396_s3 + $0x268] ss:$20 sps:$4 sm:$0xff]  }
 0x11b   : > { %3424 = vmatprep.subr.bf16.mxu1 %v4790_v16  ;;  %v4858_v32 = vld [vmem:[%s6396_s3 + $0x4e8] ss:$20 sps:$4 sm:$0xff]  }
 0x11c   : > { %v4859_v16 = vld [vmem:[%s6396_s3 + $0x128] ss:$20 sps:$4 sm:$0xff]  }
 0x11d   : > { %3382 = vmatpush1.bf16.msra.mxu0 %v4785_v17  ;;  %v4860_v17 = vld [vmem:[%s6396_s3 + $0x3a8] ss:$20 sps:$4 sm:$0xff]  }
 0x11e   : > { %3425 = vmatpush1.bf16.msra.mxu1 %v4788_v18  ;;  %3383 = vmatprep.subr.bf16.mxu0 %v4793_v33  ;;  %v4861_v18 = vld [vmem:[%s6396_s3 + $0x240] ss:$20 sps:$4 sm:$0xff]  }
 0x11f   : > { %3426 = vmatprep.subr.bf16.mxu1 %v4796_v52  ;;  %v4862_v33 = vld [vmem:[%s6396_s3 + $0x4c0] ss:$20 sps:$4 sm:$0xff]  }
 0x120   : > { %v4863_v52 = vld [vmem:[%s6396_s3 + $0x100] ss:$20 sps:$4 sm:$0xff]  }
 0x121   : > { %3384 = vmatpush1.bf16.msra.mxu0 %v4791_v34  ;;  %v4864_v34 = vld [vmem:[%s6396_s3 + $0x380] ss:$20 sps:$4 sm:$0xff]  }
 0x122   : > { %3427 = vmatpush1.bf16.msra.mxu1 %v4794_v37  ;;  %3385 = vmatprep.subr.bf16.mxu0 %v4799_v38  ;;  %v4865_v37 = vld [vmem:[%s6396_s3 + $0x218] ss:$20 sps:$4 sm:$0xff]  }
 0x123   : > { %3428 = vmatprep.subr.bf16.mxu1 %v4802_v21  ;;  %v4866_v38 = vld [vmem:[%s6396_s3 + $0x498] ss:$20 sps:$4 sm:$0xff]  }
 0x124   : > { %v4867_v21 = vld [vmem:[%s6396_s3 + $0xd8] ss:$20 sps:$4 sm:$0xff]  }
 0x125   : > { %3386 = vmatpush1.bf16.msra.mxu0 %v4797_v39  ;;  %v4868_v39 = vld [vmem:[%s6396_s3 + $0x358] ss:$20 sps:$4 sm:$0xff]  }
 0x126   : > { %3429 = vmatpush1.bf16.msra.mxu1 %v4800_v41  ;;  %3387 = vmatprep.subr.bf16.mxu0 %v4805_v44  ;;  %v4869_v41 = vld [vmem:[%s6396_s3 + $0x1f0] ss:$20 sps:$4 sm:$0xff]  }
 0x127   : > { %3430 = vmatprep.subr.bf16.mxu1 %v4808_v45  ;;  %v4872_v44 = vld [vmem:[%s6396_s3 + $0x330] ss:$20 sps:$4 sm:$0xff]   ;;  %v4873_v45 = vld [vmem:[%s6396_s3 + $0x1c8] ss:$20 sps:$4 sm:$0xff]  }
 0x129   : > { %3388 = vmatpush1.bf16.msra.mxu0 %v4803_v49  ;;  %v4874_v49 = vld [vmem:[%s6396_s3 + $0x448] ss:$20 sps:$4 sm:$0xff]  }
 0x12a   : > { %3431 = vmatpush1.bf16.msra.mxu1 %v4806_v50  ;;  %3389 = vmatprep.subr.bf16.mxu0 %v4811_v51  ;;  %v4875_v50 = vld [vmem:[%s6396_s3 + $0x88] ss:$20 sps:$4 sm:$0xff]  }
 0x12b   : > { %3432 = vmatprep.subr.bf16.mxu1 %v4814_v54  ;;  %v4876_v51 = vld [vmem:[%s6396_s3 + $0x308] ss:$20 sps:$4 sm:$0xff]   ;;  %v4877_v54 = vld [vmem:[%s6396_s3 + $0x1a0] ss:$20 sps:$4 sm:$0xff]  }
 0x12d   : > { %3390 = vmatpush2.bf16.msra.mxu0 %v4809_v56  ;;  %v4878_v56 = vld [vmem:[%s6396_s3 + $0x420] ss:$20 sps:$4 sm:$0xff]  }
 0x12e   : > { %3433 = vmatpush2.bf16.msra.mxu1 %v4812_v55  ;;  %3391 = vmatprep.subr.bf16.mxu0 %v4817_v59  ;;  %v4879_v55 = vld [vmem:[%s6396_s3 + $0x60] ss:$20 sps:$4 sm:$0xff]  }
 0x12f   : > { %3434 = vmatprep.subr.bf16.mxu1 %v4820_v60  ;;  %v4880_v59 = vld [vmem:[%s6396_s3 + $0x2e0] ss:$20 sps:$4 sm:$0xff]   ;;  %v4881_v60 = vld [vmem:[%s6396_s3 + $0x178] ss:$20 sps:$4 sm:$0xff]  }
 0x131   : > { %3392 = vmatpush2.bf16.msra.mxu0 %v4815_v61  ;;  %v4882_v61 = vld [vmem:[%s6396_s3 + $0x3f8] ss:$20 sps:$4 sm:$0xff]  }
 0x132   : > { %3435 = vmatpush2.bf16.msra.mxu1 %v4818_v62  ;;  %3393 = vmatprep.subr.bf16.mxu0 %v4823_v63  ;;  %v4883_v62 = vld [vmem:[%s6396_s3 + $0x38] ss:$20 sps:$4 sm:$0xff]  }
 0x133   : > { %3436 = vmatprep.subr.bf16.mxu1 %v4826_v0  ;;  %v4884_v63 = vld [vmem:[%s6396_s3 + $0x2b8] ss:$20 sps:$4 sm:$0xff]   ;;  %v4885_v0 = vld [vmem:[%s6396_s3 + $0x150] ss:$20 sps:$4 sm:$0xff]  }
 0x135   : > { %3394 = vmatpush2.bf16.msra.mxu0 %v4821_v57  ;;  %v4886_v57 = vld [vmem:[%s6396_s3 + $0x3d0] ss:$20 sps:$4 sm:$0xff]  }
 0x136   : > { %3437 = vmatpush2.bf16.msra.mxu1 %v4824_v3  ;;  %3395 = vmatprep.subr.bf16.mxu0 %v4829_v4  ;;  %v4887_v3 = vld [vmem:[%s6396_s3 + $0x10] ss:$20 sps:$4 sm:$0xff]  }
 0x137   : > { %3438 = vmatprep.subr.bf16.mxu1 %v4832_v6  ;;  %v4888_v4 = vld [vmem:[%s6396_s3 + $0x290] ss:$20 sps:$4 sm:$0xff]   ;;  %v4889_v6 = vld [vmem:[%s6396_s3 + $0x768] ss:$20 sps:$4 sm:$0xff]  }
 0x139   : > { %3396 = vmatpush2.bf16.msra.mxu0 %v4827_v7  ;;  %v4891_v7 = vld [vmem:[%s6396_s3 + $0x9e8] ss:$20 sps:$4 sm:$0xff]  }
 0x13a   : > { %3439 = vmatpush2.bf16.msra.mxu1 %v4830_v8  ;;  %3397 = vmatprep.subr.bf16.mxu0 %v4835_v9  ;;  %v4890_v8 = vld [vmem:[%s6396_s3 + $0x628] ss:$20 sps:$4 sm:$0xff]  }
 0x13b   : > { %3440 = vmatprep.subr.bf16.mxu1 %v4838_v10  ;;  %v4892_v9 = vld [vmem:[%s6396_s3 + $0x8a8] ss:$20 sps:$4 sm:$0xff]   ;;  %v4893_v10 = vld [vmem:[%s6396_s3 + $0x740] ss:$20 sps:$4 sm:$0xff]  }
 0x13d   : > { %3398 = vmatpush2.bf16.msra.mxu0 %v4833_v11  ;;  %v4895_v11 = vld [vmem:[%s6396_s3 + $0x9c0] ss:$20 sps:$4 sm:$0xff]  }
 0x13e   : > { %3441 = vmatpush2.bf16.msra.mxu1 %v4836_v12  ;;  %3399 = vmatprep.subr.bf16.mxu0 %v4841_v13  ;;  %v4894_v12 = vld [vmem:[%s6396_s3 + $0x600] ss:$20 sps:$4 sm:$0xff]  }
 0x13f   : > { %3442 = vmatprep.subr.bf16.mxu1 %v4844_v14  ;;  %v4896_v13 = vld [vmem:[%s6396_s3 + $0x880] ss:$20 sps:$4 sm:$0xff]   ;;  %v4897_v14 = vld [vmem:[%s6396_s3 + $0x718] ss:$20 sps:$4 sm:$0xff]  }
 0x141   : > { %3400 = vmatpush2.bf16.msra.mxu0 %v4839_v15  ;;  %v4898_v15 = vld [vmem:[%s6396_s3 + $0x5d8] ss:$20 sps:$4 sm:$0xff]  }
 0x142   : > { %3443 = vmatpush2.bf16.msra.mxu1 %v4842_v19  ;;  %3401 = vmatprep.subr.bf16.mxu0 %v4847_v20  ;;  %v4900_v19 = vld [vmem:[%s6396_s3 + $0x858] ss:$20 sps:$4 sm:$0xff]   ;;  %v4901_v20 = vld [vmem:[%s6396_s3 + $0x6f0] ss:$20 sps:$4 sm:$0xff]  }
 0x143   : > { %3444 = vmatprep.subr.bf16.mxu1 %v4850_v22 }
 0x145   : > { %3402 = vmatpush2.bf16.msra.mxu0 %v4845_v23  ;;  %v4902_v23 = vld [vmem:[%s6396_s3 + $0x5b0] ss:$20 sps:$4 sm:$0xff]  }
 0x146   : > { %3445 = vmatpush2.bf16.msra.mxu1 %v4848_v24  ;;  %3403 = vmatprep.subr.bf16.mxu0 %v4853_v26  ;;  %v4904_v24 = vld [vmem:[%s6396_s3 + $0x830] ss:$20 sps:$4 sm:$0xff]   ;;  %v4905_v26 = vld [vmem:[%s6396_s3 + $0x6c8] ss:$20 sps:$4 sm:$0xff]  }
 0x147   : > { %3446 = vmatprep.subr.bf16.mxu1 %v4856_v46  ;;  %v4907_v46 = vld [vmem:[%s6396_s3 + $0x948] ss:$20 sps:$4 sm:$0xff]  }
 0x149   : > { %3404 = vmatpush2.bf16.msra.mxu0 %v4851_v27 }
 0x14a   : > { %3447 = vmatpush2.bf16.msra.mxu1 %v4854_v28  ;;  %4257 = vmatprep.subr.bf16.mxu0 %v4857_v42  ;;  %v4906_v42 = vld [vmem:[%s6396_s3 + $0x588] ss:$20 sps:$4 sm:$0xff]  }
 0x14b   : > { %4279 = vmatprep.subr.bf16.mxu1 %v4858_v32  ;;  %v4908_v32 = vld [vmem:[%s6396_s3 + $0x808] ss:$20 sps:$4 sm:$0xff]  }
 0x14c   : > { %3406 = vmatmul.mubr.bf16.vlgmr.msra.gmra.mxu0 %v5404_v36 }
 0x14d   : > { %3449 = vmatmul.mubr.bf16.vlgmr.msra.gmra.mxu1 %v5708_v58  ;;  %4258 = vmatpush3.bf16.msra.mxu0 %v4859_v16  ;;  %v4909_v16 = vld [vmem:[%s6396_s3 + $0x6a0] ss:$20 sps:$4 sm:$0xff]  }
 0x14e   : > { %4280 = vmatpush3.bf16.msra.mxu1 %v4860_v17  ;;  %4259 = vmatprep.subr.bf16.mxu0 %v4861_v18  ;;  %v4911_v17 = vld [vmem:[%s6396_s3 + $0x920] ss:$20 sps:$4 sm:$0xff]  }
 0x14f   : > { %4281 = vmatprep.subr.bf16.mxu1 %v4862_v33  ;;  %3491 = vmatprep.mubr.bf16.mxu0 %v5211_v35  ;;  %v4870_v35 = vld [vmem:[%s6396_s3 + $0x470] ss:$20 sps:$4 sm:$0xff]  }
 0x150   : > { %3532 = vmatprep.mubr.bf16.mxu1 %v5219_v40  ;;  %v4871_v40 = vld [vmem:[%s6396_s3 + $0xb0] ss:$20 sps:$4 sm:$0xff]  }
 0x151   : > { %4260 = vmatpush3.bf16.msra.mxu0 %v4863_v52  ;;  %v4910_v52 = vld [vmem:[%s6396_s3 + $0x560] ss:$20 sps:$4 sm:$0xff]  }
 0x152   : > { %4282 = vmatpush3.bf16.msra.mxu1 %v4864_v34  ;;  %4261 = vmatprep.subr.bf16.mxu0 %v4865_v37  ;;  %v4912_v34 = vld [vmem:[%s6396_s3 + $0x7e0] ss:$20 sps:$4 sm:$0xff]  }
 0x153   : > { %4283 = vmatprep.subr.bf16.mxu1 %v4866_v38  ;;  %v4913_v38 = vld [vmem:[%s6396_s3 + $0x678] ss:$20 sps:$4 sm:$0xff]  }
 0x155   : > { %4262 = vmatpush3.bf16.msra.mxu0 %v4867_v21  ;;  %v4915_v21 = vld [vmem:[%s6396_s3 + $0x8f8] ss:$20 sps:$4 sm:$0xff]  }
 0x156   : > { %4284 = vmatpush3.bf16.msra.mxu1 %v4868_v39  ;;  %4263 = vmatprep.subr.bf16.mxu0 %v4869_v41  ;;  %v4914_v41 = vld [vmem:[%s6396_s3 + $0x538] ss:$20 sps:$4 sm:$0xff]  }
 0x157   : > { %4285 = vmatprep.subr.bf16.mxu1 %v4870_v35  ;;  %v4916_v35 = vld [vmem:[%s6396_s3 + $0x7b8] ss:$20 sps:$4 sm:$0xff]  }
 0x159   : > { %4264 = vmatpush3.bf16.msra.mxu0 %v4871_v40 }
 0x15a   : > { %4286 = vmatpush3.bf16.msra.mxu1 %v4872_v44  ;;  %4265 = vmatprep.subr.bf16.mxu0 %v4873_v45  ;;  %v4917_v45 = vld [vmem:[%s6396_s3 + $0x650] ss:$20 sps:$4 sm:$0xff]  }
 0x15b   : > { %4287 = vmatprep.subr.bf16.mxu1 %v4874_v49  ;;  %v4919_v49 = vld [vmem:[%s6396_s3 + $0x8d0] ss:$20 sps:$4 sm:$0xff]  }
 0x15d   : > { %4266 = vmatpush3.bf16.msra.mxu0 %v4875_v50 }
 0x15e   : > { %4288 = vmatpush3.bf16.msra.mxu1 %v4876_v51  ;;  %4267 = vmatprep.subr.bf16.mxu0 %v4877_v54  ;;  %v4918_v51 = vld [vmem:[%s6396_s3 + $0x510] ss:$20 sps:$4 sm:$0xff]  }
 0x15f   : > { %4289 = vmatprep.subr.bf16.mxu1 %v4878_v56  ;;  %v4920_v54 = vld [vmem:[%s6396_s3 + $0x790] ss:$20 sps:$4 sm:$0xff]  }
 0x161   : > { %4268 = vmatpush3.bf16.msra.mxu0 %v4879_v55 }
 0x162   : > { %4290 = vmatpush3.bf16.msra.mxu1 %v4880_v59  ;;  %4269 = vmatprep.subr.bf16.mxu0 %v4881_v60  ;;  %v4921_v59 = vld [vmem:[%s6396_s3 + $0xc68] ss:$20 sps:$4 sm:$0xff]  }
 0x163   : > { %4291 = vmatprep.subr.bf16.mxu1 %v4882_v61 }
 0x165   : > { %4270 = vmatpush3.bf16.msra.mxu0 %v4883_v62  ;;  %v6302_v62 = vld [vmem:[%s6397_s4] sm:$0x1f] }
 0x166   : > { %4292 = vmatpush3.bf16.msra.mxu1 %v4884_v63  ;;  %4271 = vmatprep.subr.bf16.mxu0 %v4885_v0 }
 0x167   : > { %4293 = vmatprep.subr.bf16.mxu1 %v4886_v57  ;;  %v4922_v57 = vld [vmem:[%s6396_s3 + $0xb28] ss:$20 sps:$4 sm:$0xff]  }
 0x169   : > { %4272 = vmatpush3.bf16.msra.mxu0 %v4887_v3 }
 0x16a   : > { %4294 = vmatpush3.bf16.msra.mxu1 %v4888_v4  ;;  %4301 = vmatprep.subr.bf16.mxu0 %v4889_v6  ;;  %v4923_v6 = vld [vmem:[%s6396_s3 + $0xc40] ss:$20 sps:$4 sm:$0xff]  }
 0x16b   : > { %4323 = vmatprep.subr.bf16.mxu1 %v4891_v7 }
 0x16c   : > { %3492 = vmatmul.mubr.bf16.vlgmr.msra.gmra.mxu0 %v5253_v1  ;;  %v4899_v1 = vld [vmem:[%s6396_s3 + $0x998] ss:$20 sps:$4 sm:$0xff]  }
 0x16d   : > { %3533 = vmatmul.mubr.bf16.vlgmr.msra.gmra.mxu1 %v5255_v2  ;;  %4302 = vmatpush3.bf16.msra.mxu0 %v4890_v8  ;;  %v3063_v2 = vpop.f32.mrf.mxu0 }
 0x16e   : > { %4324 = vmatpush3.bf16.msra.mxu1 %v4892_v9  ;;  %4303 = vmatprep.subr.bf16.mxu0 %v4893_v10  ;;  %v3669_v10 = vrot.slane %v6302_v62, %v5152_v53 }
 0x16f   : > { %4325 = vmatprep.subr.bf16.mxu1 %v4895_v11  ;;  %3573 = vmatprep.mubr.bf16.mxu0 %v5388_v29  ;;  %v4903_v29 = vld [vmem:[%s6396_s3 + $0x970] ss:$20 sps:$4 sm:$0xff]   ;;  %v3065_v22 = vpop.f32.mrf.mxu0 }
 0x170   : > { %3614 = vmatprep.mubr.bf16.mxu1 %v5392_v31  ;;  %v3106_v31 = vpop.f32.mrf.mxu1  ;;  %v6315_v11 = vld [vmem:[%s6398_s5] sm:$0x1f] }
 0x171   : > { %4304 = vmatpush3.bf16.msra.mxu0 %v4894_v12  ;;  %v3067_v28 = vpop.f32.mrf.mxu0  ;;  %v3107_v50 = vadd.f32 %v3106_v31, %v3063_v2 }
 0x172   : > { %4326 = vmatpush3.bf16.msra.mxu1 %v4896_v13  ;;  %4305 = vmatprep.subr.bf16.mxu0 %v4897_v14  ;;  %v3108_v27 = vpop.f32.mrf.mxu1  ;;  %v3673_v13 = vrot.slane %v6302_v62, %v5136_v47 }
 0x173   : > { %4327 = vmatprep.subr.bf16.mxu1 %v4899_v1  ;;  %v3069_v33 = vpop.f32.mrf.mxu0  ;;  %v3109_v60 = vadd.f32 %v3108_v27, %v3065_v22 }
 0x174   : > { %v3110_v18 = vpop.f32.mrf.mxu1 }
 0x175   : > { %4306 = vmatpush3.bf16.msra.mxu0 %v4898_v15  ;;  %v3149_v37 = vpop.f32.mrf.mxu0  ;;  %v3111_v63 = vadd.f32 %v3110_v18, %v3067_v28  ;;  %v4924_v15 = vld [vmem:[%s6396_s3 + $0xb00] ss:$20 sps:$4 sm:$0xff]   ;;  %v4927_v28 = vld [vmem:[%s6396_s3 + $0xbf0] ss:$20 sps:$4 sm:$0xff]  }
 0x176   : > { %4328 = vmatpush3.bf16.msra.mxu1 %v4900_v19  ;;  %4307 = vmatprep.subr.bf16.mxu0 %v4901_v20  ;;  %v3112_v39 = vpop.f32.mrf.mxu1  ;;  %v3150_v61 = vadd.f32 %v3149_v37, %v3107_v50 }
 0x177   : > { %4329 = vmatprep.subr.bf16.mxu1 %v4903_v29  ;;  %v3151_v40 = vpop.f32.mrf.mxu0  ;;  %v3113_v7 = vadd.f32 %v3112_v39, %v3069_v33  ;;  %v4928_v33 = vld [vmem:[%s6396_s3 + $0xab0] ss:$20 sps:$4 sm:$0xff]   ;;  %v4931_v39 = vld [vmem:[%s6396_s3 + $0xba0] ss:$20 sps:$4 sm:$0xff]  }
 0x178   : > { %v3192_v44 = vpop.f32.mrf.mxu1  ;;  %v3152_v0 = vadd.f32 %v3151_v40, %v3109_v60  ;;  %v4934_v40 = vld [vmem:[%s6396_s3 + $0xa38] ss:$20 sps:$4 sm:$0xff]  }
 0x179   : > { %4308 = vmatpush3.bf16.msra.mxu0 %v4902_v23  ;;  %v3153_v56 = vpop.f32.mrf.mxu0  ;;  %v3193_v8 = vadd.f32 %v3192_v44, %v3150_v61  ;;  %v3710_v23 = vrot.slane %v6315_v11, %v5136_v47  ;;  %v4935_v44 = vld [vmem:[%s6396_s3 + $0xb50] ss:$20 sps:$4 sm:$0xff]  }
 0x17a   : > { %4330 = vmatpush3.bf16.msra.mxu1 %v4904_v24  ;;  %4309 = vmatprep.subr.bf16.mxu0 %v4905_v26  ;;  %v3194_v55 = vpop.f32.mrf.mxu1  ;;  %v3154_v9 = vadd.f32 %v3153_v56, %v3111_v63 }
 0x17b   : > { %4331 = vmatprep.subr.bf16.mxu1 %v4907_v46  ;;  %v3155_v3 = vpop.f32.mrf.mxu0  ;;  %v3195_v14 = vadd.f32 %v3194_v55, %v3152_v0 }
 0x17c   : > { %v3196_v4 = vpop.f32.mrf.mxu1  ;;  %v3156_v1 = vadd.f32 %v3155_v3, %v3113_v7 }
 0x17d   : > { %4310 = vmatpush3.bf16.msra.mxu0 %v4906_v42  ;;  %v3197_v29 = vadd.f32 %v3196_v4, %v3154_v9 }
 0x17e   : > { %4332 = vmatpush3.bf16.msra.mxu1 %v4908_v32  ;;  %4311 = vmatprep.subr.bf16.mxu0 %v4909_v16  ;;  %v3198_v19 = vpop.f32.mrf.mxu1 }
 0x17f   : > { %4333 = vmatprep.subr.bf16.mxu1 %v4911_v17  ;;  %v3199_v26 = vadd.f32 %v3198_v19, %v3156_v1 }
 0x181   : > { %4312 = vmatpush3.bf16.msra.mxu0 %v4910_v52  ;;  %v4929_v52 = vld [vmem:[%s6396_s3 + $0xbc8] ss:$20 sps:$4 sm:$0xff]  }
 0x182   : > { %4334 = vmatpush3.bf16.msra.mxu1 %v4912_v34  ;;  %4313 = vmatprep.subr.bf16.mxu0 %v4913_v38 }
 0x183   : > { %4335 = vmatprep.subr.bf16.mxu1 %v4915_v21  ;;  %v4930_v21 = vld [vmem:[%s6396_s3 + $0xa88] ss:$20 sps:$4 sm:$0xff]  }
 0x185   : > { %4314 = vmatpush3.bf16.msra.mxu0 %v4914_v41  ;;  %v4932_v41 = vld [vmem:[%s6396_s3 + $0xa60] ss:$20 sps:$4 sm:$0xff]  }
 0x186   : > { %4336 = vmatpush3.bf16.msra.mxu1 %v4916_v35  ;;  %4315 = vmatprep.subr.bf16.mxu0 %v4917_v45  ;;  %v4933_v35 = vld [vmem:[%s6396_s3 + $0xb78] ss:$20 sps:$4 sm:$0xff]   ;;  %v4936_v45 = vld [vmem:[%s6396_s3 + $0xa10] ss:$20 sps:$4 sm:$0xff]  }
 0x187   : > { %4337 = vmatprep.subr.bf16.mxu1 %v4919_v49 }
 0x189   : > { %4316 = vmatpush3.bf16.msra.mxu0 %v4918_v51 }
 0x18a   : > { %4338 = vmatpush3.bf16.msra.mxu1 %v4920_v54  ;;  %4345 = vmatprep.subr.bf16.mxu0 %v4921_v59 }
 0x18c   : > { %v3235_v12 = vpop.f32.mrf.mxu0  ;;  %3574 = vmatmul.mubr.bf16.vlgmr.msra.gmra.mxu0 %v5390_v30  ;;  %v3706_v30 = vrot.slane %v6315_v11, %v5152_v53  ;;  %v4926_v53 = vld [vmem:[%s6396_s3 + $0xad8] ss:$20 sps:$4 sm:$0xff]  }
 0x18d   : > { %3615 = vmatmul.mubr.bf16.vlgmr.msra.gmra.mxu1 %v5404_v36  ;;  %v3236_v2 = vadd.f32 %v3235_v12, %v3193_v8  ;;  %4346 = vmatpush3.bf16.msra.mxu0 %v4922_v57  ;;  %v4925_v36 = vld [vmem:[%s6396_s3 + $0xc18] ss:$20 sps:$4 sm:$0xff]   ;;  %v3278_v49 = vpop.f32.mrf.mxu1 }
 0x18e   : > { %3655 = vmatprep.mubr.bf16.mxu0 %v5555_v43  ;;  %v3237_v20 = vpop.f32.mrf.mxu0  ;;  %4347 = vmatprep.subr.bf16.mxu0 %v4923_v6 }
 0x18f   : > { %v3691_v31 = vmul.f32 %v3669_v10, %v3236_v2  ;;  %v3238_v22 = vadd.f32 %v3237_v20, %v3195_v14  ;;  %v3280_v50 = vpop.f32.mrf.mxu1  ;;  %v3714_v20 = vrot.slane %v6315_v11, %v5182_v5 }
 0x190   : > { %v3239_v24 = vpop.f32.mrf.mxu0 }
 0x191   : > { %v3692_v43 = vmul.f32 %v3673_v13, %v3238_v22  ;;  %v3240_v46 = vadd.f32 %v3239_v24, %v3197_v29  ;;  %4348 = vmatpush3.bf16.msra.mxu0 %v4924_v15  ;;  %v3728_v42 = vadd.f32 %v3706_v30, %v3691_v31  ;;  %v3282_v51 = vpop.f32.mrf.mxu1  ;;  %v3718_v29 = vrot.slane %v6315_v11, %v5139_v48 }
 0x192   : > { %v3241_v27 = vpop.f32.mrf.mxu0  ;;  %4349 = vmatprep.subr.bf16.mxu0 %v4925_v36 }
 0x193   : > { %v3729_v32 = vadd.f32 %v3710_v23, %v3692_v43  ;;  %v3696_v16 = vmul.f32 %v3669_v10, %v3240_v46  ;;  %v3242_v47 = vadd.f32 %v3241_v27, %v3199_v26  ;;  %v3284_v54 = vpop.f32.mrf.mxu1 }
 0x195   : > { %v4251_v17 = vpack.c.bf16 %v3729_v32, %v3728_v42  ;;  %v3697_v18 = vmul.f32 %v3673_v13, %v3242_v47  ;;  %4350 = vmatpush3.bf16.msra.mxu0 %v4926_v53  ;;  %v3733_v34 = vadd.f32 %v3706_v30, %v3696_v16  ;;  %v3677_v13 = vrot.slane %v6302_v62, %v5182_v5 }
 0x196   : > { %4351 = vmatprep.subr.bf16.mxu0 %v4927_v28  ;;  %v3681_v30 = vrot.slane %v6302_v62, %v5139_v48 }
 0x197   : > { %3770 = vst [vmem:[%s6342_s16] sm:$0xff] %v4251_v17  ;;  %v3734_v37 = vadd.f32 %v3710_v23, %v3697_v18 }
 0x199   : > { %v4254_v38 = vpack.c.bf16 %v3734_v37, %v3733_v34  ;;  %4352 = vmatpush3.bf16.msra.mxu0 %v4928_v33 }
 0x19a   : > { %4353 = vmatprep.subr.bf16.mxu0 %v4929_v52 }
 0x19b   : > { %3773 = vst [vmem:[%s6342_s16 + $0x14] sm:$0xff] %v4254_v38 }
 0x19d   : > { %4354 = vmatpush3.bf16.msra.mxu0 %v4930_v21 }
 0x19e   : > { %4355 = vmatprep.subr.bf16.mxu0 %v4931_v39 }
 0x1a1   : > { %4356 = vmatpush3.bf16.msra.mxu0 %v4932_v41 }
 0x1a2   : > { %4357 = vmatprep.subr.bf16.mxu0 %v4933_v35 }
 0x1a5   : > { %4358 = vmatpush3.bf16.msra.mxu0 %v4934_v40 }
 0x1a6   : > { %4359 = vmatprep.subr.bf16.mxu0 %v4935_v44 }
 0x1a9   : > { %4360 = vmatpush3.bf16.msra.mxu0 %v4936_v45 }
 0x1ac   : > { %3656 = vmatmul.mubr.bf16.vlgmr.msra.gmra.mxu0 %v5708_v58 }
 0x1cc   : > { %v3321_v56 = vpop.f32.mrf.mxu0 }
 0x1cd   : > { %v3364_v55 = vpop.f32.mrf.mxu1  ;;  %v3322_v0 = vadd.f32 %v3321_v56, %v3278_v49 }
 0x1ce   : > { %v3323_v59 = vpop.f32.mrf.mxu0 }
 0x1cf   : > { %v3366_v60 = vpop.f32.mrf.mxu1  ;;  %v3324_v57 = vadd.f32 %v3323_v59, %v3280_v50  ;;  %v3365_v6 = vadd.f32 %v3364_v55, %v3322_v0 }
 0x1d0   : > { %v3325_v61 = vpop.f32.mrf.mxu0 }
 0x1d1   : > { %v3368_v63 = vpop.f32.mrf.mxu1  ;;  %v3326_v7 = vadd.f32 %v3325_v61, %v3282_v51  ;;  %v3367_v10 = vadd.f32 %v3366_v60, %v3324_v57 }
 0x1d2   : > { %v3327_v3 = vpop.f32.mrf.mxu0 }
 0x1d3   : > { %v3370_v4 = vpop.f32.mrf.mxu1  ;;  %v3328_v58 = vadd.f32 %v3327_v3, %v3284_v54  ;;  %v3369_v2 = vadd.f32 %v3368_v63, %v3326_v7 }
 0x1d5   : > { %v3371_v22 = vadd.f32 %v3370_v4, %v3328_v58 }
 0x20c   : > { %v3407_v8 = vpop.f32.mrf.mxu0 }
 0x20d   : > { %v3450_v9 = vpop.f32.mrf.mxu1  ;;  %v3408_v12 = vadd.f32 %v3407_v8, %v3365_v6 }
 0x20e   : > { %v3409_v14 = vpop.f32.mrf.mxu0 }
 0x20f   : > { %v3452_v1 = vpop.f32.mrf.mxu1  ;;  %v3410_v15 = vadd.f32 %v3409_v14, %v3367_v10  ;;  %v3451_v19 = vadd.f32 %v3450_v9, %v3408_v12  ;;  %v3685_v9 = vrot.slane %v6302_v62, %v5321_v25 }
 0x210   : > { %v3411_v36 = vpop.f32.mrf.mxu0 }
 0x211   : > { %v3454_v31 = vpop.f32.mrf.mxu1  ;;  %v3693_v23 = vmul.f32 %v3677_v13, %v3451_v19  ;;  %v3412_v24 = vadd.f32 %v3411_v36, %v3369_v2  ;;  %v3453_v26 = vadd.f32 %v3452_v1, %v3410_v15  ;;  %v3722_v2 = vrot.slane %v6315_v11, %v5321_v25 }
 0x212   : > { %v3413_v43 = vpop.f32.mrf.mxu0 }
 0x213   : > { %v3456_v46 = vpop.f32.mrf.mxu1  ;;  %v3694_v53 = vmul.f32 %v3681_v30, %v3453_v26  ;;  %v3414_v27 = vadd.f32 %v3413_v43, %v3371_v22  ;;  %v3455_v28 = vadd.f32 %v3454_v31, %v3412_v24  ;;  %v3730_v42 = vadd.f32 %v3714_v20, %v3693_v23 }
 0x215   : > { %v3731_v32 = vadd.f32 %v3718_v29, %v3694_v53  ;;  %v3698_v16 = vmul.f32 %v3677_v13, %v3455_v28  ;;  %v3457_v5 = vadd.f32 %v3456_v46, %v3414_v27 }
 0x217   : > { %v4252_v47 = vpack.c.bf16 %v3731_v32, %v3730_v42  ;;  %v3699_v17 = vmul.f32 %v3681_v30, %v3457_v5  ;;  %v3735_v48 = vadd.f32 %v3714_v20, %v3698_v16 }
 0x219   : > { %3771 = vst [vmem:[%s6342_s16 + $0x8] sm:$0xff] %v4252_v47  ;;  %v3736_v18 = vadd.f32 %v3718_v29, %v3699_v17 }
 0x21b   : > { %v4255_v33 = vpack.c.bf16 %v3736_v18, %v3735_v48 }
 0x21d   : > { %3774 = vst [vmem:[%s6342_s16 + $0x1c] sm:$0xff] %v4255_v33 }
 0x22c   : > { %v4273_v52 = vpop.f32.mrf.mxu0 }
 0x22d   : > { %v4295_v34 = vpop.f32.mrf.mxu1 }
 0x22e   : > { %v4274_v37 = vpop.f32.mrf.mxu0 }
 0x22f   : > { %v4296_v38 = vpop.f32.mrf.mxu1  ;;  %v4275_v51 = vadd.f32 %v4274_v37, %v4273_v52 }
 0x230   : > { %v4276_v21 = vpop.f32.mrf.mxu0  ;;  %v4297_v54 = vadd.f32 %v4296_v38, %v4295_v34 }
 0x231   : > { %v4298_v39 = vpop.f32.mrf.mxu1 }
 0x232   : > { %v4277_v41 = vpop.f32.mrf.mxu0  ;;  %v3535_v60 = vadd.f32 %v4297_v54, %v4275_v51 }
 0x233   : > { %v4299_v40 = vpop.f32.mrf.mxu1  ;;  %v4278_v61 = vadd.f32 %v4277_v41, %v4276_v21 }
 0x234   : > { %v4300_v63 = vadd.f32 %v4299_v40, %v4298_v39 }
 0x236   : > { %v3538_v7 = vadd.f32 %v4300_v63, %v4278_v61 }
 0x24c   : > { %v4317_v35 = vpop.f32.mrf.mxu0 }
 0x24d   : > { %v4339_v45 = vpop.f32.mrf.mxu1 }
 0x24e   : > { %v4318_v44 = vpop.f32.mrf.mxu0 }
 0x24f   : > { %v4340_v50 = vpop.f32.mrf.mxu1  ;;  %v4319_v56 = vadd.f32 %v4318_v44, %v4317_v35 }
 0x250   : > { %v4320_v49 = vpop.f32.mrf.mxu0  ;;  %v4341_v57 = vadd.f32 %v4340_v50, %v4339_v45 }
 0x251   : > { %v4342_v59 = vpop.f32.mrf.mxu1  ;;  %v3576_v0 = vadd.f32 %v4319_v56, %v3535_v60 }
 0x252   : > { %v4321_v55 = vpop.f32.mrf.mxu0 }
 0x253   : > { %v4322_v3 = vadd.f32 %v4321_v55, %v4320_v49  ;;  %v4343_v4 = vpop.f32.mrf.mxu1  ;;  %v3617_v10 = vadd.f32 %v4341_v57, %v3576_v0 }
 0x254   : > { %v4344_v12 = vadd.f32 %v4343_v4, %v4342_v59 }
 0x255   : > { %v3579_v58 = vadd.f32 %v4322_v3, %v3538_v7 }
 0x257   : > { %v3620_v19 = vadd.f32 %v4344_v12, %v3579_v58 }
 0x26c   : > { %v4361_v6 = vpop.f32.mrf.mxu0 }
 0x26e   : > { %v4362_v8 = vpop.f32.mrf.mxu0 }
 0x26f   : > { %v4363_v13 = vadd.f32 %v4362_v8, %v4361_v6 }
 0x270   : > { %v4364_v14 = vpop.f32.mrf.mxu0 }
 0x271   : > { %v3658_v1 = vadd.f32 %v4363_v13, %v3617_v10 }
 0x272   : > { %v4365_v15 = vpop.f32.mrf.mxu0 }
 0x273   : > { %v3695_v30 = vmul.f32 %v3685_v9, %v3658_v1  ;;  %v4366_v20 = vadd.f32 %v4365_v15, %v4364_v14 }
 0x275   : > { %v3732_v36 = vadd.f32 %v3722_v2, %v3695_v30  ;;  %v3661_v29 = vadd.f32 %v4366_v20, %v3620_v19 }
 0x277   : > { %v4253_v31 = vpack.c.bf16 %v3732_v36, %v3732_v36  ;;  %v3700_v22 = vmul.f32 %v3685_v9, %v3661_v29 }
 0x279   : > { %3772 = vst [vmem:[%s6342_s16 + $0x10] sm:$0xf] %v4253_v31  ;;  %v3737_v62 = vadd.f32 %v3722_v2, %v3700_v22 }
 0x27b   : > { %v4256_v23 = vpack.c.bf16 %v3737_v62, %v3737_v62 }
 0x27d   : > { %3775 = vst [vmem:[%s6342_s16 + $0x24] sm:$0xf] %v4256_v23 }
 0x27e PF: > { %s16_s21 = sadd.s32 1, %s4943_s21  }
 0x27f   : > { %p13_p4 = scmp.ge.s32.totalorder %s16_s21, 4  }
 0x281   :  { %15 = sbr.rel (!%p13_p4) target bundleno = 1 (0x1), region = 74 }

// kernel: closed_call.58
= control target key start
LH: loop header
LB: loop body
LE: loop exit
PB: predicated region body
PF: predicated region fallthrough
CT: control target
= control target key end

     0   :  { %v68_v23 = vlaneseq  ;;  %vm1829_vm0 = vmmov 0   ;;  %s2311_s3 = inlined_call_operand.vmem [shape: bf16[1664,128], index: 3, kind: input, shape index: {}]   ;;  %s2312_s0 = inlined_call_operand.vmem [shape: bf16[16,1664], index: 0, kind: input, shape index: {}]   ;;  %s2313_s1 = inlined_call_operand.vmem [shape: f32[1,1664], index: 1, kind: input, shape index: {}]   ;;  %s2314_s2 = inlined_call_operand.vmem [shape: f32[1,1664], index: 2, kind: input, shape index: {}]   ;;  %s2315_s4 = inlined_call_operand.vmem [shape: f32[1,128], index: 4, kind: input, shape index: {}]   ;;  %s2316_s5 = inlined_call_operand.vmem [shape: f32[1,128], index: 5, kind: input, shape index: {}]   ;;  %s2317_s6 = inlined_call_operand.vmem [shape: bf16[16,128], index: 6, kind: output, shape index: {}]  }
   0x1   :  { %v1724_v0 = vld [vmem:[%s2311_s3 + $0x78] sm:$0xff]   ;;  %v1728_v4 = vld [vmem:[%s2311_s3 + $0x70] sm:$0xff]   ;;  %v1732_v8 = vld [vmem:[%s2311_s3 + $0x68] sm:$0xff]  }
   0x2   :  { %v1725_v1 = vld [vmem:[%s2311_s3 + $0xf8] sm:$0xff]   ;;  %1561 = vmatprep.subr.bf16.mxu0 %v1724_v0  ;;  %v1729_v5 = vld [vmem:[%s2311_s3 + $0xf0] sm:$0xff]   ;;  %v1733_v9 = vld [vmem:[%s2311_s3 + $0xe8] sm:$0xff]   ;;  %v1946_v28 = vshrl.u32 %v68_v23, 7 }
   0x3   :  { %v1726_v2 = vld [vmem:[%s2311_s3 + $0x38] sm:$0xff]   ;;  %1583 = vmatprep.subr.bf16.mxu1 %v1725_v1  ;;  %v1730_v6 = vld [vmem:[%s2311_s3 + $0x30] sm:$0xff]   ;;  %v1734_v10 = vld [vmem:[%s2311_s3 + $0x28] sm:$0xff]  }
   0x4   :  { %v1727_v3 = vld [vmem:[%s2311_s3 + $0xb8] sm:$0xff]   ;;  %1562 = vmatpush3.bf16.msra.mxu0 %v1726_v2  ;;  %v1731_v7 = vld [vmem:[%s2311_s3 + $0xb0] sm:$0xff]   ;;  %v1735_v11 = vld [vmem:[%s2311_s3 + $0xa8] sm:$0xff]   ;;  %v1961_v33 = vsub.s32 1, %v1946_v28  ;;  %v1967_v35 = vsub.s32 3, %v1946_v28  ;;  %v1981_v39 = vsub.s32 0, %v1946_v28 }
   0x5   :  { %1584 = vmatpush3.bf16.msra.mxu1 %v1727_v3  ;;  %1563 = vmatprep.subr.bf16.mxu0 %v1728_v4  ;;  %v1736_v12 = vld [vmem:[%s2311_s3 + $0x60] sm:$0xff]   ;;  %v1740_v16 = vld [vmem:[%s2311_s3 + $0x58] sm:$0xff]   ;;  %v1744_v20 = vld [vmem:[%s2311_s3 + $0x50] sm:$0xff]   ;;  %v1984_v40 = vsub.s32 2, %v1946_v28 }
   0x6   :  { %1585 = vmatprep.subr.bf16.mxu1 %v1729_v5  ;;  %v1737_v13 = vld [vmem:[%s2311_s3 + $0xe0] sm:$0xff]   ;;  %v1741_v17 = vld [vmem:[%s2311_s3 + $0xd8] sm:$0xff]   ;;  %v1745_v21 = vld [vmem:[%s2311_s3 + $0xd0] sm:$0xff]  }
   0x7   :  { %v1738_v14 = vld [vmem:[%s2311_s3 + $0x20] sm:$0xff]   ;;  %v1742_v18 = vld [vmem:[%s2311_s3 + $0x18] sm:$0xff]   ;;  %v1746_v22 = vld [vmem:[%s2311_s3 + $0x10] sm:$0xff]  }
   0x8   :  { %1564 = vmatpush3.bf16.msra.mxu0 %v1730_v6  ;;  %v1739_v15 = vld [vmem:[%s2311_s3 + $0xa0] sm:$0xff]   ;;  %v1743_v19 = vld [vmem:[%s2311_s3 + $0x98] sm:$0xff]   ;;  %v1747_v24 = vld [vmem:[%s2311_s3 + $0x90] sm:$0xff]  }
   0x9   :  { %1586 = vmatpush3.bf16.msra.mxu1 %v1731_v7  ;;  %1565 = vmatprep.subr.bf16.mxu0 %v1732_v8  ;;  %v1748_v25 = vld [vmem:[%s2311_s3 + $0x48] sm:$0xff]   ;;  %v1752_v30 = vld [vmem:[%s2311_s3 + $0x40] sm:$0xff]   ;;  %v31_v37 = vld [vmem:[%s2312_s0 + $0x34] sm:$0xff] }
   0xa   :  { %1587 = vmatprep.subr.bf16.mxu1 %v1733_v9  ;;  %v1749_v26 = vld [vmem:[%s2311_s3 + $0xc8] sm:$0xff]   ;;  %v1753_v31 = vld [vmem:[%s2311_s3 + $0xc0] sm:$0xff]   ;;  %v51_v43 = vunpack.c.l.bf16 %v31_v37  ;;  %v52_v44 = vunpack.c.h.bf16 %v31_v37  ;;  %v1756_v52 = vld [vmem:[%s2311_s3 + $0x178] sm:$0xff]  }
   0xb   :  { %v1750_v27 = vld [vmem:[%s2311_s3 + $0x8] sm:$0xff]   ;;  %v1754_v32 = vld [vmem:[%s2311_s3] sm:$0xff]   ;;  %v1758_v61 = vld [vmem:[%s2311_s3 + $0x1f8] sm:$0xff]  }
   0xc   :  { %1566 = vmatpush3.bf16.msra.mxu0 %v1734_v10  ;;  %v1751_v29 = vld [vmem:[%s2311_s3 + $0x88] sm:$0xff]   ;;  %v1755_v34 = vld [vmem:[%s2311_s3 + $0x80] sm:$0xff]  }
   0xd   :  { %1588 = vmatpush3.bf16.msra.mxu1 %v1735_v11  ;;  %1567 = vmatprep.subr.bf16.mxu0 %v1736_v12  ;;  %v24_v36 = vld [vmem:[%s2312_s0] sm:$0xff]  ;;  %v25_v46 = vld [vmem:[%s2312_s0 + $0x8] sm:$0xff] }
   0xe   :  { %1589 = vmatprep.subr.bf16.mxu1 %v1737_v13  ;;  %v1978_v38 = vld [vmem:[%s2313_s1] sm:$0xff]  ;;  %v38_v41 = vunpack.c.l.bf16 %v24_v36  ;;  %v39_v42 = vunpack.c.h.bf16 %v24_v36  ;;  %v40_v50 = vunpack.c.l.bf16 %v25_v46  ;;  %v41_v51 = vunpack.c.h.bf16 %v25_v46  ;;  %v1766_v36 = vld [vmem:[%s2311_s3 + $0x1e8] sm:$0xff]  }
   0xf   :  { %v1989_v45 = vld [vmem:[%s2314_s2] sm:$0xff]  ;;  %v75_v48 = vrot.slane %v1978_v38, %v1961_v33  ;;  %v83_v55 = vrot.slane %v1978_v38, %v1967_v35  ;;  %v71_v59 = vrot.slane %v1978_v38, %v1981_v39  ;;  %v79_v0 = vrot.slane %v1978_v38, %v1984_v40  ;;  %v1765_v37 = vld [vmem:[%s2311_s3 + $0x128] sm:$0xff]  }
  0x10   :  { %1568 = vmatpush3.bf16.msra.mxu0 %v1738_v14  ;;  %v32_v47 = vld [vmem:[%s2312_s0 + $0x3c] sm:$0xff]  ;;  %v170_v49 = vrot.slane %v1989_v45, %v1961_v33  ;;  %v178_v56 = vrot.slane %v1989_v45, %v1967_v35  ;;  %v166_v60 = vrot.slane %v1989_v45, %v1981_v39  ;;  %v174_v1 = vrot.slane %v1989_v45, %v1984_v40 }
  0x11   :  { %1590 = vmatpush3.bf16.msra.mxu1 %v1739_v15  ;;  %1569 = vmatprep.subr.bf16.mxu0 %v1740_v16  ;;  %v53_v53 = vunpack.c.l.bf16 %v32_v47  ;;  %v54_v54 = vunpack.c.h.bf16 %v32_v47  ;;  %v134_v57 = vmul.f32 %v75_v48, %v39_v42  ;;  %v147_v58 = vmul.f32 %v75_v48, %v52_v44  ;;  %v1768_v42 = vld [vmem:[%s2311_s3 + $0x160] sm:$0xff]   ;;  %v1772_v47 = vld [vmem:[%s2311_s3 + $0x158] sm:$0xff]  }
  0x12   :  { %1591 = vmatprep.subr.bf16.mxu1 %v1741_v17  ;;  %v136_v62 = vmul.f32 %v83_v55, %v41_v51  ;;  %v133_v4 = vmul.f32 %v71_v59, %v38_v41  ;;  %v146_v5 = vmul.f32 %v71_v59, %v51_v43  ;;  %v135_v8 = vmul.f32 %v79_v0, %v40_v50  ;;  %v1767_v41 = vld [vmem:[%s2311_s3 + $0x1a8] sm:$0xff]   ;;  %v1770_v43 = vld [vmem:[%s2311_s3 + $0x1e0] sm:$0xff]   ;;  %v1774_v48 = vld [vmem:[%s2311_s3 + $0x1d8] sm:$0xff]  }
  0x13   :  { %v149_v63 = vmul.f32 %v83_v55, %v54_v54  ;;  %v229_v2 = vadd.f32 %v170_v49, %v134_v57  ;;  %v242_v3 = vadd.f32 %v170_v49, %v147_v58  ;;  %v148_v9 = vmul.f32 %v79_v0, %v53_v53  ;;  %v1769_v44 = vld [vmem:[%s2311_s3 + $0x120] sm:$0xff]   ;;  %v1773_v49 = vld [vmem:[%s2311_s3 + $0x118] sm:$0xff]   ;;  %v1778_v54 = vld [vmem:[%s2311_s3 + $0x1d0] sm:$0xff]  }
  0x14   :  { %1570 = vmatpush3.bf16.msra.mxu0 %v1742_v18  ;;  %v231_v6 = vadd.f32 %v178_v56, %v136_v62  ;;  %v228_v12 = vadd.f32 %v166_v60, %v133_v4  ;;  %v241_v13 = vadd.f32 %v166_v60, %v146_v5  ;;  %v230_v16 = vadd.f32 %v174_v1, %v135_v8  ;;  %v1757_v18 = vld [vmem:[%s2311_s3 + $0x138] sm:$0xff]   ;;  %v1771_v46 = vld [vmem:[%s2311_s3 + $0x1a0] sm:$0xff]   ;;  %v1777_v55 = vld [vmem:[%s2311_s3 + $0x110] sm:$0xff]  }
  0x15   :  { %1592 = vmatpush3.bf16.msra.mxu1 %v1743_v19  ;;  %1571 = vmatprep.subr.bf16.mxu0 %v1744_v20  ;;  %v244_v7 = vadd.f32 %v178_v56, %v149_v63  ;;  %v255_v10 = vmax.f32 %v229_v2, 0.0  ;;  %v268_v11 = vmax.f32 %v242_v3, 0.0  ;;  %v243_v17 = vadd.f32 %v174_v1, %v148_v9  ;;  %v1775_v50 = vld [vmem:[%s2311_s3 + $0x198] sm:$0xff]   ;;  %v1779_v57 = vld [vmem:[%s2311_s3 + $0x190] sm:$0xff]   ;;  %v1780_v59 = vld [vmem:[%s2311_s3 + $0x148] sm:$0xff]  }
  0x16   :  { %1593 = vmatprep.subr.bf16.mxu1 %v1745_v21  ;;  %v257_v14 = vmax.f32 %v231_v6, 0.0  ;;  %v254_v20 = vmax.f32 %v228_v12, 0.0  ;;  %v267_v21 = vmax.f32 %v241_v13, 0.0  ;;  %v256_v23 = vmax.f32 %v230_v16, 0.0  ;;  %v1781_v62 = vld [vmem:[%s2311_s3 + $0x108] sm:$0xff]   ;;  %v26_v63 = vld [vmem:[%s2312_s0 + $0x10] sm:$0xff] }
  0x17   :  { %v270_v15 = vmax.f32 %v244_v7, 0.0  ;;  %v281_v19 = vpack.c.bf16 %v268_v11, %v255_v10  ;;  %v90_v51 = vsub.s32 5, %v1946_v28  ;;  %v2078_v53 = vsub.s32 4, %v1946_v28  ;;  %v33_v1 = vld [vmem:[%s2312_s0 + $0x44] sm:$0xff] }
  0x18   :  { %1572 = vmatpush3.bf16.msra.mxu0 %v1746_v22  ;;  %v98_v56 = vsub.s32 7, %v1946_v28  ;;  %v94_v58 = vsub.s32 6, %v1946_v28  ;;  %v1782_v28 = vld [vmem:[%s2311_s3 + $0x1c8] sm:$0xff]   ;;  %v42_v2 = vunpack.c.l.bf16 %v26_v63  ;;  %v43_v3 = vunpack.c.h.bf16 %v26_v63  ;;  %v1784_v11 = vld [vmem:[%s2311_s3 + $0x140] sm:$0xff]   ;;  %v1795_v63 = vld [vmem:[%s2311_s3 + $0x2b0] sm:$0xff]  }
  0x19   :  { %1594 = vmatpush3.bf16.msra.mxu1 %v1747_v24  ;;  %1573 = vmatprep.subr.bf16.mxu0 %v1748_v25  ;;  %v283_v22 = vpack.c.bf16 %v270_v15, %v257_v14  ;;  %v269_v24 = vmax.f32 %v243_v17, 0.0  ;;  %v1759_v25 = vld [vmem:[%s2311_s3 + $0x1b8] sm:$0xff]   ;;  %v91_v60 = vrot.slane %v1978_v38, %v90_v51  ;;  %v186_v0 = vrot.slane %v1989_v45, %v90_v51  ;;  %v1783_v6 = vld [vmem:[%s2311_s3 + $0x188] sm:$0xff]   ;;  %v1786_v17 = vld [vmem:[%s2311_s3 + $0x1c0] sm:$0xff]  }
  0x1a   :  { %1595 = vmatprep.subr.bf16.mxu1 %v1749_v26  ;;  %v1760_v26 = vld [vmem:[%s2311_s3 + $0x170] sm:$0xff]   ;;  %1157 = vmatprep.mubr.bf16.mxu0 %v281_v19  ;;  %v182_v4 = vrot.slane %v1989_v45, %v2078_v53  ;;  %v99_v5 = vrot.slane %v1978_v38, %v98_v56  ;;  %v55_v7 = vunpack.c.l.bf16 %v33_v1  ;;  %v56_v8 = vunpack.c.h.bf16 %v33_v1  ;;  %v27_v14 = vld [vmem:[%s2312_s0 + $0x18] sm:$0xff]  ;;  %v1798_v1 = vld [vmem:[%s2311_s3 + $0x2e8] sm:$0xff]  }
  0x1b   :  { %1198 = vmatprep.mubr.bf16.mxu1 %v283_v22  ;;  %v194_v9 = vrot.slane %v1989_v45, %v98_v56  ;;  %v95_v10 = vrot.slane %v1978_v38, %v94_v58  ;;  %v138_v12 = vmul.f32 %v91_v60, %v43_v3  ;;  %v34_v15 = vld [vmem:[%s2312_s0 + $0x4c] sm:$0xff]  ;;  %v190_v16 = vrot.slane %v1989_v45, %v94_v58  ;;  %v1791_v58 = vld [vmem:[%s2311_s3 + $0x2b8] sm:$0xff]  }
  0x1c   :  { %1574 = vmatpush3.bf16.msra.mxu0 %v1750_v27  ;;  %v280_v27 = vpack.c.bf16 %v267_v21, %v254_v20  ;;  %v44_v20 = vunpack.c.l.bf16 %v27_v14  ;;  %v45_v21 = vunpack.c.h.bf16 %v27_v14  ;;  %v57_v45 = vunpack.c.l.bf16 %v34_v15  ;;  %v1799_v3 = vld [vmem:[%s2311_s3 + $0x2a8] sm:$0xff]   ;;  %v1811_v14 = vld [vmem:[%s2311_s3 + $0x290] sm:$0xff]  }
  0x1d   :  { %1596 = vmatpush3.bf16.msra.mxu1 %v1751_v29  ;;  %1575 = vmatprep.subr.bf16.mxu0 %v1752_v30  ;;  %v282_v29 = vpack.c.bf16 %v269_v24, %v256_v23  ;;  %v1762_v30 = vld [vmem:[%s2311_s3 + $0x1f0] sm:$0xff]   ;;  %v233_v22 = vadd.f32 %v186_v0, %v138_v12  ;;  %v1787_v23 = vld [vmem:[%s2311_s3 + $0x180] sm:$0xff]  }
  0x1e   :  { %1597 = vmatprep.subr.bf16.mxu1 %v1753_v31  ;;  %v1761_v31 = vld [vmem:[%s2311_s3 + $0x130] sm:$0xff]  }
  0x1f   :  { %v1809_v12 = vld [vmem:[%s2311_s3 + $0x210] sm:$0xff]  }
  0x20   :  { %1576 = vmatpush3.bf16.msra.mxu0 %v1754_v32  ;;  %v1763_v32 = vld [vmem:[%s2311_s3 + $0x1b0] sm:$0xff]  }
  0x21   :  { %1598 = vmatpush3.bf16.msra.mxu1 %v1755_v34  ;;  %1605 = vmatprep.subr.bf16.mxu0 %v1756_v52  ;;  %v1764_v34 = vld [vmem:[%s2311_s3 + $0x168] sm:$0xff]   ;;  %v1776_v52 = vld [vmem:[%s2311_s3 + $0x150] sm:$0xff]  }
  0x22   :  { %1627 = vmatprep.subr.bf16.mxu1 %v1758_v61  ;;  %v87_v61 = vrot.slane %v1978_v38, %v2078_v53  ;;  %v1785_v38 = vld [vmem:[%s2311_s3 + $0x100] sm:$0xff]  }
  0x23   :  { %1158 = vmatmul.mubr.bf16.vlgmr.msra.gmra.mxu0 %v280_v27 }
  0x24   :  { %1199 = vmatmul.mubr.bf16.vlgmr.msra.gmra.mxu1 %v282_v29  ;;  %1606 = vmatpush3.bf16.msra.mxu0 %v1757_v18  ;;  %v137_v13 = vmul.f32 %v87_v61, %v42_v2  ;;  %v151_v18 = vmul.f32 %v91_v60, %v56_v8  ;;  %v150_v19 = vmul.f32 %v87_v61, %v55_v7  ;;  %v1788_v29 = vld [vmem:[%s2311_s3 + $0x278] sm:$0xff]   ;;  %v1793_v61 = vld [vmem:[%s2311_s3 + $0x230] sm:$0xff]   ;;  %v1800_v2 = vld [vmem:[%s2311_s3 + $0x260] sm:$0xff]  }
  0x25   :  { %1628 = vmatpush3.bf16.msra.mxu1 %v1759_v25  ;;  %1607 = vmatprep.subr.bf16.mxu0 %v1760_v26  ;;  %v58_v25 = vunpack.c.h.bf16 %v34_v15  ;;  %v1803_v7 = vld [vmem:[%s2311_s3 + $0x2a0] sm:$0xff]   ;;  %v1805_v8 = vld [vmem:[%s2311_s3 + $0x218] sm:$0xff]   ;;  %v1812_v15 = vld [vmem:[%s2311_s3 + $0x248] sm:$0xff]  }
  0x26   :  { %1629 = vmatprep.subr.bf16.mxu1 %v1762_v30  ;;  %v232_v24 = vadd.f32 %v182_v4, %v137_v13  ;;  %v246_v26 = vadd.f32 %v186_v0, %v151_v18  ;;  %v245_v27 = vadd.f32 %v182_v4, %v150_v19  ;;  %v140_v30 = vmul.f32 %v99_v5, %v45_v21  ;;  %v1797_v0 = vld [vmem:[%s2311_s3 + $0x228] sm:$0xff]   ;;  %v1801_v4 = vld [vmem:[%s2311_s3 + $0x220] sm:$0xff]   ;;  %v1810_v13 = vld [vmem:[%s2311_s3 + $0x2d0] sm:$0xff]  }
  0x27   :  { %v28_v18 = vld [vmem:[%s2312_s0 + $0x20] sm:$0xff]  ;;  %v1815_v19 = vld [vmem:[%s2311_s3 + $0x288] sm:$0xff]  }
  0x28   :  { %1608 = vmatpush3.bf16.msra.mxu0 %v1761_v31  ;;  %v139_v31 = vmul.f32 %v95_v10, %v44_v20  ;;  %v35_v20 = vld [vmem:[%s2312_s0 + $0x54] sm:$0xff]  ;;  %v46_v21 = vunpack.c.l.bf16 %v28_v18 }
  0x29   :  { %1630 = vmatpush3.bf16.msra.mxu1 %v1763_v32  ;;  %1609 = vmatprep.subr.bf16.mxu0 %v1764_v34  ;;  %v259_v32 = vmax.f32 %v233_v22, 0.0  ;;  %v258_v34 = vmax.f32 %v232_v24, 0.0  ;;  %v47_v22 = vunpack.c.h.bf16 %v28_v18  ;;  %v2238_v24 = vld [vmem:[%s2314_s2 + $0x8] sm:$0x1f]  ;;  %v1824_v18 = vld [vmem:[%s2311_s3 + $0x318] sm:$0xff]  }
  0x2a   :  { %1631 = vmatprep.subr.bf16.mxu1 %v1766_v36  ;;  %v153_v36 = vmul.f32 %v99_v5, %v58_v25  ;;  %v1802_v5 = vld [vmem:[%s2311_s3 + $0x2e0] sm:$0xff]   ;;  %v59_v25 = vunpack.c.l.bf16 %v35_v20 }
  0x2c   :  { %1610 = vmatpush3.bf16.msra.mxu0 %v1765_v37  ;;  %v152_v37 = vmul.f32 %v95_v10, %v57_v45  ;;  %v1808_v10 = vld [vmem:[%s2311_s3 + $0x250] sm:$0xff]   ;;  %v1817_v45 = vld [vmem:[%s2311_s3 + $0x200] sm:$0xff]  }
  0x2d   :  { %1632 = vmatpush3.bf16.msra.mxu1 %v1767_v41  ;;  %1611 = vmatprep.subr.bf16.mxu0 %v1768_v42  ;;  %v272_v41 = vmax.f32 %v246_v26, 0.0  ;;  %v271_v42 = vmax.f32 %v245_v27, 0.0  ;;  %v60_v26 = vunpack.c.h.bf16 %v35_v20 }
  0x2e   :  { %1633 = vmatprep.subr.bf16.mxu1 %v1770_v43  ;;  %v235_v43 = vadd.f32 %v194_v9, %v140_v30 }
  0x30   :  { %1612 = vmatpush3.bf16.msra.mxu0 %v1769_v44  ;;  %v234_v44 = vadd.f32 %v190_v16, %v139_v31  ;;  %v261_v51 = vmax.f32 %v235_v43, 0.0  ;;  %v198_v31 = vrot.slane %v2238_v24, %v1981_v39 }
  0x31   :  { %1634 = vmatpush3.bf16.msra.mxu1 %v1771_v46  ;;  %1613 = vmatprep.subr.bf16.mxu0 %v1772_v47  ;;  %v1790_v46 = vld [vmem:[%s2311_s3 + $0x2f8] sm:$0xff]   ;;  %v248_v47 = vadd.f32 %v194_v9, %v153_v36 }
  0x32   :  { %1635 = vmatprep.subr.bf16.mxu1 %v1774_v48  ;;  %v247_v48 = vadd.f32 %v190_v16, %v152_v37  ;;  %v1806_v9 = vld [vmem:[%s2311_s3 + $0x2d8] sm:$0xff]   ;;  %v1813_v16 = vld [vmem:[%s2311_s3 + $0x208] sm:$0xff]  }
  0x33   :  { %v274_v56 = vmax.f32 %v248_v47, 0.0 }
  0x34   :  { %1614 = vmatpush3.bf16.msra.mxu0 %v1773_v49  ;;  %v285_v49 = vpack.c.bf16 %v272_v41, %v259_v32  ;;  %v29_v32 = vld [vmem:[%s2312_s0 + $0x28] sm:$0xff] }
  0x35   :  { %1636 = vmatpush3.bf16.msra.mxu1 %v1775_v50  ;;  %1615 = vmatprep.subr.bf16.mxu0 %v1776_v52  ;;  %v284_v50 = vpack.c.bf16 %v271_v42, %v258_v34  ;;  %v1789_v52 = vld [vmem:[%s2311_s3 + $0x238] sm:$0xff]   ;;  %v48_v42 = vunpack.c.l.bf16 %v29_v32  ;;  %v49_v43 = vunpack.c.h.bf16 %v29_v32 }
  0x36   :  { %1637 = vmatprep.subr.bf16.mxu1 %v1778_v54  ;;  %v260_v54 = vmax.f32 %v234_v44, 0.0  ;;  %1239 = vmatprep.mubr.bf16.mxu0 %v285_v49  ;;  %v36_v34 = vld [vmem:[%s2312_s0 + $0x5c] sm:$0xff] }
  0x37   :  { %v61_v47 = vunpack.c.l.bf16 %v36_v34 }
  0x38   :  { %1616 = vmatpush3.bf16.msra.mxu0 %v1777_v55  ;;  %v1792_v55 = vld [vmem:[%s2311_s3 + $0x270] sm:$0xff]  }
  0x39   :  { %1638 = vmatpush3.bf16.msra.mxu1 %v1779_v57  ;;  %1617 = vmatprep.subr.bf16.mxu0 %v1780_v59  ;;  %v273_v57 = vmax.f32 %v247_v48, 0.0  ;;  %v287_v59 = vpack.c.bf16 %v274_v56, %v261_v51  ;;  %v62_v48 = vunpack.c.h.bf16 %v36_v34 }
  0x3a   :  { %1639 = vmatprep.subr.bf16.mxu1 %v1782_v28  ;;  %v1796_v28 = vld [vmem:[%s2311_s3 + $0x268] sm:$0xff]  }
  0x3b   :  { %v286_v60 = vpack.c.bf16 %v273_v57, %v260_v54  ;;  %1280 = vmatprep.mubr.bf16.mxu1 %v287_v59  ;;  %v206_v57 = vrot.slane %v2238_v24, %v1984_v40 }
  0x3c   :  { %1618 = vmatpush3.bf16.msra.mxu0 %v1781_v62  ;;  %v1794_v62 = vld [vmem:[%s2311_s3 + $0x2f0] sm:$0xff]  }
  0x3d   :  { %1640 = vmatpush3.bf16.msra.mxu1 %v1783_v6  ;;  %1619 = vmatprep.subr.bf16.mxu0 %v1784_v11  ;;  %v1804_v6 = vld [vmem:[%s2311_s3 + $0x258] sm:$0xff]  }
  0x3e   :  { %1641 = vmatprep.subr.bf16.mxu1 %v1786_v17  ;;  %v1807_v11 = vld [vmem:[%s2311_s3 + $0x298] sm:$0xff]   ;;  %v1816_v17 = vld [vmem:[%s2311_s3 + $0x240] sm:$0xff]  }
  0x40   :  { %1620 = vmatpush3.bf16.msra.mxu0 %v1785_v38  ;;  %v1814_v38 = vld [vmem:[%s2311_s3 + $0x2c8] sm:$0xff]  }
  0x41   :  { %1642 = vmatpush3.bf16.msra.mxu1 %v1787_v23  ;;  %1649 = vmatprep.subr.bf16.mxu0 %v1788_v29  ;;  %v2233_v23 = vld [vmem:[%s2313_s1 + $0x8] sm:$0x1f]  ;;  %v202_v29 = vrot.slane %v2238_v24, %v1961_v33 }
  0x42   :  { %1671 = vmatprep.subr.bf16.mxu1 %v1790_v46  ;;  %v107_v27 = vrot.slane %v2233_v23, %v1961_v33  ;;  %v103_v30 = vrot.slane %v2233_v23, %v1981_v39  ;;  %v115_v36 = vrot.slane %v2233_v23, %v1967_v35  ;;  %v210_v33 = vrot.slane %v2238_v24, %v1967_v35  ;;  %v1818_v39 = vld [vmem:[%s2311_s3 + $0x2c0] sm:$0xff]  }
  0x43   :  { %1240 = vmatmul.mubr.bf16.vlgmr.msra.gmra.mxu0 %v284_v50  ;;  %v111_v35 = vrot.slane %v2233_v23, %v1984_v40 }
  0x44   :  { %1650 = vmatpush3.bf16.msra.mxu0 %v1789_v52  ;;  %1281 = vmatmul.mubr.bf16.vlgmr.msra.gmra.mxu1 %v286_v60  ;;  %v142_v37 = vmul.f32 %v107_v27, %v47_v22  ;;  %v155_v41 = vmul.f32 %v107_v27, %v60_v26  ;;  %v141_v44 = vmul.f32 %v103_v30, %v46_v21  ;;  %v1819_v52 = vld [vmem:[%s2311_s3 + $0x280] sm:$0xff]   ;;  %v1825_v22 = vld [vmem:[%s2311_s3 + $0x310] sm:$0xff]  }
  0x45   :  { %1651 = vmatprep.subr.bf16.mxu0 %v1792_v55  ;;  %1672 = vmatpush3.bf16.msra.mxu1 %v1791_v58  ;;  %v154_v46 = vmul.f32 %v103_v30, %v59_v25  ;;  %v144_v51 = vmul.f32 %v115_v36, %v49_v43  ;;  %v157_v56 = vmul.f32 %v115_v36, %v62_v48 }
  0x46   :  { %1673 = vmatprep.subr.bf16.mxu1 %v1794_v62  ;;  %v237_v49 = vadd.f32 %v202_v29, %v142_v37  ;;  %v250_v50 = vadd.f32 %v202_v29, %v155_v41  ;;  %v236_v54 = vadd.f32 %v198_v31, %v141_v44  ;;  %v214_v21 = vrot.slane %v2238_v24, %v2078_v53 }
  0x47   :  { %v249_v55 = vadd.f32 %v198_v31, %v154_v46  ;;  %v239_v60 = vadd.f32 %v210_v33, %v144_v51 }
  0x48   :  { %1652 = vmatpush3.bf16.msra.mxu0 %v1793_v61  ;;  %v263_v58 = vmax.f32 %v237_v49, 0.0  ;;  %v276_v59 = vmax.f32 %v250_v50, 0.0  ;;  %v143_v61 = vmul.f32 %v111_v35, %v48_v42  ;;  %v262_v62 = vmax.f32 %v236_v54, 0.0 }
  0x49   :  { %1653 = vmatprep.subr.bf16.mxu0 %v1796_v28  ;;  %1674 = vmatpush3.bf16.msra.mxu1 %v1795_v63  ;;  %v275_v28 = vmax.f32 %v249_v55, 0.0  ;;  %v1828_v63 = vmov 0.0  }
  0x4a   :  { %1675 = vmatprep.subr.bf16.mxu1 %v1798_v1  ;;  %v156_v1 = vmul.f32 %v111_v35, %v61_v47 }
  0x4b   :  { %v288_v40 = vpack.c.bf16 %v275_v28, %v262_v62 }
  0x4c   :  { %1654 = vmatpush3.bf16.msra.mxu0 %v1797_v0  ;;  %v252_v0 = vadd.f32 %v210_v33, %v157_v56 }
  0x4d   :  { %1655 = vmatprep.subr.bf16.mxu0 %v1800_v2  ;;  %1676 = vmatpush3.bf16.msra.mxu1 %v1799_v3  ;;  %v289_v2 = vpack.c.bf16 %v276_v59, %v263_v58  ;;  %v265_v3 = vmax.f32 %v239_v60, 0.0 }
  0x4e   :  { %1677 = vmatprep.subr.bf16.mxu1 %v1802_v5  ;;  %v238_v5 = vadd.f32 %v206_v57, %v143_v61 }
  0x4f   :  { %1321 = vmatprep.mubr.bf16.mxu0 %v289_v2 }
  0x50   :  { %1656 = vmatpush3.bf16.msra.mxu0 %v1801_v4  ;;  %v1820_v4 = vld [vmem:[%s2311_s3 + $0x338] sm:$0xff]  }
  0x51   :  { %1657 = vmatprep.subr.bf16.mxu0 %v1804_v6  ;;  %1678 = vmatpush3.bf16.msra.mxu1 %v1803_v7  ;;  %v278_v6 = vmax.f32 %v252_v0, 0.0  ;;  %v251_v7 = vadd.f32 %v206_v57, %v156_v1 }
  0x52   :  { %1679 = vmatprep.subr.bf16.mxu1 %v1806_v9 }
  0x53   :  { %v291_v9 = vpack.c.bf16 %v278_v6, %v265_v3 }
  0x54   :  { %1658 = vmatpush3.bf16.msra.mxu0 %v1805_v8  ;;  %v264_v8 = vmax.f32 %v238_v5, 0.0 }
  0x55   :  { %1659 = vmatprep.subr.bf16.mxu0 %v1808_v10  ;;  %1680 = vmatpush3.bf16.msra.mxu1 %v1807_v11  ;;  %v277_v10 = vmax.f32 %v251_v7, 0.0  ;;  %v1821_v11 = vld [vmem:[%s2311_s3 + $0x330] sm:$0xff]  }
  0x56   :  { %1681 = vmatprep.subr.bf16.mxu1 %v1810_v13  ;;  %1362 = vmatprep.mubr.bf16.mxu1 %v291_v9  ;;  %v1822_v13 = vld [vmem:[%s2311_s3 + $0x328] sm:$0xff]  }
  0x58   :  { %1660 = vmatpush3.bf16.msra.mxu0 %v1809_v12  ;;  %v290_v12 = vpack.c.bf16 %v277_v10, %v264_v8 }
  0x59   :  { %1661 = vmatprep.subr.bf16.mxu0 %v1812_v15  ;;  %1682 = vmatpush3.bf16.msra.mxu1 %v1811_v14  ;;  %v1823_v14 = vld [vmem:[%s2311_s3 + $0x320] sm:$0xff]  }
  0x5a   :  { %1683 = vmatprep.subr.bf16.mxu1 %v1814_v38  ;;  %v30_v15 = vld [vmem:[%s2312_s0 + $0x30] ss:$52 sps:$4 sm:$0xff]  }
  0x5b   :  { %v63_v38 = vunpack.c.h.bf16 %v30_v15 }
  0x5c   :  { %1662 = vmatpush3.bf16.msra.mxu0 %v1813_v16  ;;  %v50_v16 = vunpack.c.l.bf16 %v30_v15 }
  0x5d   :  { %1663 = vmatprep.subr.bf16.mxu0 %v1816_v17  ;;  %1684 = vmatpush3.bf16.msra.mxu1 %v1815_v19  ;;  %v119_v17 = vrot.slane %v2233_v23, %v2078_v53  ;;  %v1826_v23 = vld [vmem:[%s2311_s3 + $0x308] sm:$0xff]   ;;  %v1827_v53 = vld [vmem:[%s2311_s3 + $0x300] sm:$0xff]  }
  0x5e   :  { %1685 = vmatprep.subr.bf16.mxu1 %v1818_v39 }
  0x5f   :  { %v145_v19 = vmul.f32 %v119_v17, %v50_v16  ;;  %v158_v20 = vmul.f32 %v119_v17, %v63_v38  ;;  %v1551_v17 = vld [vmem:[%s2316_s5] ss:$0 sm:$0xff] }
  0x60   :  { %1664 = vmatpush3.bf16.msra.mxu0 %v1817_v45 }
  0x61   :  { %1702 = vmatprep.subr.bf16.mxu0 %v1828_v63  ;;  %1686 = vmatpush3.bf16.msra.mxu1 %v1819_v52  ;;  %v240_v45 = vadd.f32 %v214_v21, %v145_v19  ;;  %v253_v25 = vadd.f32 %v214_v21, %v158_v20 }
  0x63   :  { %1322 = vmatmul.mubr.bf16.vlgmr.msra.gmra.mxu0 %v288_v40  ;;  %v266_v26 = vmax.f32 %v240_v45, 0.0  ;;  %v279_v27 = vmax.f32 %v253_v25, 0.0 }
  0x64   :  { %1703 = vmatpush3.bf16.msra.mxu0 %v1820_v4  ;;  %1718 = vmatprep.mubr.msk.bf16.mxu0 %vm1829_vm0, %v1828_v63 }
  0x65   :  { %1704 = vmatprep.subr.bf16.mxu0 %v1828_v63  ;;  %1363 = vmatmul.mubr.bf16.vlgmr.msra.gmra.mxu1 %v290_v12  ;;  %v292_v24 = vpack.c.bf16 %v279_v27, %v266_v26 }
  0x68   :  { %1705 = vmatpush3.bf16.msra.mxu0 %v1821_v11 }
  0x69   :  { %1706 = vmatprep.subr.bf16.mxu0 %v1828_v63 }
  0x6c   :  { %1707 = vmatpush3.bf16.msra.mxu0 %v1822_v13  ;;  %v1550_v13 = vld [vmem:[%s2315_s4] ss:$0 sm:$0xff] }
  0x6d   :  { %1708 = vmatprep.subr.bf16.mxu0 %v1828_v63 }
  0x70   :  { %1709 = vmatpush3.bf16.msra.mxu0 %v1823_v14 }
  0x71   :  { %1710 = vmatprep.subr.bf16.mxu0 %v1828_v63 }
  0x74   :  { %1711 = vmatpush3.bf16.msra.mxu0 %v1824_v18 }
  0x75   :  { %1712 = vmatprep.subr.bf16.mxu0 %v1828_v63 }
  0x78   :  { %1713 = vmatpush3.bf16.msra.mxu0 %v1825_v22 }
  0x79   :  { %1714 = vmatprep.subr.bf16.mxu0 %v1828_v63 }
  0x7c   :  { %1715 = vmatpush3.bf16.msra.mxu0 %v1826_v23 }
  0x7d   :  { %1716 = vmatprep.subr.bf16.mxu0 %v1828_v63 }
  0x80   :  { %1717 = vmatpush3.bf16.msra.mxu0 %v1827_v53 }
  0x83   :  { %1719 = vmatmul.mubr.bf16.vlgmr.msra.gmra.mxu0 %v292_v24 }
  0xe3   :  { %v1577_v29 = vpop.f32.mrf.mxu0 }
  0xe4   :  { %v1599_v30 = vpop.f32.mrf.mxu1 }
  0xe5   :  { %v1578_v31 = vpop.f32.mrf.mxu0 }
  0xe6   :  { %v1600_v32 = vpop.f32.mrf.mxu1  ;;  %v1579_v50 = vadd.f32 %v1578_v31, %v1577_v29 }
  0xe7   :  { %v1580_v34 = vpop.f32.mrf.mxu0  ;;  %v1601_v51 = vadd.f32 %v1600_v32, %v1599_v30 }
  0xe8   :  { %v1602_v36 = vpop.f32.mrf.mxu1 }
  0xe9   :  { %v1581_v33 = vpop.f32.mrf.mxu0  ;;  %v1201_v55 = vadd.f32 %v1601_v51, %v1579_v50 }
  0xea   :  { %v1603_v37 = vpop.f32.mrf.mxu1  ;;  %v1582_v56 = vadd.f32 %v1581_v33, %v1580_v34 }
  0xeb   :  { %v1604_v57 = vadd.f32 %v1603_v37, %v1602_v36 }
  0xed   :  { %v1204_v28 = vadd.f32 %v1604_v57, %v1582_v56 }
 0x103   :  { %v1621_v39 = vpop.f32.mrf.mxu0 }
 0x104   :  { %v1643_v42 = vpop.f32.mrf.mxu1 }
 0x105   :  { %v1622_v41 = vpop.f32.mrf.mxu0 }
 0x106   :  { %v1644_v44 = vpop.f32.mrf.mxu1  ;;  %v1623_v54 = vadd.f32 %v1622_v41, %v1621_v39 }
 0x107   :  { %v1624_v43 = vpop.f32.mrf.mxu0  ;;  %v1645_v61 = vadd.f32 %v1644_v44, %v1643_v42 }
 0x108   :  { %v1646_v47 = vpop.f32.mrf.mxu1  ;;  %v1242_v60 = vadd.f32 %v1623_v54, %v1201_v55 }
 0x109   :  { %v1625_v46 = vpop.f32.mrf.mxu0 }
 0x10a   :  { %v1647_v49 = vpop.f32.mrf.mxu1  ;;  %v1626_v62 = vadd.f32 %v1625_v46, %v1624_v43  ;;  %v1283_v2 = vadd.f32 %v1645_v61, %v1242_v60 }
 0x10b   :  { %v1648_v4 = vadd.f32 %v1647_v49, %v1646_v47 }
 0x10c   :  { %v1245_v3 = vadd.f32 %v1626_v62, %v1204_v28 }
 0x10e   :  { %v1286_v8 = vadd.f32 %v1648_v4, %v1245_v3 }
 0x123   :  { %v1665_v48 = vpop.f32.mrf.mxu0 }
 0x125   :  { %v1666_v35 = vpop.f32.mrf.mxu0  ;;  %v1687_v52 = vpop.f32.mrf.mxu1 }
 0x126   :  { %v1667_v63 = vadd.f32 %v1666_v35, %v1665_v48 }
 0x127   :  { %v1668_v58 = vpop.f32.mrf.mxu0  ;;  %v1688_v59 = vpop.f32.mrf.mxu1 }
 0x128   :  { %v1324_v5 = vadd.f32 %v1667_v63, %v1283_v2  ;;  %v1689_v40 = vadd.f32 %v1688_v59, %v1687_v52 }
 0x129   :  { %v1669_v0 = vpop.f32.mrf.mxu0  ;;  %v1690_v1 = vpop.f32.mrf.mxu1 }
 0x12a   :  { %v1670_v6 = vadd.f32 %v1669_v0, %v1668_v58  ;;  %v1365_v11 = vadd.f32 %v1689_v40, %v1324_v5 }
 0x12b   :  { %v1691_v7 = vpop.f32.mrf.mxu1 }
 0x12c   :  { %v1327_v9 = vadd.f32 %v1670_v6, %v1286_v8  ;;  %v1692_v10 = vadd.f32 %v1691_v7, %v1690_v1 }
 0x12e   :  { %v1368_v38 = vadd.f32 %v1692_v10, %v1327_v9 }
 0x143   :  { %v1405_v12 = vpop.f32.mrf.mxu0 }
 0x144   :  { %v1406_v14 = vadd.f32 %v1405_v12, %v1365_v11 }
 0x145   :  { %v1720_v15 = vpop.f32.mrf.mxu0 }
 0x146   :  { %v1419_v16 = vmul.f32 %v1550_v13, %v1406_v14 }
 0x147   :  { %v1408_v18 = vpop.f32.mrf.mxu0 }
 0x148   :  { %v1409_v19 = vadd.f32 %v1408_v18, %v1368_v38  ;;  %v1428_v21 = vadd.f32 %v1551_v17, %v1419_v16 }
 0x149   :  { %v1721_v20 = vpop.f32.mrf.mxu0 }
 0x14a   :  { %v1420_v22 = vmul.f32 %v1550_v13, %v1409_v19  ;;  %v1430_v25 = vmax.f32 %v1428_v21, 0.0 }
 0x14c   :  { %v1429_v45 = vadd.f32 %v1551_v17, %v1420_v22 }
 0x14e   :  { %v1431_v23 = vmax.f32 %v1429_v45, 0.0 }
 0x150   :  { %v1559_v26 = vpack.c.bf16 %v1431_v23, %v1430_v25 }
 0x152   :  { %1560 = vst [vmem:[%s2317_s6] sm:$0xff] %v1559_v26  }

// kernel: closed_call.59
= control target key start
LH: loop header
LB: loop body
LE: loop exit
PB: predicated region body
PF: predicated region fallthrough
CT: control target
= control target key end

     0   :  { %vm1184_vm0 = vmmov 0   ;;  %s1462_s1 = inlined_call_operand.vmem [shape: bf16[1152,128], index: 1, kind: input, shape index: {}]   ;;  %s1463_s0 = inlined_call_operand.vmem [shape: bf16[16,1152], index: 0, kind: input, shape index: {}]   ;;  %s1464_s2 = inlined_call_operand.vmem [shape: f32[1,128], index: 2, kind: input, shape index: {}]   ;;  %s1465_s3 = inlined_call_operand.vmem [shape: f32[1,128], index: 3, kind: input, shape index: {}]   ;;  %s1466_s4 = inlined_call_operand.vmem [shape: bf16[16,128], index: 4, kind: output, shape index: {}]  }
   0x1   :  { %v1098_v0 = vld [vmem:[%s1462_s1 + $0x78] sm:$0xff]   ;;  %v1102_v4 = vld [vmem:[%s1462_s1 + $0x70] sm:$0xff]   ;;  %v1106_v8 = vld [vmem:[%s1462_s1 + $0x68] sm:$0xff]  }
   0x2   :  { %v1099_v1 = vld [vmem:[%s1462_s1 + $0xf8] sm:$0xff]   ;;  %979 = vmatprep.subr.bf16.mxu0 %v1098_v0  ;;  %v1103_v5 = vld [vmem:[%s1462_s1 + $0xf0] sm:$0xff]   ;;  %v1107_v9 = vld [vmem:[%s1462_s1 + $0xe8] sm:$0xff]  }
   0x3   :  { %v1100_v2 = vld [vmem:[%s1462_s1 + $0x38] sm:$0xff]   ;;  %1001 = vmatprep.subr.bf16.mxu1 %v1099_v1  ;;  %v1104_v6 = vld [vmem:[%s1462_s1 + $0x30] sm:$0xff]   ;;  %v1108_v10 = vld [vmem:[%s1462_s1 + $0x28] sm:$0xff]  }
   0x4   :  { %v1101_v3 = vld [vmem:[%s1462_s1 + $0xb8] sm:$0xff]   ;;  %980 = vmatpush3.bf16.msra.mxu0 %v1100_v2  ;;  %v1105_v7 = vld [vmem:[%s1462_s1 + $0xb0] sm:$0xff]   ;;  %v1109_v11 = vld [vmem:[%s1462_s1 + $0xa8] sm:$0xff]  }
   0x5   :  { %1002 = vmatpush3.bf16.msra.mxu1 %v1101_v3  ;;  %981 = vmatprep.subr.bf16.mxu0 %v1102_v4  ;;  %v1110_v12 = vld [vmem:[%s1462_s1 + $0x60] sm:$0xff]   ;;  %v1114_v16 = vld [vmem:[%s1462_s1 + $0x58] sm:$0xff]   ;;  %v1118_v20 = vld [vmem:[%s1462_s1 + $0x50] sm:$0xff]  }
   0x6   :  { %1003 = vmatprep.subr.bf16.mxu1 %v1103_v5  ;;  %v1111_v13 = vld [vmem:[%s1462_s1 + $0xe0] sm:$0xff]   ;;  %v1115_v17 = vld [vmem:[%s1462_s1 + $0xd8] sm:$0xff]   ;;  %v1119_v21 = vld [vmem:[%s1462_s1 + $0xd0] sm:$0xff]  }
   0x7   :  { %v1112_v14 = vld [vmem:[%s1462_s1 + $0x20] sm:$0xff]   ;;  %v1116_v18 = vld [vmem:[%s1462_s1 + $0x18] sm:$0xff]   ;;  %v1120_v22 = vld [vmem:[%s1462_s1 + $0x10] sm:$0xff]  }
   0x8   :  { %982 = vmatpush3.bf16.msra.mxu0 %v1104_v6  ;;  %v1113_v15 = vld [vmem:[%s1462_s1 + $0xa0] sm:$0xff]   ;;  %v1117_v19 = vld [vmem:[%s1462_s1 + $0x98] sm:$0xff]   ;;  %v1121_v23 = vld [vmem:[%s1462_s1 + $0x90] sm:$0xff]   ;;  %v1183_v6 = vmov 0.0  }
   0x9   :  { %1004 = vmatpush3.bf16.msra.mxu1 %v1105_v7  ;;  %983 = vmatprep.subr.bf16.mxu0 %v1106_v8  ;;  %v1122_v24 = vld [vmem:[%s1462_s1 + $0x48] sm:$0xff]   ;;  %v1126_v28 = vld [vmem:[%s1462_s1 + $0x40] sm:$0xff]   ;;  %v1136_v36 = vld [vmem:[%s1462_s1 + $0x178] sm:$0xff]  }
   0xa   :  { %1005 = vmatprep.subr.bf16.mxu1 %v1107_v9  ;;  %v1123_v25 = vld [vmem:[%s1462_s1 + $0xc8] sm:$0xff]   ;;  %v1127_v29 = vld [vmem:[%s1462_s1 + $0xc0] sm:$0xff]   ;;  %v1137_v37 = vld [vmem:[%s1462_s1 + $0x138] sm:$0xff]  }
   0xb   :  { %v1124_v26 = vld [vmem:[%s1462_s1 + $0x8] sm:$0xff]   ;;  %v1128_v30 = vld [vmem:[%s1462_s1] sm:$0xff]   ;;  %v1138_v38 = vld [vmem:[%s1462_s1 + $0x1f8] sm:$0xff]  }
   0xc   :  { %984 = vmatpush3.bf16.msra.mxu0 %v1108_v10  ;;  %v1125_v27 = vld [vmem:[%s1462_s1 + $0x88] sm:$0xff]   ;;  %v1129_v31 = vld [vmem:[%s1462_s1 + $0x80] sm:$0xff]   ;;  %v1139_v39 = vld [vmem:[%s1462_s1 + $0x1b8] sm:$0xff]  }
   0xd   :  { %1006 = vmatpush3.bf16.msra.mxu1 %v1109_v11  ;;  %985 = vmatprep.subr.bf16.mxu0 %v1110_v12  ;;  %v1130_v32 = vld [vmem:[%s1463_s0] ss:$36 sps:$4 sm:$0xff]   ;;  %v1133_v34 = vld [vmem:[%s1463_s0 + $0x8] ss:$36 sps:$4 sm:$0xff]   ;;  %v1140_v40 = vld [vmem:[%s1462_s1 + $0x170] sm:$0xff]  }
   0xe   :  { %1007 = vmatprep.subr.bf16.mxu1 %v1111_v13  ;;  %v1132_v33 = vld [vmem:[%s1463_s0 + $0x4] ss:$36 sps:$4 sm:$0xff]   ;;  %v1135_v35 = vld [vmem:[%s1463_s0 + $0xc] ss:$36 sps:$4 sm:$0xff]   ;;  %v1152_v52 = vld [vmem:[%s1462_s1 + $0x158] sm:$0xff]  }
   0xf   :  { %682 = vmatprep.mubr.bf16.mxu0 %v1132_v33  ;;  %723 = vmatprep.mubr.bf16.mxu1 %v1135_v35  ;;  %v1141_v41 = vld [vmem:[%s1462_s1 + $0x130] sm:$0xff]   ;;  %v1144_v44 = vld [vmem:[%s1462_s1 + $0x168] sm:$0xff]   ;;  %v1148_v48 = vld [vmem:[%s1462_s1 + $0x160] sm:$0xff]  }
  0x10   :  { %986 = vmatpush3.bf16.msra.mxu0 %v1112_v14  ;;  %v1142_v42 = vld [vmem:[%s1462_s1 + $0x1f0] sm:$0xff]   ;;  %v1145_v45 = vld [vmem:[%s1462_s1 + $0x128] sm:$0xff]   ;;  %v1149_v49 = vld [vmem:[%s1462_s1 + $0x120] sm:$0xff]  }
  0x11   :  { %1008 = vmatpush3.bf16.msra.mxu1 %v1113_v15  ;;  %987 = vmatprep.subr.bf16.mxu0 %v1114_v16  ;;  %v1143_v43 = vld [vmem:[%s1462_s1 + $0x1b0] sm:$0xff]   ;;  %v1146_v46 = vld [vmem:[%s1462_s1 + $0x1e8] sm:$0xff]   ;;  %v1150_v50 = vld [vmem:[%s1462_s1 + $0x1e0] sm:$0xff]  }
  0x12   :  { %1009 = vmatprep.subr.bf16.mxu1 %v1115_v17  ;;  %v1147_v47 = vld [vmem:[%s1462_s1 + $0x1a8] sm:$0xff]   ;;  %v1151_v51 = vld [vmem:[%s1462_s1 + $0x1a0] sm:$0xff]   ;;  %v1153_v53 = vld [vmem:[%s1462_s1 + $0x118] sm:$0xff]  }
  0x13   :  { %v1154_v54 = vld [vmem:[%s1462_s1 + $0x1d8] sm:$0xff]   ;;  %v1156_v56 = vld [vmem:[%s1462_s1 + $0x150] sm:$0xff]   ;;  %v1160_v60 = vld [vmem:[%s1462_s1 + $0x148] sm:$0xff]  }
  0x14   :  { %988 = vmatpush3.bf16.msra.mxu0 %v1116_v18  ;;  %v1155_v55 = vld [vmem:[%s1462_s1 + $0x198] sm:$0xff]   ;;  %v1157_v57 = vld [vmem:[%s1462_s1 + $0x110] sm:$0xff]   ;;  %v1161_v61 = vld [vmem:[%s1462_s1 + $0x108] sm:$0xff]  }
  0x15   :  { %1010 = vmatpush3.bf16.msra.mxu1 %v1117_v19  ;;  %989 = vmatprep.subr.bf16.mxu0 %v1118_v20  ;;  %v1158_v58 = vld [vmem:[%s1462_s1 + $0x1d0] sm:$0xff]   ;;  %v1162_v62 = vld [vmem:[%s1462_s1 + $0x1c8] sm:$0xff]   ;;  %v1164_v0 = vld [vmem:[%s1462_s1 + $0x140] sm:$0xff]  }
  0x16   :  { %1011 = vmatprep.subr.bf16.mxu1 %v1119_v21  ;;  %v1159_v59 = vld [vmem:[%s1462_s1 + $0x190] sm:$0xff]   ;;  %v1163_v63 = vld [vmem:[%s1462_s1 + $0x188] sm:$0xff]   ;;  %v1165_v1 = vld [vmem:[%s1462_s1 + $0x100] sm:$0xff]  }
  0x17   :  { %v1166_v2 = vld [vmem:[%s1462_s1 + $0x1c0] sm:$0xff]   ;;  %v1167_v3 = vld [vmem:[%s1463_s0 + $0x10] ss:$36 sps:$4 sm:$0xff]   ;;  %v1171_v7 = vld [vmem:[%s1463_s0 + $0x18] ss:$36 sps:$4 sm:$0xff]  }
  0x18   :  { %990 = vmatpush3.bf16.msra.mxu0 %v1120_v22  ;;  %v1169_v4 = vld [vmem:[%s1463_s0 + $0x14] ss:$36 sps:$4 sm:$0xff]   ;;  %v1170_v5 = vld [vmem:[%s1462_s1 + $0x180] sm:$0xff]   ;;  %v1176_v11 = vld [vmem:[%s1462_s1 + $0x228] sm:$0xff]  }
  0x19   :  { %1012 = vmatpush3.bf16.msra.mxu1 %v1121_v23  ;;  %991 = vmatprep.subr.bf16.mxu0 %v1122_v24  ;;  %v1173_v8 = vld [vmem:[%s1463_s0 + $0x1c] ss:$36 sps:$4 sm:$0xff]   ;;  %v1175_v10 = vld [vmem:[%s1462_s1 + $0x230] sm:$0xff]   ;;  %v1180_v15 = vld [vmem:[%s1462_s1 + $0x208] sm:$0xff]  }
  0x1a   :  { %1013 = vmatprep.subr.bf16.mxu1 %v1123_v25  ;;  %v1174_v9 = vld [vmem:[%s1462_s1 + $0x238] sm:$0xff]   ;;  %v1177_v12 = vld [vmem:[%s1462_s1 + $0x220] sm:$0xff]   ;;  %v1179_v14 = vld [vmem:[%s1462_s1 + $0x210] sm:$0xff]  }
  0x1b   :  { %v1178_v13 = vld [vmem:[%s1462_s1 + $0x218] sm:$0xff]   ;;  %v1181_v16 = vld [vmem:[%s1462_s1 + $0x200] sm:$0xff]  }
  0x1c   :  { %992 = vmatpush3.bf16.msra.mxu0 %v1124_v26  ;;  %v1182_v17 = vld [vmem:[%s1463_s0 + $0x20] ss:$36 sps:$4 sm:$0xff]  }
  0x1d   :  { %1014 = vmatpush3.bf16.msra.mxu1 %v1125_v27  ;;  %993 = vmatprep.subr.bf16.mxu0 %v1126_v28 }
  0x1e   :  { %1015 = vmatprep.subr.bf16.mxu1 %v1127_v29 }
  0x20   :  { %994 = vmatpush3.bf16.msra.mxu0 %v1128_v30 }
  0x21   :  { %1016 = vmatpush3.bf16.msra.mxu1 %v1129_v31  ;;  %1023 = vmatprep.subr.bf16.mxu0 %v1136_v36 }
  0x22   :  { %1045 = vmatprep.subr.bf16.mxu1 %v1138_v38 }
  0x23   :  { %683 = vmatmul.mubr.bf16.vlgmr.msra.gmra.mxu0 %v1130_v32 }
  0x24   :  { %724 = vmatmul.mubr.bf16.vlgmr.msra.gmra.mxu1 %v1133_v34  ;;  %1024 = vmatpush3.bf16.msra.mxu0 %v1137_v37 }
  0x25   :  { %1046 = vmatpush3.bf16.msra.mxu1 %v1139_v39  ;;  %1025 = vmatprep.subr.bf16.mxu0 %v1140_v40 }
  0x26   :  { %1047 = vmatprep.subr.bf16.mxu1 %v1142_v42  ;;  %764 = vmatprep.mubr.bf16.mxu0 %v1169_v4 }
  0x27   :  { %805 = vmatprep.mubr.bf16.mxu1 %v1173_v8 }
  0x28   :  { %1026 = vmatpush3.bf16.msra.mxu0 %v1141_v41 }
  0x29   :  { %1048 = vmatpush3.bf16.msra.mxu1 %v1143_v43  ;;  %1027 = vmatprep.subr.bf16.mxu0 %v1144_v44 }
  0x2a   :  { %1049 = vmatprep.subr.bf16.mxu1 %v1146_v46 }
  0x2c   :  { %1028 = vmatpush3.bf16.msra.mxu0 %v1145_v45 }
  0x2d   :  { %1050 = vmatpush3.bf16.msra.mxu1 %v1147_v47  ;;  %1029 = vmatprep.subr.bf16.mxu0 %v1148_v48 }
  0x2e   :  { %1051 = vmatprep.subr.bf16.mxu1 %v1150_v50 }
  0x30   :  { %1030 = vmatpush3.bf16.msra.mxu0 %v1149_v49  ;;  %v968_v49 = vld [vmem:[%s1464_s2] ss:$0 sm:$0xff] }
  0x31   :  { %1052 = vmatpush3.bf16.msra.mxu1 %v1151_v51  ;;  %1031 = vmatprep.subr.bf16.mxu0 %v1152_v52 }
  0x32   :  { %1053 = vmatprep.subr.bf16.mxu1 %v1154_v54 }
  0x34   :  { %1032 = vmatpush3.bf16.msra.mxu0 %v1153_v53 }
  0x35   :  { %1054 = vmatpush3.bf16.msra.mxu1 %v1155_v55  ;;  %1033 = vmatprep.subr.bf16.mxu0 %v1156_v56  ;;  %v969_v55 = vld [vmem:[%s1465_s3] ss:$0 sm:$0xff] }
  0x36   :  { %1055 = vmatprep.subr.bf16.mxu1 %v1158_v58 }
  0x38   :  { %1034 = vmatpush3.bf16.msra.mxu0 %v1157_v57 }
  0x39   :  { %1056 = vmatpush3.bf16.msra.mxu1 %v1159_v59  ;;  %1035 = vmatprep.subr.bf16.mxu0 %v1160_v60 }
  0x3a   :  { %1057 = vmatprep.subr.bf16.mxu1 %v1162_v62 }
  0x3c   :  { %1036 = vmatpush3.bf16.msra.mxu0 %v1161_v61 }
  0x3d   :  { %1058 = vmatpush3.bf16.msra.mxu1 %v1163_v63  ;;  %1037 = vmatprep.subr.bf16.mxu0 %v1164_v0 }
  0x3e   :  { %1059 = vmatprep.subr.bf16.mxu1 %v1166_v2 }
  0x40   :  { %1038 = vmatpush3.bf16.msra.mxu0 %v1165_v1 }
  0x41   :  { %1076 = vmatprep.subr.bf16.mxu0 %v1183_v6  ;;  %1060 = vmatpush3.bf16.msra.mxu1 %v1170_v5 }
  0x43   :  { %765 = vmatmul.mubr.bf16.vlgmr.msra.gmra.mxu0 %v1167_v3 }
  0x44   :  { %1092 = vmatprep.mubr.msk.bf16.mxu0 %vm1184_vm0, %v1183_v6  ;;  %1077 = vmatpush3.bf16.msra.mxu0 %v1174_v9 }
  0x45   :  { %806 = vmatmul.mubr.bf16.vlgmr.msra.gmra.mxu1 %v1171_v7  ;;  %1078 = vmatprep.subr.bf16.mxu0 %v1183_v6 }
  0x48   :  { %1079 = vmatpush3.bf16.msra.mxu0 %v1175_v10 }
  0x49   :  { %1080 = vmatprep.subr.bf16.mxu0 %v1183_v6 }
  0x4c   :  { %1081 = vmatpush3.bf16.msra.mxu0 %v1176_v11 }
  0x4d   :  { %1082 = vmatprep.subr.bf16.mxu0 %v1183_v6 }
  0x50   :  { %1083 = vmatpush3.bf16.msra.mxu0 %v1177_v12 }
  0x51   :  { %1084 = vmatprep.subr.bf16.mxu0 %v1183_v6 }
  0x54   :  { %1085 = vmatpush3.bf16.msra.mxu0 %v1178_v13 }
  0x55   :  { %1086 = vmatprep.subr.bf16.mxu0 %v1183_v6 }
  0x58   :  { %1087 = vmatpush3.bf16.msra.mxu0 %v1179_v14 }
  0x59   :  { %1088 = vmatprep.subr.bf16.mxu0 %v1183_v6 }
  0x5c   :  { %1089 = vmatpush3.bf16.msra.mxu0 %v1180_v15 }
  0x5d   :  { %1090 = vmatprep.subr.bf16.mxu0 %v1183_v6 }
  0x60   :  { %1091 = vmatpush3.bf16.msra.mxu0 %v1181_v16 }
  0x63   :  { %1093 = vmatmul.mubr.bf16.vlgmr.msra.gmra.mxu0 %v1182_v17 }
  0xe3   :  { %v995_v18 = vpop.f32.mrf.mxu0 }
  0xe4   :  { %v1017_v19 = vpop.f32.mrf.mxu1 }
  0xe5   :  { %v996_v20 = vpop.f32.mrf.mxu0 }
  0xe6   :  { %v1018_v21 = vpop.f32.mrf.mxu1  ;;  %v997_v31 = vadd.f32 %v996_v20, %v995_v18 }
  0xe7   :  { %v998_v22 = vpop.f32.mrf.mxu0  ;;  %v1019_v32 = vadd.f32 %v1018_v21, %v1017_v19 }
  0xe8   :  { %v1020_v23 = vpop.f32.mrf.mxu1 }
  0xe9   :  { %v999_v24 = vpop.f32.mrf.mxu0  ;;  %v726_v36 = vadd.f32 %v1019_v32, %v997_v31 }
  0xea   :  { %v1021_v26 = vpop.f32.mrf.mxu1  ;;  %v1000_v37 = vadd.f32 %v999_v24, %v998_v22 }
  0xeb   :  { %v1022_v38 = vadd.f32 %v1021_v26, %v1020_v23 }
  0xed   :  { %v729_v43 = vadd.f32 %v1022_v38, %v1000_v37 }
 0x103   :  { %v1039_v25 = vpop.f32.mrf.mxu0 }
 0x105   :  { %v1040_v27 = vpop.f32.mrf.mxu0  ;;  %v1061_v28 = vpop.f32.mrf.mxu1 }
 0x106   :  { %v1041_v33 = vadd.f32 %v1040_v27, %v1039_v25 }
 0x107   :  { %v1042_v29 = vpop.f32.mrf.mxu0  ;;  %v1062_v30 = vpop.f32.mrf.mxu1 }
 0x108   :  { %v767_v39 = vadd.f32 %v1041_v33, %v726_v36  ;;  %v1063_v40 = vadd.f32 %v1062_v30, %v1061_v28 }
 0x109   :  { %v1043_v34 = vpop.f32.mrf.mxu0  ;;  %v1064_v35 = vpop.f32.mrf.mxu1 }
 0x10a   :  { %v1044_v41 = vadd.f32 %v1043_v34, %v1042_v29  ;;  %v808_v46 = vadd.f32 %v1063_v40, %v767_v39 }
 0x10b   :  { %v1065_v42 = vpop.f32.mrf.mxu1 }
 0x10c   :  { %v770_v44 = vadd.f32 %v1044_v41, %v729_v43  ;;  %v1066_v45 = vadd.f32 %v1065_v42, %v1064_v35 }
 0x10e   :  { %v811_v51 = vadd.f32 %v1066_v45, %v770_v44 }
 0x123   :  { %v848_v47 = vpop.f32.mrf.mxu0 }
 0x124   :  { %v849_v48 = vadd.f32 %v848_v47, %v808_v46 }
 0x125   :  { %v1094_v50 = vpop.f32.mrf.mxu0 }
 0x126   :  { %v862_v53 = vmul.f32 %v968_v49, %v849_v48 }
 0x127   :  { %v851_v52 = vpop.f32.mrf.mxu0 }
 0x128   :  { %v852_v54 = vadd.f32 %v851_v52, %v811_v51  ;;  %v871_v58 = vadd.f32 %v969_v55, %v862_v53 }
 0x129   :  { %v1095_v56 = vpop.f32.mrf.mxu0 }
 0x12a   :  { %v863_v57 = vmul.f32 %v968_v49, %v852_v54 }
 0x12c   :  { %v872_v59 = vadd.f32 %v969_v55, %v863_v57 }
 0x12e   :  { %v977_v60 = vpack.c.bf16 %v872_v59, %v871_v58 }
 0x130   :  { %978 = vst [vmem:[%s1466_s4] sm:$0xff] %v977_v60  }

// kernel: model_forward.11
= control target key start
LH: loop header
LB: loop body
LE: loop exit
PB: predicated region body
PF: predicated region fallthrough
CT: control target
= control target key end

     0   :  { %v46_v25 = vlaneseq  ;;  %vm258_vm0 = vcmask 1043456   ;;  %vm709_vm1 = vcmask 1041409   ;;  %vm1508_vm2 = vmmov 0   ;;  %s2378_s3 = inlined_call_operand.vmem [shape: f32[1664,128], index: 3, kind: input, shape index: {}]   ;;  %s2379_s0 = inlined_call_operand.vmem [shape: bf16[2,4,1664], index: 0, kind: input, shape index: {}]   ;;  %s2380_s1 = inlined_call_operand.vmem [shape: f32[1,1,1664], index: 1, kind: input, shape index: {}]   ;;  %s2381_s2 = inlined_call_operand.vmem [shape: f32[1,1,1664], index: 2, kind: input, shape index: {}]   ;;  %s2382_s4 = inlined_call_operand.vmem [shape: f32[1,128], index: 4, kind: input, shape index: {}]   ;;  %s2383_s5 = inlined_call_operand.vmem [shape: f32[2,128], index: 5, kind: output, shape index: {}]  }
   0x1   :  { %v499_v0 = vld [vmem:[%s2378_s3 + $0xf8] sm:$0xff]  ;;  %v498_v2 = vld [vmem:[%s2378_s3 + $0xf0] sm:$0xff]  ;;  %v497_v6 = vld [vmem:[%s2378_s3 + $0xe8] sm:$0xff] }
   0x2   :  { %v483_v1 = vld [vmem:[%s2378_s3 + $0x78] sm:$0xff]  ;;  %1239 = vmatprep.subr.mxu0 %v499_v0  ;;  %v482_v4 = vld [vmem:[%s2378_s3 + $0x70] sm:$0xff]  ;;  %v481_v8 = vld [vmem:[%s2378_s3 + $0x68] sm:$0xff]  ;;  %v1638_v34 = vshrl.u32 %v46_v25, 7 }
   0x3   :  { %v531_v3 = vld [vmem:[%s2378_s3 + $0x1f8] sm:$0xff]  ;;  %1240 = vmatpush3.msra.mxu0 %v483_v1  ;;  %v530_v7 = vld [vmem:[%s2378_s3 + $0x1f0] sm:$0xff]  ;;  %v529_v10 = vld [vmem:[%s2378_s3 + $0x1e8] sm:$0xff] }
   0x4   :  { %v515_v5 = vld [vmem:[%s2378_s3 + $0x178] sm:$0xff]  ;;  %1274 = vmatprep.subr.mxu1 %v531_v3  ;;  %1241 = vmatprep.subr.mxu0 %v498_v2  ;;  %v514_v9 = vld [vmem:[%s2378_s3 + $0x170] sm:$0xff]  ;;  %v496_v11 = vld [vmem:[%s2378_s3 + $0xe0] sm:$0xff]  ;;  %v1668_v44 = vsub.s32 0, %v1638_v34  ;;  %v1671_v45 = vsub.s32 1, %v1638_v34  ;;  %v1683_v49 = vsub.s32 2, %v1638_v34 }
   0x5   :  { %1275 = vmatpush3.msra.mxu1 %v515_v5  ;;  %1242 = vmatpush3.msra.mxu0 %v482_v4  ;;  %v513_v12 = vld [vmem:[%s2378_s3 + $0x168] sm:$0xff]  ;;  %v480_v13 = vld [vmem:[%s2378_s3 + $0x60] sm:$0xff]  ;;  %v495_v15 = vld [vmem:[%s2378_s3 + $0xd8] sm:$0xff]  ;;  %v1686_v50 = vsub.s32 3, %v1638_v34  ;;  %v1711_v59 = vsub.s32 4, %v1638_v34  ;;  %v68_v60 = vsub.s32 5, %v1638_v34 }
   0x6   :  { %1276 = vmatprep.subr.mxu1 %v530_v7  ;;  %1243 = vmatprep.subr.mxu0 %v497_v6  ;;  %v528_v14 = vld [vmem:[%s2378_s3 + $0x1e0] sm:$0xff]  ;;  %v479_v17 = vld [vmem:[%s2378_s3 + $0x58] sm:$0xff]  ;;  %v494_v19 = vld [vmem:[%s2378_s3 + $0xd0] sm:$0xff] }
   0x7   :  { %1277 = vmatpush3.msra.mxu1 %v514_v9  ;;  %1244 = vmatpush3.msra.mxu0 %v481_v8  ;;  %v512_v16 = vld [vmem:[%s2378_s3 + $0x160] sm:$0xff]  ;;  %v527_v18 = vld [vmem:[%s2378_s3 + $0x1d8] sm:$0xff]  ;;  %v478_v21 = vld [vmem:[%s2378_s3 + $0x50] sm:$0xff] }
   0x8   :  { %1278 = vmatprep.subr.mxu1 %v529_v10  ;;  %1245 = vmatprep.subr.mxu0 %v496_v11  ;;  %v511_v20 = vld [vmem:[%s2378_s3 + $0x158] sm:$0xff]  ;;  %v526_v22 = vld [vmem:[%s2378_s3 + $0x1d0] sm:$0xff]  ;;  %v493_v23 = vld [vmem:[%s2378_s3 + $0xc8] sm:$0xff] }
   0x9   :  { %1279 = vmatpush3.msra.mxu1 %v513_v12  ;;  %1246 = vmatpush3.msra.mxu0 %v480_v13  ;;  %v510_v24 = vld [vmem:[%s2378_s3 + $0x150] sm:$0xff]  ;;  %v477_v26 = vld [vmem:[%s2378_s3 + $0x48] sm:$0xff]  ;;  %v492_v28 = vld [vmem:[%s2378_s3 + $0xc0] sm:$0xff] }
   0xa   :  { %1280 = vmatprep.subr.mxu1 %v528_v14  ;;  %1247 = vmatprep.subr.mxu0 %v495_v15  ;;  %v525_v27 = vld [vmem:[%s2378_s3 + $0x1c8] sm:$0xff]  ;;  %v476_v30 = vld [vmem:[%s2378_s3 + $0x40] sm:$0xff]  ;;  %v491_v32 = vld [vmem:[%s2378_s3 + $0xb8] sm:$0xff] }
   0xb   :  { %1281 = vmatpush3.msra.mxu1 %v512_v16  ;;  %1248 = vmatpush3.msra.mxu0 %v479_v17  ;;  %v509_v29 = vld [vmem:[%s2378_s3 + $0x148] sm:$0xff]  ;;  %v524_v31 = vld [vmem:[%s2378_s3 + $0x1c0] sm:$0xff]  ;;  %v475_v35 = vld [vmem:[%s2378_s3 + $0x38] sm:$0xff] }
   0xc   :  { %1282 = vmatprep.subr.mxu1 %v527_v18  ;;  %1249 = vmatprep.subr.mxu0 %v494_v19  ;;  %v508_v33 = vld [vmem:[%s2378_s3 + $0x140] sm:$0xff]  ;;  %v523_v36 = vld [vmem:[%s2378_s3 + $0x1b8] sm:$0xff]  ;;  %v490_v37 = vld [vmem:[%s2378_s3 + $0xb0] sm:$0xff] }
   0xd   :  { %1283 = vmatpush3.msra.mxu1 %v511_v20  ;;  %1250 = vmatpush3.msra.mxu0 %v478_v21  ;;  %v507_v38 = vld [vmem:[%s2378_s3 + $0x138] sm:$0xff]  ;;  %v474_v39 = vld [vmem:[%s2378_s3 + $0x30] sm:$0xff]  ;;  %v489_v41 = vld [vmem:[%s2378_s3 + $0xa8] sm:$0xff] }
   0xe   :  { %1284 = vmatprep.subr.mxu1 %v526_v22  ;;  %1251 = vmatprep.subr.mxu0 %v493_v23  ;;  %v522_v40 = vld [vmem:[%s2378_s3 + $0x1b0] sm:$0xff]  ;;  %v473_v42 = vld [vmem:[%s2378_s3 + $0x28] sm:$0xff]  ;;  %v488_v46 = vld [vmem:[%s2378_s3 + $0xa0] sm:$0xff] }
   0xf   :  { %1285 = vmatpush3.msra.mxu1 %v510_v24  ;;  %1252 = vmatpush3.msra.mxu0 %v477_v26  ;;  %v506_v43 = vld [vmem:[%s2378_s3 + $0x130] sm:$0xff]  ;;  %v521_v47 = vld [vmem:[%s2378_s3 + $0x1a8] sm:$0xff]  ;;  %v472_v48 = vld [vmem:[%s2378_s3 + $0x20] sm:$0xff]  ;;  %v72_v24 = vsub.s32 6, %v1638_v34 }
  0x10   :  { %1286 = vmatprep.subr.mxu1 %v525_v27  ;;  %1253 = vmatprep.subr.mxu0 %v492_v28  ;;  %v505_v51 = vld [vmem:[%s2378_s3 + $0x128] sm:$0xff]  ;;  %v520_v52 = vld [vmem:[%s2378_s3 + $0x1a0] sm:$0xff]  ;;  %v487_v61 = vld [vmem:[%s2378_s3 + $0x98] sm:$0xff] }
  0x11   :  { %1287 = vmatpush3.msra.mxu1 %v509_v29  ;;  %1254 = vmatpush3.msra.mxu0 %v476_v30  ;;  %v20_v53 = vld [vmem:[%s2379_s0] sm:$0xff]  ;;  %v471_v3 = vld [vmem:[%s2378_s3 + $0x18] sm:$0xff]  ;;  %v486_v9 = vld [vmem:[%s2378_s3 + $0x90] sm:$0xff]  ;;  %v76_v30 = vsub.s32 7, %v1638_v34 }
  0x12   :  { %1288 = vmatprep.subr.mxu1 %v524_v31  ;;  %1255 = vmatprep.subr.mxu0 %v491_v32  ;;  %v24_v54 = vld [vmem:[%s2379_s0 + $0x1a] sm:$0xff]  ;;  %v28_v55 = vunpack.c.l.bf16 %v20_v53  ;;  %v29_v58 = vunpack.c.h.bf16 %v20_v53  ;;  %v470_v14 = vld [vmem:[%s2378_s3 + $0x10] sm:$0xff]  ;;  %v485_v19 = vld [vmem:[%s2378_s3 + $0x88] sm:$0xff] }
  0x13   :  { %1289 = vmatpush3.msra.mxu1 %v508_v33  ;;  %1256 = vmatpush3.msra.mxu0 %v475_v35  ;;  %v1703_v56 = vld [vmem:[%s2380_s1] sm:$0xff]  ;;  %v35_v63 = vunpack.c.l.bf16 %v24_v54  ;;  %v519_v4 = vld [vmem:[%s2378_s3 + $0x198] sm:$0xff]  ;;  %v36_v6 = vunpack.c.h.bf16 %v24_v54  ;;  %v518_v15 = vld [vmem:[%s2378_s3 + $0x190] sm:$0xff] }
  0x14   :  { %1290 = vmatprep.subr.mxu1 %v523_v36  ;;  %1257 = vmatprep.subr.mxu0 %v490_v37  ;;  %v1708_v57 = vld [vmem:[%s2381_s2] sm:$0xff]  ;;  %v49_v0 = vrot.slane %v1703_v56, %v1668_v44  ;;  %v53_v1 = vrot.slane %v1703_v56, %v1671_v45  ;;  %v57_v7 = vrot.slane %v1703_v56, %v1683_v49  ;;  %v503_v10 = vld [vmem:[%s2378_s3 + $0x118] sm:$0xff]  ;;  %v502_v20 = vld [vmem:[%s2378_s3 + $0x110] sm:$0xff] }
  0x15   :  { %1291 = vmatpush3.msra.mxu1 %v507_v38  ;;  %1258 = vmatpush3.msra.mxu0 %v474_v39  ;;  %v504_v62 = vld [vmem:[%s2378_s3 + $0x120] sm:$0xff]  ;;  %v132_v2 = vrot.slane %v1708_v57, %v1668_v44  ;;  %v136_v5 = vrot.slane %v1708_v57, %v1671_v45  ;;  %v61_v8 = vrot.slane %v1703_v56, %v1686_v50  ;;  %v469_v25 = vld [vmem:[%s2378_s3 + $0x8] sm:$0xff]  ;;  %v595_v54 = vld [vmem:[%s2378_s3 + $0x3f8] sm:$0xff] }
  0x16   :  { %1292 = vmatprep.subr.mxu1 %v522_v40  ;;  %1259 = vmatprep.subr.mxu0 %v489_v41  ;;  %v99_v11 = vcombine.low %v49_v0, %v53_v1  ;;  %v140_v12 = vrot.slane %v1708_v57, %v1683_v49  ;;  %v144_v13 = vrot.slane %v1708_v57, %v1686_v50  ;;  %v517_v26 = vld [vmem:[%s2378_s3 + $0x188] sm:$0xff]  ;;  %v484_v31 = vld [vmem:[%s2378_s3 + $0x80] sm:$0xff]  ;;  %v578_v34 = vld [vmem:[%s2378_s3 + $0x370] sm:$0xff] }
  0x17   :  { %1293 = vmatpush3.msra.mxu1 %v506_v43  ;;  %1260 = vmatpush3.msra.mxu0 %v473_v42  ;;  %v182_v16 = vcombine.low %v132_v2, %v136_v5  ;;  %v100_v17 = vcombine.low %v57_v7, %v61_v8  ;;  %v65_v18 = vrot.slane %v1703_v56, %v1711_v59  ;;  %v501_v32 = vld [vmem:[%s2378_s3 + $0x108] sm:$0xff]  ;;  %v468_v37 = vld [vmem:[%s2378_s3] sm:$0xff] }
  0x18   :  { %1294 = vmatprep.subr.mxu1 %v521_v47  ;;  %1261 = vmatprep.subr.mxu0 %v488_v46  ;;  %v111_v21 = vmul.f32 %v99_v11, %v28_v55  ;;  %v118_v22 = vmul.f32 %v99_v11, %v35_v63  ;;  %v183_v23 = vcombine.low %v140_v12, %v144_v13  ;;  %v516_v38 = vld [vmem:[%s2378_s3 + $0x180] sm:$0xff]  ;;  %v563_v46 = vld [vmem:[%s2378_s3 + $0x2f8] sm:$0xff] }
  0x19   :  { %1295 = vmatpush3.msra.mxu1 %v505_v51  ;;  %1262 = vmatpush3.msra.mxu0 %v472_v48  ;;  %v112_v27 = vmul.f32 %v100_v17, %v29_v58  ;;  %v119_v28 = vmul.f32 %v100_v17, %v36_v6  ;;  %v69_v29 = vrot.slane %v1703_v56, %v68_v60  ;;  %v500_v47 = vld [vmem:[%s2378_s3 + $0x100] sm:$0xff] }
  0x1a   :  { %1296 = vmatprep.subr.mxu1 %v520_v52  ;;  %1263 = vmatprep.subr.mxu0 %v487_v61  ;;  %v194_v33 = vadd.f32 %v182_v16, %v111_v21  ;;  %v201_v35 = vadd.f32 %v182_v16, %v118_v22  ;;  %v148_v36 = vrot.slane %v1708_v57, %v1711_v59 }
  0x1b   :  { %1297 = vmatpush3.msra.mxu1 %v504_v62  ;;  %1264 = vmatpush3.msra.mxu0 %v471_v3  ;;  %v195_v39 = vadd.f32 %v183_v23, %v112_v27  ;;  %v202_v40 = vadd.f32 %v183_v23, %v119_v28  ;;  %v1787_v41 = vcombine.low %v65_v18, %v69_v29 }
  0x1c   :  { %1298 = vmatprep.subr.mxu1 %v519_v4  ;;  %1265 = vmatprep.subr.mxu0 %v486_v9  ;;  %v208_v42 = vmax.f32 %v194_v33, 0.0  ;;  %v215_v43 = vmax.f32 %v201_v35, 0.0  ;;  %v1798_v48 = vrot.slane %v1708_v57, %v68_v60  ;;  %v1801_v51 = vrot.slane %v1703_v56, %v72_v24 }
  0x1d   :  { %1299 = vmatpush3.msra.mxu1 %v503_v10  ;;  %1266 = vmatpush3.msra.mxu0 %v470_v14  ;;  %v209_v52 = vmax.f32 %v195_v39, 0.0  ;;  %v216_v53 = vmax.f32 %v202_v40, 0.0  ;;  %v1809_v55 = vrot.slane %v1703_v56, %v76_v30  ;;  %v1812_v58 = vrot.slane %v1708_v57, %v72_v24 }
  0x1e   :  { %1300 = vmatprep.subr.mxu1 %v518_v15  ;;  %1267 = vmatprep.subr.mxu0 %v485_v19  ;;  %v234_v60 = vcombine.high %v208_v42, %v208_v42  ;;  %v240_v61 = vcombine.high %v215_v43, %v215_v43  ;;  %v259_v62 = vsel %vm258_vm0, %v208_v42, 0.0  ;;  %v350_v63 = vsel %vm258_vm0, %v215_v43, 0.0 }
  0x1f   :  { %1301 = vmatpush3.msra.mxu1 %v502_v20  ;;  %1268 = vmatpush3.msra.mxu0 %v469_v25  ;;  %v260_v0 = vrot.slane %v259_v62, 4  ;;  %v351_v1 = vrot.slane %v350_v63, 4  ;;  %v235_v2 = vcombine.high %v209_v52, %v209_v52  ;;  %v241_v3 = vcombine.high %v216_v53, %v216_v53 }
  0x20   :  { %1302 = vmatprep.subr.mxu1 %v517_v26  ;;  %1269 = vmatprep.subr.mxu0 %v484_v31  ;;  %v266_v56 = vsel %vm258_vm0, %v234_v60, 0.0  ;;  %v357_v4 = vsel %vm258_vm0, %v240_v61, 0.0  ;;  %v273_v5 = vsel %vm258_vm0, %v209_v52, 0.0  ;;  %v364_v6 = vsel %vm258_vm0, %v216_v53, 0.0 }
  0x21   :  { %1303 = vmatpush3.msra.mxu1 %v501_v32  ;;  %1270 = vmatpush3.msra.mxu0 %v468_v37  ;;  %v267_v7 = vrot.slane %v266_v56, 4  ;;  %v358_v8 = vrot.slane %v357_v4, 4  ;;  %v261_v9 = vadd.f32 %v260_v0, %v259_v62  ;;  %v352_v10 = vadd.f32 %v351_v1, %v350_v63  ;;  %v21_v62 = vld [vmem:[%s2379_s0 + $0x8] sm:$0xff] }
  0x22   :  { %1304 = vmatprep.subr.mxu1 %v516_v38  ;;  %1309 = vmatprep.subr.mxu0 %v563_v46  ;;  %v280_v11 = vsel %vm258_vm0, %v235_v2, 0.0  ;;  %v371_v12 = vsel %vm258_vm0, %v241_v3, 0.0  ;;  %v274_v13 = vrot.slane %v273_v5, 4  ;;  %v365_v14 = vrot.slane %v364_v6, 4 }
  0x23   :  { %1305 = vmatpush3.msra.mxu1 %v500_v47  ;;  %v268_v15 = vadd.f32 %v267_v7, %v266_v56  ;;  %v359_v16 = vadd.f32 %v358_v8, %v357_v4  ;;  %v262_v17 = vrot.slane %v261_v9, 2  ;;  %v353_v18 = vrot.slane %v352_v10, 2 }
  0x24   :  { %1344 = vmatprep.subr.mxu1 %v595_v54  ;;  %v281_v19 = vrot.slane %v280_v11, 4  ;;  %v372_v20 = vrot.slane %v371_v12, 4  ;;  %v275_v21 = vadd.f32 %v274_v13, %v273_v5  ;;  %v366_v22 = vadd.f32 %v365_v14, %v364_v6  ;;  %v25_v6 = vld [vmem:[%s2379_s0 + $0x22] sm:$0xff] }
  0x25   :  { %v269_v23 = vrot.slane %v268_v15, 2  ;;  %v360_v24 = vrot.slane %v359_v16, 2  ;;  %v263_v25 = vadd.f32 %v262_v17, %v261_v9  ;;  %v354_v26 = vadd.f32 %v353_v18, %v352_v10 }
  0x26   :  { %v282_v27 = vadd.f32 %v281_v19, %v280_v11  ;;  %v373_v28 = vadd.f32 %v372_v20, %v371_v12  ;;  %v276_v29 = vrot.slane %v275_v21, 2  ;;  %v367_v31 = vrot.slane %v366_v22, 2 }
  0x27   :  { %v270_v32 = vadd.f32 %v269_v23, %v268_v15  ;;  %v361_v33 = vadd.f32 %v360_v24, %v359_v16  ;;  %v264_v35 = vrot.slane %v263_v25, 1  ;;  %v355_v37 = vrot.slane %v354_v26, 1  ;;  %v547_v16 = vld [vmem:[%s2378_s3 + $0x278] sm:$0xff] }
  0x28   :  { %v283_v38 = vrot.slane %v282_v27, 2  ;;  %v374_v39 = vrot.slane %v373_v28, 2  ;;  %v277_v40 = vadd.f32 %v276_v29, %v275_v21  ;;  %v368_v42 = vadd.f32 %v367_v31, %v366_v22  ;;  %v562_v22 = vld [vmem:[%s2378_s3 + $0x2f0] sm:$0xff]  ;;  %v579_v29 = vld [vmem:[%s2378_s3 + $0x378] sm:$0xff]  ;;  %v561_v31 = vld [vmem:[%s2378_s3 + $0x2e8] sm:$0xff] }
  0x29   :  { %v271_v43 = vrot.slane %v270_v32, 1  ;;  %v362_v46 = vrot.slane %v361_v33, 1  ;;  %v265_v47 = vadd.f32 %v264_v35, %v263_v25  ;;  %v356_v52 = vadd.f32 %v355_v37, %v354_v26  ;;  %v546_v25 = vld [vmem:[%s2378_s3 + $0x270] sm:$0xff] }
  0x2a   :  { %v284_v53 = vadd.f32 %v283_v38, %v282_v27  ;;  %v375_v54 = vadd.f32 %v374_v39, %v373_v28  ;;  %v278_v60 = vrot.slane %v277_v40, 1  ;;  %v369_v61 = vrot.slane %v368_v42, 1  ;;  %v593_v38 = vld [vmem:[%s2378_s3 + $0x3e8] sm:$0xff]  ;;  %v544_v39 = vld [vmem:[%s2378_s3 + $0x260] sm:$0xff] }
  0x2b   :  { %v272_v63 = vadd.f32 %v271_v43, %v270_v32  ;;  %v363_v0 = vadd.f32 %v362_v46, %v361_v33  ;;  %v442_v1 = vmul.f32 0.25, %v265_v47  ;;  %v455_v2 = vmul.f32 0.25, %v356_v52  ;;  %v559_v46 = vld [vmem:[%s2378_s3 + $0x2d8] sm:$0xff] }
  0x2c   :  { %v285_v3 = vrot.slane %v284_v53, 1  ;;  %v376_v56 = vrot.slane %v375_v54, 1  ;;  %v279_v4 = vadd.f32 %v278_v60, %v277_v40  ;;  %v370_v5 = vadd.f32 %v369_v61, %v368_v42  ;;  %v543_v60 = vld [vmem:[%s2378_s3 + $0x258] sm:$0xff] }
  0x2d   :  { %v443_v7 = vmul.f32 0.25, %v272_v63  ;;  %v456_v8 = vmul.f32 0.25, %v363_v0  ;;  %v710_v9 = vsel %vm709_vm1, %v455_v2, %v442_v1  ;;  %v30_v10 = vunpack.c.l.bf16 %v21_v62  ;;  %v576_v0 = vld [vmem:[%s2378_s3 + $0x360] sm:$0xff]  ;;  %v558_v1 = vld [vmem:[%s2378_s3 + $0x2d0] sm:$0xff] }
  0x2e   :  { %v286_v11 = vadd.f32 %v285_v3, %v284_v53  ;;  %v377_v12 = vadd.f32 %v376_v56, %v375_v54  ;;  %v444_v13 = vmul.f32 0.25, %v279_v4  ;;  %v457_v14 = vmul.f32 0.25, %v370_v5  ;;  %v592_v54 = vld [vmem:[%s2378_s3 + $0x3e0] sm:$0xff]  ;;  %v591_v5 = vld [vmem:[%s2378_s3 + $0x3d8] sm:$0xff] }
  0x2f   :  { %v711_v15 = vsel %vm709_vm1, %v456_v8, %v443_v7  ;;  %v37_v17 = vunpack.c.l.bf16 %v25_v6  ;;  %v113_v18 = vmul.f32 %v1787_v41, %v30_v10  ;;  %v184_v19 = vcombine.low %v148_v36, %v1798_v48  ;;  %v557_v10 = vld [vmem:[%s2378_s3 + $0x2c8] sm:$0xff] }
  0x30   :  { %800 = vmatprep.mubr.f32.mxu0 %v711_v15  ;;  %v445_v20 = vmul.f32 0.25, %v286_v11  ;;  %v458_v21 = vmul.f32 0.25, %v377_v12  ;;  %v712_v23 = vsel %vm709_vm1, %v457_v14, %v444_v13  ;;  %v31_v24 = vunpack.c.h.bf16 %v21_v62  ;;  %v590_v15 = vld [vmem:[%s2378_s3 + $0x3d0] sm:$0xff] }
  0x31   :  { %801 = vmatmul.mubr.f32.vlgmr.msra.gmra.mxu0 %v710_v9  ;;  %v120_v26 = vmul.f32 %v1787_v41, %v37_v17  ;;  %v196_v27 = vadd.f32 %v184_v19, %v113_v18  ;;  %v38_v28 = vunpack.c.h.bf16 %v25_v6  ;;  %v102_v36 = vcombine.low %v1801_v51, %v1809_v55  ;;  %v594_v51 = vld [vmem:[%s2378_s3 + $0x3f0] sm:$0xff]  ;;  %v545_v55 = vld [vmem:[%s2378_s3 + $0x268] sm:$0xff]  ;;  %v575_v9 = vld [vmem:[%s2378_s3 + $0x358] sm:$0xff] }
  0x32   :  { %1310 = vmatpush3.msra.mxu0 %v547_v16  ;;  %v713_v48 = vsel %vm709_vm1, %v458_v21, %v445_v20  ;;  %v160_v41 = vrot.slane %v1708_v57, %v76_v30  ;;  %v560_v57 = vld [vmem:[%s2378_s3 + $0x2e0] sm:$0xff]  ;;  %v542_v6 = vld [vmem:[%s2378_s3 + $0x250] sm:$0xff]  ;;  %v541_v16 = vld [vmem:[%s2378_s3 + $0x248] sm:$0xff] }
  0x33   :  { %870 = vmatprep.mubr.f32.mxu1 %v713_v48  ;;  %1311 = vmatprep.subr.mxu0 %v562_v22  ;;  %v203_v32 = vadd.f32 %v184_v19, %v120_v26  ;;  %v210_v33 = vmax.f32 %v196_v27, 0.0  ;;  %v114_v35 = vmul.f32 %v102_v36, %v31_v24  ;;  %v121_v37 = vmul.f32 %v102_v36, %v38_v28  ;;  %v574_v21 = vld [vmem:[%s2378_s3 + $0x350] sm:$0xff]  ;;  %v556_v22 = vld [vmem:[%s2378_s3 + $0x2c0] sm:$0xff]  ;;  %v589_v27 = vld [vmem:[%s2378_s3 + $0x3c8] sm:$0xff] }
  0x34   :  { %871 = vmatmul.mubr.f32.vlgmr.msra.gmra.mxu1 %v712_v23  ;;  %1312 = vmatpush3.msra.mxu0 %v546_v25  ;;  %v185_v30 = vcombine.low %v1812_v58, %v160_v41  ;;  %v577_v58 = vld [vmem:[%s2378_s3 + $0x368] sm:$0xff]  ;;  %v540_v28 = vld [vmem:[%s2378_s3 + $0x240] sm:$0xff] }
  0x35   :  { %1345 = vmatpush3.msra.mxu1 %v579_v29  ;;  %1313 = vmatprep.subr.mxu0 %v561_v31  ;;  %v217_v40 = vmax.f32 %v203_v32, 0.0  ;;  %v236_v42 = vcombine.high %v210_v33, %v210_v33  ;;  %v287_v43 = vsel %vm258_vm0, %v210_v33, 0.0  ;;  %v573_v41 = vld [vmem:[%s2378_s3 + $0x348] sm:$0xff] }
  0x36   :  { %1346 = vmatprep.subr.mxu1 %v594_v51  ;;  %1314 = vmatpush3.msra.mxu0 %v545_v55  ;;  %v288_v47 = vrot.slane %v287_v43, 4  ;;  %v197_v52 = vadd.f32 %v185_v30, %v114_v35  ;;  %v204_v53 = vadd.f32 %v185_v30, %v121_v37  ;;  %v555_v51 = vld [vmem:[%s2378_s3 + $0x2b8] sm:$0xff]  ;;  %v588_v37 = vld [vmem:[%s2378_s3 + $0x3c0] sm:$0xff] }
  0x37   :  { %1347 = vmatpush3.msra.mxu1 %v578_v34  ;;  %1315 = vmatprep.subr.mxu0 %v560_v57  ;;  %v242_v61 = vcombine.high %v217_v40, %v217_v40  ;;  %v294_v62 = vsel %vm258_vm0, %v236_v42, 0.0  ;;  %v378_v63 = vsel %vm258_vm0, %v217_v40, 0.0  ;;  %v539_v34 = vld [vmem:[%s2378_s3 + $0x238] sm:$0xff]  ;;  %v572_v40 = vld [vmem:[%s2378_s3 + $0x340] sm:$0xff]  ;;  %v554_v42 = vld [vmem:[%s2378_s3 + $0x2b0] sm:$0xff] }
  0x38   :  { %1348 = vmatprep.subr.mxu1 %v593_v38  ;;  %1316 = vmatpush3.msra.mxu0 %v544_v39  ;;  %v295_v2 = vrot.slane %v294_v62, 4  ;;  %v289_v3 = vadd.f32 %v288_v47, %v287_v43  ;;  %v379_v56 = vrot.slane %v378_v63, 4  ;;  %v211_v4 = vmax.f32 %v197_v52, 0.0  ;;  %v587_v52 = vld [vmem:[%s2378_s3 + $0x3b8] sm:$0xff] }
  0x39   :  { %1349 = vmatpush3.msra.mxu1 %v577_v58  ;;  %1317 = vmatprep.subr.mxu0 %v559_v46  ;;  %v385_v7 = vsel %vm258_vm0, %v242_v61, 0.0  ;;  %v218_v8 = vmax.f32 %v204_v53, 0.0  ;;  %v538_v53 = vld [vmem:[%s2378_s3 + $0x230] sm:$0xff] }
  0x3a   :  { %1350 = vmatprep.subr.mxu1 %v592_v54  ;;  %1318 = vmatpush3.msra.mxu0 %v543_v60  ;;  %v296_v11 = vadd.f32 %v295_v2, %v294_v62  ;;  %v386_v12 = vrot.slane %v385_v7, 4  ;;  %v290_v13 = vrot.slane %v289_v3, 2  ;;  %v380_v14 = vadd.f32 %v379_v56, %v378_v63  ;;  %v571_v63 = vld [vmem:[%s2378_s3 + $0x338] sm:$0xff] }
  0x3b   :  { %1351 = vmatpush3.msra.mxu1 %v576_v0  ;;  %1319 = vmatprep.subr.mxu0 %v558_v1  ;;  %v237_v17 = vcombine.high %v211_v4, %v211_v4  ;;  %v243_v18 = vcombine.high %v218_v8, %v218_v8  ;;  %v301_v19 = vsel %vm258_vm0, %v211_v4, 0.0  ;;  %v392_v20 = vsel %vm258_vm0, %v218_v8, 0.0  ;;  %v553_v0 = vld [vmem:[%s2378_s3 + $0x2a8] sm:$0xff]  ;;  %v586_v1 = vld [vmem:[%s2378_s3 + $0x3b0] sm:$0xff] }
  0x3c   :  { %1352 = vmatprep.subr.mxu1 %v591_v5  ;;  %1320 = vmatpush3.msra.mxu0 %v542_v6  ;;  %v297_v23 = vrot.slane %v296_v11, 2  ;;  %v387_v24 = vadd.f32 %v386_v12, %v385_v7  ;;  %v291_v25 = vadd.f32 %v290_v13, %v289_v3  ;;  %v381_v26 = vrot.slane %v380_v14, 2  ;;  %v537_v5 = vld [vmem:[%s2378_s3 + $0x228] sm:$0xff]  ;;  %v570_v12 = vld [vmem:[%s2378_s3 + $0x330] sm:$0xff]  ;;  %v552_v13 = vld [vmem:[%s2378_s3 + $0x2a0] sm:$0xff] }
  0x3d   :  { %1353 = vmatpush3.msra.mxu1 %v575_v9  ;;  %1321 = vmatprep.subr.mxu0 %v557_v10  ;;  %v308_v36 = vsel %vm258_vm0, %v237_v17, 0.0  ;;  %v399_v48 = vsel %vm258_vm0, %v243_v18, 0.0  ;;  %v302_v29 = vrot.slane %v301_v19, 4  ;;  %v393_v31 = vrot.slane %v392_v20, 4  ;;  %v1972_v10 = vld [vmem:[%s2379_s0 + $0x10] sm:$0xff]  ;;  %v536_v18 = vld [vmem:[%s2378_s3 + $0x220] sm:$0xff] }
  0x3e   :  { %1354 = vmatprep.subr.mxu1 %v590_v15  ;;  %1322 = vmatpush3.msra.mxu0 %v541_v16  ;;  %v298_v55 = vadd.f32 %v297_v23, %v296_v11  ;;  %v388_v32 = vrot.slane %v387_v24, 2  ;;  %v292_v33 = vrot.slane %v291_v25, 1  ;;  %v382_v35 = vadd.f32 %v381_v26, %v380_v14  ;;  %v1977_v11 = vld [vmem:[%s2380_s1 + $0x8] sm:$0x1f]  ;;  %v551_v26 = vld [vmem:[%s2378_s3 + $0x298] sm:$0xff] }
  0x3f   :  { %1355 = vmatpush3.msra.mxu1 %v574_v21  ;;  %1323 = vmatprep.subr.mxu0 %v556_v22  ;;  %v309_v57 = vrot.slane %v308_v36, 4  ;;  %v400_v30 = vrot.slane %v399_v48, 4  ;;  %v303_v38 = vadd.f32 %v302_v29, %v301_v19  ;;  %v394_v39 = vadd.f32 %v393_v31, %v392_v20  ;;  %v585_v14 = vld [vmem:[%s2378_s3 + $0x3a8] sm:$0xff]  ;;  %v584_v29 = vld [vmem:[%s2378_s3 + $0x3a0] sm:$0xff]  ;;  %v535_v31 = vld [vmem:[%s2378_s3 + $0x218] sm:$0xff] }
  0x40   :  { %1356 = vmatprep.subr.mxu1 %v589_v27  ;;  %1324 = vmatpush3.msra.mxu0 %v540_v28  ;;  %v299_v43 = vrot.slane %v298_v55, 1  ;;  %v389_v58 = vadd.f32 %v388_v32, %v387_v24  ;;  %v293_v46 = vadd.f32 %v292_v33, %v291_v25  ;;  %v383_v47 = vrot.slane %v382_v35, 1  ;;  %v1994_v23 = vld [vmem:[%s2379_s0 + $0x2a] sm:$0xff]  ;;  %v568_v33 = vld [vmem:[%s2378_s3 + $0x320] sm:$0xff] }
  0x41   :  { %1357 = vmatpush3.msra.mxu1 %v573_v41  ;;  %1325 = vmatprep.subr.mxu0 %v555_v51  ;;  %v310_v54 = vadd.f32 %v309_v57, %v308_v36  ;;  %v401_v60 = vadd.f32 %v400_v30, %v399_v48  ;;  %v304_v61 = vrot.slane %v303_v38, 2  ;;  %v395_v62 = vrot.slane %v394_v39, 2  ;;  %v1999_v24 = vld [vmem:[%s2381_s2 + $0x8] sm:$0x1f] }
  0x42   :  { %1358 = vmatprep.subr.mxu1 %v588_v37  ;;  %1326 = vmatpush3.msra.mxu0 %v539_v34  ;;  %v300_v2 = vadd.f32 %v299_v43, %v298_v55  ;;  %v390_v3 = vrot.slane %v389_v58, 1  ;;  %v384_v56 = vadd.f32 %v383_v47, %v382_v35  ;;  %v446_v4 = vmul.f32 0.25, %v293_v46  ;;  %v569_v25 = vld [vmem:[%s2378_s3 + $0x328] sm:$0xff]  ;;  %v550_v35 = vld [vmem:[%s2378_s3 + $0x290] sm:$0xff] }
  0x43   :  { %1359 = vmatpush3.msra.mxu1 %v572_v40  ;;  %1327 = vmatprep.subr.mxu0 %v554_v42  ;;  %v311_v6 = vrot.slane %v310_v54, 2  ;;  %v402_v7 = vrot.slane %v401_v60, 2  ;;  %v305_v8 = vadd.f32 %v304_v61, %v303_v38  ;;  %v396_v9 = vadd.f32 %v395_v62, %v394_v39  ;;  %v583_v38 = vld [vmem:[%s2378_s3 + $0x398] sm:$0xff]  ;;  %v534_v39 = vld [vmem:[%s2378_s3 + $0x210] sm:$0xff] }
  0x44   :  { %1360 = vmatprep.subr.mxu1 %v587_v52  ;;  %1328 = vmatpush3.msra.mxu0 %v538_v53  ;;  %v391_v15 = vadd.f32 %v390_v3, %v389_v58  ;;  %v447_v16 = vmul.f32 0.25, %v300_v2  ;;  %v459_v17 = vmul.f32 0.25, %v384_v56  ;;  %v32_v36 = vunpack.c.l.bf16 %v1972_v10  ;;  %v567_v40 = vld [vmem:[%s2378_s3 + $0x318] sm:$0xff]  ;;  %v27_v61 = vld [vmem:[%s2379_s0 + $0x32] sm:$0x3]  ;;  %v548_v56 = vld [vmem:[%s2378_s3 + $0x280] sm:$0xff] }
  0x45   :  { %1361 = vmatpush3.msra.mxu1 %v571_v63  ;;  %1329 = vmatprep.subr.mxu0 %v553_v0  ;;  %v312_v19 = vadd.f32 %v311_v6, %v310_v54  ;;  %v403_v20 = vadd.f32 %v402_v7, %v401_v60  ;;  %v306_v21 = vrot.slane %v305_v8, 1  ;;  %v397_v22 = vrot.slane %v396_v9, 1  ;;  %v23_v60 = vld [vmem:[%s2379_s0 + $0x18] sm:$0x3]  ;;  %v582_v62 = vld [vmem:[%s2378_s3 + $0x390] sm:$0xff] }
  0x46   :  { %1362 = vmatprep.subr.mxu1 %v586_v1  ;;  %1330 = vmatpush3.msra.mxu0 %v537_v5  ;;  %v460_v27 = vmul.f32 0.25, %v391_v15  ;;  %v2008_v28 = vsel %vm709_vm1, %v459_v17, %v446_v4  ;;  %v81_v48 = vrot.slane %v1977_v11, %v1668_v44  ;;  %v39_v34 = vunpack.c.l.bf16 %v1994_v23  ;;  %v566_v3 = vld [vmem:[%s2378_s3 + $0x310] sm:$0xff]  ;;  %v565_v15 = vld [vmem:[%s2378_s3 + $0x308] sm:$0xff] }
  0x47   :  { %1363 = vmatpush3.msra.mxu1 %v570_v12  ;;  %1331 = vmatprep.subr.mxu0 %v552_v13  ;;  %v313_v41 = vrot.slane %v312_v19, 1  ;;  %v404_v51 = vrot.slane %v403_v20, 1  ;;  %v307_v55 = vadd.f32 %v306_v21, %v305_v8  ;;  %v398_v32 = vadd.f32 %v397_v22, %v396_v9  ;;  %v581_v8 = vld [vmem:[%s2378_s3 + $0x388] sm:$0xff]  ;;  %v532_v9 = vld [vmem:[%s2378_s3 + $0x200] sm:$0xff]  ;;  %v627_v22 = vld [vmem:[%s2378_s3 + $0x4f8] sm:$0xff] }
  0x48   :  { %1364 = vmatprep.subr.mxu1 %v585_v14  ;;  %1332 = vmatpush3.msra.mxu0 %v536_v18  ;;  %v2026_v37 = vsel %vm709_vm1, %v460_v27, %v447_v16  ;;  %v85_v57 = vrot.slane %v1977_v11, %v1671_v45  ;;  %v164_v30 = vrot.slane %v1999_v24, %v1668_v44  ;;  %v549_v44 = vld [vmem:[%s2378_s3 + $0x288] sm:$0xff]  ;;  %v33_v53 = vunpack.c.h.bf16 %v1972_v10 }
  0x49   :  { %1365 = vmatpush3.msra.mxu1 %v569_v25  ;;  %1333 = vmatprep.subr.mxu0 %v551_v26  ;;  %v314_v42 = vadd.f32 %v313_v41, %v312_v19  ;;  %v405_v43 = vadd.f32 %v404_v51, %v403_v20  ;;  %v448_v58 = vmul.f32 0.25, %v307_v55  ;;  %v461_v46 = vmul.f32 0.25, %v398_v32  ;;  %v580_v19 = vld [vmem:[%s2378_s3 + $0x380] sm:$0xff]  ;;  %v659_v55 = vld [vmem:[%s2378_s3 + $0x5f8] sm:$0xff] }
  0x4a   :  { %1366 = vmatprep.subr.mxu1 %v584_v29  ;;  %1334 = vmatpush3.msra.mxu0 %v535_v31  ;;  %v103_v47 = vcombine.low %v81_v48, %v85_v57  ;;  %v168_v52 = vrot.slane %v1999_v24, %v1671_v45  ;;  %v89_v54 = vrot.slane %v1977_v11, %v1683_v49  ;;  %v533_v45 = vld [vmem:[%s2378_s3 + $0x208] sm:$0xff]  ;;  %v40_v1 = vunpack.c.h.bf16 %v1994_v23  ;;  %v626_v31 = vld [vmem:[%s2378_s3 + $0x4f0] sm:$0xff] }
  0x4b   :  { %1367 = vmatpush3.msra.mxu1 %v568_v33  ;;  %1335 = vmatprep.subr.mxu0 %v550_v35  ;;  %v449_v63 = vmul.f32 0.25, %v314_v42  ;;  %v2063_v0 = vsel %vm709_vm1, %v461_v46, %v448_v58  ;;  %v93_v2 = vrot.slane %v1977_v11, %v1686_v50  ;;  %v462_v4 = vmul.f32 0.25, %v405_v43  ;;  %v625_v57 = vld [vmem:[%s2378_s3 + $0x4e8] sm:$0xff]  ;;  %v658_v42 = vld [vmem:[%s2378_s3 + $0x5f0] sm:$0xff] }
  0x4c   :  { %1368 = vmatprep.subr.mxu1 %v583_v38  ;;  %1336 = vmatpush3.msra.mxu0 %v534_v39  ;;  %v115_v5 = vmul.f32 %v103_v47, %v32_v36  ;;  %v122_v6 = vmul.f32 %v103_v47, %v39_v34  ;;  %v186_v7 = vcombine.low %v164_v30, %v168_v52  ;;  %v34_v13 = vunpack.c.l.bf16 %v23_v60  ;;  %v611_v36 = vld [vmem:[%s2378_s3 + $0x478] sm:$0xff]  ;;  %v609_v43 = vld [vmem:[%s2378_s3 + $0x468] sm:$0xff]  ;;  %v642_v52 = vld [vmem:[%s2378_s3 + $0x570] sm:$0xff] }
  0x4d   :  { %1369 = vmatpush3.msra.mxu1 %v567_v40  ;;  %1337 = vmatprep.subr.mxu0 %v549_v44  ;;  %v104_v10 = vcombine.low %v89_v54, %v93_v2  ;;  %v172_v12 = vrot.slane %v1999_v24, %v1683_v49  ;;  %v41_v14 = vunpack.c.l.bf16 %v27_v61  ;;  %v176_v18 = vrot.slane %v1999_v24, %v1686_v50  ;;  %v564_v50 = vld [vmem:[%s2378_s3 + $0x300] sm:$0xff]  ;;  %v643_v34 = vld [vmem:[%s2378_s3 + $0x578] sm:$0xff] }
  0x4e   :  { %1370 = vmatprep.subr.mxu1 %v582_v62  ;;  %1338 = vmatpush3.msra.mxu0 %v533_v45  ;;  %v198_v16 = vadd.f32 %v186_v7, %v115_v5  ;;  %v205_v17 = vadd.f32 %v186_v7, %v122_v6  ;;  %v97_v21 = vrot.slane %v1977_v11, %v1711_v59  ;;  %v657_v45 = vld [vmem:[%s2378_s3 + $0x5e8] sm:$0xff] }
  0x4f   :  { %1371 = vmatpush3.msra.mxu1 %v566_v3  ;;  %1339 = vmatprep.subr.mxu0 %v548_v56  ;;  %v116_v49 = vmul.f32 %v104_v10, %v33_v53  ;;  %v123_v20 = vmul.f32 %v104_v10, %v40_v1  ;;  %v187_v26 = vcombine.low %v172_v12, %v176_v18  ;;  %v624_v53 = vld [vmem:[%s2378_s3 + $0x4e0] sm:$0xff]  ;;  %v641_v56 = vld [vmem:[%s2378_s3 + $0x568] sm:$0xff]  ;;  %v607_v10 = vld [vmem:[%s2378_s3 + $0x458] sm:$0xff] }
  0x50   :  { %1372 = vmatprep.subr.mxu1 %v581_v8  ;;  %1340 = vmatpush3.msra.mxu0 %v532_v9  ;;  %v212_v23 = vmax.f32 %v198_v16, 0.0  ;;  %v219_v25 = vmax.f32 %v205_v17, 0.0  ;;  %v180_v27 = vrot.slane %v1999_v24, %v1711_v59  ;;  %v717_v11 = vsel %vm709_vm1, %v462_v4, %v449_v63  ;;  %v608_v63 = vld [vmem:[%s2378_s3 + $0x460] sm:$0xff]  ;;  %v623_v4 = vld [vmem:[%s2378_s3 + $0x4d8] sm:$0xff]  ;;  %v622_v17 = vld [vmem:[%s2378_s3 + $0x4d0] sm:$0xff] }
  0x51   :  { %940 = vmatprep.mubr.f32.mxu0 %v2026_v37  ;;  %1373 = vmatpush3.msra.mxu1 %v565_v15  ;;  %v117_v48 = vmul.f32 %v97_v21, %v34_v13  ;;  %v124_v29 = vmul.f32 %v97_v21, %v41_v14  ;;  %v199_v35 = vadd.f32 %v187_v26, %v116_v49  ;;  %v656_v9 = vld [vmem:[%s2378_s3 + $0x5e0] sm:$0xff]  ;;  %v655_v21 = vld [vmem:[%s2378_s3 + $0x5d8] sm:$0xff] }
  0x52   :  { %941 = vmatmul.mubr.f32.vlgmr.msra.gmra.mxu0 %v2008_v28  ;;  %1374 = vmatprep.subr.mxu1 %v580_v19  ;;  %v238_v41 = vcombine.high %v212_v23, %v212_v23  ;;  %v244_v59 = vcombine.high %v219_v25, %v219_v25  ;;  %v315_v24 = vsel %vm258_vm0, %v212_v23, 0.0  ;;  %v406_v51 = vsel %vm258_vm0, %v219_v25, 0.0  ;;  %v610_v28 = vld [vmem:[%s2378_s3 + $0x470] sm:$0xff]  ;;  %v640_v16 = vld [vmem:[%s2378_s3 + $0x560] sm:$0xff] }
  0x53   :  { %1379 = vmatprep.subr.mxu0 %v627_v22  ;;  %1375 = vmatpush3.msra.mxu1 %v564_v50  ;;  %v316_v32 = vrot.slane %v315_v24, 4  ;;  %v407_v33 = vrot.slane %v406_v51, 4  ;;  %v206_v37 = vadd.f32 %v187_v26, %v123_v20  ;;  %v2125_v39 = vadd.f32 %v180_v27, %v117_v48  ;;  %v606_v22 = vld [vmem:[%s2378_s3 + $0x450] sm:$0xff] }
  0x54   :  { %1010 = vmatprep.mubr.f32.mxu1 %v717_v11  ;;  %1380 = vmatpush3.msra.mxu0 %v611_v36  ;;  %v322_v30 = vsel %vm258_vm0, %v238_v41, 0.0  ;;  %v413_v38 = vsel %vm258_vm0, %v244_v59, 0.0  ;;  %v2127_v40 = vadd.f32 %v180_v27, %v124_v29  ;;  %v213_v54 = vmax.f32 %v199_v35, 0.0  ;;  %v639_v27 = vld [vmem:[%s2378_s3 + $0x558] sm:$0xff]  ;;  %v621_v11 = vld [vmem:[%s2378_s3 + $0x4c8] sm:$0xff]  ;;  %v654_v41 = vld [vmem:[%s2378_s3 + $0x5d0] sm:$0xff] }
  0x55   :  { %1011 = vmatmul.mubr.f32.vlgmr.msra.gmra.mxu1 %v2063_v0  ;;  %1381 = vmatprep.subr.mxu0 %v626_v31  ;;  %v323_v58 = vrot.slane %v322_v30, 4  ;;  %v414_v46 = vrot.slane %v413_v38, 4  ;;  %v317_v44 = vadd.f32 %v316_v32, %v315_v24  ;;  %v408_v47 = vadd.f32 %v407_v33, %v406_v51  ;;  %v605_v59 = vld [vmem:[%s2378_s3 + $0x448] sm:$0xff]  ;;  %v638_v32 = vld [vmem:[%s2378_s3 + $0x550] sm:$0xff]  ;;  %v620_v33 = vld [vmem:[%s2378_s3 + $0x4c0] sm:$0xff] }
  0x56   :  { %1414 = vmatprep.subr.mxu1 %v659_v55  ;;  %1382 = vmatpush3.msra.mxu0 %v610_v28  ;;  %v220_v60 = vmax.f32 %v206_v37, 0.0  ;;  %v214_v61 = vmax.f32 %v2125_v39, 0.0  ;;  %v221_v62 = vmax.f32 %v2127_v40, 0.0  ;;  %v239_v5 = vcombine.high %v213_v54, %v213_v54  ;;  %v651_v39 = vld [vmem:[%s2378_s3 + $0x5b8] sm:$0xff]  ;;  %v650_v40 = vld [vmem:[%s2378_s3 + $0x5b0] sm:$0xff] }
  0x57   :  { %1415 = vmatpush3.msra.mxu1 %v643_v34  ;;  %1383 = vmatprep.subr.mxu0 %v625_v57  ;;  %v324_v0 = vadd.f32 %v323_v58, %v322_v30  ;;  %v415_v1 = vadd.f32 %v414_v46, %v413_v38  ;;  %v318_v2 = vrot.slane %v317_v44, 2  ;;  %v409_v3 = vrot.slane %v408_v47, 2  ;;  %v653_v30 = vld [vmem:[%s2378_s3 + $0x5c8] sm:$0xff]  ;;  %v604_v38 = vld [vmem:[%s2378_s3 + $0x440] sm:$0xff] }
  0x58   :  { %1416 = vmatprep.subr.mxu1 %v658_v42  ;;  %1384 = vmatpush3.msra.mxu0 %v609_v43  ;;  %v245_v6 = vcombine.high %v220_v60, %v220_v60  ;;  %v329_v7 = vsel %vm258_vm0, %v213_v54, 0.0  ;;  %v420_v8 = vsel %vm258_vm0, %v220_v60, 0.0  ;;  %v336_v18 = vsel %vm258_vm0, %v239_v5, 0.0 }
  0x59   :  { %1417 = vmatpush3.msra.mxu1 %v642_v52  ;;  %1385 = vmatprep.subr.mxu0 %v624_v53  ;;  %v325_v12 = vrot.slane %v324_v0, 2  ;;  %v416_v13 = vrot.slane %v415_v1, 2  ;;  %v319_v14 = vadd.f32 %v318_v2, %v317_v44  ;;  %v410_v15 = vadd.f32 %v409_v3, %v408_v47  ;;  %v637_v44 = vld [vmem:[%s2378_s3 + $0x548] sm:$0xff]  ;;  %v619_v47 = vld [vmem:[%s2378_s3 + $0x4b8] sm:$0xff] }
  0x5a   :  { %1418 = vmatprep.subr.mxu1 %v657_v45  ;;  %1386 = vmatpush3.msra.mxu0 %v608_v63  ;;  %v427_v19 = vsel %vm258_vm0, %v245_v6, 0.0  ;;  %v330_v49 = vrot.slane %v329_v7, 4  ;;  %v421_v20 = vrot.slane %v420_v8, 4  ;;  %v337_v36 = vrot.slane %v336_v18, 4  ;;  %v652_v45 = vld [vmem:[%s2378_s3 + $0x5c0] sm:$0xff]  ;;  %v603_v63 = vld [vmem:[%s2378_s3 + $0x438] sm:$0xff] }
  0x5b   :  { %1419 = vmatpush3.msra.mxu1 %v641_v56  ;;  %1387 = vmatprep.subr.mxu0 %v623_v4  ;;  %v326_v50 = vadd.f32 %v325_v12, %v324_v0  ;;  %v417_v23 = vadd.f32 %v416_v13, %v415_v1  ;;  %v320_v25 = vrot.slane %v319_v14, 1  ;;  %v411_v26 = vrot.slane %v410_v15, 1  ;;  %v636_v56 = vld [vmem:[%s2378_s3 + $0x540] sm:$0xff]  ;;  %v618_v4 = vld [vmem:[%s2378_s3 + $0x4b0] sm:$0xff]  ;;  %v635_v13 = vld [vmem:[%s2378_s3 + $0x538] sm:$0xff] }
  0x5c   :  { %1420 = vmatprep.subr.mxu1 %v656_v9  ;;  %1388 = vmatpush3.msra.mxu0 %v607_v10  ;;  %v428_v48 = vrot.slane %v427_v19, 4  ;;  %v331_v29 = vadd.f32 %v330_v49, %v329_v7  ;;  %v422_v31 = vadd.f32 %v421_v20, %v420_v8  ;;  %v338_v35 = vadd.f32 %v337_v36, %v336_v18  ;;  %v634_v20 = vld [vmem:[%s2378_s3 + $0x530] sm:$0xff] }
  0x5d   :  { %1421 = vmatpush3.msra.mxu1 %v640_v16  ;;  %1389 = vmatprep.subr.mxu0 %v622_v17  ;;  %v327_v24 = vrot.slane %v326_v50, 1  ;;  %v418_v51 = vrot.slane %v417_v23, 1  ;;  %v321_v55 = vadd.f32 %v320_v25, %v319_v14  ;;  %v412_v28 = vadd.f32 %v411_v26, %v410_v15  ;;  %v617_v14 = vld [vmem:[%s2378_s3 + $0x4a8] sm:$0xff] }
  0x5e   :  { %1422 = vmatprep.subr.mxu1 %v655_v21  ;;  %1390 = vmatpush3.msra.mxu0 %v606_v22  ;;  %v429_v37 = vadd.f32 %v428_v48, %v427_v19  ;;  %v332_v34 = vrot.slane %v331_v29, 2  ;;  %v423_v57 = vrot.slane %v422_v31, 2  ;;  %v339_v52 = vrot.slane %v338_v35, 2  ;;  %v616_v21 = vld [vmem:[%s2378_s3 + $0x4a0] sm:$0xff]  ;;  %v649_v26 = vld [vmem:[%s2378_s3 + $0x5a8] sm:$0xff] }
  0x5f   :  { %1423 = vmatpush3.msra.mxu1 %v639_v27  ;;  %1391 = vmatprep.subr.mxu0 %v621_v11  ;;  %v328_v42 = vadd.f32 %v327_v24, %v326_v50  ;;  %v419_v43 = vadd.f32 %v418_v51, %v417_v23  ;;  %v450_v58 = vmul.f32 0.25, %v321_v55  ;;  %v463_v46 = vmul.f32 0.25, %v412_v28  ;;  %v600_v27 = vld [vmem:[%s2378_s3 + $0x420] sm:$0xff]  ;;  %v633_v48 = vld [vmem:[%s2378_s3 + $0x528] sm:$0xff]  ;;  %v599_v51 = vld [vmem:[%s2378_s3 + $0x418] sm:$0xff] }
  0x60   :  { %1424 = vmatprep.subr.mxu1 %v654_v41  ;;  %1392 = vmatpush3.msra.mxu0 %v605_v59  ;;  %v430_v53 = vrot.slane %v429_v37, 2  ;;  %v333_v54 = vadd.f32 %v332_v34, %v331_v29  ;;  %v424_v60 = vadd.f32 %v423_v57, %v422_v31  ;;  %v343_v3 = vsel %vm258_vm0, %v214_v61, 0.0  ;;  %v602_v61 = vld [vmem:[%s2378_s3 + $0x430] sm:$0xff]  ;;  %v615_v29 = vld [vmem:[%s2378_s3 + $0x498] sm:$0xff]  ;;  %v648_v24 = vld [vmem:[%s2378_s3 + $0x5a0] sm:$0xff] }
  0x61   :  { %1425 = vmatpush3.msra.mxu1 %v638_v32  ;;  %1393 = vmatprep.subr.mxu0 %v620_v33  ;;  %v451_v0 = vmul.f32 0.25, %v328_v42  ;;  %v464_v1 = vmul.f32 0.25, %v419_v43  ;;  %v2215_v2 = vsel %vm709_vm1, %v463_v46, %v450_v58  ;;  %v340_v5 = vadd.f32 %v339_v52, %v338_v35  ;;  %v632_v32 = vld [vmem:[%s2378_s3 + $0x520] sm:$0xff]  ;;  %v614_v33 = vld [vmem:[%s2378_s3 + $0x490] sm:$0xff]  ;;  %v613_v42 = vld [vmem:[%s2378_s3 + $0x488] sm:$0xff] }
  0x62   :  { %1426 = vmatprep.subr.mxu1 %v653_v30  ;;  %1394 = vmatpush3.msra.mxu0 %v604_v38  ;;  %v431_v6 = vadd.f32 %v430_v53, %v429_v37  ;;  %v334_v7 = vrot.slane %v333_v54, 1  ;;  %v425_v8 = vrot.slane %v424_v60, 1  ;;  %v344_v10 = vrot.slane %v343_v3, 4  ;;  %v647_v37 = vld [vmem:[%s2378_s3 + $0x598] sm:$0xff]  ;;  %v598_v34 = vld [vmem:[%s2378_s3 + $0x410] sm:$0xff]  ;;  %v597_v58 = vld [vmem:[%s2378_s3 + $0x408] sm:$0xff] }
  0x63   :  { %1427 = vmatpush3.msra.mxu1 %v637_v44  ;;  %1395 = vmatprep.subr.mxu0 %v619_v47  ;;  %v2233_v9 = vsel %vm709_vm1, %v464_v1, %v451_v0  ;;  %v434_v12 = vsel %vm258_vm0, %v221_v62, 0.0  ;;  %v341_v15 = vrot.slane %v340_v5, 1  ;;  %v601_v62 = vld [vmem:[%s2378_s3 + $0x428] sm:$0xff]  ;;  %v631_v38 = vld [vmem:[%s2378_s3 + $0x518] sm:$0xff]  ;;  %v646_v43 = vld [vmem:[%s2378_s3 + $0x590] sm:$0xff] }
  0x64   :  { %1428 = vmatprep.subr.mxu1 %v652_v45  ;;  %1396 = vmatpush3.msra.mxu0 %v603_v63  ;;  %v432_v16 = vrot.slane %v431_v6, 1  ;;  %v335_v17 = vadd.f32 %v334_v7, %v333_v54  ;;  %v426_v18 = vadd.f32 %v425_v8, %v424_v60  ;;  %v345_v19 = vadd.f32 %v344_v10, %v343_v3  ;;  %v630_v47 = vld [vmem:[%s2378_s3 + $0x510] sm:$0xff]  ;;  %v612_v52 = vld [vmem:[%s2378_s3 + $0x480] sm:$0xff]  ;;  %v645_v53 = vld [vmem:[%s2378_s3 + $0x588] sm:$0xff] }
  0x65   :  { %1429 = vmatpush3.msra.mxu1 %v636_v56  ;;  %1397 = vmatprep.subr.mxu0 %v618_v4  ;;  %v435_v49 = vrot.slane %v434_v12, 4  ;;  %v342_v22 = vadd.f32 %v341_v15, %v340_v5  ;;  %v596_v54 = vld [vmem:[%s2378_s3 + $0x400] sm:$0xff]  ;;  %v629_v63 = vld [vmem:[%s2378_s3 + $0x508] sm:$0xff]  ;;  %v675_v56 = vld [vmem:[%s2378_s3 + $0x678] sm:$0xff]  ;;  %v1507_v5 = vmov 0.0  }
  0x66   :  { %1430 = vmatprep.subr.mxu1 %v651_v39  ;;  %1398 = vmatpush3.msra.mxu0 %v602_v61  ;;  %v433_v50 = vadd.f32 %v432_v16, %v431_v6  ;;  %v452_v23 = vmul.f32 0.25, %v335_v17  ;;  %v465_v25 = vmul.f32 0.25, %v426_v18  ;;  %v346_v11 = vrot.slane %v345_v19, 2  ;;  %v644_v0 = vld [vmem:[%s2378_s3 + $0x580] sm:$0xff]  ;;  %v674_v6 = vld [vmem:[%s2378_s3 + $0x670] sm:$0xff]  ;;  %v673_v7 = vld [vmem:[%s2378_s3 + $0x668] sm:$0xff] }
  0x67   :  { %1431 = vmatpush3.msra.mxu1 %v635_v13  ;;  %1399 = vmatprep.subr.mxu0 %v617_v14  ;;  %v436_v36 = vadd.f32 %v435_v49, %v434_v12  ;;  %v453_v31 = vmul.f32 0.25, %v342_v22  ;;  %v628_v3 = vld [vmem:[%s2378_s3 + $0x500] sm:$0xff]  ;;  %v671_v8 = vld [vmem:[%s2378_s3 + $0x658] sm:$0xff]  ;;  %v670_v39 = vld [vmem:[%s2378_s3 + $0x650] sm:$0xff] }
  0x68   :  { %1432 = vmatprep.subr.mxu1 %v650_v40  ;;  %1400 = vmatpush3.msra.mxu0 %v601_v62  ;;  %v466_v41 = vmul.f32 0.25, %v433_v50  ;;  %v720_v59 = vsel %vm709_vm1, %v465_v25, %v452_v23  ;;  %v347_v55 = vadd.f32 %v346_v11, %v345_v19  ;;  %v669_v61 = vld [vmem:[%s2378_s3 + $0x648] sm:$0xff]  ;;  %v667_v10 = vld [vmem:[%s2378_s3 + $0x638] sm:$0xff]  ;;  %v666_v12 = vld [vmem:[%s2378_s3 + $0x630] sm:$0xff] }
  0x69   :  { %1433 = vmatpush3.msra.mxu1 %v634_v20  ;;  %1401 = vmatprep.subr.mxu0 %v616_v21  ;;  %v437_v28 = vrot.slane %v436_v36, 2  ;;  %v665_v13 = vld [vmem:[%s2378_s3 + $0x628] sm:$0xff]  ;;  %v664_v14 = vld [vmem:[%s2378_s3 + $0x620] sm:$0xff]  ;;  %v663_v15 = vld [vmem:[%s2378_s3 + $0x618] sm:$0xff] }
  0x6a   :  { %1434 = vmatprep.subr.mxu1 %v649_v26  ;;  %1402 = vmatpush3.msra.mxu0 %v600_v27  ;;  %v721_v35 = vsel %vm709_vm1, %v466_v41, %v453_v31  ;;  %v348_v57 = vrot.slane %v347_v55, 1  ;;  %v662_v16 = vld [vmem:[%s2378_s3 + $0x610] sm:$0xff]  ;;  %v661_v17 = vld [vmem:[%s2378_s3 + $0x608] sm:$0xff]  ;;  %v660_v18 = vld [vmem:[%s2378_s3 + $0x600] sm:$0xff] }
  0x6b   :  { %1435 = vmatpush3.msra.mxu1 %v633_v48  ;;  %1403 = vmatprep.subr.mxu0 %v615_v29  ;;  %v438_v30 = vadd.f32 %v437_v28, %v436_v36  ;;  %v1237_v21 = vld [vmem:[%s2382_s4] ss:$0 sm:$0xff] }
  0x6c   :  { %1436 = vmatprep.subr.mxu1 %v648_v24  ;;  %1404 = vmatpush3.msra.mxu0 %v599_v51  ;;  %v349_v46 = vadd.f32 %v348_v57, %v347_v55 }
  0x6d   :  { %1437 = vmatpush3.msra.mxu1 %v632_v32  ;;  %1405 = vmatprep.subr.mxu0 %v614_v33  ;;  %v439_v44 = vrot.slane %v438_v30, 1 }
  0x6e   :  { %1438 = vmatprep.subr.mxu1 %v647_v37  ;;  %1406 = vmatpush3.msra.mxu0 %v598_v34  ;;  %v454_v45 = vmul.f32 0.25, %v349_v46 }
  0x6f   :  { %1439 = vmatpush3.msra.mxu1 %v631_v38  ;;  %1407 = vmatprep.subr.mxu0 %v613_v42  ;;  %v440_v60 = vadd.f32 %v439_v44, %v438_v30 }
  0x70   :  { %1440 = vmatprep.subr.mxu1 %v646_v43  ;;  %1408 = vmatpush3.msra.mxu0 %v597_v58 }
  0x71   :  { %1441 = vmatpush3.msra.mxu1 %v630_v47  ;;  %1409 = vmatprep.subr.mxu0 %v612_v52  ;;  %v467_v1 = vmul.f32 0.25, %v440_v60 }
  0x72   :  { %1442 = vmatprep.subr.mxu1 %v645_v53  ;;  %1410 = vmatpush3.msra.mxu0 %v596_v54 }
  0x73   :  { %1080 = vmatprep.mubr.f32.mxu0 %v2233_v9  ;;  %1443 = vmatpush3.msra.mxu1 %v629_v63  ;;  %v722_v4 = vsel %vm709_vm1, %v467_v1, %v454_v45  ;;  %v668_v9 = vld [vmem:[%s2378_s3 + $0x640] sm:$0xff] }
  0x74   :  { %1081 = vmatmul.mubr.f32.vlgmr.msra.gmra.mxu0 %v2215_v2  ;;  %1444 = vmatprep.subr.mxu1 %v644_v0  ;;  %v672_v2 = vld [vmem:[%s2378_s3 + $0x660] sm:$0xff] }
  0x75   :  { %1466 = vmatprep.subr.mxu0 %v1507_v5  ;;  %1445 = vmatpush3.msra.mxu1 %v628_v3 }
  0x76   :  { %1150 = vmatprep.mubr.f32.mxu1 %v721_v35  ;;  %1467 = vmatpush3.msra.mxu0 %v675_v56 }
  0x77   :  { %1151 = vmatmul.mubr.f32.vlgmr.msra.gmra.mxu1 %v720_v59  ;;  %1468 = vmatprep.subr.mxu0 %v1507_v5 }
  0x78   :  { %1469 = vmatpush3.msra.mxu0 %v674_v6  ;;  %1498 = vmatprep.mubr.msk.f32.mxu0 %vm1508_vm2, %v1507_v5 }
  0x79   :  { %1470 = vmatprep.subr.mxu0 %v1507_v5 }
  0x7a   :  { %1471 = vmatpush3.msra.mxu0 %v673_v7 }
  0x7b   :  { %1472 = vmatprep.subr.mxu0 %v1507_v5 }
  0x7c   :  { %1473 = vmatpush3.msra.mxu0 %v672_v2 }
  0x7d   :  { %1474 = vmatprep.subr.mxu0 %v1507_v5 }
  0x7e   :  { %1475 = vmatpush3.msra.mxu0 %v671_v8 }
  0x7f   :  { %1476 = vmatprep.subr.mxu0 %v1507_v5 }
  0x80   :  { %1477 = vmatpush3.msra.mxu0 %v670_v39 }
  0x81   :  { %1478 = vmatprep.subr.mxu0 %v1507_v5 }
  0x82   :  { %1479 = vmatpush3.msra.mxu0 %v669_v61 }
  0x83   :  { %1480 = vmatprep.subr.mxu0 %v1507_v5 }
  0x84   :  { %1481 = vmatpush3.msra.mxu0 %v668_v9 }
  0x85   :  { %1482 = vmatprep.subr.mxu0 %v1507_v5 }
  0x86   :  { %1483 = vmatpush3.msra.mxu0 %v667_v10 }
  0x87   :  { %1484 = vmatprep.subr.mxu0 %v1507_v5 }
  0x88   :  { %1485 = vmatpush3.msra.mxu0 %v666_v12 }
  0x89   :  { %1486 = vmatprep.subr.mxu0 %v1507_v5 }
  0x8a   :  { %1487 = vmatpush3.msra.mxu0 %v665_v13 }
  0x8b   :  { %1488 = vmatprep.subr.mxu0 %v1507_v5 }
  0x8c   :  { %1489 = vmatpush3.msra.mxu0 %v664_v14 }
  0x8d   :  { %1490 = vmatprep.subr.mxu0 %v1507_v5 }
  0x8e   :  { %1491 = vmatpush3.msra.mxu0 %v663_v15 }
  0x8f   :  { %1492 = vmatprep.subr.mxu0 %v1507_v5 }
  0x90   :  { %1493 = vmatpush3.msra.mxu0 %v662_v16 }
  0x91   :  { %1494 = vmatprep.subr.mxu0 %v1507_v5 }
  0x92   :  { %1495 = vmatpush3.msra.mxu0 %v661_v17 }
  0x93   :  { %1496 = vmatprep.subr.mxu0 %v1507_v5 }
  0x94   :  { %1497 = vmatpush3.msra.mxu0 %v660_v18 }
  0x95   :  { %1499 = vmatmul.mubr.f32.vlgmr.msra.gmra.mxu0 %v722_v4 }
  0xf1   :  { %v1271_v40 = vpop.f32.mrf.mxu0 }
  0xf3   :  { %v1272_v62 = vpop.f32.mrf.mxu0 }
  0xf4   :  { %v1306_v19 = vpop.f32.mrf.mxu1  ;;  %v1273_v20 = vadd.f32 %v1272_v62, %v1271_v40 }
  0xf6   :  { %v1307_v22 = vpop.f32.mrf.mxu1  ;;  %v803_v25 = vadd.f32 %v1273_v20, %v1237_v21 }
  0xf7   :  { %v1308_v26 = vadd.f32 %v1307_v22, %v1306_v19 }
  0xf9   :  { %v873_v48 = vadd.f32 %v1308_v26, %v803_v25 }
 0x112   :  { %v1341_v49 = vpop.f32.mrf.mxu0 }
 0x114   :  { %v1342_v50 = vpop.f32.mrf.mxu0 }
 0x115   :  { %v1376_v23 = vpop.f32.mrf.mxu1  ;;  %v1343_v11 = vadd.f32 %v1342_v50, %v1341_v49 }
 0x117   :  { %v1377_v36 = vpop.f32.mrf.mxu1  ;;  %v943_v41 = vadd.f32 %v1343_v11, %v873_v48 }
 0x118   :  { %v1378_v59 = vadd.f32 %v1377_v36, %v1376_v23 }
 0x11a   :  { %v1013_v55 = vadd.f32 %v1378_v59, %v943_v41 }
 0x134   :  { %v1411_v27 = vpop.f32.mrf.mxu0 }
 0x136   :  { %v1412_v29 = vpop.f32.mrf.mxu0 }
 0x137   :  { %v1446_v31 = vpop.f32.mrf.mxu1  ;;  %v1413_v24 = vadd.f32 %v1412_v29, %v1411_v27 }
 0x139   :  { %v1447_v51 = vpop.f32.mrf.mxu1  ;;  %v1083_v28 = vadd.f32 %v1413_v24, %v1013_v55 }
 0x13a   :  { %v1448_v32 = vadd.f32 %v1447_v51, %v1446_v31 }
 0x13c   :  { %v1153_v33 = vadd.f32 %v1448_v32, %v1083_v28 }
 0x155   :  { %v1222_v35 = vpop.f32.mrf.mxu0 }
 0x156   :  { %v1223_v37 = vadd.f32 %v1222_v35, %v1153_v33 }
 0x157   :  { %v1500_v34 = vpop.f32.mrf.mxu0 }
 0x158   :  { %v1238_v57 = vmul.f32 -1.442695, %v1223_v37 }
 0x15a   :  { %1503 = vpow2.f32 %v1238_v57 }
 0x167   :  { %v1504_v30 = vpop.eup %1503 }
 0x168   :  { %v1229_v38 = vadd.f32 1.0, %v1504_v30 }
 0x16a   :  { %1505 = vrcp.f32 %v1229_v38 }
 0x177   :  { %v1506_v42 = vpop.eup %1505 }
 0x178   :  { %1232 = vst [vmem:[%s2383_s5] sm:$0x3] %v1506_v42 }

</bundles_post_ra>
